<compile_context>
chip_gen: v7x
topology: tpu7x:2x2x1
jax: 0.10.0
libtpu: 0.0.40
codegen_flags: <defaults>
</compile_context>

<pallas_src>
import jax
import jax.numpy as jnp
from jax.experimental import pallas as pl
from jax.experimental.pallas import tpu as pltpu

# Original PyTorch hidden sizes.
H1, H2, H3, H4 = 1000, 400, 20, 1
# Lane-aligned (multiple-of-128) widths used inside the kernel.
P1, P2, P3 = 1024, 512, 128
# Minimum batch-tile (keeps all lane dims >=128-aligned, incl. the output row).
_MIN_TB = 128


def _mlp_kernel(x_ref,
                w1_ref, b1_ref,
                w2_ref, b2_ref,
                w3_ref, b3_ref,
                w4_ref, b4_ref,
                o_ref):
    # Layer 1: (TB, D) @ (D, 1024) — bf16 operands, f32 accumulation on the MXU.
    h = jnp.dot(x_ref[...].astype(jnp.bfloat16), w1_ref[...],
                preferred_element_type=jnp.float32)
    h = jnp.maximum(h + b1_ref[...], 0.0)            # ReLU (Dropout -> identity)

    # Layer 2: (TB, 1024) @ (1024, 512)
    h = jnp.dot(h.astype(jnp.bfloat16), w2_ref[...],
                preferred_element_type=jnp.float32)
    h = jnp.maximum(h + b2_ref[...], 0.0)            # ReLU (Dropout -> identity)

    # Layer 3: (TB, 512) @ (512, 128)
    h = jnp.dot(h.astype(jnp.bfloat16), w3_ref[...],
                preferred_element_type=jnp.float32)
    h = jnp.maximum(h + b3_ref[...], 0.0)            # ReLU (Dropout -> identity)

    # Layer 4 (128 -> 1): VPU broadcast-multiply by the w4 row (padded lanes are
    # zero), XLU transpose (TB,128)->(128,TB) (slack slot), sublane reduce.
    # Result is a lane-dense (1, TB) row -> unmasked stores + dense writeback.
    prod_t = jnp.transpose(h * w4_ref[...])          # (128, TB)
    o_ref[...] = jnp.sum(prod_t, axis=0, keepdims=True) + b4_ref[...]


def _round_up(n, m):
    return ((n + m - 1) // m) * m


def _device_kind():
    try:
        return jax.devices()[0].device_kind.lower()
    except Exception:
        return ""


def _tile_and_vmem(batch):
    """Per-generation batch tile + scoped-VMEM limit."""
    kind = _device_kind()
    if "v5" in kind:
        # v5e: 512 amortizes the ~0.35us/step overhead to <10%; raise the
        # scoped-VMEM limit above v5e's 16 MiB default.
        base, ncore, vmem = 512, 1, 64 << 20
    elif "v7" in kind or "7x" in kind:
        # v7x: 2 TensorCores but only 64 MiB VMEM/TC -> cap the tile and leave
        # headroom; prefer >=2 grid steps so both cores get tiles.
        base, ncore, vmem = 512, 2, 48 << 20
    else:
        # v6e (and default): big tiles, weights stay resident.
        base, ncore, vmem = 1024, 1, 64 << 20
    per_core = -(-batch // ncore)                      # ceil(batch / ncore)
    tb = min(base, max(_MIN_TB, _round_up(per_core, _MIN_TB)))
    return tb, vmem


def predictor_forward(x, packed, *, block_b=None):
    """x: (B, D) float32; packed: dict from prepare_params(). Returns (B, 1) f32."""
    B, D = x.shape
    tb, vmem_limit = _tile_and_vmem(B)
    if block_b is not None:
        tb = max(_MIN_TB, _round_up(block_b, _MIN_TB))
    Bp = _round_up(max(B, tb), tb)
    if Bp != B:
        x = jnp.pad(x, ((0, Bp - B), (0, 0)))

    w1, b1 = packed["w1"], packed["b1"]
    w2, b2 = packed["w2"], packed["b2"]
    w3, b3 = packed["w3"], packed["b3"]
    w4, b4 = packed["w4"], packed["b4"]

    flops = 2 * Bp * (D * P1 + P1 * P2 + P2 * P3 + P3)
    bytes_accessed = (Bp * D * 4
                      + (w1.size + w2.size + w3.size) * 2          # bf16 weights
                      + (b1.size + b2.size + b3.size + w4.size + b4.size) * 4
                      + Bp * 4)                                     # output

    def run(single_buffer_consts):
        # Weights / biases: full-array blocks with constant index maps -> DMA'd
        # once and kept VMEM-resident while x / out tiles are pipelined.
        if single_buffer_consts:
            const = lambda a: pl.BlockSpec(a.shape, lambda i: (0, 0),
                                           pipeline_mode=pl.Buffered(1))
        else:
            const = lambda a: pl.BlockSpec(a.shape, lambda i: (0, 0))
        return pl.pallas_call(
            _mlp_kernel,
            out_shape=jax.ShapeDtypeStruct((1, Bp), jnp.float32),
            grid=(Bp // tb,),
            in_specs=[pl.BlockSpec((tb, D), lambda i: (i, 0)),
                      const(w1), const(b1),
                      const(w2), const(b2),
                      const(w3), const(b3),
                      const(w4), const(b4)],
            out_specs=pl.BlockSpec((1, tb), lambda i: (0, i)),
            compiler_params=pltpu.CompilerParams(
                dimension_semantics=("parallel",),
                vmem_limit_bytes=vmem_limit),
            cost_estimate=pl.CostEstimate(flops=flops,
                                          transcendentals=0,
                                          bytes_accessed=bytes_accessed),
        )(x, w1, b1, w2, b2, w3, b3, w4, b4)

    try:
        # Single-buffered resident weights (reclaims ~1.5 MB VMEM; matters on v7x).
        out = run(True)
    except Exception:
        # Older jax/Mosaic without pipeline_mode support: default double buffering.
        out = run(False)

    return out.reshape(Bp, 1)[:B]


def init_params(key, in_dim):
    """Deterministic synthetic init at the original PyTorch shapes.

    Weights are stored (in_features, out_features) so y = x @ W + b matches
    torch's x @ W.T + b."""
    dims = [(in_dim, H1), (H1, H2), (H2, H3), (H3, H4)]
    params = {}
    for i, (fin, fout) in enumerate(dims, start=1):
        key, kw, kb = jax.random.split(key, 3)
        bound = 1.0 / jnp.sqrt(fin)
        params[f"w{i}"] = jax.random.uniform(
            kw, (fin, fout), jnp.float32, -bound, bound)
        params[f"b{i}"] = jax.random.uniform(
            kb, (1, fout), jnp.float32, -bound, bound)
    return params


def prepare_params(params):
    """Pad hidden widths to lane multiples (zero padding -> identical math) and
    store the large weights in bf16 (halves the dominant HBM weight traffic).
    Note: the kernel also rounds x and the hidden activations to bf16 before
    each MXU matmul (f32 accumulation), so deviation from pure-f32 math comes
    from both weight storage and activation rounding."""
    def pad(a, shape):
        return jnp.pad(a, [(0, t - s) for s, t in zip(a.shape, shape)])

    D = params["w1"].shape[0]
    return {
        "w1": pad(params["w1"], (D, P1)).astype(jnp.bfloat16),
        "b1": pad(params["b1"], (1, P1)),
        "w2": pad(params["w2"], (P1, P2)).astype(jnp.bfloat16),
        "b2": pad(params["b2"], (1, P2)),
        "w3": pad(params["w3"], (P2, P3)).astype(jnp.bfloat16),
        "b3": pad(params["b3"], (1, P3)),
        # Final layer done on the VPU: store the (20, 1) column as a (1, 128) row.
        "w4": pad(params["w4"].T, (1, P3)),
        "b4": params["b4"],                       # (1, 1)
    }


def reference_forward(x, params):
    """Pure-f32 reference at the original (unpadded) shapes."""
    h = jnp.maximum(x @ params["w1"] + params["b1"], 0.0)
    h = jnp.maximum(h @ params["w2"] + params["b2"], 0.0)
    h = jnp.maximum(h @ params["w3"] + params["b3"], 0.0)
    return h @ params["w4"] + params["b4"]


def reference_forward_packed(x, packed):
    """Reference mirroring the kernel's bf16-operand / f32-accumulate matmuls."""
    dot = lambda a, b: jnp.dot(a.astype(jnp.bfloat16), b,
                               preferred_element_type=jnp.float32)
    h = jnp.maximum(dot(x, packed["w1"]) + packed["b1"], 0.0)
    h = jnp.maximum(dot(h, packed["w2"]) + packed["b2"], 0.0)
    h = jnp.maximum(dot(h, packed["w3"]) + packed["b3"], 0.0)
    return jnp.sum(h * packed["w4"], axis=-1, keepdims=True) + packed["b4"]


if __name__ == "__main__":
    word_representation_length = 32
    context_range = 2
    D = word_representation_length * (2 * context_range + 1)   # 160
    B = 8

    key = jax.random.PRNGKey(0)
    key, kx = jax.random.split(key)
    x = jax.random.normal(kx, (B, D), jnp.float32)
    params = init_params(key, D)
    packed = prepare_params(params)

    out = predictor_forward(x, packed)
    out = jax.block_until_ready(out)
    assert out.shape == (B, 1), out.shape

    # Exact-semantics check against a reference using the same bf16-operand /
    # f32-accumulate math as the kernel.
    ref = reference_forward_packed(x, packed)
    err = float(jnp.max(jnp.abs(out - ref)))
    assert jnp.allclose(out, ref, atol=2e-3, rtol=2e-3), f"max err {err}"

    # Informational: deviation from the full-f32 math of the PyTorch module
    # (bf16 rounding of weights *and* activations in the large layers).
    _f32_err = float(jnp.max(jnp.abs(out - reference_forward(x, params))))

    print("KERNEL_OK")
</pallas_src>

<mosaic_0001>
module attributes {stable_mosaic.version = 11 : i64} {
  func.func @_mlp_kernel(%arg0: i32, %arg1: memref<128x160xf32, #tpu.memory_space<vmem>>, %arg2: memref<160x1024xbf16, #tpu.memory_space<vmem>>, %arg3: memref<1x1024xf32, #tpu.memory_space<vmem>>, %arg4: memref<1024x512xbf16, #tpu.memory_space<vmem>>, %arg5: memref<1x512xf32, #tpu.memory_space<vmem>>, %arg6: memref<512x128xbf16, #tpu.memory_space<vmem>>, %arg7: memref<1x128xf32, #tpu.memory_space<vmem>>, %arg8: memref<1x128xf32, #tpu.memory_space<vmem>>, %arg9: memref<1x1xf32, #tpu.memory_space<vmem>>, %arg10: memref<1x128xf32, #tpu.memory_space<vmem>>) attributes {dimension_semantics = [#tpu.dimension_semantics<parallel>], iteration_bounds = array<i64: 1>, scalar_prefetch = 0 : i64, scratch_operands = 0 : i64, tpu.core_type = #tpu.core_type<tc>, window_params = [{transform_indices = @transform_0, window_bounds = array<i64: 128, 160>}, {pipeline_mode = #tpu.pipeline_mode<synchronous>, transform_indices = @transform_1, window_bounds = array<i64: 160, 1024>}, {pipeline_mode = #tpu.pipeline_mode<synchronous>, transform_indices = @transform_2, window_bounds = array<i64: 1, 1024>}, {pipeline_mode = #tpu.pipeline_mode<synchronous>, transform_indices = @transform_3, window_bounds = array<i64: 1024, 512>}, {pipeline_mode = #tpu.pipeline_mode<synchronous>, transform_indices = @transform_4, window_bounds = array<i64: 1, 512>}, {pipeline_mode = #tpu.pipeline_mode<synchronous>, transform_indices = @transform_5, window_bounds = array<i64: 512, 128>}, {pipeline_mode = #tpu.pipeline_mode<synchronous>, transform_indices = @transform_6, window_bounds = array<i64: 1, 128>}, {pipeline_mode = #tpu.pipeline_mode<synchronous>, transform_indices = @transform_7, window_bounds = array<i64: 1, 128>}, {pipeline_mode = #tpu.pipeline_mode<synchronous>, transform_indices = @transform_8, window_bounds = array<i64: 1, 1>}, {transform_indices = @transform_9, window_bounds = array<i64: 1, 128>}]} {
    %c0 = arith.constant 0 : index
    %c0_0 = arith.constant 0 : index
    %0 = vector.load %arg1[%c0, %c0_0] : memref<128x160xf32, #tpu.memory_space<vmem>>, vector<128x160xf32>
    %1 = arith.truncf %0 : vector<128x160xf32> to vector<128x160xbf16>
    %c0_1 = arith.constant 0 : index
    %c0_2 = arith.constant 0 : index
    %2 = vector.load %arg2[%c0_1, %c0_2] : memref<160x1024xbf16, #tpu.memory_space<vmem>>, vector<160x1024xbf16>
    %cst = arith.constant dense<0.000000e+00> : vector<128x1024xf32>
    %3 = tpu.matmul %1, %2, %cst {dimension_numbers = #tpu.dot_dimension_numbers<[1], [0], [0], [1], [0, 0, 1, 1], [], []>} : vector<128x160xbf16>, vector<160x1024xbf16>, vector<128x1024xf32> -> vector<128x1024xf32>
    %c0_3 = arith.constant 0 : index
    %c0_4 = arith.constant 0 : index
    %4 = vector.load %arg3[%c0_3, %c0_4] : memref<1x1024xf32, #tpu.memory_space<vmem>>, vector<1x1024xf32>
    %5 = vector.broadcast %4 : vector<1x1024xf32> to vector<128x1024xf32>
    %6 = arith.addf %3, %5 : vector<128x1024xf32>
    %cst_5 = arith.constant 0.000000e+00 : f32
    %7 = vector.broadcast %cst_5 : f32 to vector<128x1024xf32>
    %8 = arith.maximumf %6, %7 : vector<128x1024xf32>
    %9 = arith.truncf %8 : vector<128x1024xf32> to vector<128x1024xbf16>
    %c0_6 = arith.constant 0 : index
    %c0_7 = arith.constant 0 : index
    %10 = vector.load %arg4[%c0_6, %c0_7] : memref<1024x512xbf16, #tpu.memory_space<vmem>>, vector<1024x512xbf16>
    %cst_8 = arith.constant dense<0.000000e+00> : vector<128x512xf32>
    %11 = tpu.matmul %9, %10, %cst_8 {dimension_numbers = #tpu.dot_dimension_numbers<[1], [0], [0], [1], [0, 0, 1, 1], [], []>} : vector<128x1024xbf16>, vector<1024x512xbf16>, vector<128x512xf32> -> vector<128x512xf32>
    %c0_9 = arith.constant 0 : index
    %c0_10 = arith.constant 0 : index
    %12 = vector.load %arg5[%c0_9, %c0_10] : memref<1x512xf32, #tpu.memory_space<vmem>>, vector<1x512xf32>
    %13 = vector.broadcast %12 : vector<1x512xf32> to vector<128x512xf32>
    %14 = arith.addf %11, %13 : vector<128x512xf32>
    %cst_11 = arith.constant 0.000000e+00 : f32
    %15 = vector.broadcast %cst_11 : f32 to vector<128x512xf32>
    %16 = arith.maximumf %14, %15 : vector<128x512xf32>
    %17 = arith.truncf %16 : vector<128x512xf32> to vector<128x512xbf16>
    %c0_12 = arith.constant 0 : index
    %c0_13 = arith.constant 0 : index
    %18 = vector.load %arg6[%c0_12, %c0_13] : memref<512x128xbf16, #tpu.memory_space<vmem>>, vector<512x128xbf16>
    %cst_14 = arith.constant dense<0.000000e+00> : vector<128x128xf32>
    %19 = tpu.matmul %17, %18, %cst_14 {dimension_numbers = #tpu.dot_dimension_numbers<[1], [0], [0], [1], [0, 0, 1, 1], [], []>} : vector<128x512xbf16>, vector<512x128xbf16>, vector<128x128xf32> -> vector<128x128xf32>
    %c0_15 = arith.constant 0 : index
    %c0_16 = arith.constant 0 : index
    %20 = vector.load %arg7[%c0_15, %c0_16] : memref<1x128xf32, #tpu.memory_space<vmem>>, vector<1x128xf32>
    %21 = vector.broadcast %20 : vector<1x128xf32> to vector<128x128xf32>
    %22 = arith.addf %19, %21 : vector<128x128xf32>
    %cst_17 = arith.constant 0.000000e+00 : f32
    %23 = vector.broadcast %cst_17 : f32 to vector<128x128xf32>
    %24 = arith.maximumf %22, %23 : vector<128x128xf32>
    %c0_18 = arith.constant 0 : index
    %c0_19 = arith.constant 0 : index
    %25 = vector.load %arg8[%c0_18, %c0_19] : memref<1x128xf32, #tpu.memory_space<vmem>>, vector<1x128xf32>
    %26 = vector.broadcast %25 : vector<1x128xf32> to vector<128x128xf32>
    %27 = arith.mulf %24, %26 : vector<128x128xf32>
    %28 = tpu.transpose %27, [1, 0] : vector<128x128xf32> -> vector<128x128xf32>
    %cst_20 = arith.constant dense<0.000000e+00> : vector<128xf32>
    %29 = vector.multi_reduction <add>, %28, %cst_20 [0] : vector<128x128xf32> to vector<128xf32>
    %30 = vector.shape_cast %29 : vector<128xf32> to vector<1x128xf32>
    %c0_21 = arith.constant 0 : index
    %c0_22 = arith.constant 0 : index
    %31 = vector.load %arg9[%c0_21, %c0_22] : memref<1x1xf32, #tpu.memory_space<vmem>>, vector<1x1xf32>
    %32 = vector.broadcast %31 : vector<1x1xf32> to vector<1x128xf32>
    %33 = arith.addf %30, %32 : vector<1x128xf32>
    %c0_23 = arith.constant 0 : index
    %c0_24 = arith.constant 0 : index
    %34 = vector.load %arg10[%c0_23, %c0_24] : memref<1x128xf32, #tpu.memory_space<vmem>>, vector<1x128xf32>
    tpu.vector_store %arg10[%c0_23, %c0_24], %33 {strides = array<i32>} : memref<1x128xf32, #tpu.memory_space<vmem>>, vector<1x128xf32>,
    return
  }
  func.func @transform_0(%arg0: i32) -> (i32, i32) {
    %c0_i32 = arith.constant 0 : i32
    %c0_i32_0 = arith.constant 0 : i32
    return %arg0, %c0_i32 : i32, i32
  }
  func.func @transform_1(%arg0: i32) -> (i32, i32) {
    %c0_i32 = arith.constant 0 : i32
    %c0_i32_0 = arith.constant 0 : i32
    %c0_i32_1 = arith.constant 0 : i32
    return %c0_i32, %c0_i32_0 : i32, i32
  }
  func.func @transform_2(%arg0: i32) -> (i32, i32) {
    %c0_i32 = arith.constant 0 : i32
    %c0_i32_0 = arith.constant 0 : i32
    %c0_i32_1 = arith.constant 0 : i32
    return %c0_i32, %c0_i32_0 : i32, i32
  }
  func.func @transform_3(%arg0: i32) -> (i32, i32) {
    %c0_i32 = arith.constant 0 : i32
    %c0_i32_0 = arith.constant 0 : i32
    %c0_i32_1 = arith.constant 0 : i32
    return %c0_i32, %c0_i32_0 : i32, i32
  }
  func.func @transform_4(%arg0: i32) -> (i32, i32) {
    %c0_i32 = arith.constant 0 : i32
    %c0_i32_0 = arith.constant 0 : i32
    %c0_i32_1 = arith.constant 0 : i32
    return %c0_i32, %c0_i32_0 : i32, i32
  }
  func.func @transform_5(%arg0: i32) -> (i32, i32) {
    %c0_i32 = arith.constant 0 : i32
    %c0_i32_0 = arith.constant 0 : i32
    %c0_i32_1 = arith.constant 0 : i32
    return %c0_i32, %c0_i32_0 : i32, i32
  }
  func.func @transform_6(%arg0: i32) -> (i32, i32) {
    %c0_i32 = arith.constant 0 : i32
    %c0_i32_0 = arith.constant 0 : i32
    %c0_i32_1 = arith.constant 0 : i32
    return %c0_i32, %c0_i32_0 : i32, i32
  }
  func.func @transform_7(%arg0: i32) -> (i32, i32) {
    %c0_i32 = arith.constant 0 : i32
    %c0_i32_0 = arith.constant 0 : i32
    %c0_i32_1 = arith.constant 0 : i32
    return %c0_i32, %c0_i32_0 : i32, i32
  }
  func.func @transform_8(%arg0: i32) -> (i32, i32) {
    %c0_i32 = arith.constant 0 : i32
    %c0_i32_0 = arith.constant 0 : i32
    %c0_i32_1 = arith.constant 0 : i32
    return %c0_i32, %c0_i32_0 : i32, i32
  }
  func.func @transform_9(%arg0: i32) -> (i32, i32) {
    %c0_i32 = arith.constant 0 : i32
    %c0_i32_0 = arith.constant 0 : i32
    return %c0_i32, %arg0 : i32, i32
  }
}

module attributes {stable_mosaic.version = 11 : i64} {
  func.func @_mlp_kernel(%arg0: i32, %arg1: memref<128x160xf32, #tpu.memory_space<vmem>>, %arg2: memref<160x1024xbf16, #tpu.memory_space<vmem>>, %arg3: memref<1x1024xf32, #tpu.memory_space<vmem>>, %arg4: memref<1024x512xbf16, #tpu.memory_space<vmem>>, %arg5: memref<1x512xf32, #tpu.memory_space<vmem>>, %arg6: memref<512x128xbf16, #tpu.memory_space<vmem>>, %arg7: memref<1x128xf32, #tpu.memory_space<vmem>>, %arg8: memref<1x128xf32, #tpu.memory_space<vmem>>, %arg9: memref<1x1xf32, #tpu.memory_space<vmem>>, %arg10: memref<1x128xf32, #tpu.memory_space<vmem>>) attributes {dimension_semantics = [#tpu.dimension_semantics<parallel>], iteration_bounds = array<i64: 1>, scalar_prefetch = 0 : i64, scratch_operands = 0 : i64, tpu.core_type = #tpu.core_type<tc>, window_params = [{transform_indices = @transform_0, window_bounds = array<i64: 128, 160>}, {pipeline_mode = #tpu.pipeline_mode<synchronous>, transform_indices = @transform_1, window_bounds = array<i64: 160, 1024>}, {pipeline_mode = #tpu.pipeline_mode<synchronous>, transform_indices = @transform_2, window_bounds = array<i64: 1, 1024>}, {pipeline_mode = #tpu.pipeline_mode<synchronous>, transform_indices = @transform_3, window_bounds = array<i64: 1024, 512>}, {pipeline_mode = #tpu.pipeline_mode<synchronous>, transform_indices = @transform_4, window_bounds = array<i64: 1, 512>}, {pipeline_mode = #tpu.pipeline_mode<synchronous>, transform_indices = @transform_5, window_bounds = array<i64: 512, 128>}, {pipeline_mode = #tpu.pipeline_mode<synchronous>, transform_indices = @transform_6, window_bounds = array<i64: 1, 128>}, {pipeline_mode = #tpu.pipeline_mode<synchronous>, transform_indices = @transform_7, window_bounds = array<i64: 1, 128>}, {pipeline_mode = #tpu.pipeline_mode<synchronous>, transform_indices = @transform_8, window_bounds = array<i64: 1, 1>}, {transform_indices = @transform_9, window_bounds = array<i64: 1, 128>}]} {
    %c0 = arith.constant 0 : index
    %c0_0 = arith.constant 0 : index
    %0 = vector.load %arg1[%c0, %c0_0] : memref<128x160xf32, #tpu.memory_space<vmem>>, vector<128x160xf32>
    %1 = arith.truncf %0 : vector<128x160xf32> to vector<128x160xbf16>
    %c0_1 = arith.constant 0 : index
    %c0_2 = arith.constant 0 : index
    %2 = vector.load %arg2[%c0_1, %c0_2] : memref<160x1024xbf16, #tpu.memory_space<vmem>>, vector<160x1024xbf16>
    %cst = arith.constant dense<0.000000e+00> : vector<128x1024xf32>
    %3 = tpu.matmul %1, %2, %cst {dimension_numbers = #tpu.dot_dimension_numbers<[1], [0], [0], [1], [0, 0, 1, 1], [], []>} : vector<128x160xbf16>, vector<160x1024xbf16>, vector<128x1024xf32> -> vector<128x1024xf32>
    %c0_3 = arith.constant 0 : index
    %c0_4 = arith.constant 0 : index
    %4 = vector.load %arg3[%c0_3, %c0_4] : memref<1x1024xf32, #tpu.memory_space<vmem>>, vector<1x1024xf32>
    %5 = vector.broadcast %4 : vector<1x1024xf32> to vector<128x1024xf32>
    %6 = arith.addf %3, %5 : vector<128x1024xf32>
    %cst_5 = arith.constant 0.000000e+00 : f32
    %7 = vector.broadcast %cst_5 : f32 to vector<128x1024xf32>
    %8 = arith.maximumf %6, %7 : vector<128x1024xf32>
    %9 = arith.truncf %8 : vector<128x1024xf32> to vector<128x1024xbf16>
    %c0_6 = arith.constant 0 : index
    %c0_7 = arith.constant 0 : index
    %10 = vector.load %arg4[%c0_6, %c0_7] : memref<1024x512xbf16, #tpu.memory_space<vmem>>, vector<1024x512xbf16>
    %cst_8 = arith.constant dense<0.000000e+00> : vector<128x512xf32>
    %11 = tpu.matmul %9, %10, %cst_8 {dimension_numbers = #tpu.dot_dimension_numbers<[1], [0], [0], [1], [0, 0, 1, 1], [], []>} : vector<128x1024xbf16>, vector<1024x512xbf16>, vector<128x512xf32> -> vector<128x512xf32>
    %c0_9 = arith.constant 0 : index
    %c0_10 = arith.constant 0 : index
    %12 = vector.load %arg5[%c0_9, %c0_10] : memref<1x512xf32, #tpu.memory_space<vmem>>, vector<1x512xf32>
    %13 = vector.broadcast %12 : vector<1x512xf32> to vector<128x512xf32>
    %14 = arith.addf %11, %13 : vector<128x512xf32>
    %cst_11 = arith.constant 0.000000e+00 : f32
    %15 = vector.broadcast %cst_11 : f32 to vector<128x512xf32>
    %16 = arith.maximumf %14, %15 : vector<128x512xf32>
    %17 = arith.truncf %16 : vector<128x512xf32> to vector<128x512xbf16>
    %c0_12 = arith.constant 0 : index
    %c0_13 = arith.constant 0 : index
    %18 = vector.load %arg6[%c0_12, %c0_13] : memref<512x128xbf16, #tpu.memory_space<vmem>>, vector<512x128xbf16>
    %cst_14 = arith.constant dense<0.000000e+00> : vector<128x128xf32>
    %19 = tpu.matmul %17, %18, %cst_14 {dimension_numbers = #tpu.dot_dimension_numbers<[1], [0], [0], [1], [0, 0, 1, 1], [], []>} : vector<128x512xbf16>, vector<512x128xbf16>, vector<128x128xf32> -> vector<128x128xf32>
    %c0_15 = arith.constant 0 : index
    %c0_16 = arith.constant 0 : index
    %20 = vector.load %arg7[%c0_15, %c0_16] : memref<1x128xf32, #tpu.memory_space<vmem>>, vector<1x128xf32>
    %21 = vector.broadcast %20 : vector<1x128xf32> to vector<128x128xf32>
    %22 = arith.addf %19, %21 : vector<128x128xf32>
    %cst_17 = arith.constant 0.000000e+00 : f32
    %23 = vector.broadcast %cst_17 : f32 to vector<128x128xf32>
    %24 = arith.maximumf %22, %23 : vector<128x128xf32>
    %c0_18 = arith.constant 0 : index
    %c0_19 = arith.constant 0 : index
    %25 = vector.load %arg8[%c0_18, %c0_19] : memref<1x128xf32, #tpu.memory_space<vmem>>, vector<1x128xf32>
    %26 = vector.broadcast %25 : vector<1x128xf32> to vector<128x128xf32>
    %27 = arith.mulf %24, %26 : vector<128x128xf32>
    %28 = tpu.transpose %27, [1, 0] : vector<128x128xf32> -> vector<128x128xf32>
    %cst_20 = arith.constant dense<0.000000e+00> : vector<128xf32>
    %29 = vector.multi_reduction <add>, %28, %cst_20 [0] : vector<128x128xf32> to vector<128xf32>
    %30 = vector.shape_cast %29 : vector<128xf32> to vector<1x128xf32>
    %c0_21 = arith.constant 0 : index
    %c0_22 = arith.constant 0 : index
    %31 = vector.load %arg9[%c0_21, %c0_22] : memref<1x1xf32, #tpu.memory_space<vmem>>, vector<1x1xf32>
    %32 = vector.broadcast %31 : vector<1x1xf32> to vector<1x128xf32>
    %33 = arith.addf %30, %32 : vector<1x128xf32>
    %c0_23 = arith.constant 0 : index
    %c0_24 = arith.constant 0 : index
    %34 = vector.load %arg10[%c0_23, %c0_24] : memref<1x128xf32, #tpu.memory_space<vmem>>, vector<1x128xf32>
    tpu.vector_store %arg10[%c0_23, %c0_24], %33 {strides = array<i32>} : memref<1x128xf32, #tpu.memory_space<vmem>>, vector<1x128xf32>,
    return
  }
  func.func @transform_0(%arg0: i32) -> (i32, i32) {
    %c0_i32 = arith.constant 0 : i32
    %c0_i32_0 = arith.constant 0 : i32
    return %arg0, %c0_i32 : i32, i32
  }
  func.func @transform_1(%arg0: i32) -> (i32, i32) {
    %c0_i32 = arith.constant 0 : i32
    %c0_i32_0 = arith.constant 0 : i32
    %c0_i32_1 = arith.constant 0 : i32
    return %c0_i32, %c0_i32_0 : i32, i32
  }
  func.func @transform_2(%arg0: i32) -> (i32, i32) {
    %c0_i32 = arith.constant 0 : i32
    %c0_i32_0 = arith.constant 0 : i32
    %c0_i32_1 = arith.constant 0 : i32
    return %c0_i32, %c0_i32_0 : i32, i32
  }
  func.func @transform_3(%arg0: i32) -> (i32, i32) {
    %c0_i32 = arith.constant 0 : i32
    %c0_i32_0 = arith.constant 0 : i32
    %c0_i32_1 = arith.constant 0 : i32
    return %c0_i32, %c0_i32_0 : i32, i32
  }
  func.func @transform_4(%arg0: i32) -> (i32, i32) {
    %c0_i32 = arith.constant 0 : i32
    %c0_i32_0 = arith.constant 0 : i32
    %c0_i32_1 = arith.constant 0 : i32
    return %c0_i32, %c0_i32_0 : i32, i32
  }
  func.func @transform_5(%arg0: i32) -> (i32, i32) {
    %c0_i32 = arith.constant 0 : i32
    %c0_i32_0 = arith.constant 0 : i32
    %c0_i32_1 = arith.constant 0 : i32
    return %c0_i32, %c0_i32_0 : i32, i32
  }
  func.func @transform_6(%arg0: i32) -> (i32, i32) {
    %c0_i32 = arith.constant 0 : i32
    %c0_i32_0 = arith.constant 0 : i32
    %c0_i32_1 = arith.constant 0 : i32
    return %c0_i32, %c0_i32_0 : i32, i32
  }
  func.func @transform_7(%arg0: i32) -> (i32, i32) {
    %c0_i32 = arith.constant 0 : i32
    %c0_i32_0 = arith.constant 0 : i32
    %c0_i32_1 = arith.constant 0 : i32
    return %c0_i32, %c0_i32_0 : i32, i32
  }
  func.func @transform_8(%arg0: i32) -> (i32, i32) {
    %c0_i32 = arith.constant 0 : i32
    %c0_i32_0 = arith.constant 0 : i32
    %c0_i32_1 = arith.constant 0 : i32
    return %c0_i32, %c0_i32_0 : i32, i32
  }
  func.func @transform_9(%arg0: i32) -> (i32, i32) {
    %c0_i32 = arith.constant 0 : i32
    %c0_i32_0 = arith.constant 0 : i32
    return %c0_i32, %arg0 : i32, i32
  }
}

</mosaic_0001>

<bundles_post_ra>
// kernel: tpu_custom_call.1
= control target key start
LH: loop header
LB: loop body
LE: loop exit
PB: predicated region body
PF: predicated region fallthrough
CT: control target
= control target key end

     0   :  { %s6738_s0 = inlined_call_operand.hbm [shape: f32[128,160], index: 0, kind: input, shape index: {}]   ;;  %s6739_s1 = inlined_call_operand.hbm [shape: bf16[160,1024], index: 1, kind: input, shape index: {}]   ;;  %s6740_s2 = inlined_call_operand.hbm [shape: f32[1,1024], index: 2, kind: input, shape index: {}]   ;;  %s6741_s3 = inlined_call_operand.hbm [shape: bf16[1024,512], index: 3, kind: input, shape index: {}]   ;;  %s6742_s4 = inlined_call_operand.hbm [shape: f32[1,512], index: 4, kind: input, shape index: {}]   ;;  %s6743_s5 = inlined_call_operand.hbm [shape: bf16[512,128], index: 5, kind: input, shape index: {}]   ;;  %s6744_s6 = inlined_call_operand.hbm [shape: f32[1,128], index: 6, kind: input, shape index: {}]   ;;  %s6745_s7 = inlined_call_operand.hbm [shape: f32[1,128], index: 7, kind: input, shape index: {}]   ;;  %s6746_s8 = inlined_call_operand.<no memory space> [shape: f32[1,1], index: 8, kind: input, shape index: {}]   ;;  %s6747_s9 = inlined_call_operand.hbm [shape: f32[1,128], index: 9, kind: output, shape index: {}]  }
   0x1   :  { %v14_v0 = vstv %s6746_s8 }
   0x2   :  { %15 = vst [vmem:[#allocation2] sm:$0x1] %v14_v0 }
   0x3   :  { %16 = vsyncpa [#allocation4], 0 }
   0x4   :  { %17 = vsyncpa [#allocation7], 0 }
   0x5   :  { %18 = vsyncpa [#allocation10], 0 }
   0x6   :  { %19 = vsyncpa [#allocation13], 0 }
   0x7   :  { %20 = vsyncpa [#allocation16], 0 }
   0x8   :  { %21 = vsyncpa [#allocation5], 0  ;;  %s5944_s11 = smov [#allocation6]   ;;  %s5734_s15 = scalar_lea.hbm %s6739_s1, 10240 }
   0x9   :  { %s39_s12 = sshll.u32 %s5944_s11, 4  ;;  %p5735_p0 = scmp.ne.s32.totalorder %s6739_s1, %s5734_s15  ;;  %s40_s12 = int_to_ptr.vmem [resolvable:$true] %s39_s12 }
   0xa   :  { %p5738_p1 = scmp.lt.u32.totalorder %s5734_s15, %s6739_s1 }
   0xc   :  { %p5740_p2 = pnand %p5738_p1, %p5735_p0 }
   0xe   :  { %5743 = shalt.err (!%p5740_p2)
}
   0xf   :  { %s5744_s19 = scalar_lea.vmem %s40_s12, 10240  ;;  %p5749_p4 = scmp.lt.s32.totalorder %s40_s12, %s40_s12 }
  0x10   :  { %p5745_p3 = scmp.ne.s32.totalorder %s40_s12, %s5744_s19  ;;  %p5750_p5 = scmp.lt.s32.totalorder %s5744_s19, %s5744_s19 }
  0x12   :  { %p5751_p6 = por %p5750_p5, %p5749_p4 }
  0x14   :  { %p5752_p7 = pnand %p5751_p6, %p5745_p3 }
  0x16   :  { %5755 = shalt.err (!%p5752_p7)
}
  0x17   :  { %s5945_s20 = smov 512   ;;  %s5946_s21 = smov 32  }
  0x18   :  { %45 = dma.hbm_to_vmem [thread:$0]  %s6739_s1, 10240, %s40_s12, [#allocation7], %s5945_s20, %s5945_s20, %s5946_s21  }
  0x19   :  { %s5947_s24 = smov [#allocation9]   ;;  %s5948_s26 = smov [#allocation12]  }
  0x1a   :  { %s61_s25 = sshll.u32 %s5947_s24, 4  ;;  %s83_s27 = sshll.u32 %s5948_s26, 4  ;;  %s62_s25 = int_to_ptr.vmem [resolvable:$true] %s61_s25  ;;  %s84_s27 = int_to_ptr.vmem [resolvable:$true] %s83_s27 }
  0x1b   :  { %s5756_s30 = scalar_lea.hbm %s6741_s3, 32768 }
  0x1c   :  { %p5757_p8 = scmp.ne.s32.totalorder %s6741_s3, %s5756_s30  ;;  %p5760_p9 = scmp.lt.u32.totalorder %s5756_s30, %s6741_s3 }
  0x1e   :  { %p5762_p10 = pnand %p5760_p9, %p5757_p8 }
  0x20   :  { %5765 = shalt.err (!%p5762_p10)
}
  0x21   :  { %s5766_s1 = scalar_lea.vmem %s62_s25, 32768  ;;  %p5771_p12 = scmp.lt.s32.totalorder %s62_s25, %s62_s25 }
  0x22   :  { %p5767_p11 = scmp.ne.s32.totalorder %s62_s25, %s5766_s1  ;;  %p5772_p13 = scmp.lt.s32.totalorder %s5766_s1, %s5766_s1 }
  0x24   :  { %p5773_p0 = por %p5772_p13, %p5771_p12 }
  0x26   :  { %p5774_p1 = pnand %p5773_p0, %p5767_p11 }
  0x28   :  { %5777 = shalt.err (!%p5774_p1)
}
  0x29   :  { %s5949_s12 = smov 256   ;;  %s5950_s15 = smov 16  }
  0x2a   :  { %67 = dma.hbm_to_vmem [thread:$0]  %s6741_s3, 32768, %s62_s25, [#allocation10], %s5949_s12, %s5949_s12, %s5950_s15  }
  0x2b   :  { %s5778_s19 = scalar_lea.hbm %s6743_s5, 4096 }
  0x2c   :  { %p5779_p2 = scmp.ne.s32.totalorder %s6743_s5, %s5778_s19  ;;  %p5782_p3 = scmp.lt.u32.totalorder %s5778_s19, %s6743_s5 }
  0x2e   :  { %p5784_p4 = pnand %p5782_p3, %p5779_p2 }
  0x30   :  { %5787 = shalt.err (!%p5784_p4)
}
  0x31   :  { %s5788_s24 = scalar_lea.vmem %s84_s27, 4096  ;;  %p5793_p6 = scmp.lt.s32.totalorder %s84_s27, %s84_s27 }
  0x32   :  { %p5789_p5 = scmp.ne.s32.totalorder %s84_s27, %s5788_s24  ;;  %p5794_p7 = scmp.lt.s32.totalorder %s5788_s24, %s5788_s24 }
  0x34   :  { %p5795_p8 = por %p5794_p7, %p5793_p6 }
  0x36   :  { %p5796_p9 = pnand %p5795_p8, %p5789_p5 }
  0x38   :  { %5799 = shalt.err (!%p5796_p9)
}
  0x39   :  { %s5951_s3 = smov 64   ;;  %s5952_s25 = smov 4  }
  0x3a   :  { %89 = dma.hbm_to_vmem [thread:$0]  %s6743_s5, 4096, %s84_s27, [#allocation13], %s5951_s3, %s5951_s3, %s5952_s25  }
  0x3b   :  { %s5953_s29 = smov [#allocation3]   ;;  %s5954_s10 = smov [#allocation8]  }
  0x3c   :  { %s27_s30 = sshll.u32 %s5953_s29, 4  ;;  %s52_s11 = sshll.u32 %s5954_s10, 4  ;;  %s28_s30 = int_to_ptr.vmem [resolvable:$true] %s27_s30  ;;  %s53_s11 = int_to_ptr.vmem [resolvable:$true] %s52_s11 }
  0x3d   :  { %s5800_s1 = scalar_lea.hbm %s6738_s0, 4096 }
  0x3e   :  { %p5801_p10 = scmp.ne.s32.totalorder %s6738_s0, %s5800_s1  ;;  %p5804_p11 = scmp.lt.u32.totalorder %s5800_s1, %s6738_s0 }
  0x40   :  { %p5806_p12 = pnand %p5804_p11, %p5801_p10 }
  0x42   :  { %5809 = shalt.err (!%p5806_p12)
}
  0x43   :  { %s5810_s5 = scalar_lea.vmem %s28_s30, 4096  ;;  %p5815_p0 = scmp.lt.s32.totalorder %s28_s30, %s28_s30 }
  0x44   :  { %p5811_p13 = scmp.ne.s32.totalorder %s28_s30, %s5810_s5  ;;  %p5816_p1 = scmp.lt.s32.totalorder %s5810_s5, %s5810_s5 }
  0x46   :  { %p5817_p2 = por %p5816_p1, %p5815_p0 }
  0x48   :  { %p5818_p3 = pnand %p5817_p2, %p5811_p13 }
  0x4a   :  { %5821 = shalt.err (!%p5818_p3)
}
  0x4b   :  { %33 = dma.hbm_to_vmem [thread:$0]  %s6738_s0, 4096, %s28_s30, [#allocation4], %s5949_s12, %s5949_s12, %s5950_s15  }
  0x4c   :  { %s5822_s22 = scalar_lea.hbm %s6740_s2, 128 }
  0x4d   :  { %p5823_p4 = scmp.ne.s32.totalorder %s6740_s2, %s5822_s22  ;;  %p5826_p5 = scmp.lt.u32.totalorder %s5822_s22, %s6740_s2 }
  0x4f   :  { %p5828_p6 = pnand %p5826_p5, %p5823_p4 }
  0x51   :  { %5831 = shalt.err (!%p5828_p6)
}
  0x52   :  { %s5832_s26 = scalar_lea.vmem %s53_s11, 128  ;;  %p5837_p8 = scmp.lt.s32.totalorder %s53_s11, %s53_s11 }
  0x53   :  { %p5833_p7 = scmp.ne.s32.totalorder %s53_s11, %s5832_s26  ;;  %p5838_p9 = scmp.lt.s32.totalorder %s5832_s26, %s5832_s26 }
  0x55   :  { %p5839_p10 = por %p5838_p9, %p5837_p8 }
  0x57   :  { %p5840_p11 = pnand %p5839_p10, %p5833_p7 }
  0x59   :  { %5843 = shalt.err (!%p5840_p11)
}
  0x5a   :  { %55 = dma.hbm_to_vmem [thread:$0]  %s6740_s2, 128, %s53_s11, [#allocation7]  }
  0x5b   :  { %s5955_s15 = smov [#allocation11]   ;;  %s5956_s29 = smov [#allocation14]  }
  0x5c   :  { %s74_s28 = sshll.u32 %s5955_s15, 4  ;;  %s96_s30 = sshll.u32 %s5956_s29, 4  ;;  %s75_s28 = int_to_ptr.vmem [resolvable:$true] %s74_s28  ;;  %s97_s30 = int_to_ptr.vmem [resolvable:$true] %s96_s30 }
  0x5d   :  { %s5844_s14 = scalar_lea.hbm %s6742_s4, 64 }
  0x5e   :  { %p5845_p12 = scmp.ne.s32.totalorder %s6742_s4, %s5844_s14  ;;  %p5848_p13 = scmp.lt.u32.totalorder %s5844_s14, %s6742_s4 }
  0x60   :  { %p5850_p0 = pnand %p5848_p13, %p5845_p12 }
  0x62   :  { %5853 = shalt.err (!%p5850_p0)
}
  0x63   :  { %s5854_s2 = scalar_lea.vmem %s75_s28, 64  ;;  %p5859_p2 = scmp.lt.s32.totalorder %s75_s28, %s75_s28 }
  0x64   :  { %p5855_p1 = scmp.ne.s32.totalorder %s75_s28, %s5854_s2  ;;  %p5860_p3 = scmp.lt.s32.totalorder %s5854_s2, %s5854_s2 }
  0x66   :  { %p5861_p4 = por %p5860_p3, %p5859_p2 }
  0x68   :  { %p5862_p5 = pnand %p5861_p4, %p5855_p1 }
  0x6a   :  { %5865 = shalt.err (!%p5862_p5)
}
  0x6b   :  { %77 = dma.hbm_to_vmem [thread:$0]  %s6742_s4, 64, %s75_s28, [#allocation10]  }
  0x6c   :  { %s5866_s19 = scalar_lea.hbm %s6744_s6, 16 }
  0x6d   :  { %p5867_p6 = scmp.ne.s32.totalorder %s6744_s6, %s5866_s19  ;;  %p5870_p7 = scmp.lt.u32.totalorder %s5866_s19, %s6744_s6 }
  0x6f   :  { %p5872_p8 = pnand %p5870_p7, %p5867_p6 }
  0x71   :  { %5875 = shalt.err (!%p5872_p8)
}
  0x72   :  { %s5876_s24 = scalar_lea.vmem %s97_s30, 16  ;;  %s5880_s3 = scalar_lea.vmem %s97_s30, 32 }
  0x73   :  { %p5877_p9 = scmp.ne.s32.totalorder %s97_s30, %s5876_s24  ;;  %p5881_p10 = scmp.lt.s32.totalorder %s97_s30, %s97_s30 }
  0x74   :  { %p5882_p11 = scmp.lt.s32.totalorder %s5880_s3, %s5876_s24 }
  0x76   :  { %p5883_p12 = por %p5882_p11, %p5881_p10 }
  0x78   :  { %p5884_p13 = pnand %p5883_p12, %p5877_p9 }
  0x7a   :  { %5887 = shalt.err (!%p5884_p13)
}
  0x7b   :  { %99 = dma.hbm_to_vmem [thread:$0]  %s6744_s6, 16, %s97_s30, [#allocation13]  }
  0x7c   :  { %s5957_s26 = smov [#allocation15]   ;;  %s5888_s28 = scalar_lea.hbm %s6745_s7, 16 }
  0x7d   :  { %s106_s0 = sshll.u32 %s5957_s26, 4  ;;  %p5889_p0 = scmp.ne.s32.totalorder %s6745_s7, %s5888_s28  ;;  %s107_s0 = int_to_ptr.vmem [resolvable:$true] %s106_s0 }
  0x7e   :  { %p5892_p1 = scmp.lt.u32.totalorder %s5888_s28, %s6745_s7 }
  0x80   :  { %p5894_p2 = pnand %p5892_p1, %p5889_p0 }
  0x82   :  { %5897 = shalt.err (!%p5894_p2)
}
  0x83   :  { %s5898_s1 = scalar_lea.vmem %s107_s0, 16  ;;  %s5902_s6 = scalar_lea.vmem %s107_s0, 32 }
  0x84   :  { %p5899_p3 = scmp.ne.s32.totalorder %s107_s0, %s5898_s1  ;;  %p5903_p4 = scmp.lt.s32.totalorder %s107_s0, %s107_s0 }
  0x85   :  { %p5904_p5 = scmp.lt.s32.totalorder %s5902_s6, %s5898_s1 }
  0x87   :  { %p5905_p6 = por %p5904_p5, %p5903_p4 }
  0x89   :  { %p5906_p7 = pnand %p5905_p6, %p5899_p3 }
  0x8b   :  { %5909 = shalt.err (!%p5906_p7)
}
  0x8c   :  { %109 = dma.hbm_to_vmem [thread:$0]  %s6745_s7, 16, %s107_s0, [#allocation16]  }
  0x8d   :  { %5932 = dma.done.wait [#allocation4], 4096  }
  0x8e   :  { %5933 = vsyncadd [#allocation4], 4294963200 }
  0x8f   :  { %5934 = dma.done.wait [#allocation7], 10368  }
  0x90   :  { %5935 = vsyncadd [#allocation7], 4294956928 }
  0x91   :  { %5936 = dma.done.wait [#allocation10], 32832  }
  0x92   :  { %5937 = vsyncadd [#allocation10], 4294934464 }
  0x93   :  { %5938 = dma.done.wait [#allocation13], 4112  }
  0x94   :  { %5939 = vsyncadd [#allocation13], 4294963184 }
  0x95   :  { %5940 = dma.done.wait [#allocation16], 16  }
  0x96   :  { %5941 = vsyncadd [#allocation16], 4294967280  ;;  %v185_v1 = vld [vmem:[#allocation6] sm:$0xff]  ;;  %v138_v14 = vld [vmem:[#allocation3 + $0x8] sm:$0xff]  ;;  %vm707_vm0 = vcmask 261120   ;;  %s5959_s7 = smov [#allocation17]  }
  0x97   :  { %v189_v2 = vld [vmem:[#allocation6 + $0x20] sm:$0xff]  ;;  %v140_v15 = vld [vmem:[#allocation3 + $0x18] sm:$0xff]  ;;  %v186_v21 = vld [vmem:[#allocation6 + $0x8] sm:$0xff]  ;;  %s4501_s17 = sshll.u32 %s5959_s7, 4  ;;  %s4502_s17 = int_to_ptr.vmem [resolvable:$true] %s4501_s17 }
  0x98   :  { %v193_v3 = vld [vmem:[#allocation6 + $0x40] sm:$0xff]  ;;  %v4515_v4 = vcombine.high %v185_v1, %v189_v2  ;;  %v4514_v5 = vcombine.low %v185_v1, %v189_v2  ;;  %v6115_v17 = vpack.c.bf16 %v140_v15, %v138_v14  ;;  %v190_v22 = vld [vmem:[#allocation6 + $0x28] sm:$0xff]  ;;  %v144_v15 = vld [vmem:[#allocation3 + $0x38] sm:$0xff]  ;;  %s5910_s18 = scalar_lea.vmem %s4502_s17, 16  ;;  %s5914_s2 = scalar_lea.vmem %s4502_s17, 32 }
  0x99   :  { %v197_v6 = vld [vmem:[#allocation6 + $0x60] sm:$0xff]  ;;  %v4517_v24 = vcombine.high %v186_v21, %v190_v22  ;;  %v4516_v25 = vcombine.low %v186_v21, %v190_v22  ;;  %v194_v26 = vld [vmem:[#allocation6 + $0x48] sm:$0xff]  ;;  %p5911_p8 = scmp.ne.s32.totalorder %s4502_s17, %s5910_s18  ;;  %p5915_p9 = scmp.lt.s32.totalorder %s4502_s17, %s4502_s17 }
  0x9a   :  { %v4523_v7 = vcombine.high %v193_v3, %v197_v6  ;;  %v201_v8 = vld [vmem:[#allocation6 + $0x80] sm:$0xff]  ;;  %732 = vmatprep.subr.bf16.mxu0 %v4515_v4  ;;  %v4522_v10 = vcombine.low %v193_v3, %v197_v6  ;;  %4594 = vmatprep.mubr.msk.bf16.mxu0 %vm707_vm0, %v6115_v17  ;;  %v198_v28 = vld [vmem:[#allocation6 + $0x68] sm:$0xff]  ;;  %p5916_p10 = scmp.lt.s32.totalorder %s5914_s2, %s5910_s18 }
  0x9b   :  { %v205_v9 = vld [vmem:[#allocation6 + $0xa0] sm:$0xff]  ;;  %733 = vmatpush1.bf16.msra.mxu0 %v4514_v5  ;;  %4602 = vmatprep.mubr.msk.bf16.mxu1 %vm707_vm0, %v6115_v17  ;;  %v202_v29 = vld [vmem:[#allocation6 + $0x88] sm:$0xff]  ;;  %v4525_v33 = vcombine.high %v194_v26, %v198_v28  ;;  %v4524_v34 = vcombine.low %v194_v26, %v198_v28 }
  0x9c   :  { %734 = vmatprep.subr.bf16.mxu0 %v4523_v7  ;;  %v4531_v11 = vcombine.high %v201_v8, %v205_v9  ;;  %v209_v12 = vld [vmem:[#allocation6 + $0xc0] sm:$0xff]  ;;  %v4530_v16 = vcombine.low %v201_v8, %v205_v9  ;;  %v206_v30 = vld [vmem:[#allocation6 + $0xa8] sm:$0xff]  ;;  %845 = vmatprep.subr.bf16.mxu1 %v4517_v24  ;;  %v187_v8 = vld [vmem:[#allocation6 + $0x10] sm:$0xff]  ;;  %p5917_p11 = por %p5916_p10, %p5915_p9 }
  0x9d   :  { %v213_v13 = vld [vmem:[#allocation6 + $0xe0] sm:$0xff]  ;;  %846 = vmatpush1.bf16.msra.mxu1 %v4516_v25  ;;  %v4533_v36 = vcombine.high %v202_v29, %v206_v30  ;;  %v210_v38 = vld [vmem:[#allocation6 + $0xc8] sm:$0xff]  ;;  %v4532_v42 = vcombine.low %v202_v29, %v206_v30  ;;  %v191_v9 = vld [vmem:[#allocation6 + $0x30] sm:$0xff] }
  0x9e   :  { %v4539_v18 = vcombine.high %v209_v12, %v213_v13  ;;  %v217_v19 = vld [vmem:[#allocation6 + $0x100] sm:$0xff]  ;;  %v4538_v23 = vcombine.low %v209_v12, %v213_v13  ;;  %847 = vmatprep.subr.bf16.mxu1 %v4525_v33  ;;  %v214_v39 = vld [vmem:[#allocation6 + $0xe8] sm:$0xff]  ;;  %v199_v24 = vld [vmem:[#allocation6 + $0x70] sm:$0xff]  ;;  %v4518_v29 = vcombine.low %v187_v8, %v191_v9  ;;  %p5918_p12 = pnand %p5917_p11, %p5911_p8 }
  0x9f   :  { %735 = vmatpush1.bf16.msra.mxu0 %v4522_v10  ;;  %v221_v20 = vld [vmem:[#allocation6 + $0x120] sm:$0xff]  ;;  %v4541_v44 = vcombine.high %v210_v38, %v214_v39  ;;  %v218_v46 = vld [vmem:[#allocation6 + $0x108] sm:$0xff]  ;;  %v4540_v50 = vcombine.low %v210_v38, %v214_v39  ;;  %v188_v39 = vld [vmem:[#allocation6 + $0x18] sm:$0xff] }
  0xa0   :  { %736 = vmatprep.subr.bf16.mxu0 %v4531_v11  ;;  %v4547_v27 = vcombine.high %v217_v19, %v221_v20  ;;  %v225_v31 = vld [vmem:[#allocation6 + $0x140] sm:$0xff]  ;;  %v4546_v35 = vcombine.low %v217_v19, %v221_v20  ;;  %v222_v47 = vld [vmem:[#allocation6 + $0x128] sm:$0xff]  ;;  %v139_v11 = vld [vmem:[#allocation3 + $0x10] sm:$0xff]  ;;  %v4519_v20 = vcombine.high %v187_v8, %v191_v9 }
  0xa1   :  { %v229_v32 = vld [vmem:[#allocation6 + $0x160] sm:$0xff]  ;;  %848 = vmatpush1.bf16.msra.mxu1 %v4524_v34  ;;  %v4549_v52 = vcombine.high %v218_v46, %v222_v47  ;;  %v226_v54 = vld [vmem:[#allocation6 + $0x148] sm:$0xff]  ;;  %v4548_v58 = vcombine.low %v218_v46, %v222_v47  ;;  %v148_v34 = vld [vmem:[#allocation3 + $0x58] sm:$0xff] }
  0xa2   :  { %v4555_v37 = vcombine.high %v225_v31, %v229_v32  ;;  %v233_v40 = vld [vmem:[#allocation6 + $0x180] sm:$0xff]  ;;  %v4554_v43 = vcombine.low %v225_v31, %v229_v32  ;;  %849 = vmatprep.subr.bf16.mxu1 %v4533_v36  ;;  %v230_v55 = vld [vmem:[#allocation6 + $0x168] sm:$0xff]  ;;  %v143_v31 = vld [vmem:[#allocation3 + $0x30] sm:$0xff] }
  0xa3   :  { %737 = vmatpush1.bf16.msra.mxu0 %v4530_v16  ;;  %v237_v41 = vld [vmem:[#allocation6 + $0x1a0] sm:$0xff]  ;;  %v4557_v60 = vcombine.high %v226_v54, %v230_v55  ;;  %v234_v62 = vld [vmem:[#allocation6 + $0x188] sm:$0xff]  ;;  %v4556_v2 = vcombine.low %v226_v54, %v230_v55  ;;  %v203_v36 = vld [vmem:[#allocation6 + $0x90] sm:$0xff] }
  0xa4   :  { %738 = vmatprep.subr.bf16.mxu0 %v4539_v18  ;;  %v4563_v45 = vcombine.high %v233_v40, %v237_v41  ;;  %v241_v48 = vld [vmem:[#allocation6 + $0x1c0] sm:$0xff]  ;;  %v4562_v51 = vcombine.low %v233_v40, %v237_v41  ;;  %v238_v63 = vld [vmem:[#allocation6 + $0x1a8] sm:$0xff]  ;;  %v192_v41 = vld [vmem:[#allocation6 + $0x38] sm:$0xff] }
  0xa5   :  { %v245_v49 = vld [vmem:[#allocation6 + $0x1e0] sm:$0xff]  ;;  %850 = vmatpush1.bf16.msra.mxu1 %v4532_v42  ;;  %v4565_v4 = vcombine.high %v234_v62, %v238_v63  ;;  %v242_v6 = vld [vmem:[#allocation6 + $0x1c8] sm:$0xff]  ;;  %v4564_v12 = vcombine.low %v234_v62, %v238_v63  ;;  %v215_v46 = vld [vmem:[#allocation6 + $0xf0] sm:$0xff] }
  0xa6   :  { %851 = vmatprep.subr.bf16.mxu1 %v4541_v44  ;;  %v4571_v53 = vcombine.high %v241_v48, %v245_v49  ;;  %v249_v56 = vld [vmem:[#allocation6 + $0x200] sm:$0xff]  ;;  %v4570_v59 = vcombine.low %v241_v48, %v245_v49  ;;  %v246_v7 = vld [vmem:[#allocation6 + $0x1e8] sm:$0xff]  ;;  %v4521_v48 = vcombine.high %v188_v39, %v192_v41  ;;  %v196_v49 = vld [vmem:[#allocation6 + $0x58] sm:$0xff] }
  0xa7   :  { %739 = vmatpush1.bf16.msra.mxu0 %v4538_v23  ;;  %v253_v57 = vld [vmem:[#allocation6 + $0x220] sm:$0xff]  ;;  %v142_v14 = vld [vmem:[#allocation3 + $0x28] sm:$0xff]  ;;  %v4573_v16 = vcombine.high %v242_v6, %v246_v7  ;;  %v4572_v22 = vcombine.low %v242_v6, %v246_v7  ;;  %v195_v23 = vld [vmem:[#allocation6 + $0x50] sm:$0xff] }
  0xa8   :  { %740 = vmatprep.subr.bf16.mxu0 %v4547_v27  ;;  %v4579_v61 = vcombine.high %v249_v56, %v253_v57  ;;  %v257_v0 = vld [vmem:[#allocation6 + $0x240] sm:$0xff]  ;;  %v4578_v3 = vcombine.low %v249_v56, %v253_v57  ;;  %v250_v18 = vld [vmem:[#allocation6 + $0x208] sm:$0xff]  ;;  %v6123_v25 = vpack.c.bf16 %v144_v15, %v142_v14  ;;  %v4527_v32 = vcombine.high %v195_v23, %v199_v24  ;;  %v152_v56 = vld [vmem:[#allocation3 + $0x78] sm:$0xff] }
  0xa9   :  { %852 = vmatpush1.bf16.msra.mxu1 %v4540_v50  ;;  %v261_v1 = vld [vmem:[#allocation6 + $0x260] sm:$0xff]  ;;  %v254_v19 = vld [vmem:[#allocation6 + $0x228] sm:$0xff]  ;;  %v4526_v40 = vcombine.low %v195_v23, %v199_v24  ;;  %v219_v57 = vld [vmem:[#allocation6 + $0x110] sm:$0xff] }
  0xaa   :  { %853 = vmatprep.subr.bf16.mxu1 %v4549_v52  ;;  %v4587_v5 = vcombine.high %v257_v0, %v261_v1  ;;  %v137_v10 = vld [vmem:[#allocation3] sm:$0xff]  ;;  %v4586_v13 = vcombine.low %v257_v0, %v261_v1  ;;  %v4581_v26 = vcombine.high %v250_v18, %v254_v19  ;;  %v258_v27 = vld [vmem:[#allocation6 + $0x248] sm:$0xff]  ;;  %v208_v63 = vld [vmem:[#allocation6 + $0xb8] sm:$0xff] }
  0xab   :  { %741 = vmatpush1.bf16.msra.mxu0 %v4546_v35  ;;  %v6121_v21 = vpack.c.bf16 %v139_v11, %v137_v10  ;;  %v262_v28 = vld [vmem:[#allocation6 + $0x268] sm:$0xff]  ;;  %v141_v30 = vld [vmem:[#allocation3 + $0x20] sm:$0xff]  ;;  %v4580_v35 = vcombine.low %v250_v18, %v254_v19  ;;  %v212_v7 = vld [vmem:[#allocation6 + $0xd8] sm:$0xff] }
  0xac   :  { %742 = vmatprep.subr.bf16.mxu0 %v4555_v37  ;;  %v146_v33 = vld [vmem:[#allocation3 + $0x48] sm:$0xff]  ;;  %v207_v37 = vld [vmem:[#allocation6 + $0xb0] sm:$0xff]  ;;  %v4589_v38 = vcombine.high %v258_v27, %v262_v28  ;;  %v4588_v44 = vcombine.low %v258_v27, %v262_v28  ;;  %v145_v52 = vld [vmem:[#allocation3 + $0x40] sm:$0xff] }
  0xad   :  { %854 = vmatpush1.bf16.msra.mxu1 %v4548_v58  ;;  %v4535_v42 = vcombine.high %v203_v36, %v207_v37  ;;  %v6130_v47 = vpack.c.bf16 %v148_v34, %v146_v33  ;;  %v4534_v50 = vcombine.low %v203_v36, %v207_v37  ;;  %v150_v55 = vld [vmem:[#allocation3 + $0x68] sm:$0xff]  ;;  %v223_v58 = vld [vmem:[#allocation6 + $0x130] sm:$0xff]  ;;  %v216_v9 = vld [vmem:[#allocation6 + $0xf8] sm:$0xff] }
  0xae   :  { %855 = vmatprep.subr.bf16.mxu1 %v4557_v60  ;;  %v4551_v0 = vcombine.high %v219_v57, %v223_v58  ;;  %v4550_v8 = vcombine.low %v219_v57, %v223_v58  ;;  %v149_v10 = vld [vmem:[#allocation3 + $0x60] sm:$0xff]  ;;  %v151_v11 = vld [vmem:[#allocation3 + $0x70] sm:$0xff]  ;;  %v156_v14 = vld [vmem:[#allocation3 + $0x98] sm:$0xff]  ;;  %v4545_v19 = vcombine.high %v212_v7, %v216_v9 }
  0xaf   :  { %743 = vmatpush1.bf16.msra.mxu0 %v4554_v43  ;;  %v6128_v43 = vpack.c.bf16 %v143_v31, %v141_v30  ;;  %v235_v15 = vld [vmem:[#allocation6 + $0x190] sm:$0xff]  ;;  %v224_v23 = vld [vmem:[#allocation6 + $0x138] sm:$0xff] }
  0xb0   :  { %744 = vmatprep.subr.bf16.mxu0 %v4563_v45  ;;  %v211_v45 = vld [vmem:[#allocation6 + $0xd0] sm:$0xff]  ;;  %v232_v34 = vld [vmem:[#allocation6 + $0x178] sm:$0xff] }
  0xb1   :  { %856 = vmatpush1.bf16.msra.mxu1 %v4556_v2  ;;  %v4543_v54 = vcombine.high %v211_v45, %v215_v46  ;;  %v4542_v62 = vcombine.low %v211_v45, %v215_v46  ;;  %v227_v2 = vld [vmem:[#allocation6 + $0x150] sm:$0xff]  ;;  %v236_v45 = vld [vmem:[#allocation6 + $0x198] sm:$0xff] }
  0xb2   :  { %857 = vmatprep.subr.bf16.mxu1 %v4565_v4  ;;  %v243_v27 = vld [vmem:[#allocation6 + $0x1d0] sm:$0xff]  ;;  %v248_v58 = vld [vmem:[#allocation6 + $0x1f8] sm:$0xff] }
  0xb3   :  { %745 = vmatpush1.bf16.msra.mxu0 %v4562_v51  ;;  %v200_v51 = vld [vmem:[#allocation6 + $0x78] sm:$0xff]  ;;  %v247_v28 = vld [vmem:[#allocation6 + $0x1f0] sm:$0xff] }
  0xb4   :  { %746 = vmatprep.subr.bf16.mxu0 %v4571_v53  ;;  %v147_v53 = vld [vmem:[#allocation3 + $0x50] sm:$0xff]  ;;  %v4529_v60 = vcombine.high %v196_v49, %v200_v51  ;;  %v4528_v4 = vcombine.low %v196_v49, %v200_v51  ;;  %v4575_v37 = vcombine.high %v243_v27, %v247_v28  ;;  %v4574_v46 = vcombine.low %v243_v27, %v247_v28  ;;  %v165_v28 = vld [vmem:[#allocation3 + $0xe0] sm:$0xff] }
  0xb5   :  { %858 = vmatpush1.bf16.msra.mxu1 %v4564_v12  ;;  %v6136_v1 = vpack.c.bf16 %v147_v53, %v145_v52  ;;  %v155_v36 = vld [vmem:[#allocation3 + $0x90] sm:$0xff] }
  0xb6   :  { %859 = vmatprep.subr.bf16.mxu1 %v4573_v16  ;;  %v239_v16 = vld [vmem:[#allocation6 + $0x1b0] sm:$0xff] }
  0xb7   :  { %747 = vmatpush1.bf16.msra.mxu0 %v4570_v59  ;;  %v4520_v59 = vcombine.low %v188_v39, %v192_v41  ;;  %v4567_v24 = vcombine.high %v235_v15, %v239_v16  ;;  %v4566_v33 = vcombine.low %v235_v15, %v239_v16  ;;  %v160_v39 = vld [vmem:[#allocation3 + $0xb8] sm:$0xff]  ;;  %v255_v41 = vld [vmem:[#allocation6 + $0x230] sm:$0xff]  ;;  %v166_v16 = vld [vmem:[#allocation3 + $0xe8] sm:$0xff] }
  0xb8   :  { %748 = vmatprep.subr.bf16.mxu0 %v4579_v61  ;;  %v204_v61 = vld [vmem:[#allocation6 + $0x98] sm:$0xff]  ;;  %v259_v51 = vld [vmem:[#allocation6 + $0x250] sm:$0xff] }
  0xb9   :  { %860 = vmatpush1.bf16.msra.mxu1 %v4572_v22  ;;  %v4537_v6 = vcombine.high %v204_v61, %v208_v63  ;;  %v4536_v18 = vcombine.low %v204_v61, %v208_v63  ;;  %v263_v52 = vld [vmem:[#allocation6 + $0x270] sm:$0xff]  ;;  %v164_v63 = vld [vmem:[#allocation3 + $0xd8] sm:$0xff] }
  0xba   :  { %861 = vmatprep.subr.bf16.mxu1 %v4581_v26  ;;  %v6146_v26 = vpack.c.bf16 %v151_v11, %v149_v10  ;;  %v4591_v61 = vcombine.high %v259_v51, %v263_v52  ;;  %v260_v10 = vld [vmem:[#allocation6 + $0x258] sm:$0xff]  ;;  %v163_v15 = vld [vmem:[#allocation3 + $0xd0] sm:$0xff] }
  0xbb   :  { %749 = vmatpush1.bf16.msra.mxu0 %v4578_v3  ;;  %v231_v3 = vld [vmem:[#allocation6 + $0x170] sm:$0xff]  ;;  %v264_v11 = vld [vmem:[#allocation6 + $0x278] sm:$0xff] }
  0xbc   :  { %750 = vmatprep.subr.bf16.mxu0 %v4587_v5  ;;  %v6140_v5 = vpack.c.bf16 %v152_v56, %v150_v55  ;;  %v4559_v12 = vcombine.high %v227_v2, %v231_v3  ;;  %v4558_v22 = vcombine.low %v227_v2, %v231_v3  ;;  %v244_v56 = vld [vmem:[#allocation6 + $0x1d8] sm:$0xff] }
  0xbd   :  { %862 = vmatpush1.bf16.msra.mxu1 %v4580_v35  ;;  %v153_v35 = vld [vmem:[#allocation3 + $0x80] sm:$0xff]  ;;  %v252_v2 = vld [vmem:[#allocation6 + $0x218] sm:$0xff] }
  0xbe   :  { %863 = vmatprep.subr.bf16.mxu1 %v4589_v38  ;;  %v158_v38 = vld [vmem:[#allocation3 + $0xa8] sm:$0xff]  ;;  %v256_v3 = vld [vmem:[#allocation6 + $0x238] sm:$0xff] }
  0xbf   :  { %751 = vmatpush1.bf16.msra.mxu0 %v4586_v13  ;;  %v154_v13 = vld [vmem:[#allocation3 + $0x88] sm:$0xff] }
  0xc0   :  { %958 = vmatprep.subr.bf16.mxu0 %v4519_v20  ;;  %v220_v20 = vld [vmem:[#allocation6 + $0x118] sm:$0xff]  ;;  %v6150_v30 = vpack.c.bf16 %v156_v14, %v154_v13  ;;  %v4585_v13 = vcombine.high %v252_v2, %v256_v3  ;;  %v161_v14 = vld [vmem:[#allocation3 + $0xc0] sm:$0xff] }
  0xc1   :  { %864 = vmatpush1.bf16.msra.mxu1 %v4588_v44  ;;  %v4553_v31 = vcombine.high %v220_v20, %v224_v23 }
  0xc2   :  { %765 = vmatmul.mubr.bf16.vlgmr.msra.gmra.mrb[0].mxu0 %v6121_v21  ;;  %1071 = vmatprep.subr.bf16.mxu1 %v4521_v48  ;;  %v240_v48 = vld [vmem:[#allocation6 + $0x1b8] sm:$0xff] }
  0xc3   :  { %4595 = vmatprep.mubr.msk.bf16.mxu0 %vm707_vm0, %v6123_v25  ;;  %959 = vmatpush1.bf16.msra.mxu0 %v4518_v29  ;;  %v4544_v29 = vcombine.low %v212_v7, %v216_v9  ;;  %v4569_v55 = vcombine.high %v236_v45, %v240_v48  ;;  %v4590_v7 = vcombine.low %v259_v51, %v263_v52  ;;  %v5347_v51 = vld [vmem:[#allocation9 + $0x8c] ss:$16 sps:$4 sm:$0xff]   ;;  %v5354_v52 = vld [vmem:[#allocation9 + $0xc0] ss:$16 sps:$4 sm:$0xff]  }
  0xc4   :  { %960 = vmatprep.subr.bf16.mxu0 %v4527_v32  ;;  %878 = vmatmul.mubr.bf16.vlgmr.msra.gmra.mrb[0].mxu1 %v6121_v21  ;;  %v228_v32 = vld [vmem:[#allocation6 + $0x158] sm:$0xff]  ;;  %v4576_v9 = vcombine.low %v244_v56, %v248_v58 }
  0xc5   :  { %4603 = vmatprep.mubr.msk.bf16.mxu1 %vm707_vm0, %v6123_v25  ;;  %1072 = vmatpush1.bf16.msra.mxu1 %v4520_v59  ;;  %v4561_v44 = vcombine.high %v228_v32, %v232_v34  ;;  %v4560_v53 = vcombine.low %v228_v32, %v232_v34  ;;  %v157_v59 = vld [vmem:[#allocation3 + $0xa0] sm:$0xff]  ;;  %v5318_v32 = vld [vmem:[#allocation9] ss:$16 sps:$4 sm:$0xff]  }
  0xc6   :  { %1073 = vmatprep.subr.bf16.mxu1 %v4529_v60  ;;  %v159_v60 = vld [vmem:[#allocation3 + $0xb0] sm:$0xff]  ;;  %v5324_v34 = vld [vmem:[#allocation9 + $0x20] ss:$16 sps:$4 sm:$0xff]  }
  0xc7   :  { %961 = vmatpush1.bf16.msra.mxu0 %v4526_v40  ;;  %v251_v40 = vld [vmem:[#allocation6 + $0x210] sm:$0xff] }
  0xc8   :  { %962 = vmatprep.subr.bf16.mxu0 %v4535_v42  ;;  %v4552_v42 = vcombine.low %v220_v20, %v224_v23  ;;  %v4583_v49 = vcombine.high %v251_v40, %v255_v41  ;;  %v4582_v57 = vcombine.low %v251_v40, %v255_v41  ;;  %v4593_v20 = vcombine.high %v260_v10, %v264_v11  ;;  %v5336_v40 = vld [vmem:[#allocation9 + $0x60] ss:$16 sps:$4 sm:$0xff]   ;;  %v5344_v41 = vld [vmem:[#allocation9 + $0x84] ss:$16 sps:$4 sm:$0xff]  }
  0xc9   :  { %1074 = vmatpush1.bf16.msra.mxu1 %v4528_v4  ;;  %v4577_v4 = vcombine.high %v244_v56, %v248_v58  ;;  %v6176_v23 = vpack.c.bf16 %v163_v15, %v161_v14  ;;  %v5353_v56 = vld [vmem:[#allocation9 + $0xac] ss:$16 sps:$4 sm:$0xff]   ;;  %v5404_v15 = vld [vmem:[#allocation9 + $0x1c4] ss:$16 sps:$4 sm:$0xff]  }
  0xca   :  { %775 = vmatmul.mubr.bf16.gmra.mrb[4].mxu0 %v6128_v43  ;;  %1075 = vmatprep.subr.bf16.mxu1 %v4537_v6  ;;  %v5320_v6 = vld [vmem:[#allocation9 + $0x4] ss:$16 sps:$4 sm:$0xff]   ;;  %v5359_v58 = vld [vmem:[#allocation9 + $0xcc] ss:$16 sps:$4 sm:$0xff]  }
  0xcb   :  { %4596 = vmatprep.mubr.msk.bf16.mxu0 %vm707_vm0, %v6130_v47  ;;  %963 = vmatpush1.bf16.msra.mxu0 %v4534_v50  ;;  %v6156_v50 = vpack.c.bf16 %v155_v36, %v153_v35  ;;  %v5332_v35 = vld [vmem:[#allocation9 + $0x44] ss:$16 sps:$4 sm:$0xff]   ;;  %v5330_v36 = vld [vmem:[#allocation9 + $0x40] ss:$16 sps:$4 sm:$0xff]   ;;  %v5389_v14 = vld [vmem:[#allocation9 + $0x16c] ss:$16 sps:$4 sm:$0xff]  }
  0xcc   :  { %964 = vmatprep.subr.bf16.mxu0 %v4543_v54  ;;  %888 = vmatmul.mubr.bf16.gmra.mrb[4].mxu1 %v6128_v43  ;;  %v6160_v54 = vpack.c.bf16 %v160_v39, %v158_v38  ;;  %v5321_v38 = vld [vmem:[#allocation9 + $0x8] ss:$16 sps:$4 sm:$0xff]   ;;  %v5329_v39 = vld [vmem:[#allocation9 + $0x2c] ss:$16 sps:$4 sm:$0xff]  }
  0xcd   :  { %4604 = vmatprep.mubr.msk.bf16.mxu1 %vm707_vm0, %v6130_v47  ;;  %1076 = vmatpush1.bf16.msra.mxu1 %v4536_v18  ;;  %v168_v18 = vld [vmem:[#allocation3 + $0xf8] sm:$0xff] }
  0xce   :  { %1077 = vmatprep.subr.bf16.mxu1 %v4545_v19  ;;  %v4584_v19 = vcombine.low %v252_v2, %v256_v3  ;;  %v6180_v27 = vpack.c.bf16 %v168_v18, %v166_v16  ;;  %v5378_v2 = vld [vmem:[#allocation9 + $0x140] ss:$16 sps:$4 sm:$0xff]   ;;  %v5386_v3 = vld [vmem:[#allocation9 + $0x164] ss:$16 sps:$4 sm:$0xff]   ;;  %v5395_v16 = vld [vmem:[#allocation9 + $0x18c] ss:$16 sps:$4 sm:$0xff]  }
  0xcf   :  { %965 = vmatpush1.bf16.msra.mxu0 %v4542_v62  ;;  %v162_v62 = vld [vmem:[#allocation3 + $0xc8] sm:$0xff] }
  0xd0   :  { %966 = vmatprep.subr.bf16.mxu0 %v4551_v0  ;;  %v4568_v0 = vcombine.low %v236_v45, %v240_v48  ;;  %v5350_v45 = vld [vmem:[#allocation9 + $0xa4] ss:$16 sps:$4 sm:$0xff]   ;;  %v5341_v48 = vld [vmem:[#allocation9 + $0x6c] ss:$16 sps:$4 sm:$0xff]   ;;  %v5402_v18 = vld [vmem:[#allocation9 + $0x1c0] ss:$16 sps:$4 sm:$0xff]  }
  0xd1   :  { %1078 = vmatpush1.bf16.msra.mxu1 %v4544_v29  ;;  %v167_v29 = vld [vmem:[#allocation3 + $0xf0] sm:$0xff] }
  0xd2   :  { %785 = vmatmul.mubr.bf16.gmra.mrb[8].mxu0 %v6136_v1  ;;  %1079 = vmatprep.subr.bf16.mxu1 %v4553_v31  ;;  %v6186_v31 = vpack.c.bf16 %v167_v29, %v165_v28  ;;  %v5407_v28 = vld [vmem:[#allocation9 + $0x1cc] ss:$16 sps:$4 sm:$0xff]   ;;  %v5405_v29 = vld [vmem:[#allocation9 + $0x1c8] ss:$16 sps:$4 sm:$0xff]  }
  0xd3   :  { %4597 = vmatprep.mubr.msk.bf16.mxu0 %vm707_vm0, %v6140_v5  ;;  %967 = vmatpush1.bf16.msra.mxu0 %v4550_v8  ;;  %v6166_v8 = vpack.c.bf16 %v159_v60, %v157_v59  ;;  %v5366_v59 = vld [vmem:[#allocation9 + $0x100] ss:$16 sps:$4 sm:$0xff]   ;;  %v5374_v60 = vld [vmem:[#allocation9 + $0x124] ss:$16 sps:$4 sm:$0xff]  }
  0xd4   :  { %968 = vmatprep.subr.bf16.mxu0 %v4559_v12  ;;  %898 = vmatmul.mubr.bf16.gmra.mrb[8].mxu1 %v6136_v1  ;;  %v6170_v12 = vpack.c.bf16 %v164_v63, %v162_v62  ;;  %v5365_v62 = vld [vmem:[#allocation9 + $0xec] ss:$16 sps:$4 sm:$0xff]   ;;  %v5380_v63 = vld [vmem:[#allocation9 + $0x144] ss:$16 sps:$4 sm:$0xff]  }
  0xd5   :  { %4605 = vmatprep.mubr.msk.bf16.mxu1 %vm707_vm0, %v6140_v5  ;;  %1080 = vmatpush1.bf16.msra.mxu1 %v4552_v42  ;;  %v5327_v42 = vld [vmem:[#allocation9 + $0x28] ss:$16 sps:$4 sm:$0xff]  }
  0xd6   :  { %1081 = vmatprep.subr.bf16.mxu1 %v4561_v44  ;;  %v5335_v44 = vld [vmem:[#allocation9 + $0x4c] ss:$16 sps:$4 sm:$0xff]  }
  0xd7   :  { %969 = vmatpush1.bf16.msra.mxu0 %v4558_v22  ;;  %v5323_v22 = vld [vmem:[#allocation9 + $0xc] ss:$16 sps:$4 sm:$0xff]  }
  0xd8   :  { %970 = vmatprep.subr.bf16.mxu0 %v4567_v24  ;;  %v4592_v24 = vcombine.low %v260_v10, %v264_v11  ;;  %v5390_v10 = vld [vmem:[#allocation9 + $0x180] ss:$16 sps:$4 sm:$0xff]   ;;  %v5398_v11 = vld [vmem:[#allocation9 + $0x1a4] ss:$16 sps:$4 sm:$0xff]  }
  0xd9   :  { %1082 = vmatpush1.bf16.msra.mxu1 %v4560_v53  ;;  %v5362_v53 = vld [vmem:[#allocation9 + $0xe4] ss:$16 sps:$4 sm:$0xff]  }
  0xda   :  { %795 = vmatmul.mubr.bf16.gmra.mrb[12].mxu0 %v6146_v26  ;;  %1083 = vmatprep.subr.bf16.mxu1 %v4569_v55  ;;  %v5345_v55 = vld [vmem:[#allocation9 + $0x88] ss:$16 sps:$4 sm:$0xff]  }
  0xdb   :  { %4598 = vmatprep.mubr.msk.bf16.mxu0 %vm707_vm0, %v6150_v30  ;;  %971 = vmatpush1.bf16.msra.mxu0 %v4566_v33  ;;  %v5326_v33 = vld [vmem:[#allocation9 + $0x24] ss:$16 sps:$4 sm:$0xff]  }
  0xdc   :  { %972 = vmatprep.subr.bf16.mxu0 %v4575_v37  ;;  %908 = vmatmul.mubr.bf16.gmra.mrb[12].mxu1 %v6146_v26  ;;  %v5338_v37 = vld [vmem:[#allocation9 + $0x64] ss:$16 sps:$4 sm:$0xff]  }
  0xdd   :  { %4606 = vmatprep.mubr.msk.bf16.mxu1 %vm707_vm0, %v6150_v30  ;;  %1084 = vmatpush1.bf16.msra.mxu1 %v4568_v0  ;;  %v5371_v0 = vld [vmem:[#allocation9 + $0x10c] ss:$16 sps:$4 sm:$0xff]  }
  0xde   :  { %1085 = vmatprep.subr.bf16.mxu1 %v4577_v4  ;;  %v5369_v4 = vld [vmem:[#allocation9 + $0x108] ss:$16 sps:$4 sm:$0xff]  }
  0xdf   :  { %973 = vmatpush1.bf16.msra.mxu0 %v4574_v46  ;;  %v5333_v46 = vld [vmem:[#allocation9 + $0x48] ss:$16 sps:$4 sm:$0xff]  }
  0xe0   :  { %974 = vmatprep.subr.bf16.mxu0 %v4583_v49  ;;  %v5348_v49 = vld [vmem:[#allocation9 + $0xa0] ss:$16 sps:$4 sm:$0xff]  }
  0xe1   :  { %1086 = vmatpush1.bf16.msra.mxu1 %v4576_v9  ;;  %v5383_v9 = vld [vmem:[#allocation9 + $0x14c] ss:$16 sps:$4 sm:$0xff]  }
  0xe2   :  { %805 = vmatmul.mubr.bf16.gmra.mrb[16].mxu0 %v6156_v50  ;;  %1087 = vmatprep.subr.bf16.mxu1 %v4585_v13  ;;  %v5381_v13 = vld [vmem:[#allocation9 + $0x148] ss:$16 sps:$4 sm:$0xff]  }
  0xe3   :  { %4599 = vmatprep.mubr.msk.bf16.mxu0 %vm707_vm0, %v6160_v54  ;;  %975 = vmatpush1.bf16.msra.mxu0 %v4582_v57  ;;  %v5368_v57 = vld [vmem:[#allocation9 + $0x104] ss:$16 sps:$4 sm:$0xff]  }
  0xe4   :  { %976 = vmatprep.subr.bf16.mxu0 %v4591_v61  ;;  %918 = vmatmul.mubr.bf16.gmra.mrb[16].mxu1 %v6156_v50  ;;  %v5357_v61 = vld [vmem:[#allocation9 + $0xc8] ss:$16 sps:$4 sm:$0xff]  }
  0xe5   :  { %4607 = vmatprep.mubr.msk.bf16.mxu1 %vm707_vm0, %v6160_v54  ;;  %1088 = vmatpush1.bf16.msra.mxu1 %v4584_v19  ;;  %v5410_v19 = vld [vmem:[#allocation9 + $0x1e4] ss:$16 sps:$4 sm:$0xff]  }
  0xe6   :  { %1089 = vmatprep.subr.bf16.mxu1 %v4593_v20  ;;  %v5393_v20 = vld [vmem:[#allocation9 + $0x188] ss:$16 sps:$4 sm:$0xff]  }
  0xe7   :  { %977 = vmatpush1.bf16.msra.mxu0 %v4590_v7  ;;  %v5392_v7 = vld [vmem:[#allocation9 + $0x184] ss:$16 sps:$4 sm:$0xff]  }
  0xe8   :  { %2934 = vmatprep.subr.bf16.mxu0 %v5320_v6  ;;  %v5377_v6 = vld [vmem:[#allocation9 + $0x12c] ss:$16 sps:$4 sm:$0xff]  }
  0xe9   :  { %1090 = vmatpush1.bf16.msra.mxu1 %v4592_v24  ;;  %v5408_v24 = vld [vmem:[#allocation9 + $0x1e0] ss:$16 sps:$4 sm:$0xff]  }
  0xea   :  { %815 = vmatmul.mubr.bf16.gmra.mrb[20].mxu0 %v6166_v8  ;;  %3386 = vmatprep.subr.bf16.mxu1 %v5323_v22  ;;  %v5401_v22 = vld [vmem:[#allocation9 + $0x1ac] ss:$16 sps:$4 sm:$0xff]  }
  0xeb   :  { %4600 = vmatprep.mubr.msk.bf16.mxu0 %vm707_vm0, %v6170_v12 }
  0xec   :  { %928 = vmatmul.mubr.bf16.gmra.mrb[20].mxu1 %v6166_v8 }
  0xed   :  { %4608 = vmatprep.mubr.msk.bf16.mxu1 %vm707_vm0, %v6170_v12 }
  0xf2   :  { %825 = vmatmul.mubr.bf16.gmra.mrb[24].mxu0 %v6176_v23 }
  0xf3   :  { %4601 = vmatprep.mubr.msk.bf16.mxu0 %vm707_vm0, %v6180_v27 }
  0xf4   :  { %938 = vmatmul.mubr.bf16.gmra.mrb[24].mxu1 %v6176_v23 }
  0xf5   :  { %4609 = vmatprep.mubr.msk.bf16.mxu1 %vm707_vm0, %v6180_v27 }
  0xfa   :  { %835 = vmatmul.mubr.bf16.gmra.mrb[28].mxu0 %v6186_v31 }
  0xfb   :  { %4610 = vmatprep.mubr.msk.bf16.mxu0 %vm707_vm0, %v6115_v17 }
  0xfc   :  { %948 = vmatmul.mubr.bf16.gmra.mrb[28].mxu1 %v6186_v31 }
  0xfd   :  { %4618 = vmatprep.mubr.msk.bf16.mxu1 %vm707_vm0, %v6115_v17  ;;  %v5342_v17 = vld [vmem:[#allocation9 + $0x80] ss:$16 sps:$4 sm:$0xff]  }
 0x102   :  { %991 = vmatmul.mubr.bf16.vlgmr.msra.gmra.mrb[32].mxu0 %v6121_v21 }
 0x103   :  { %4611 = vmatprep.mubr.msk.bf16.mxu0 %vm707_vm0, %v6123_v25  ;;  %2935 = vmatpush1.bf16.msra.mxu0 %v5318_v32  ;;  %v5413_v32 = vld [vmem:[#allocation9 + $0x1ec] ss:$16 sps:$4 sm:$0xff]  }
 0x104   :  { %2936 = vmatprep.subr.bf16.mxu0 %v5326_v33  ;;  %1104 = vmatmul.mubr.bf16.vlgmr.msra.gmra.mrb[32].mxu1 %v6121_v21  ;;  %v5356_v21 = vld [vmem:[#allocation9 + $0xc4] ss:$16 sps:$4 sm:$0xff]   ;;  %v5411_v33 = vld [vmem:[#allocation9 + $0x1e8] ss:$16 sps:$4 sm:$0xff]  }
 0x105   :  { %3387 = vmatpush1.bf16.msra.mxu1 %v5321_v38  ;;  %4619 = vmatprep.mubr.msk.bf16.mxu1 %vm707_vm0, %v6123_v25  ;;  %v5339_v25 = vld [vmem:[#allocation9 + $0x68] ss:$16 sps:$4 sm:$0xff]  }
 0x106   :  { %3388 = vmatprep.subr.bf16.mxu1 %v5329_v39 }
 0x107   :  { %2937 = vmatpush1.bf16.msra.mxu0 %v5324_v34  ;;  %v267_v34 = vlaneseq }
 0x108   :  { %2938 = vmatprep.subr.bf16.mxu0 %v5332_v35 }
 0x109   :  { %3389 = vmatpush1.bf16.msra.mxu1 %v5327_v42  ;;  %v6243_v35 = vshrl.u32 %v267_v34, 7  ;;  %v5437_v34 = vld [vmem:[#allocation9 + $0x26c] ss:$16 sps:$4 sm:$0xff]  }
 0x10a   :  { %1001 = vmatmul.mubr.bf16.gmra.mrb[36].mxu0 %v6128_v43  ;;  %3390 = vmatprep.subr.bf16.mxu1 %v5335_v44 }
 0x10b   :  { %4612 = vmatprep.mubr.msk.bf16.mxu0 %vm707_vm0, %v6130_v47  ;;  %2939 = vmatpush1.bf16.msra.mxu0 %v5330_v36  ;;  %v6248_v36 = vld [vmem:[#allocation8] sm:$0xff] }
 0x10c   :  { %2940 = vmatprep.subr.bf16.mxu0 %v5338_v37  ;;  %1114 = vmatmul.mubr.bf16.gmra.mrb[36].mxu1 %v6128_v43  ;;  %v5360_v43 = vld [vmem:[#allocation9 + $0xe0] ss:$16 sps:$4 sm:$0xff]   ;;  %v273_v37 = vsub.s32 1, %v6243_v35 }
 0x10d   :  { %3391 = vmatpush1.bf16.msra.mxu1 %v5333_v46  ;;  %4620 = vmatprep.mubr.msk.bf16.mxu1 %vm707_vm0, %v6130_v47  ;;  %v5351_v47 = vld [vmem:[#allocation9 + $0xa8] ss:$16 sps:$4 sm:$0xff]  }
 0x10e   :  { %3392 = vmatprep.subr.bf16.mxu1 %v5341_v48  ;;  %v277_v48 = vsub.s32 2, %v6243_v35 }
 0x10f   :  { %2941 = vmatpush1.bf16.msra.mxu0 %v5336_v40 }
 0x110   :  { %2942 = vmatprep.subr.bf16.mxu0 %v5344_v41 }
 0x111   :  { %3393 = vmatpush1.bf16.msra.mxu1 %v5339_v25  ;;  %v281_v25 = vsub.s32 3, %v6243_v35 }
 0x112   :  { %1011 = vmatmul.mubr.bf16.gmra.mrb[40].mxu0 %v6136_v1  ;;  %3394 = vmatprep.subr.bf16.mxu1 %v5347_v51 }
 0x113   :  { %4613 = vmatprep.mubr.msk.bf16.mxu0 %vm707_vm0, %v6140_v5  ;;  %2943 = vmatpush1.bf16.msra.mxu0 %v5342_v17 }
 0x114   :  { %2944 = vmatprep.subr.bf16.mxu0 %v5350_v45  ;;  %1124 = vmatmul.mubr.bf16.gmra.mrb[40].mxu1 %v6136_v1  ;;  %v5372_v1 = vld [vmem:[#allocation9 + $0x120] ss:$16 sps:$4 sm:$0xff]  }
 0x115   :  { %3395 = vmatpush1.bf16.msra.mxu1 %v5345_v55  ;;  %4621 = vmatprep.mubr.msk.bf16.mxu1 %vm707_vm0, %v6140_v5  ;;  %v5363_v5 = vld [vmem:[#allocation9 + $0xe8] ss:$16 sps:$4 sm:$0xff]  }
 0x116   :  { %3396 = vmatprep.subr.bf16.mxu1 %v5353_v56 }
 0x117   :  { %2945 = vmatpush1.bf16.msra.mxu0 %v5348_v49 }
 0x118   :  { %2946 = vmatprep.subr.bf16.mxu0 %v5356_v21 }
 0x119   :  { %3397 = vmatpush1.bf16.msra.mxu1 %v5351_v47  ;;  %v6269_v47 = vrot.slane %v6248_v36, %v277_v48 }
 0x11a   :  { %1021 = vmatmul.mubr.bf16.gmra.mrb[44].mxu0 %v6146_v26  ;;  %3398 = vmatprep.subr.bf16.mxu1 %v5359_v58 }
 0x11b   :  { %4614 = vmatprep.mubr.msk.bf16.mxu0 %vm707_vm0, %v6150_v30  ;;  %2947 = vmatpush1.bf16.msra.mxu0 %v5354_v52 }
 0x11c   :  { %2948 = vmatprep.subr.bf16.mxu0 %v5362_v53  ;;  %1134 = vmatmul.mubr.bf16.gmra.mrb[44].mxu1 %v6146_v26  ;;  %v5384_v26 = vld [vmem:[#allocation9 + $0x160] ss:$16 sps:$4 sm:$0xff]  }
 0x11d   :  { %3399 = vmatpush1.bf16.msra.mxu1 %v5357_v61  ;;  %4622 = vmatprep.mubr.msk.bf16.mxu1 %vm707_vm0, %v6150_v30  ;;  %v5375_v30 = vld [vmem:[#allocation9 + $0x128] ss:$16 sps:$4 sm:$0xff]   ;;  %v5425_v61 = vld [vmem:[#allocation9 + $0x22c] ss:$16 sps:$4 sm:$0xff]  }
 0x11e   :  { %3400 = vmatprep.subr.bf16.mxu1 %v5365_v62  ;;  %v6275_v62 = vrot.slane %v6248_v36, %v281_v25 }
 0x11f   :  { %2949 = vmatpush1.bf16.msra.mxu0 %v5360_v43  ;;  %v5414_v43 = vld [vmem:[#allocation9 + $0x200] ss:$16 sps:$4 sm:$0xff]  }
 0x120   :  { %2950 = vmatprep.subr.bf16.mxu0 %v5368_v57  ;;  %v5417_v57 = vld [vmem:[#allocation9 + $0x208] ss:$16 sps:$4 sm:$0xff]  }
 0x121   :  { %3401 = vmatpush1.bf16.msra.mxu1 %v5363_v5 }
 0x122   :  { %1031 = vmatmul.mubr.bf16.gmra.mrb[48].mxu0 %v6156_v50  ;;  %3402 = vmatprep.subr.bf16.mxu1 %v5371_v0 }
 0x123   :  { %4615 = vmatprep.mubr.msk.bf16.mxu0 %vm707_vm0, %v6160_v54  ;;  %2951 = vmatpush1.bf16.msra.mxu0 %v5366_v59 }
 0x124   :  { %2952 = vmatprep.subr.bf16.mxu0 %v5374_v60  ;;  %1144 = vmatmul.mubr.bf16.gmra.mrb[48].mxu1 %v6156_v50  ;;  %v5396_v50 = vld [vmem:[#allocation9 + $0x1a0] ss:$16 sps:$4 sm:$0xff]   ;;  %v5422_v60 = vld [vmem:[#allocation9 + $0x224] ss:$16 sps:$4 sm:$0xff]  }
 0x125   :  { %3403 = vmatpush1.bf16.msra.mxu1 %v5369_v4  ;;  %4623 = vmatprep.mubr.msk.bf16.mxu1 %vm707_vm0, %v6160_v54  ;;  %v5387_v54 = vld [vmem:[#allocation9 + $0x168] ss:$16 sps:$4 sm:$0xff]  }
 0x126   :  { %3404 = vmatprep.subr.bf16.mxu1 %v5377_v6  ;;  %v5423_v6 = vld [vmem:[#allocation9 + $0x228] ss:$16 sps:$4 sm:$0xff]  }
 0x127   :  { %2953 = vmatpush1.bf16.msra.mxu0 %v5372_v1 }
 0x128   :  { %2954 = vmatprep.subr.bf16.mxu0 %v5380_v63 }
 0x129   :  { %3405 = vmatpush1.bf16.msra.mxu1 %v5375_v30 }
 0x12a   :  { %1041 = vmatmul.mubr.bf16.gmra.mrb[52].mxu0 %v6166_v8  ;;  %3406 = vmatprep.subr.bf16.mxu1 %v5383_v9 }
 0x12b   :  { %4616 = vmatprep.mubr.msk.bf16.mxu0 %vm707_vm0, %v6170_v12  ;;  %2955 = vmatpush1.bf16.msra.mxu0 %v5378_v2  ;;  %v5420_v2 = vld [vmem:[#allocation9 + $0x220] ss:$16 sps:$4 sm:$0xff]  }
 0x12c   :  { %2956 = vmatprep.subr.bf16.mxu0 %v5386_v3  ;;  %1154 = vmatmul.mubr.bf16.gmra.mrb[52].mxu1 %v6166_v8  ;;  %v5416_v8 = vld [vmem:[#allocation9 + $0x204] ss:$16 sps:$4 sm:$0xff]  }
 0x12d   :  { %3407 = vmatpush1.bf16.msra.mxu1 %v5381_v13  ;;  %4624 = vmatprep.mubr.msk.bf16.mxu1 %vm707_vm0, %v6170_v12  ;;  %v5399_v12 = vld [vmem:[#allocation9 + $0x1a8] ss:$16 sps:$4 sm:$0xff]  }
 0x12e   :  { %3408 = vmatprep.subr.bf16.mxu1 %v5389_v14 }
 0x12f   :  { %2957 = vmatpush1.bf16.msra.mxu0 %v5384_v26  ;;  %v5428_v26 = vld [vmem:[#allocation9 + $0x244] ss:$16 sps:$4 sm:$0xff]  }
 0x130   :  { %2958 = vmatprep.subr.bf16.mxu0 %v5392_v7 }
 0x131   :  { %3409 = vmatpush1.bf16.msra.mxu1 %v5387_v54 }
 0x132   :  { %1051 = vmatmul.mubr.bf16.gmra.mrb[56].mxu0 %v6176_v23  ;;  %3410 = vmatprep.subr.bf16.mxu1 %v5395_v16 }
 0x133   :  { %4617 = vmatprep.mubr.msk.bf16.mxu0 %vm707_vm0, %v6180_v27  ;;  %2959 = vmatpush1.bf16.msra.mxu0 %v5390_v10 }
 0x134   :  { %2960 = vmatprep.subr.bf16.mxu0 %v5398_v11  ;;  %1164 = vmatmul.mubr.bf16.gmra.mrb[56].mxu1 %v6176_v23  ;;  %v5419_v23 = vld [vmem:[#allocation9 + $0x20c] ss:$16 sps:$4 sm:$0xff]  }
 0x135   :  { %3411 = vmatpush1.bf16.msra.mxu1 %v5393_v20  ;;  %4625 = vmatprep.mubr.msk.bf16.mxu1 %vm707_vm0, %v6180_v27  ;;  %v6246_v27 = vsub.s32 0, %v6243_v35  ;;  %v5431_v11 = vld [vmem:[#allocation9 + $0x24c] ss:$16 sps:$4 sm:$0xff]  }
 0x136   :  { %3412 = vmatprep.subr.bf16.mxu1 %v5401_v22 }
 0x137   :  { %2961 = vmatpush1.bf16.msra.mxu0 %v5396_v50  ;;  %v6253_v38 = vrot.slane %v6248_v36, %v6246_v27 }
 0x138   :  { %2962 = vmatprep.subr.bf16.mxu0 %v5404_v15 }
 0x139   :  { %3413 = vmatpush1.bf16.msra.mxu1 %v5399_v12  ;;  %v5426_v12 = vld [vmem:[#allocation9 + $0x240] ss:$16 sps:$4 sm:$0xff]  }
 0x13a   :  { %1061 = vmatmul.mubr.bf16.gmra.mrb[60].mxu0 %v6186_v31  ;;  %3414 = vmatprep.subr.bf16.mxu1 %v5407_v28  ;;  %v5429_v28 = vld [vmem:[#allocation9 + $0x248] ss:$16 sps:$4 sm:$0xff]  }
 0x13b   :  { %2963 = vmatpush1.bf16.msra.mxu0 %v5402_v18 }
 0x13c   :  { %2964 = vmatprep.subr.bf16.mxu0 %v5410_v19  ;;  %1174 = vmatmul.mubr.bf16.gmra.mrb[60].mxu1 %v6186_v31  ;;  %v6258_v31 = vrot.slane %v6248_v36, %v273_v37 }
 0x13d   :  { %3415 = vmatpush1.bf16.msra.mxu1 %v5405_v29 }
 0x13e   :  { %3416 = vmatprep.subr.bf16.mxu1 %v5413_v32 }
 0x13f   :  { %2965 = vmatpush1.bf16.msra.mxu0 %v5408_v24 }
 0x140   :  { %3047 = vmatprep.subr.bf16.mxu0 %v5416_v8 }
 0x141   :  { %3417 = vmatpush1.bf16.msra.mxu1 %v5411_v33 }
 0x142   :  { %3499 = vmatprep.subr.bf16.mxu1 %v5419_v23  ;;  %v5434_v23 = vld [vmem:[#allocation9 + $0x264] ss:$16 sps:$4 sm:$0xff]  }
 0x195   :  { %v766_v39 = vpop.f32.mrb[0].mxu0 }
 0x196   :  { %v767_v40 = vadd.f32 %v766_v39, %v6253_v38  ;;  %v768_v41 = vpop.f32.mrb[1].mxu0 }
 0x197   :  { %v769_v42 = vadd.f32 %v768_v41, %v6258_v31  ;;  %v770_v44 = vpop.f32.mrb[2].mxu0  ;;  %v879_v3 = vpop.f32.mrb[0].mxu1 }
 0x198   :  { %v771_v17 = vadd.f32 %v770_v44, %v6253_v38  ;;  %v772_v45 = vpop.f32.mrb[3].mxu0  ;;  %v1184_v49 = vmax.f32 %v767_v40, 0.0  ;;  %v880_v7 = vadd.f32 %v879_v3, %v6269_v47  ;;  %v881_v30 = vpop.f32.mrb[1].mxu1 }
 0x199   :  { %v773_v46 = vadd.f32 %v772_v45, %v6258_v31  ;;  %v1185_v51 = vmax.f32 %v769_v42, 0.0  ;;  %v882_v13 = vadd.f32 %v881_v30, %v6275_v62  ;;  %v883_v14 = vpop.f32.mrb[2].mxu1  ;;  %v5432_v45 = vld [vmem:[#allocation9 + $0x260] ss:$16 sps:$4 sm:$0xff]  }
 0x19a   :  { %v1192_v21 = vmax.f32 %v771_v17, 0.0  ;;  %v1186_v54 = vmax.f32 %v880_v7, 0.0  ;;  %v884_v16 = vadd.f32 %v883_v14, %v6269_v47  ;;  %v885_v18 = vpop.f32.mrb[3].mxu1  ;;  %v5441_v7 = vld [vmem:[#allocation9 + $0x288] ss:$16 sps:$4 sm:$0xff]  }
 0x19b   :  { %v1193_v52 = vmax.f32 %v773_v46, 0.0  ;;  %v1187_v20 = vmax.f32 %v882_v13, 0.0  ;;  %v886_v22 = vadd.f32 %v885_v18, %v6275_v62  ;;  %v5449_v13 = vld [vmem:[#allocation9 + $0x2ac] ss:$16 sps:$4 sm:$0xff]  }
 0x19c   :  { %v1312_v53 = vpack.c.bf16 %v1192_v21, %v1184_v49  ;;  %v1194_v29 = vmax.f32 %v884_v16, 0.0 }
 0x19d   :  { %v1313_v55 = vpack.c.bf16 %v1193_v52, %v1185_v51  ;;  %v776_v56 = vpop.f32.mrb[4].mxu0  ;;  %v1195_v39 = vmax.f32 %v886_v22, 0.0  ;;  %v5435_v51 = vld [vmem:[#allocation9 + $0x268] ss:$16 sps:$4 sm:$0xff]   ;;  %v5440_v52 = vld [vmem:[#allocation9 + $0x284] ss:$16 sps:$4 sm:$0xff]  }
 0x19e   :  { %v777_v58 = vadd.f32 %v776_v56, %v6253_v38  ;;  %v778_v59 = vpop.f32.mrb[5].mxu0  ;;  %v6286_v42 = vpack.c.bf16 %v1194_v29, %v1186_v54 }
 0x19f   :  { %v779_v1 = vadd.f32 %v778_v59, %v6258_v31  ;;  %v780_v63 = vpop.f32.mrb[6].mxu0  ;;  %2966 = vmatprep.mubr.bf16.mxu0 %v1313_v55  ;;  %3418 = vmatprep.mubr.bf16.mxu1 %v1313_v55  ;;  %v6289_v46 = vpack.c.bf16 %v1195_v39, %v1187_v20  ;;  %v889_v49 = vpop.f32.mrb[4].mxu1 }
 0x1a0   :  { %v781_v5 = vadd.f32 %v780_v63, %v6253_v38  ;;  %v782_v0 = vpop.f32.mrb[7].mxu0  ;;  %2967 = vmatmul.mubr.bf16.vlgmr.msra.gmra.mrb[64].mxu0 %v1312_v53  ;;  %3419 = vmatmul.mubr.bf16.vlgmr.msra.gmra.mrb[64].mxu1 %v1312_v53  ;;  %v1200_v9 = vmax.f32 %v777_v58, 0.0  ;;  %v890_v53 = vadd.f32 %v889_v49, %v6269_v47  ;;  %v891_v55 = vpop.f32.mrb[5].mxu1 }
 0x1a1   :  { %v783_v4 = vadd.f32 %v782_v0, %v6258_v31  ;;  %3048 = vmatpush1.bf16.msra.mxu0 %v5414_v43  ;;  %3500 = vmatpush1.bf16.msra.mxu1 %v5417_v57  ;;  %v1201_v50 = vmax.f32 %v779_v1, 0.0  ;;  %v5443_v57 = vld [vmem:[#allocation9 + $0x28c] ss:$16 sps:$4 sm:$0xff]   ;;  %v892_v58 = vadd.f32 %v891_v55, %v6275_v62  ;;  %v893_v59 = vpop.f32.mrb[6].mxu1  ;;  %v5450_v55 = vld [vmem:[#allocation9 + $0x2c0] ss:$16 sps:$4 sm:$0xff]  }
 0x1a2   :  { %v1208_v10 = vmax.f32 %v781_v5, 0.0  ;;  %3049 = vmatprep.subr.bf16.mxu0 %v5422_v60  ;;  %3501 = vmatprep.subr.bf16.mxu1 %v5425_v61  ;;  %v1202_v1 = vmax.f32 %v890_v53, 0.0  ;;  %v894_v63 = vadd.f32 %v893_v59, %v6269_v47  ;;  %v895_v5 = vpop.f32.mrb[7].mxu1  ;;  %v5458_v59 = vld [vmem:[#allocation9 + $0x2e4] ss:$16 sps:$4 sm:$0xff]  }
 0x1a3   :  { %v1209_v15 = vmax.f32 %v783_v4, 0.0  ;;  %v896_v3 = vadd.f32 %v895_v5, %v6275_v62 }
 0x1a4   :  { %v1320_v19 = vpack.c.bf16 %v1208_v10, %v1200_v9  ;;  %v1210_v30 = vmax.f32 %v894_v63, 0.0 }
 0x1a5   :  { %v1321_v24 = vpack.c.bf16 %v1209_v15, %v1201_v50  ;;  %3050 = vmatpush1.bf16.msra.mxu0 %v5420_v2  ;;  %v786_v8 = vpop.f32.mrb[8].mxu0  ;;  %3502 = vmatpush1.bf16.msra.mxu1 %v5423_v6  ;;  %v1203_v2 = vmax.f32 %v892_v58, 0.0  ;;  %v1211_v14 = vmax.f32 %v896_v3, 0.0  ;;  %v5456_v3 = vld [vmem:[#allocation9 + $0x2e0] ss:$16 sps:$4 sm:$0xff]  }
 0x1a6   :  { %v787_v32 = vadd.f32 %v786_v8, %v6253_v38  ;;  %v788_v33 = vpop.f32.mrb[9].mxu0  ;;  %3051 = vmatprep.subr.bf16.mxu0 %v5428_v26  ;;  %3503 = vmatprep.subr.bf16.mxu1 %v5431_v11  ;;  %v5438_v26 = vld [vmem:[#allocation9 + $0x280] ss:$16 sps:$4 sm:$0xff]   ;;  %v5446_v11 = vld [vmem:[#allocation9 + $0x2a4] ss:$16 sps:$4 sm:$0xff]   ;;  %v6298_v54 = vpack.c.bf16 %v1210_v30, %v1202_v1 }
 0x1a7   :  { %v789_v40 = vadd.f32 %v788_v33, %v6258_v31  ;;  %v790_v41 = vpop.f32.mrb[10].mxu0  ;;  %2976 = vmatprep.mubr.bf16.mxu0 %v1321_v24  ;;  %3428 = vmatprep.mubr.bf16.mxu1 %v1321_v24  ;;  %v6301_v20 = vpack.c.bf16 %v1211_v14, %v1203_v2  ;;  %v899_v22 = vpop.f32.mrb[8].mxu1  ;;  %v5447_v8 = vld [vmem:[#allocation9 + $0x2a8] ss:$16 sps:$4 sm:$0xff]   ;;  %v5464_v30 = vld [vmem:[#allocation9 + $0x304] ss:$16 sps:$4 sm:$0xff]  }
 0x1a8   :  { %v791_v44 = vadd.f32 %v790_v41, %v6253_v38  ;;  %v792_v17 = vpop.f32.mrb[11].mxu0  ;;  %2977 = vmatmul.mubr.bf16.gmra.mrb[68].mxu0 %v1320_v19  ;;  %3429 = vmatmul.mubr.bf16.gmra.mrb[68].mxu1 %v1320_v19  ;;  %v1216_v56 = vmax.f32 %v787_v32, 0.0  ;;  %v5444_v19 = vld [vmem:[#allocation9 + $0x2a0] ss:$16 sps:$4 sm:$0xff]   ;;  %v901_v29 = vpop.f32.mrb[9].mxu1 }
 0x1a9   :  { %v793_v21 = vadd.f32 %v792_v17, %v6258_v31  ;;  %3052 = vmatpush1.bf16.msra.mxu0 %v5426_v12  ;;  %3504 = vmatpush1.bf16.msra.mxu1 %v5429_v28  ;;  %v1217_v60 = vmax.f32 %v789_v40, 0.0  ;;  %v5452_v12 = vld [vmem:[#allocation9 + $0x2c4] ss:$16 sps:$4 sm:$0xff]   ;;  %v900_v28 = vadd.f32 %v899_v22, %v6269_v47  ;;  %v903_v39 = vpop.f32.mrb[10].mxu1  ;;  %v5467_v14 = vld [vmem:[#allocation9 + $0x30c] ss:$16 sps:$4 sm:$0xff]  }
 0x1aa   :  { %v1224_v43 = vmax.f32 %v791_v44, 0.0  ;;  %3053 = vmatprep.subr.bf16.mxu0 %v5434_v23  ;;  %3505 = vmatprep.subr.bf16.mxu1 %v5437_v34  ;;  %v5455_v23 = vld [vmem:[#allocation9 + $0x2cc] ss:$16 sps:$4 sm:$0xff]   ;;  %v902_v34 = vadd.f32 %v901_v29, %v6275_v62  ;;  %v904_v17 = vadd.f32 %v903_v39, %v6269_v47 }
 0x1ab   :  { %v1225_v61 = vmax.f32 %v793_v21, 0.0  ;;  %v1218_v44 = vmax.f32 %v900_v28, 0.0 }
 0x1ac   :  { %v1328_v0 = vpack.c.bf16 %v1224_v43, %v1216_v56  ;;  %v1219_v21 = vmax.f32 %v902_v34, 0.0  ;;  %v5453_v56 = vld [vmem:[#allocation9 + $0x2c8] ss:$16 sps:$4 sm:$0xff]   ;;  %v1226_v43 = vmax.f32 %v904_v17, 0.0 }
 0x1ad   :  { %v1329_v4 = vpack.c.bf16 %v1225_v61, %v1217_v60  ;;  %3054 = vmatpush1.bf16.msra.mxu0 %v5432_v45  ;;  %v796_v6 = vpop.f32.mrb[12].mxu0  ;;  %3506 = vmatpush1.bf16.msra.mxu1 %v5435_v51  ;;  %v905_v45 = vpop.f32.mrb[11].mxu1  ;;  %v5461_v60 = vld [vmem:[#allocation9 + $0x2ec] ss:$16 sps:$4 sm:$0xff]  }
 0x1ae   :  { %v797_v9 = vadd.f32 %v796_v6, %v6253_v38  ;;  %v798_v10 = vpop.f32.mrb[13].mxu0  ;;  %3055 = vmatprep.subr.bf16.mxu0 %v5440_v52  ;;  %3507 = vmatprep.subr.bf16.mxu1 %v5443_v57  ;;  %v906_v51 = vadd.f32 %v905_v45, %v6275_v62  ;;  %v6310_v5 = vpack.c.bf16 %v1226_v43, %v1218_v44  ;;  %v5473_v44 = vld [vmem:[#allocation9 + $0x32c] ss:$16 sps:$4 sm:$0xff]  }
 0x1af   :  { %v799_v50 = vadd.f32 %v798_v10, %v6258_v31  ;;  %v800_v15 = vpop.f32.mrb[14].mxu0  ;;  %2986 = vmatprep.mubr.bf16.mxu0 %v1329_v4  ;;  %3438 = vmatprep.mubr.bf16.mxu1 %v1329_v4  ;;  %v909_v6 = vpop.f32.mrb[12].mxu1 }
 0x1b0   :  { %v801_v16 = vadd.f32 %v800_v15, %v6253_v38  ;;  %v802_v18 = vpop.f32.mrb[15].mxu0  ;;  %2987 = vmatmul.mubr.bf16.gmra.mrb[72].mxu0 %v1328_v0  ;;  %3439 = vmatmul.mubr.bf16.gmra.mrb[72].mxu1 %v1328_v0  ;;  %v1232_v32 = vmax.f32 %v797_v9, 0.0  ;;  %v1227_v61 = vmax.f32 %v906_v51, 0.0  ;;  %v910_v9 = vadd.f32 %v909_v6, %v6269_v47  ;;  %v911_v10 = vpop.f32.mrb[13].mxu1 }
 0x1b1   :  { %v803_v24 = vadd.f32 %v802_v18, %v6258_v31  ;;  %3056 = vmatpush1.bf16.msra.mxu0 %v5438_v26  ;;  %3508 = vmatpush1.bf16.msra.mxu1 %v5441_v7  ;;  %v1233_v40 = vmax.f32 %v799_v50, 0.0  ;;  %v5459_v7 = vld [vmem:[#allocation9 + $0x2e8] ss:$16 sps:$4 sm:$0xff]   ;;  %v912_v50 = vadd.f32 %v911_v10, %v6275_v62  ;;  %v913_v15 = vpop.f32.mrb[14].mxu1 }
 0x1b2   :  { %v1240_v33 = vmax.f32 %v801_v16, 0.0  ;;  %3057 = vmatprep.subr.bf16.mxu0 %v5446_v11  ;;  %3509 = vmatprep.subr.bf16.mxu1 %v5449_v13  ;;  %v6313_v4 = vpack.c.bf16 %v1227_v61, %v1219_v21  ;;  %v914_v22 = vadd.f32 %v913_v15, %v6269_v47  ;;  %v5477_v15 = vld [vmem:[#allocation9 + $0x348] ss:$16 sps:$4 sm:$0xff]  }
 0x1b3   :  { %v1241_v41 = vmax.f32 %v803_v24, 0.0  ;;  %v915_v24 = vpop.f32.mrb[15].mxu1 }
 0x1b4   :  { %v1336_v49 = vpack.c.bf16 %v1240_v33, %v1232_v32  ;;  %v916_v28 = vadd.f32 %v915_v24, %v6275_v62  ;;  %v5462_v33 = vld [vmem:[#allocation9 + $0x300] ss:$16 sps:$4 sm:$0xff]   ;;  %v1242_v34 = vmax.f32 %v914_v22, 0.0  ;;  %v5482_v22 = vld [vmem:[#allocation9 + $0x364] ss:$16 sps:$4 sm:$0xff]  }
 0x1b5   :  { %v1337_v52 = vpack.c.bf16 %v1241_v41, %v1233_v40  ;;  %3058 = vmatpush1.bf16.msra.mxu0 %v5444_v19  ;;  %v806_v53 = vpop.f32.mrb[16].mxu0  ;;  %3510 = vmatpush1.bf16.msra.mxu1 %v5447_v8  ;;  %v1234_v19 = vmax.f32 %v910_v9, 0.0  ;;  %v5470_v41 = vld [vmem:[#allocation9 + $0x324] ss:$16 sps:$4 sm:$0xff]   ;;  %v5485_v24 = vld [vmem:[#allocation9 + $0x36c] ss:$16 sps:$4 sm:$0xff]  }
 0x1b6   :  { %v807_v57 = vadd.f32 %v806_v53, %v6253_v38  ;;  %v808_v58 = vpop.f32.mrb[17].mxu0  ;;  %3059 = vmatprep.subr.bf16.mxu0 %v5452_v12  ;;  %3511 = vmatprep.subr.bf16.mxu1 %v5455_v23  ;;  %v1235_v12 = vmax.f32 %v912_v50, 0.0  ;;  %v5465_v23 = vld [vmem:[#allocation9 + $0x308] ss:$16 sps:$4 sm:$0xff]   ;;  %v1243_v17 = vmax.f32 %v916_v28, 0.0 }
 0x1b7   :  { %v809_v1 = vadd.f32 %v808_v58, %v6258_v31  ;;  %v810_v63 = vpop.f32.mrb[18].mxu0  ;;  %2996 = vmatprep.mubr.bf16.mxu0 %v1337_v52  ;;  %3448 = vmatprep.mubr.bf16.mxu1 %v1337_v52  ;;  %v6322_v21 = vpack.c.bf16 %v1242_v34, %v1234_v19  ;;  %v5468_v53 = vld [vmem:[#allocation9 + $0x320] ss:$16 sps:$4 sm:$0xff]   ;;  %v5476_v58 = vld [vmem:[#allocation9 + $0x344] ss:$16 sps:$4 sm:$0xff]  }
 0x1b8   :  { %v811_v0 = vadd.f32 %v810_v63, %v6253_v38  ;;  %v812_v2 = vpop.f32.mrb[19].mxu0  ;;  %2997 = vmatmul.mubr.bf16.gmra.mrb[76].mxu0 %v1336_v49  ;;  %3449 = vmatmul.mubr.bf16.gmra.mrb[76].mxu1 %v1336_v49  ;;  %v1248_v11 = vmax.f32 %v807_v57, 0.0  ;;  %v5471_v57 = vld [vmem:[#allocation9 + $0x328] ss:$16 sps:$4 sm:$0xff]   ;;  %v5479_v63 = vld [vmem:[#allocation9 + $0x34c] ss:$16 sps:$4 sm:$0xff]  }
 0x1b9   :  { %v813_v26 = vadd.f32 %v812_v2, %v6258_v31  ;;  %3060 = vmatpush1.bf16.msra.mxu0 %v5450_v55  ;;  %3512 = vmatpush1.bf16.msra.mxu1 %v5453_v56  ;;  %v1249_v16 = vmax.f32 %v809_v1, 0.0  ;;  %v6325_v55 = vpack.c.bf16 %v1243_v17, %v1235_v12  ;;  %v919_v56 = vpop.f32.mrb[16].mxu1  ;;  %v5474_v50 = vld [vmem:[#allocation9 + $0x340] ss:$16 sps:$4 sm:$0xff]  }
 0x1ba   :  { %v1256_v13 = vmax.f32 %v811_v0, 0.0  ;;  %3061 = vmatprep.subr.bf16.mxu0 %v5458_v59  ;;  %3513 = vmatprep.subr.bf16.mxu1 %v5461_v60  ;;  %v920_v59 = vadd.f32 %v919_v56, %v6269_v47  ;;  %v921_v60 = vpop.f32.mrb[17].mxu1 }
 0x1bb   :  { %v1257_v18 = vmax.f32 %v813_v26, 0.0  ;;  %v922_v0 = vadd.f32 %v921_v60, %v6275_v62  ;;  %v923_v2 = vpop.f32.mrb[18].mxu1 }
 0x1bc   :  { %v1344_v8 = vpack.c.bf16 %v1256_v13, %v1248_v11  ;;  %v1250_v26 = vmax.f32 %v920_v59, 0.0 }
 0x1bd   :  { %v1345_v29 = vpack.c.bf16 %v1257_v18, %v1249_v16  ;;  %3062 = vmatpush1.bf16.msra.mxu0 %v5456_v3  ;;  %v816_v32 = vpop.f32.mrb[20].mxu0  ;;  %3514 = vmatpush1.bf16.msra.mxu1 %v5459_v7  ;;  %v924_v7 = vadd.f32 %v923_v2, %v6269_v47  ;;  %v1251_v10 = vmax.f32 %v922_v0, 0.0 }
 0x1be   :  { %v817_v39 = vadd.f32 %v816_v32, %v6253_v38  ;;  %v818_v40 = vpop.f32.mrb[21].mxu0  ;;  %3063 = vmatprep.subr.bf16.mxu0 %v5464_v30  ;;  %3515 = vmatprep.subr.bf16.mxu1 %v5467_v14  ;;  %v925_v30 = vpop.f32.mrb[19].mxu1 }
 0x1bf   :  { %v819_v45 = vadd.f32 %v818_v40, %v6258_v31  ;;  %v820_v49 = vpop.f32.mrb[22].mxu0  ;;  %3006 = vmatprep.mubr.bf16.mxu0 %v1345_v29  ;;  %3458 = vmatprep.mubr.bf16.mxu1 %v1345_v29  ;;  %v926_v11 = vadd.f32 %v925_v30, %v6275_v62  ;;  %v1258_v16 = vmax.f32 %v924_v7, 0.0  ;;  %v285_v30 = vsub.s32 4, %v6243_v35 }
 0x1c0   :  { %v821_v51 = vadd.f32 %v820_v49, %v6253_v38  ;;  %v822_v52 = vpop.f32.mrb[23].mxu0  ;;  %3007 = vmatmul.mubr.bf16.gmra.mrb[80].mxu0 %v1344_v8  ;;  %3459 = vmatmul.mubr.bf16.gmra.mrb[80].mxu1 %v1344_v8  ;;  %v1264_v61 = vmax.f32 %v817_v39, 0.0  ;;  %v929_v39 = vpop.f32.mrb[20].mxu1 }
 0x1c1   :  { %v823_v43 = vadd.f32 %v822_v52, %v6258_v31  ;;  %3064 = vmatpush1.bf16.msra.mxu0 %v5462_v33  ;;  %3516 = vmatpush1.bf16.msra.mxu1 %v5465_v23  ;;  %v1265_v3 = vmax.f32 %v819_v45, 0.0  ;;  %v1259_v8 = vmax.f32 %v926_v11, 0.0  ;;  %v6334_v29 = vpack.c.bf16 %v1258_v16, %v1250_v26  ;;  %v5480_v23 = vld [vmem:[#allocation9 + $0x360] ss:$16 sps:$4 sm:$0xff]   ;;  %v931_v45 = vpop.f32.mrb[21].mxu1 }
 0x1c2   :  { %v1272_v1 = vmax.f32 %v821_v51, 0.0  ;;  %3065 = vmatprep.subr.bf16.mxu0 %v5470_v41  ;;  %3517 = vmatprep.subr.bf16.mxu1 %v5473_v44  ;;  %v5483_v41 = vld [vmem:[#allocation9 + $0x368] ss:$16 sps:$4 sm:$0xff]   ;;  %v5488_v44 = vld [vmem:[#allocation9 + $0x384] ss:$16 sps:$4 sm:$0xff]   ;;  %v930_v17 = vadd.f32 %v929_v39, %v6269_v47  ;;  %v933_v56 = vpop.f32.mrb[22].mxu1  ;;  %v6356_v39 = vrot.slane %v6248_v36, %v285_v30 }
 0x1c3   :  { %v1273_v6 = vmax.f32 %v823_v43, 0.0  ;;  %v6337_v34 = vpack.c.bf16 %v1259_v8, %v1251_v10  ;;  %v5491_v52 = vld [vmem:[#allocation9 + $0x38c] ss:$16 sps:$4 sm:$0xff]   ;;  %v934_v59 = vadd.f32 %v933_v56, %v6269_v47  ;;  %v935_v60 = vpop.f32.mrb[23].mxu1  ;;  %v5494_v26 = vld [vmem:[#allocation9 + $0x3a4] ss:$16 sps:$4 sm:$0xff]  }
 0x1c4   :  { %v1352_v9 = vpack.c.bf16 %v1272_v1, %v1264_v61  ;;  %v5486_v1 = vld [vmem:[#allocation9 + $0x380] ss:$16 sps:$4 sm:$0xff]   ;;  %v936_v2 = vadd.f32 %v935_v60, %v6275_v62  ;;  %v5497_v11 = vld [vmem:[#allocation9 + $0x3ac] ss:$16 sps:$4 sm:$0xff]   ;;  %v5501_v60 = vld [vmem:[#allocation9 + $0x3c8] ss:$16 sps:$4 sm:$0xff]  }
 0x1c5   :  { %v1353_v13 = vpack.c.bf16 %v1273_v6, %v1265_v3  ;;  %3066 = vmatpush1.bf16.msra.mxu0 %v5468_v53  ;;  %v826_v14 = vpop.f32.mrb[24].mxu0  ;;  %3518 = vmatpush1.bf16.msra.mxu1 %v5471_v57  ;;  %v932_v53 = vadd.f32 %v931_v45, %v6275_v62  ;;  %v1274_v7 = vmax.f32 %v934_v59, 0.0  ;;  %v5498_v59 = vld [vmem:[#allocation9 + $0x3c0] ss:$16 sps:$4 sm:$0xff]  }
 0x1c6   :  { %v827_v18 = vadd.f32 %v826_v14, %v6253_v38  ;;  %v828_v19 = vpop.f32.mrb[25].mxu0  ;;  %3067 = vmatprep.subr.bf16.mxu0 %v5476_v58  ;;  %3519 = vmatprep.subr.bf16.mxu1 %v5479_v63  ;;  %v1266_v58 = vmax.f32 %v930_v17, 0.0  ;;  %v5489_v63 = vld [vmem:[#allocation9 + $0x388] ss:$16 sps:$4 sm:$0xff]   ;;  %v289_v14 = vsub.s32 5, %v6243_v35 }
 0x1c7   :  { %v829_v12 = vadd.f32 %v828_v19, %v6258_v31  ;;  %v830_v28 = vpop.f32.mrb[26].mxu0  ;;  %3016 = vmatprep.mubr.bf16.mxu0 %v1353_v13  ;;  %3468 = vmatprep.mubr.bf16.mxu1 %v1353_v13  ;;  %v1267_v0 = vmax.f32 %v932_v53, 0.0  ;;  %v1275_v13 = vmax.f32 %v936_v2, 0.0  ;;  %v939_v8 = vpop.f32.mrb[24].mxu1 }
 0x1c8   :  { %v831_v32 = vadd.f32 %v830_v28, %v6253_v38  ;;  %v832_v33 = vpop.f32.mrb[27].mxu0  ;;  %3017 = vmatmul.mubr.bf16.gmra.mrb[84].mxu0 %v1352_v9  ;;  %3469 = vmatmul.mubr.bf16.gmra.mrb[84].mxu1 %v1352_v9  ;;  %v1280_v49 = vmax.f32 %v827_v18, 0.0  ;;  %v6348_v16 = vpack.c.bf16 %v1274_v7, %v1266_v58  ;;  %v5495_v28 = vld [vmem:[#allocation9 + $0x3a8] ss:$16 sps:$4 sm:$0xff]  }
 0x1c9   :  { %v833_v40 = vadd.f32 %v832_v33, %v6258_v31  ;;  %3068 = vmatpush1.bf16.msra.mxu0 %v5474_v50  ;;  %3520 = vmatpush1.bf16.msra.mxu1 %v5477_v15  ;;  %v1281_v43 = vmax.f32 %v829_v12, 0.0  ;;  %v940_v33 = vadd.f32 %v939_v8, %v6269_v47 }
 0x1ca   :  { %v1288_v51 = vmax.f32 %v831_v32, 0.0  ;;  %3069 = vmatprep.subr.bf16.mxu0 %v5482_v22  ;;  %3521 = vmatprep.subr.bf16.mxu1 %v5485_v24  ;;  %v5492_v22 = vld [vmem:[#allocation9 + $0x3a0] ss:$16 sps:$4 sm:$0xff]   ;;  %v6351_v24 = vpack.c.bf16 %v1275_v13, %v1267_v0  ;;  %v5500_v32 = vld [vmem:[#allocation9 + $0x3c4] ss:$16 sps:$4 sm:$0xff]  }
 0x1cb   :  { %v1289_v57 = vmax.f32 %v833_v40, 0.0 }
 0x1cc   :  { %v1360_v61 = vpack.c.bf16 %v1288_v51, %v1280_v49  ;;  %v1282_v51 = vmax.f32 %v940_v33, 0.0 }
 0x1cd   :  { %v1361_v3 = vpack.c.bf16 %v1289_v57, %v1281_v43  ;;  %3070 = vmatpush1.bf16.msra.mxu0 %v5480_v23  ;;  %v836_v6 = vpop.f32.mrb[28].mxu0  ;;  %3522 = vmatpush1.bf16.msra.mxu1 %v5483_v41  ;;  %v941_v23 = vpop.f32.mrb[25].mxu1  ;;  %v5503_v41 = vld [vmem:[#allocation9 + $0x3cc] ss:$16 sps:$4 sm:$0xff]  }
 0x1ce   :  { %v837_v9 = vadd.f32 %v836_v6, %v6253_v38  ;;  %v838_v10 = vpop.f32.mrb[29].mxu0  ;;  %3071 = vmatprep.subr.bf16.mxu0 %v5488_v44  ;;  %3523 = vmatprep.subr.bf16.mxu1 %v5491_v52  ;;  %v942_v44 = vadd.f32 %v941_v23, %v6275_v62  ;;  %v943_v17 = vpop.f32.mrb[26].mxu1  ;;  %v5504_v6 = vld [vmem:[#allocation9 + $0x3e0] ss:$16 sps:$4 sm:$0xff]  }
 0x1cf   :  { %v839_v50 = vadd.f32 %v838_v10, %v6258_v31  ;;  %v840_v15 = vpop.f32.mrb[30].mxu0  ;;  %3026 = vmatprep.mubr.bf16.mxu0 %v1361_v3  ;;  %3478 = vmatprep.mubr.bf16.mxu1 %v1361_v3  ;;  %v944_v52 = vadd.f32 %v943_v17, %v6269_v47  ;;  %v945_v53 = vpop.f32.mrb[27].mxu1  ;;  %v5507_v10 = vld [vmem:[#allocation9 + $0x3e8] ss:$16 sps:$4 sm:$0xff]  }
 0x1d0   :  { %v841_v18 = vadd.f32 %v840_v15, %v6253_v38  ;;  %v842_v19 = vpop.f32.mrb[31].mxu0  ;;  %3027 = vmatmul.mubr.bf16.gmra.mrb[88].mxu0 %v1360_v61  ;;  %3479 = vmatmul.mubr.bf16.gmra.mrb[88].mxu1 %v1360_v61  ;;  %v1296_v38 = vmax.f32 %v837_v9, 0.0  ;;  %v1283_v43 = vmax.f32 %v942_v44, 0.0  ;;  %v946_v57 = vadd.f32 %v945_v53, %v6275_v62  ;;  %v949_v13 = vpop.f32.mrb[28].mxu1  ;;  %v5510_v53 = vld [vmem:[#allocation9 + $0x400] ss:$16 sps:$4 sm:$0xff]  }
 0x1d1   :  { %v843_v12 = vadd.f32 %v842_v19, %v6258_v31  ;;  %3072 = vmatpush1.bf16.msra.mxu0 %v5486_v1  ;;  %3524 = vmatpush1.bf16.msra.mxu1 %v5489_v63  ;;  %v6360_v31 = vrot.slane %v6248_v36, %v289_v14  ;;  %v1297_v45 = vmax.f32 %v839_v50, 0.0  ;;  %v1290_v61 = vmax.f32 %v944_v52, 0.0  ;;  %v5506_v63 = vld [vmem:[#allocation9 + $0x3e4] ss:$16 sps:$4 sm:$0xff]  }
 0x1d2   :  { %v1304_v40 = vmax.f32 %v841_v18, 0.0  ;;  %3073 = vmatprep.subr.bf16.mxu0 %v5494_v26  ;;  %3525 = vmatprep.subr.bf16.mxu1 %v5497_v11  ;;  %v1291_v0 = vmax.f32 %v946_v57, 0.0  ;;  %v5509_v26 = vld [vmem:[#allocation9 + $0x3ec] ss:$16 sps:$4 sm:$0xff]   ;;  %v5512_v18 = vld [vmem:[#allocation9 + $0x404] ss:$16 sps:$4 sm:$0xff]   ;;  %v950_v19 = vadd.f32 %v949_v13, %v6269_v47 }
 0x1d3   :  { %v1305_v49 = vmax.f32 %v843_v12, 0.0  ;;  %v6365_v7 = vpack.c.bf16 %v1290_v61, %v1282_v51 }
 0x1d4   :  { %v1368_v56 = vpack.c.bf16 %v1304_v40, %v1296_v38  ;;  %v6368_v11 = vpack.c.bf16 %v1291_v0, %v1283_v43  ;;  %v297_v40 = vsub.s32 7, %v6243_v35 }
 0x1d5   :  { %v1369_v58 = vpack.c.bf16 %v1305_v49, %v1297_v45  ;;  %3074 = vmatpush1.bf16.msra.mxu0 %v5492_v22  ;;  %3526 = vmatpush1.bf16.msra.mxu1 %v5495_v28  ;;  %v992_v1 = vpop.f32.mrb[32].mxu0  ;;  %v951_v22 = vpop.f32.mrb[29].mxu1  ;;  %v293_v28 = vsub.s32 6, %v6243_v35 }
 0x1d6   :  { %3075 = vmatprep.subr.bf16.mxu0 %v5500_v32  ;;  %3527 = vmatprep.subr.bf16.mxu1 %v5503_v41  ;;  %v993_v2 = vadd.f32 %v992_v1, %v6356_v39  ;;  %v994_v3 = vpop.f32.mrb[33].mxu0  ;;  %v5515_v32 = vld [vmem:[#allocation9 + $0x40c] ss:$16 sps:$4 sm:$0xff]   ;;  %v952_v33 = vadd.f32 %v951_v22, %v6275_v62  ;;  %v953_v23 = vpop.f32.mrb[30].mxu1  ;;  %v1298_v41 = vmax.f32 %v950_v19, 0.0  ;;  %v6389_v61 = vrot.slane %v6248_v36, %v297_v40 }
 0x1d7   :  { %3036 = vmatprep.mubr.bf16.mxu0 %v1369_v58  ;;  %3488 = vmatprep.mubr.bf16.mxu1 %v1369_v58  ;;  %v995_v30 = vadd.f32 %v994_v3, %v6360_v31  ;;  %v996_v9 = vpop.f32.mrb[34].mxu0  ;;  %v954_v44 = vadd.f32 %v953_v23, %v6269_v47  ;;  %v955_v17 = vpop.f32.mrb[31].mxu1  ;;  %v5518_v47 = vld [vmem:[#allocation9 + $0x424] ss:$16 sps:$4 sm:$0xff]   ;;  %v5521_v1 = vld [vmem:[#allocation9 + $0x42c] ss:$16 sps:$4 sm:$0xff]  }
 0x1d8   :  { %3037 = vmatmul.mubr.bf16.gmra.mrb[92].mxu0 %v1368_v56  ;;  %3489 = vmatmul.mubr.bf16.gmra.mrb[92].mxu1 %v1368_v56  ;;  %v1188_v14 = vmax.f32 %v993_v2, 0.0  ;;  %v997_v50 = vadd.f32 %v996_v9, %v6356_v39  ;;  %v998_v15 = vpop.f32.mrb[35].mxu0  ;;  %v1299_v49 = vmax.f32 %v952_v33, 0.0  ;;  %v956_v51 = vadd.f32 %v955_v17, %v6275_v62  ;;  %v5513_v56 = vld [vmem:[#allocation9 + $0x408] ss:$16 sps:$4 sm:$0xff]   ;;  %v1105_v9 = vpop.f32.mrb[32].mxu1 }
 0x1d9   :  { %3076 = vmatpush1.bf16.msra.mxu0 %v5498_v59  ;;  %3528 = vmatpush1.bf16.msra.mxu1 %v5501_v60  ;;  %v1189_v8 = vmax.f32 %v995_v30, 0.0  ;;  %v999_v12 = vadd.f32 %v998_v15, %v6360_v31  ;;  %v1306_v43 = vmax.f32 %v954_v44, 0.0  ;;  %v1107_v15 = vpop.f32.mrb[33].mxu1  ;;  %v5525_v44 = vld [vmem:[#allocation9 + $0x448] ss:$16 sps:$4 sm:$0xff]  }
 0x1da   :  { %3077 = vmatprep.subr.bf16.mxu0 %v5506_v63  ;;  %3079 = vmatprep.mubr.bf16.mxu0 %v6289_v46  ;;  %v1196_v38 = vmax.f32 %v997_v50, 0.0  ;;  %v1307_v59 = vmax.f32 %v956_v51, 0.0  ;;  %v1108_v22 = vadd.f32 %v1107_v15, %v6389_v61 }
 0x1db   :  { %3529 = vmatprep.subr.bf16.mxu1 %v5509_v26  ;;  %3531 = vmatprep.mubr.bf16.mxu1 %v6289_v46  ;;  %v1197_v45 = vmax.f32 %v999_v12, 0.0  ;;  %v6385_v46 = vrot.slane %v6248_v36, %v293_v28  ;;  %v6391_v63 = vpack.c.bf16 %v1306_v43, %v1298_v41  ;;  %v5516_v36 = vld [vmem:[#allocation9 + $0x420] ss:$16 sps:$4 sm:$0xff]   ;;  %v5533_v43 = vld [vmem:[#allocation9 + $0x46c] ss:$16 sps:$4 sm:$0xff]  }
 0x1dc   :  { %v6380_v52 = vpack.c.bf16 %v1196_v38, %v1188_v14  ;;  %v6396_v3 = vpack.c.bf16 %v1307_v59, %v1299_v49  ;;  %v1191_v38 = vmax.f32 %v1108_v22, 0.0  ;;  %v5522_v41 = vld [vmem:[#allocation9 + $0x440] ss:$16 sps:$4 sm:$0xff]  }
 0x1dd   :  { %3078 = vmatpush1.bf16.msra.mxu0 %v5504_v6  ;;  %3530 = vmatpush1.bf16.msra.mxu1 %v5507_v10  ;;  %v6382_v57 = vpack.c.bf16 %v1197_v45, %v1189_v8  ;;  %v1002_v58 = vpop.f32.mrb[36].mxu0  ;;  %v5519_v10 = vld [vmem:[#allocation9 + $0x428] ss:$16 sps:$4 sm:$0xff]   ;;  %v1106_v50 = vadd.f32 %v1105_v9, %v6385_v46  ;;  %v1109_v8 = vpop.f32.mrb[34].mxu1 }
 0x1de   :  { %3160 = vmatprep.subr.bf16.mxu0 %v5512_v18  ;;  %3612 = vmatprep.subr.bf16.mxu1 %v5515_v32  ;;  %v1003_v60 = vadd.f32 %v1002_v58, %v6356_v39  ;;  %v1004_v62 = vpop.f32.mrb[37].mxu0  ;;  %v5527_v18 = vld [vmem:[#allocation9 + $0x44c] ss:$16 sps:$4 sm:$0xff]   ;;  %v1110_v32 = vadd.f32 %v1109_v8, %v6385_v46  ;;  %v1111_v33 = vpop.f32.mrb[35].mxu1 }
 0x1df   :  { %v1005_v0 = vadd.f32 %v1004_v62, %v6360_v31  ;;  %v1006_v2 = vpop.f32.mrb[38].mxu0  ;;  %v1190_v28 = vmax.f32 %v1106_v50, 0.0  ;;  %v1112_v40 = vadd.f32 %v1111_v33, %v6389_v61  ;;  %v5537_v33 = vld [vmem:[#allocation9 + $0x488] ss:$16 sps:$4 sm:$0xff]  }
 0x1e0   :  { %3080 = vmatmul.mubr.bf16.vlgmr.msra.gmra.mrb[64].mxu0 %v6286_v42  ;;  %3532 = vmatmul.mubr.bf16.vlgmr.msra.gmra.mrb[64].mxu1 %v6286_v42  ;;  %v1204_v6 = vmax.f32 %v1003_v60, 0.0  ;;  %v1007_v26 = vadd.f32 %v1006_v2, %v6356_v39  ;;  %v1008_v30 = vpop.f32.mrb[39].mxu0  ;;  %v5524_v42 = vld [vmem:[#allocation9 + $0x444] ss:$16 sps:$4 sm:$0xff]   ;;  %v1198_v49 = vmax.f32 %v1110_v32, 0.0  ;;  %v1115_v2 = vpop.f32.mrb[36].mxu1 }
 0x1e1   :  { %3161 = vmatpush1.bf16.msra.mxu0 %v5510_v53  ;;  %3613 = vmatpush1.bf16.msra.mxu1 %v5513_v56  ;;  %v1205_v13 = vmax.f32 %v1005_v0, 0.0  ;;  %v1009_v14 = vadd.f32 %v1008_v30, %v6360_v31  ;;  %v1199_v56 = vmax.f32 %v1112_v40, 0.0  ;;  %v5534_v32 = vld [vmem:[#allocation9 + $0x480] ss:$16 sps:$4 sm:$0xff]  }
 0x1e2   :  { %3162 = vmatprep.subr.bf16.mxu0 %v5518_v47  ;;  %3089 = vmatprep.mubr.bf16.mxu0 %v6301_v20  ;;  %v1212_v19 = vmax.f32 %v1007_v26, 0.0  ;;  %v6412_v59 = vpack.c.bf16 %v1198_v49, %v1190_v28  ;;  %v5531_v26 = vld [vmem:[#allocation9 + $0x468] ss:$16 sps:$4 sm:$0xff]  }
 0x1e3   :  { %3541 = vmatprep.mubr.bf16.mxu1 %v6301_v20  ;;  %3614 = vmatprep.subr.bf16.mxu1 %v5521_v1  ;;  %v1213_v12 = vmax.f32 %v1009_v14, 0.0  ;;  %v5530_v20 = vld [vmem:[#allocation9 + $0x464] ss:$16 sps:$4 sm:$0xff]   ;;  %v6417_v0 = vpack.c.bf16 %v1199_v56, %v1191_v38 }
 0x1e4   :  { %v6405_v23 = vpack.c.bf16 %v1212_v19, %v1204_v6  ;;  %v5528_v6 = vld [vmem:[#allocation9 + $0x460] ss:$16 sps:$4 sm:$0xff]  }
 0x1e5   :  { %3163 = vmatpush1.bf16.msra.mxu0 %v5516_v36  ;;  %3615 = vmatpush1.bf16.msra.mxu1 %v5519_v10  ;;  %v6408_v17 = vpack.c.bf16 %v1213_v12, %v1205_v13  ;;  %v1012_v45 = vpop.f32.mrb[40].mxu0  ;;  %v1116_v36 = vadd.f32 %v1115_v2, %v6385_v46  ;;  %v1117_v10 = vpop.f32.mrb[37].mxu1  ;;  %v5539_v13 = vld [vmem:[#allocation9 + $0x48c] ss:$16 sps:$4 sm:$0xff]   ;;  %v5543_v2 = vld [vmem:[#allocation9 + $0x4a8] ss:$16 sps:$4 sm:$0xff]  }
 0x1e6   :  { %3164 = vmatprep.subr.bf16.mxu0 %v5524_v42  ;;  %3616 = vmatprep.subr.bf16.mxu1 %v5527_v18  ;;  %v1013_v51 = vadd.f32 %v1012_v45, %v6356_v39  ;;  %v1014_v53 = vpop.f32.mrb[41].mxu0  ;;  %v1118_v50 = vadd.f32 %v1117_v10, %v6389_v61  ;;  %v1119_v15 = vpop.f32.mrb[38].mxu1 }
 0x1e7   :  { %v1015_v58 = vadd.f32 %v1014_v53, %v6360_v31  ;;  %v1016_v47 = vpop.f32.mrb[42].mxu0  ;;  %v1206_v18 = vmax.f32 %v1116_v36, 0.0  ;;  %v1120_v19 = vadd.f32 %v1119_v15, %v6385_v46  ;;  %v1121_v22 = vpop.f32.mrb[39].mxu1  ;;  %v5551_v36 = vld [vmem:[#allocation9 + $0x4cc] ss:$16 sps:$4 sm:$0xff]  }
 0x1e8   :  { %3090 = vmatmul.mubr.bf16.gmra.mrb[68].mxu0 %v6298_v54  ;;  %3542 = vmatmul.mubr.bf16.gmra.mrb[68].mxu1 %v6298_v54  ;;  %v1220_v60 = vmax.f32 %v1013_v51, 0.0  ;;  %v1017_v62 = vadd.f32 %v1016_v47, %v6356_v39  ;;  %v1018_v1 = vpop.f32.mrb[43].mxu0  ;;  %v5536_v54 = vld [vmem:[#allocation9 + $0x484] ss:$16 sps:$4 sm:$0xff]   ;;  %v1207_v12 = vmax.f32 %v1118_v50, 0.0  ;;  %v1122_v28 = vadd.f32 %v1121_v22, %v6389_v61 }
 0x1e9   :  { %3165 = vmatpush1.bf16.msra.mxu0 %v5522_v41  ;;  %3617 = vmatpush1.bf16.msra.mxu1 %v5525_v44  ;;  %v1221_v30 = vmax.f32 %v1015_v58, 0.0  ;;  %v1019_v9 = vadd.f32 %v1018_v1, %v6360_v31  ;;  %v1214_v41 = vmax.f32 %v1120_v19, 0.0  ;;  %v5540_v1 = vld [vmem:[#allocation9 + $0x4a0] ss:$16 sps:$4 sm:$0xff]  }
 0x1ea   :  { %3166 = vmatprep.subr.bf16.mxu0 %v5530_v20  ;;  %3099 = vmatprep.mubr.bf16.mxu0 %v6313_v4  ;;  %v1228_v14 = vmax.f32 %v1017_v62, 0.0  ;;  %v1215_v49 = vmax.f32 %v1122_v28, 0.0  ;;  %v5545_v20 = vld [vmem:[#allocation9 + $0x4ac] ss:$16 sps:$4 sm:$0xff]   ;;  %v1125_v62 = vpop.f32.mrb[40].mxu1 }
 0x1eb   :  { %3551 = vmatprep.mubr.bf16.mxu1 %v6313_v4  ;;  %3618 = vmatprep.subr.bf16.mxu1 %v5533_v43  ;;  %v1229_v42 = vmax.f32 %v1019_v9, 0.0  ;;  %v5542_v4 = vld [vmem:[#allocation9 + $0x4a4] ss:$16 sps:$4 sm:$0xff]   ;;  %v6432_v56 = vpack.c.bf16 %v1214_v41, %v1206_v18  ;;  %v1127_v9 = vpop.f32.mrb[41].mxu1  ;;  %v5549_v28 = vld [vmem:[#allocation9 + $0x4c8] ss:$16 sps:$4 sm:$0xff]  }
 0x1ec   :  { %v6425_v8 = vpack.c.bf16 %v1228_v14, %v1220_v60  ;;  %v6437_v60 = vpack.c.bf16 %v1215_v49, %v1207_v12  ;;  %v5546_v12 = vld [vmem:[#allocation9 + $0x4c0] ss:$16 sps:$4 sm:$0xff]  }
 0x1ed   :  { %3167 = vmatpush1.bf16.msra.mxu0 %v5528_v6  ;;  %3619 = vmatpush1.bf16.msra.mxu1 %v5531_v26  ;;  %v6428_v38 = vpack.c.bf16 %v1229_v42, %v1221_v30  ;;  %v1022_v40 = vpop.f32.mrb[44].mxu0  ;;  %v1126_v30 = vadd.f32 %v1125_v62, %v6385_v46 }
 0x1ee   :  { %3168 = vmatprep.subr.bf16.mxu0 %v5536_v54  ;;  %3620 = vmatprep.subr.bf16.mxu1 %v5539_v13  ;;  %v1023_v44 = vadd.f32 %v1022_v40, %v6356_v39  ;;  %v1024_v45 = vpop.f32.mrb[45].mxu0  ;;  %v1128_v54 = vadd.f32 %v1127_v9, %v6389_v61  ;;  %v1129_v13 = vpop.f32.mrb[42].mxu1 }
 0x1ef   :  { %v1025_v51 = vadd.f32 %v1024_v45, %v6360_v31  ;;  %v1026_v53 = vpop.f32.mrb[46].mxu0  ;;  %v1222_v50 = vmax.f32 %v1126_v30, 0.0  ;;  %v1130_v15 = vadd.f32 %v1129_v13, %v6385_v46  ;;  %v1131_v42 = vpop.f32.mrb[43].mxu1  ;;  %v5557_v45 = vld [vmem:[#allocation9 + $0x4ec] ss:$16 sps:$4 sm:$0xff]  }
 0x1f0   :  { %3100 = vmatmul.mubr.bf16.gmra.mrb[72].mxu0 %v6310_v5  ;;  %3552 = vmatmul.mubr.bf16.gmra.mrb[72].mxu1 %v6310_v5  ;;  %v1236_v43 = vmax.f32 %v1023_v44, 0.0  ;;  %v1027_v58 = vadd.f32 %v1026_v53, %v6356_v39  ;;  %v1028_v47 = vpop.f32.mrb[47].mxu0  ;;  %v5548_v5 = vld [vmem:[#allocation9 + $0x4c4] ss:$16 sps:$4 sm:$0xff]   ;;  %v1223_v19 = vmax.f32 %v1128_v54, 0.0  ;;  %v1132_v22 = vadd.f32 %v1131_v42, %v6389_v61  ;;  %v1135_v62 = vpop.f32.mrb[44].mxu1 }
 0x1f1   :  { %3169 = vmatpush1.bf16.msra.mxu0 %v5534_v32  ;;  %3621 = vmatpush1.bf16.msra.mxu1 %v5537_v33  ;;  %v1237_v6 = vmax.f32 %v1025_v51, 0.0  ;;  %v1029_v26 = vadd.f32 %v1028_v47, %v6360_v31  ;;  %v1230_v40 = vmax.f32 %v1130_v15, 0.0  ;;  %v1136_v30 = vadd.f32 %v1135_v62, %v6385_v46  ;;  %v1137_v9 = vpop.f32.mrb[45].mxu1 }
 0x1f2   :  { %3170 = vmatprep.subr.bf16.mxu0 %v5542_v4  ;;  %3109 = vmatprep.mubr.bf16.mxu0 %v6325_v55  ;;  %v1244_v10 = vmax.f32 %v1027_v58, 0.0  ;;  %v1231_v44 = vmax.f32 %v1132_v22, 0.0  ;;  %v1139_v54 = vpop.f32.mrb[46].mxu1 }
 0x1f3   :  { %3561 = vmatprep.mubr.bf16.mxu1 %v6325_v55  ;;  %3622 = vmatprep.subr.bf16.mxu1 %v5545_v20  ;;  %v1245_v14 = vmax.f32 %v1029_v26, 0.0  ;;  %v5554_v55 = vld [vmem:[#allocation9 + $0x4e4] ss:$16 sps:$4 sm:$0xff]   ;;  %v6452_v51 = vpack.c.bf16 %v1230_v40, %v1222_v50  ;;  %v1140_v50 = vadd.f32 %v1139_v54, %v6385_v46  ;;  %v1141_v15 = vpop.f32.mrb[47].mxu1 }
 0x1f4   :  { %v6445_v18 = vpack.c.bf16 %v1244_v10, %v1236_v43  ;;  %v6457_v47 = vpack.c.bf16 %v1231_v44, %v1223_v19  ;;  %v1138_v10 = vadd.f32 %v1137_v9, %v6389_v61  ;;  %v1142_v22 = vadd.f32 %v1141_v15, %v6389_v61 }
 0x1f5   :  { %3171 = vmatpush1.bf16.msra.mxu0 %v5540_v1  ;;  %3623 = vmatpush1.bf16.msra.mxu1 %v5543_v2  ;;  %v6448_v32 = vpack.c.bf16 %v1245_v14, %v1237_v6  ;;  %v1032_v33 = vpop.f32.mrb[48].mxu0  ;;  %v5552_v1 = vld [vmem:[#allocation9 + $0x4e0] ss:$16 sps:$4 sm:$0xff]   ;;  %v5555_v2 = vld [vmem:[#allocation9 + $0x4e8] ss:$16 sps:$4 sm:$0xff]   ;;  %v1238_v14 = vmax.f32 %v1136_v30, 0.0 }
 0x1f6   :  { %3172 = vmatprep.subr.bf16.mxu0 %v5548_v5  ;;  %3624 = vmatprep.subr.bf16.mxu1 %v5551_v36  ;;  %v1033_v41 = vadd.f32 %v1032_v33, %v6356_v39  ;;  %v1034_v4 = vpop.f32.mrb[49].mxu0  ;;  %v5563_v5 = vld [vmem:[#allocation9 + $0x50c] ss:$16 sps:$4 sm:$0xff]   ;;  %v1239_v19 = vmax.f32 %v1138_v10, 0.0  ;;  %v1247_v44 = vmax.f32 %v1142_v22, 0.0 }
 0x1f7   :  { %v1035_v49 = vadd.f32 %v1034_v4, %v6360_v31  ;;  %v1036_v20 = vpop.f32.mrb[50].mxu0 }
 0x1f8   :  { %3110 = vmatmul.mubr.bf16.gmra.mrb[76].mxu0 %v6322_v21  ;;  %3562 = vmatmul.mubr.bf16.gmra.mrb[76].mxu1 %v6322_v21  ;;  %v1252_v53 = vmax.f32 %v1033_v41, 0.0  ;;  %v1037_v43 = vadd.f32 %v1036_v20, %v6356_v39  ;;  %v1038_v58 = vpop.f32.mrb[51].mxu0  ;;  %v5560_v21 = vld [vmem:[#allocation9 + $0x504] ss:$16 sps:$4 sm:$0xff]  }
 0x1f9   :  { %3173 = vmatpush1.bf16.msra.mxu0 %v5546_v12  ;;  %3625 = vmatpush1.bf16.msra.mxu1 %v5549_v28  ;;  %v1253_v6 = vmax.f32 %v1035_v49, 0.0  ;;  %v1039_v26 = vadd.f32 %v1038_v58, %v6360_v31  ;;  %v5558_v12 = vld [vmem:[#allocation9 + $0x500] ss:$16 sps:$4 sm:$0xff]   ;;  %v5561_v28 = vld [vmem:[#allocation9 + $0x508] ss:$16 sps:$4 sm:$0xff]  }
 0x1fa   :  { %3174 = vmatprep.subr.bf16.mxu0 %v5554_v55  ;;  %3119 = vmatprep.mubr.bf16.mxu0 %v6337_v34  ;;  %v1260_v36 = vmax.f32 %v1037_v43, 0.0  ;;  %v1246_v55 = vmax.f32 %v1140_v50, 0.0 }
 0x1fb   :  { %3571 = vmatprep.mubr.bf16.mxu1 %v6337_v34  ;;  %3626 = vmatprep.subr.bf16.mxu1 %v5557_v45  ;;  %v1261_v13 = vmax.f32 %v1039_v26, 0.0  ;;  %v5566_v34 = vld [vmem:[#allocation9 + $0x524] ss:$16 sps:$4 sm:$0xff]   ;;  %v5569_v45 = vld [vmem:[#allocation9 + $0x52c] ss:$16 sps:$4 sm:$0xff]  }
 0x1fc   :  { %v6465_v42 = vpack.c.bf16 %v1260_v36, %v1252_v53  ;;  %v6472_v53 = vpack.c.bf16 %v1246_v55, %v1238_v14  ;;  %v5567_v26 = vld [vmem:[#allocation9 + $0x528] ss:$16 sps:$4 sm:$0xff]   ;;  %v5575_v36 = vld [vmem:[#allocation9 + $0x54c] ss:$16 sps:$4 sm:$0xff]  }
 0x1fd   :  { %3175 = vmatpush1.bf16.msra.mxu0 %v5552_v1  ;;  %3627 = vmatpush1.bf16.msra.mxu1 %v5555_v2  ;;  %v6468_v33 = vpack.c.bf16 %v1261_v13, %v1253_v6  ;;  %v1042_v40 = vpop.f32.mrb[52].mxu0  ;;  %v6477_v1 = vpack.c.bf16 %v1247_v44, %v1239_v19  ;;  %v1145_v2 = vpop.f32.mrb[48].mxu1  ;;  %v5564_v6 = vld [vmem:[#allocation9 + $0x520] ss:$16 sps:$4 sm:$0xff]   ;;  %v5573_v55 = vld [vmem:[#allocation9 + $0x548] ss:$16 sps:$4 sm:$0xff]  }
 0x1fe   :  { %3176 = vmatprep.subr.bf16.mxu0 %v5560_v21  ;;  %3628 = vmatprep.subr.bf16.mxu1 %v5563_v5  ;;  %v1043_v41 = vadd.f32 %v1042_v40, %v6356_v39  ;;  %v1044_v4 = vpop.f32.mrb[53].mxu0  ;;  %v1146_v21 = vadd.f32 %v1145_v2, %v6385_v46  ;;  %v1147_v5 = vpop.f32.mrb[49].mxu1  ;;  %v5570_v40 = vld [vmem:[#allocation9 + $0x540] ss:$16 sps:$4 sm:$0xff]  }
 0x1ff   :  { %v1045_v49 = vadd.f32 %v1044_v4, %v6360_v31  ;;  %v1046_v20 = vpop.f32.mrb[54].mxu0  ;;  %v1148_v54 = vadd.f32 %v1147_v5, %v6389_v61  ;;  %v1149_v13 = vpop.f32.mrb[50].mxu1  ;;  %v5579_v5 = vld [vmem:[#allocation9 + $0x568] ss:$16 sps:$4 sm:$0xff]  }
 0x200   :  { %3120 = vmatmul.mubr.bf16.gmra.mrb[80].mxu0 %v6334_v29  ;;  %3572 = vmatmul.mubr.bf16.gmra.mrb[80].mxu1 %v6334_v29  ;;  %v1268_v43 = vmax.f32 %v1043_v41, 0.0  ;;  %v1047_v58 = vadd.f32 %v1046_v20, %v6356_v39  ;;  %v1048_v62 = vpop.f32.mrb[55].mxu0  ;;  %v5572_v29 = vld [vmem:[#allocation9 + $0x544] ss:$16 sps:$4 sm:$0xff]   ;;  %v1254_v50 = vmax.f32 %v1146_v21, 0.0  ;;  %v1150_v15 = vadd.f32 %v1149_v13, %v6385_v46  ;;  %v1151_v19 = vpop.f32.mrb[51].mxu1 }
 0x201   :  { %3177 = vmatpush1.bf16.msra.mxu0 %v5558_v12  ;;  %3629 = vmatpush1.bf16.msra.mxu1 %v5561_v28  ;;  %v1269_v30 = vmax.f32 %v1045_v49, 0.0  ;;  %v1049_v9 = vadd.f32 %v1048_v62, %v6360_v31  ;;  %v1255_v12 = vmax.f32 %v1148_v54, 0.0  ;;  %v1152_v28 = vadd.f32 %v1151_v19, %v6389_v61  ;;  %v5581_v20 = vld [vmem:[#allocation9 + $0x56c] ss:$16 sps:$4 sm:$0xff]   ;;  %v5576_v21 = vld [vmem:[#allocation9 + $0x560] ss:$16 sps:$4 sm:$0xff]  }
 0x202   :  { %3178 = vmatprep.subr.bf16.mxu0 %v5566_v34  ;;  %3129 = vmatprep.mubr.bf16.mxu0 %v6351_v24  ;;  %v1276_v10 = vmax.f32 %v1047_v58, 0.0  ;;  %v1262_v4 = vmax.f32 %v1150_v15, 0.0  ;;  %v5587_v13 = vld [vmem:[#allocation9 + $0x58c] ss:$16 sps:$4 sm:$0xff]  }
 0x203   :  { %3581 = vmatprep.mubr.bf16.mxu1 %v6351_v24  ;;  %3630 = vmatprep.subr.bf16.mxu1 %v5569_v45  ;;  %v1277_v14 = vmax.f32 %v1049_v9, 0.0  ;;  %v5578_v24 = vld [vmem:[#allocation9 + $0x564] ss:$16 sps:$4 sm:$0xff]   ;;  %v1263_v49 = vmax.f32 %v1152_v28, 0.0  ;;  %v1155_v9 = vpop.f32.mrb[52].mxu1 }
 0x204   :  { %v6485_v22 = vpack.c.bf16 %v1276_v10, %v1268_v43  ;;  %v6492_v62 = vpack.c.bf16 %v1262_v4, %v1254_v50  ;;  %v1156_v10 = vadd.f32 %v1155_v9, %v6385_v46  ;;  %v1157_v54 = vpop.f32.mrb[53].mxu1 }
 0x205   :  { %3179 = vmatpush1.bf16.msra.mxu0 %v5564_v6  ;;  %3631 = vmatpush1.bf16.msra.mxu1 %v5567_v26  ;;  %v6488_v34 = vpack.c.bf16 %v1277_v14, %v1269_v30  ;;  %v1052_v41 = vpop.f32.mrb[56].mxu0  ;;  %v6497_v30 = vpack.c.bf16 %v1263_v49, %v1255_v12  ;;  %v1158_v50 = vadd.f32 %v1157_v54, %v6389_v61  ;;  %v1159_v15 = vpop.f32.mrb[54].mxu1 }
 0x206   :  { %3180 = vmatprep.subr.bf16.mxu0 %v5572_v29  ;;  %3632 = vmatprep.subr.bf16.mxu1 %v5575_v36  ;;  %v1053_v44 = vadd.f32 %v1052_v41, %v6356_v39  ;;  %v1054_v45 = vpop.f32.mrb[57].mxu0  ;;  %v1270_v12 = vmax.f32 %v1156_v10, 0.0  ;;  %v1160_v28 = vadd.f32 %v1159_v15, %v6385_v46 }
 0x207   :  { %v1055_v43 = vadd.f32 %v1054_v45, %v6360_v31  ;;  %v1056_v58 = vpop.f32.mrb[58].mxu0  ;;  %v1271_v41 = vmax.f32 %v1158_v50, 0.0 }
 0x208   :  { %3130 = vmatmul.mubr.bf16.gmra.mrb[84].mxu0 %v6348_v16  ;;  %3582 = vmatmul.mubr.bf16.gmra.mrb[84].mxu1 %v6348_v16  ;;  %v1284_v2 = vmax.f32 %v1053_v44, 0.0  ;;  %v1057_v6 = vadd.f32 %v1056_v58, %v6356_v39  ;;  %v1058_v26 = vpop.f32.mrb[59].mxu0  ;;  %v5584_v16 = vld [vmem:[#allocation9 + $0x584] ss:$16 sps:$4 sm:$0xff]   ;;  %v5585_v44 = vld [vmem:[#allocation9 + $0x588] ss:$16 sps:$4 sm:$0xff]  }
 0x209   :  { %3181 = vmatpush1.bf16.msra.mxu0 %v5570_v40  ;;  %3633 = vmatpush1.bf16.msra.mxu1 %v5573_v55  ;;  %v1285_v29 = vmax.f32 %v1055_v43, 0.0  ;;  %v1059_v36 = vadd.f32 %v1058_v26, %v6360_v31  ;;  %v1161_v40 = vpop.f32.mrb[55].mxu1  ;;  %v1278_v43 = vmax.f32 %v1160_v28, 0.0 }
 0x20a   :  { %3182 = vmatprep.subr.bf16.mxu0 %v5578_v24  ;;  %3139 = vmatprep.mubr.bf16.mxu0 %v6368_v11  ;;  %v1292_v14 = vmax.f32 %v1057_v6, 0.0  ;;  %v1162_v4 = vadd.f32 %v1161_v40, %v6389_v61  ;;  %v5582_v24 = vld [vmem:[#allocation9 + $0x580] ss:$16 sps:$4 sm:$0xff]   ;;  %v1165_v54 = vpop.f32.mrb[56].mxu1 }
 0x20b   :  { %3591 = vmatprep.mubr.bf16.mxu1 %v6368_v11  ;;  %3634 = vmatprep.subr.bf16.mxu1 %v5581_v20  ;;  %v1293_v19 = vmax.f32 %v1059_v36, 0.0  ;;  %v5590_v11 = vld [vmem:[#allocation9 + $0x5a4] ss:$16 sps:$4 sm:$0xff]   ;;  %v6512_v36 = vpack.c.bf16 %v1278_v43, %v1270_v12  ;;  %v1166_v15 = vadd.f32 %v1165_v54, %v6385_v46  ;;  %v5599_v12 = vld [vmem:[#allocation9 + $0x5cc] ss:$16 sps:$4 sm:$0xff]  }
 0x20c   :  { %v6505_v55 = vpack.c.bf16 %v1292_v14, %v1284_v2  ;;  %v1279_v6 = vmax.f32 %v1162_v4, 0.0  ;;  %v5593_v2 = vld [vmem:[#allocation9 + $0x5ac] ss:$16 sps:$4 sm:$0xff]   ;;  %v5603_v54 = vld [vmem:[#allocation9 + $0x5e8] ss:$16 sps:$4 sm:$0xff]  }
 0x20d   :  { %3183 = vmatpush1.bf16.msra.mxu0 %v5576_v21  ;;  %3635 = vmatpush1.bf16.msra.mxu1 %v5579_v5  ;;  %v6508_v45 = vpack.c.bf16 %v1293_v19, %v1285_v29  ;;  %v1062_v49 = vpop.f32.mrb[60].mxu0  ;;  %v1167_v19 = vpop.f32.mrb[57].mxu1  ;;  %v1286_v4 = vmax.f32 %v1166_v15, 0.0 }
 0x20e   :  { %3184 = vmatprep.subr.bf16.mxu0 %v5584_v16  ;;  %3636 = vmatprep.subr.bf16.mxu1 %v5587_v13  ;;  %v1063_v20 = vadd.f32 %v1062_v49, %v6356_v39  ;;  %v1064_v58 = vpop.f32.mrb[61].mxu0  ;;  %v6517_v10 = vpack.c.bf16 %v1279_v6, %v1271_v41  ;;  %v5588_v16 = vld [vmem:[#allocation9 + $0x5a0] ss:$16 sps:$4 sm:$0xff]   ;;  %v5591_v13 = vld [vmem:[#allocation9 + $0x5a8] ss:$16 sps:$4 sm:$0xff]   ;;  %v1168_v28 = vadd.f32 %v1167_v19, %v6389_v61  ;;  %v1169_v40 = vpop.f32.mrb[58].mxu1 }
 0x20f   :  { %v1065_v26 = vadd.f32 %v1064_v58, %v6360_v31  ;;  %v1066_v9 = vpop.f32.mrb[62].mxu0 }
 0x210   :  { %3140 = vmatmul.mubr.bf16.gmra.mrb[88].mxu0 %v6365_v7  ;;  %3592 = vmatmul.mubr.bf16.gmra.mrb[88].mxu1 %v6365_v7  ;;  %v1300_v21 = vmax.f32 %v1063_v20, 0.0  ;;  %v1067_v5 = vadd.f32 %v1066_v9, %v6356_v39  ;;  %v1068_v29 = vpop.f32.mrb[63].mxu0  ;;  %v5596_v7 = vld [vmem:[#allocation9 + $0x5c4] ss:$16 sps:$4 sm:$0xff]   ;;  %v1287_v49 = vmax.f32 %v1168_v28, 0.0 }
 0x211   :  { %3185 = vmatpush1.bf16.msra.mxu0 %v5582_v24  ;;  %3637 = vmatpush1.bf16.msra.mxu1 %v5585_v44  ;;  %v1301_v14 = vmax.f32 %v1065_v26, 0.0  ;;  %v1069_v50 = vadd.f32 %v1068_v29, %v6360_v31  ;;  %v1170_v24 = vadd.f32 %v1169_v40, %v6385_v46  ;;  %v1171_v31 = vpop.f32.mrb[59].mxu1  ;;  %v5597_v20 = vld [vmem:[#allocation9 + $0x5c8] ss:$16 sps:$4 sm:$0xff]   ;;  %v5605_v26 = vld [vmem:[#allocation9 + $0x5ec] ss:$16 sps:$4 sm:$0xff]  }
 0x212   :  { %3186 = vmatprep.subr.bf16.mxu0 %v5590_v11  ;;  %3149 = vmatprep.mubr.bf16.mxu0 %v6396_v3  ;;  %v1308_v39 = vmax.f32 %v1067_v5, 0.0  ;;  %v1172_v43 = vadd.f32 %v1171_v31, %v6389_v61  ;;  %v5594_v11 = vld [vmem:[#allocation9 + $0x5c0] ss:$16 sps:$4 sm:$0xff]   ;;  %v1175_v5 = vpop.f32.mrb[60].mxu1 }
 0x213   :  { %3601 = vmatprep.mubr.bf16.mxu1 %v6396_v3  ;;  %3638 = vmatprep.subr.bf16.mxu1 %v5593_v2  ;;  %v1309_v41 = vmax.f32 %v1069_v50, 0.0  ;;  %v1294_v6 = vmax.f32 %v1170_v24, 0.0  ;;  %v5602_v3 = vld [vmem:[#allocation9 + $0x5e4] ss:$16 sps:$4 sm:$0xff]   ;;  %v5600_v29 = vld [vmem:[#allocation9 + $0x5e0] ss:$16 sps:$4 sm:$0xff]  }
 0x214   :  { %v6525_v44 = vpack.c.bf16 %v1308_v39, %v1300_v21  ;;  %v1295_v2 = vmax.f32 %v1172_v43, 0.0  ;;  %v5611_v50 = vld [vmem:[#allocation9 + $0x60c] ss:$16 sps:$4 sm:$0xff]   ;;  %v5606_v40 = vld [vmem:[#allocation9 + $0x600] ss:$16 sps:$4 sm:$0xff]  }
 0x215   :  { %3187 = vmatpush1.bf16.msra.mxu0 %v5588_v16  ;;  %3639 = vmatpush1.bf16.msra.mxu1 %v5591_v13  ;;  %v6528_v58 = vpack.c.bf16 %v1309_v41, %v1301_v14  ;;  %v6530_v9 = vpack.c.bf16 %v1294_v6, %v1286_v4  ;;  %v1176_v16 = vadd.f32 %v1175_v5, %v6385_v46  ;;  %v1177_v13 = vpop.f32.mrb[61].mxu1  ;;  %v5608_v14 = vld [vmem:[#allocation9 + $0x604] ss:$16 sps:$4 sm:$0xff]   ;;  %v5609_v41 = vld [vmem:[#allocation9 + $0x608] ss:$16 sps:$4 sm:$0xff]  }
 0x216   :  { %3188 = vmatprep.subr.bf16.mxu0 %v5596_v7  ;;  %3640 = vmatprep.subr.bf16.mxu1 %v5599_v12  ;;  %v6534_v21 = vpack.c.bf16 %v1295_v2, %v1287_v49  ;;  %v1178_v15 = vadd.f32 %v1177_v13, %v6389_v61  ;;  %v1179_v19 = vpop.f32.mrb[62].mxu1  ;;  %v5614_v24 = vld [vmem:[#allocation9 + $0x624] ss:$16 sps:$4 sm:$0xff]   ;;  %v5617_v49 = vld [vmem:[#allocation9 + $0x62c] ss:$16 sps:$4 sm:$0xff]  }
 0x217   :  { %v1180_v7 = vadd.f32 %v1179_v19, %v6385_v46  ;;  %v1181_v12 = vpop.f32.mrb[63].mxu1  ;;  %v5612_v46 = vld [vmem:[#allocation9 + $0x620] ss:$16 sps:$4 sm:$0xff]   ;;  %v5629_v2 = vld [vmem:[#allocation9 + $0x66c] ss:$16 sps:$4 sm:$0xff]  }
 0x218   :  { %3150 = vmatmul.mubr.bf16.gmra.mrb[92].mxu0 %v6391_v63  ;;  %3602 = vmatmul.mubr.bf16.gmra.mrb[92].mxu1 %v6391_v63  ;;  %v1302_v63 = vmax.f32 %v1176_v16, 0.0  ;;  %v1303_v39 = vmax.f32 %v1178_v15, 0.0  ;;  %v1182_v28 = vadd.f32 %v1181_v12, %v6389_v61  ;;  %v5615_v61 = vld [vmem:[#allocation9 + $0x628] ss:$16 sps:$4 sm:$0xff]   ;;  %v5618_v6 = vld [vmem:[#allocation9 + $0x640] ss:$16 sps:$4 sm:$0xff]  }
 0x219   :  { %3189 = vmatpush1.bf16.msra.mxu0 %v5594_v11  ;;  %3641 = vmatpush1.bf16.msra.mxu1 %v5597_v20  ;;  %v1310_v4 = vmax.f32 %v1180_v7, 0.0  ;;  %v5620_v11 = vld [vmem:[#allocation9 + $0x644] ss:$16 sps:$4 sm:$0xff]   ;;  %v5623_v20 = vld [vmem:[#allocation9 + $0x64c] ss:$16 sps:$4 sm:$0xff]  }
 0x21a   :  { %3190 = vmatprep.subr.bf16.mxu0 %v5602_v3  ;;  %3192 = vmatprep.mubr.bf16.mxu0 %v6382_v57  ;;  %v1311_v31 = vmax.f32 %v1182_v28, 0.0  ;;  %v5621_v3 = vld [vmem:[#allocation9 + $0x648] ss:$16 sps:$4 sm:$0xff]   ;;  %v5638_v13 = vld [vmem:[#allocation9 + $0x6a4] ss:$16 sps:$4 sm:$0xff]  }
 0x21b   :  { %3642 = vmatprep.subr.bf16.mxu1 %v5605_v26  ;;  %3644 = vmatprep.mubr.bf16.mxu1 %v6382_v57  ;;  %v6542_v43 = vpack.c.bf16 %v1310_v4, %v1302_v63  ;;  %v5624_v26 = vld [vmem:[#allocation9 + $0x660] ss:$16 sps:$4 sm:$0xff]   ;;  %v5627_v5 = vld [vmem:[#allocation9 + $0x668] ss:$16 sps:$4 sm:$0xff]   ;;  %v5647_v15 = vld [vmem:[#allocation9 + $0x6cc] ss:$16 sps:$4 sm:$0xff]  }
 0x21c   :  { %v6546_v57 = vpack.c.bf16 %v1311_v31, %v1303_v39  ;;  %v5633_v16 = vld [vmem:[#allocation9 + $0x688] ss:$16 sps:$4 sm:$0xff]   ;;  %v5642_v19 = vld [vmem:[#allocation9 + $0x6c0] ss:$16 sps:$4 sm:$0xff]   ;;  %v5650_v7 = vld [vmem:[#allocation9 + $0x6e4] ss:$16 sps:$4 sm:$0xff]  }
 0x21d   :  { %3191 = vmatpush1.bf16.msra.mxu0 %v5600_v29  ;;  %3643 = vmatpush1.bf16.msra.mxu1 %v5603_v54  ;;  %v5635_v29 = vld [vmem:[#allocation9 + $0x68c] ss:$16 sps:$4 sm:$0xff]   ;;  %v5630_v54 = vld [vmem:[#allocation9 + $0x680] ss:$16 sps:$4 sm:$0xff]   ;;  %v5645_v63 = vld [vmem:[#allocation9 + $0x6c8] ss:$16 sps:$4 sm:$0xff]  }
 0x21e   :  { %3273 = vmatprep.subr.bf16.mxu0 %v5608_v14  ;;  %3725 = vmatprep.subr.bf16.mxu1 %v5611_v50  ;;  %v5636_v14 = vld [vmem:[#allocation9 + $0x6a0] ss:$16 sps:$4 sm:$0xff]   ;;  %v5639_v50 = vld [vmem:[#allocation9 + $0x6a8] ss:$16 sps:$4 sm:$0xff]   ;;  %v5659_v28 = vld [vmem:[#allocation9 + $0x70c] ss:$16 sps:$4 sm:$0xff]  }
 0x21f   :  { %v5648_v12 = vld [vmem:[#allocation9 + $0x6e0] ss:$16 sps:$4 sm:$0xff]   ;;  %v5651_v39 = vld [vmem:[#allocation9 + $0x6e8] ss:$16 sps:$4 sm:$0xff]   ;;  %v5662_v4 = vld [vmem:[#allocation9 + $0x724] ss:$16 sps:$4 sm:$0xff]  }
 0x220   :  { %3193 = vmatmul.mubr.bf16.vlgmr.msra.gmra.mrb[64].mxu0 %v6380_v52  ;;  %3645 = vmatmul.mubr.bf16.vlgmr.msra.gmra.mrb[64].mxu1 %v6380_v52  ;;  %v5626_v52 = vld [vmem:[#allocation9 + $0x664] ss:$16 sps:$4 sm:$0xff]   ;;  %v5663_v31 = vld [vmem:[#allocation9 + $0x728] ss:$16 sps:$4 sm:$0xff]  }
 0x221   :  { %3274 = vmatpush1.bf16.msra.mxu0 %v5606_v40  ;;  %3726 = vmatpush1.bf16.msra.mxu1 %v5609_v41  ;;  %v5654_v40 = vld [vmem:[#allocation9 + $0x700] ss:$16 sps:$4 sm:$0xff]   ;;  %v5657_v41 = vld [vmem:[#allocation9 + $0x708] ss:$16 sps:$4 sm:$0xff]  }
 0x222   :  { %3275 = vmatprep.subr.bf16.mxu0 %v5614_v24  ;;  %3202 = vmatprep.mubr.bf16.mxu0 %v6408_v17  ;;  %v5660_v24 = vld [vmem:[#allocation9 + $0x720] ss:$16 sps:$4 sm:$0xff]  }
 0x223   :  { %3654 = vmatprep.mubr.bf16.mxu1 %v6408_v17  ;;  %3727 = vmatprep.subr.bf16.mxu1 %v5617_v49  ;;  %v5632_v17 = vld [vmem:[#allocation9 + $0x684] ss:$16 sps:$4 sm:$0xff]   ;;  %v5671_v49 = vld [vmem:[#allocation9 + $0x74c] ss:$16 sps:$4 sm:$0xff]  }
 0x225   :  { %3276 = vmatpush1.bf16.msra.mxu0 %v5612_v46  ;;  %3728 = vmatpush1.bf16.msra.mxu1 %v5615_v61  ;;  %v5666_v46 = vld [vmem:[#allocation9 + $0x740] ss:$16 sps:$4 sm:$0xff]   ;;  %v5669_v61 = vld [vmem:[#allocation9 + $0x748] ss:$16 sps:$4 sm:$0xff]  }
 0x226   :  { %3277 = vmatprep.subr.bf16.mxu0 %v5620_v11  ;;  %3729 = vmatprep.subr.bf16.mxu1 %v5623_v20  ;;  %v5674_v11 = vld [vmem:[#allocation9 + $0x764] ss:$16 sps:$4 sm:$0xff]   ;;  %v5672_v20 = vld [vmem:[#allocation9 + $0x760] ss:$16 sps:$4 sm:$0xff]  }
 0x228   :  { %3203 = vmatmul.mubr.bf16.gmra.mrb[68].mxu0 %v6405_v23  ;;  %3655 = vmatmul.mubr.bf16.gmra.mrb[68].mxu1 %v6405_v23  ;;  %v5641_v23 = vld [vmem:[#allocation9 + $0x6ac] ss:$16 sps:$4 sm:$0xff]  }
 0x229   :  { %3278 = vmatpush1.bf16.msra.mxu0 %v5618_v6  ;;  %3730 = vmatpush1.bf16.msra.mxu1 %v5621_v3  ;;  %v5675_v6 = vld [vmem:[#allocation9 + $0x768] ss:$16 sps:$4 sm:$0xff]   ;;  %v5683_v3 = vld [vmem:[#allocation9 + $0x78c] ss:$16 sps:$4 sm:$0xff]  }
 0x22a   :  { %3279 = vmatprep.subr.bf16.mxu0 %v5626_v52  ;;  %3212 = vmatprep.mubr.bf16.mxu0 %v6428_v38  ;;  %v5678_v52 = vld [vmem:[#allocation9 + $0x780] ss:$16 sps:$4 sm:$0xff]  }
 0x22b   :  { %3664 = vmatprep.mubr.bf16.mxu1 %v6428_v38  ;;  %3731 = vmatprep.subr.bf16.mxu1 %v5629_v2  ;;  %v5644_v38 = vld [vmem:[#allocation9 + $0x6c4] ss:$16 sps:$4 sm:$0xff]   ;;  %v5681_v2 = vld [vmem:[#allocation9 + $0x788] ss:$16 sps:$4 sm:$0xff]  }
 0x22d   :  { %3280 = vmatpush1.bf16.msra.mxu0 %v5624_v26  ;;  %3732 = vmatpush1.bf16.msra.mxu1 %v5627_v5  ;;  %v5686_v26 = vld [vmem:[#allocation9 + $0x7a4] ss:$16 sps:$4 sm:$0xff]   ;;  %v5684_v5 = vld [vmem:[#allocation9 + $0x7a0] ss:$16 sps:$4 sm:$0xff]  }
 0x22e   :  { %3281 = vmatprep.subr.bf16.mxu0 %v5632_v17  ;;  %3733 = vmatprep.subr.bf16.mxu1 %v5635_v29  ;;  %v5687_v17 = vld [vmem:[#allocation9 + $0x7a8] ss:$16 sps:$4 sm:$0xff]   ;;  %v5695_v29 = vld [vmem:[#allocation9 + $0x7cc] ss:$16 sps:$4 sm:$0xff]  }
 0x230   :  { %3213 = vmatmul.mubr.bf16.gmra.mrb[72].mxu0 %v6425_v8  ;;  %3665 = vmatmul.mubr.bf16.gmra.mrb[72].mxu1 %v6425_v8  ;;  %v5653_v8 = vld [vmem:[#allocation9 + $0x6ec] ss:$16 sps:$4 sm:$0xff]  }
 0x231   :  { %3282 = vmatpush1.bf16.msra.mxu0 %v5630_v54  ;;  %3734 = vmatpush1.bf16.msra.mxu1 %v5633_v16  ;;  %v5690_v54 = vld [vmem:[#allocation9 + $0x7c0] ss:$16 sps:$4 sm:$0xff]   ;;  %v5693_v16 = vld [vmem:[#allocation9 + $0x7c8] ss:$16 sps:$4 sm:$0xff]  }
 0x232   :  { %3283 = vmatprep.subr.bf16.mxu0 %v5638_v13  ;;  %3222 = vmatprep.mubr.bf16.mxu0 %v6448_v32  ;;  %v5698_v13 = vld [vmem:[#allocation9 + $0x7e4] ss:$16 sps:$4 sm:$0xff]  }
 0x233   :  { %3674 = vmatprep.mubr.bf16.mxu1 %v6448_v32  ;;  %3735 = vmatprep.subr.bf16.mxu1 %v5641_v23  ;;  %v5656_v32 = vld [vmem:[#allocation9 + $0x704] ss:$16 sps:$4 sm:$0xff]   ;;  %v5696_v23 = vld [vmem:[#allocation9 + $0x7e0] ss:$16 sps:$4 sm:$0xff]  }
 0x235   :  { %3284 = vmatpush1.bf16.msra.mxu0 %v5636_v14  ;;  %3736 = vmatpush1.bf16.msra.mxu1 %v5639_v50  ;;  %v5702_v14 = vld [vmem:[#allocation12 + $0x40] sm:$0xff]  }
 0x236   :  { %3285 = vmatprep.subr.bf16.mxu0 %v5644_v38  ;;  %3737 = vmatprep.subr.bf16.mxu1 %v5647_v15  ;;  %v5704_v50 = vld [vmem:[#allocation12 + $0xc0] sm:$0xff]  }
 0x237   :  { %v5703_v38 = vld [vmem:[#allocation12] sm:$0xff]  }
 0x238   :  { %3223 = vmatmul.mubr.bf16.gmra.mrb[76].mxu0 %v6445_v18  ;;  %3675 = vmatmul.mubr.bf16.gmra.mrb[76].mxu1 %v6445_v18  ;;  %v5665_v18 = vld [vmem:[#allocation9 + $0x72c] ss:$16 sps:$4 sm:$0xff]   ;;  %v5705_v15 = vld [vmem:[#allocation12 + $0x80] sm:$0xff]  }
 0x239   :  { %3286 = vmatpush1.bf16.msra.mxu0 %v5642_v19  ;;  %3738 = vmatpush1.bf16.msra.mxu1 %v5645_v63  ;;  %v5706_v19 = vld [vmem:[#allocation12 + $0x48] sm:$0xff]  }
 0x23a   :  { %3287 = vmatprep.subr.bf16.mxu0 %v5650_v7  ;;  %3232 = vmatprep.mubr.bf16.mxu0 %v6468_v33  ;;  %v5709_v63 = vld [vmem:[#allocation12 + $0x88] sm:$0xff]   ;;  %v5710_v7 = vld [vmem:[#allocation12 + $0x50] sm:$0xff]  }
 0x23b   :  { %3684 = vmatprep.mubr.bf16.mxu1 %v6468_v33  ;;  %3739 = vmatprep.subr.bf16.mxu1 %v5653_v8  ;;  %v5668_v33 = vld [vmem:[#allocation9 + $0x744] ss:$16 sps:$4 sm:$0xff]  }
 0x23c   :  { %v5712_v8 = vld [vmem:[#allocation12 + $0xd0] sm:$0xff]  }
 0x23d   :  { %3288 = vmatpush1.bf16.msra.mxu0 %v5648_v12  ;;  %3740 = vmatpush1.bf16.msra.mxu1 %v5651_v39  ;;  %v5711_v12 = vld [vmem:[#allocation12 + $0x10] sm:$0xff]  }
 0x23e   :  { %3289 = vmatprep.subr.bf16.mxu0 %v5656_v32  ;;  %3741 = vmatprep.subr.bf16.mxu1 %v5659_v28  ;;  %v5713_v39 = vld [vmem:[#allocation12 + $0x90] sm:$0xff]   ;;  %v5714_v32 = vld [vmem:[#allocation12 + $0x58] sm:$0xff]  }
 0x23f   :  { %v5717_v28 = vld [vmem:[#allocation12 + $0x98] sm:$0xff]  }
 0x240   :  { %3233 = vmatmul.mubr.bf16.gmra.mrb[80].mxu0 %v6465_v42  ;;  %3685 = vmatmul.mubr.bf16.gmra.mrb[80].mxu1 %v6465_v42  ;;  %v5677_v42 = vld [vmem:[#allocation9 + $0x76c] ss:$16 sps:$4 sm:$0xff]  }
 0x241   :  { %3290 = vmatpush1.bf16.msra.mxu0 %v5654_v40  ;;  %3742 = vmatpush1.bf16.msra.mxu1 %v5657_v41  ;;  %v5718_v40 = vld [vmem:[#allocation12 + $0x60] sm:$0xff]  }
 0x242   :  { %3291 = vmatprep.subr.bf16.mxu0 %v5662_v4  ;;  %3242 = vmatprep.mubr.bf16.mxu0 %v6488_v34  ;;  %v5720_v41 = vld [vmem:[#allocation12 + $0xe0] sm:$0xff]  }
 0x243   :  { %3694 = vmatprep.mubr.bf16.mxu1 %v6488_v34  ;;  %3743 = vmatprep.subr.bf16.mxu1 %v5665_v18  ;;  %v5680_v34 = vld [vmem:[#allocation9 + $0x784] ss:$16 sps:$4 sm:$0xff]  }
 0x244   :  { %v5719_v4 = vld [vmem:[#allocation12 + $0x20] sm:$0xff]  }
 0x245   :  { %3292 = vmatpush1.bf16.msra.mxu0 %v5660_v24  ;;  %3744 = vmatpush1.bf16.msra.mxu1 %v5663_v31  ;;  %v5721_v18 = vld [vmem:[#allocation12 + $0xa0] sm:$0xff]   ;;  %v5722_v24 = vld [vmem:[#allocation12 + $0x68] sm:$0xff]  }
 0x246   :  { %3293 = vmatprep.subr.bf16.mxu0 %v5668_v33  ;;  %3745 = vmatprep.subr.bf16.mxu1 %v5671_v49  ;;  %v5725_v31 = vld [vmem:[#allocation12 + $0xa8] sm:$0xff]   ;;  %v5726_v33 = vld [vmem:[#allocation12 + $0x70] sm:$0xff]  }
 0x247   :  { %v5728_v49 = vld [vmem:[#allocation12 + $0xf0] sm:$0xff]  }
 0x248   :  { %3243 = vmatmul.mubr.bf16.gmra.mrb[84].mxu0 %v6485_v22  ;;  %3695 = vmatmul.mubr.bf16.gmra.mrb[84].mxu1 %v6485_v22  ;;  %v5689_v22 = vld [vmem:[#allocation9 + $0x7ac] ss:$16 sps:$4 sm:$0xff]  }
 0x249   :  { %3294 = vmatpush1.bf16.msra.mxu0 %v5666_v46  ;;  %3746 = vmatpush1.bf16.msra.mxu1 %v5669_v61  ;;  %v5727_v46 = vld [vmem:[#allocation12 + $0x30] sm:$0xff]  }
 0x24a   :  { %3295 = vmatprep.subr.bf16.mxu0 %v5674_v11  ;;  %3252 = vmatprep.mubr.bf16.mxu0 %v6508_v45  ;;  %v5729_v61 = vld [vmem:[#allocation12 + $0xb0] sm:$0xff]  }
 0x24b   :  { %3704 = vmatprep.mubr.bf16.mxu1 %v6508_v45  ;;  %3747 = vmatprep.subr.bf16.mxu1 %v5677_v42  ;;  %v5692_v45 = vld [vmem:[#allocation9 + $0x7c4] ss:$16 sps:$4 sm:$0xff]  }
 0x24d   :  { %3296 = vmatpush1.bf16.msra.mxu0 %v5672_v20  ;;  %3748 = vmatpush1.bf16.msra.mxu1 %v5675_v6 }
 0x24e   :  { %3297 = vmatprep.subr.bf16.mxu0 %v5680_v34  ;;  %3749 = vmatprep.subr.bf16.mxu1 %v5683_v3 }
 0x250   :  { %3253 = vmatmul.mubr.bf16.gmra.mrb[88].mxu0 %v6505_v55  ;;  %3705 = vmatmul.mubr.bf16.gmra.mrb[88].mxu1 %v6505_v55  ;;  %v5701_v55 = vld [vmem:[#allocation9 + $0x7ec] ss:$16 sps:$4 sm:$0xff]  }
 0x251   :  { %3298 = vmatpush1.bf16.msra.mxu0 %v5678_v52  ;;  %3750 = vmatpush1.bf16.msra.mxu1 %v5681_v2 }
 0x252   :  { %3299 = vmatprep.subr.bf16.mxu0 %v5686_v26  ;;  %3262 = vmatprep.mubr.bf16.mxu0 %v6528_v58 }
 0x253   :  { %3714 = vmatprep.mubr.bf16.mxu1 %v6528_v58  ;;  %3751 = vmatprep.subr.bf16.mxu1 %v5689_v22  ;;  %v5699_v58 = vld [vmem:[#allocation9 + $0x7e8] ss:$16 sps:$4 sm:$0xff]  }
 0x255   :  { %3300 = vmatpush1.bf16.msra.mxu0 %v5684_v5  ;;  %3752 = vmatpush1.bf16.msra.mxu1 %v5687_v17 }
 0x256   :  { %3301 = vmatprep.subr.bf16.mxu0 %v5692_v45  ;;  %3753 = vmatprep.subr.bf16.mxu1 %v5695_v29 }
 0x258   :  { %3263 = vmatmul.mubr.bf16.gmra.mrb[92].mxu0 %v6525_v44  ;;  %3715 = vmatmul.mubr.bf16.gmra.mrb[92].mxu1 %v6525_v44  ;;  %v5708_v44 = vld [vmem:[#allocation12 + $0xc8] sm:$0xff]  }
 0x259   :  { %3302 = vmatpush1.bf16.msra.mxu0 %v5690_v54  ;;  %3305 = vmatprep.mubr.bf16.mxu0 %v6417_v0 }
 0x25a   :  { %3754 = vmatpush1.bf16.msra.mxu1 %v5693_v16  ;;  %3757 = vmatprep.mubr.bf16.mxu1 %v6417_v0  ;;  %v5707_v0 = vld [vmem:[#allocation12 + $0x8] sm:$0xff]  }
 0x25b   :  { %3303 = vmatprep.subr.bf16.mxu0 %v5698_v13  ;;  %3755 = vmatprep.subr.bf16.mxu1 %v5701_v55 }
 0x25d   :  { %3304 = vmatpush1.bf16.msra.mxu0 %v5696_v23 }
 0x25e   :  { %3756 = vmatpush1.bf16.msra.mxu1 %v5699_v58  ;;  %4916 = vmatprep.subr.bf16.mxu0 %v5702_v14 }
 0x25f   :  { %4980 = vmatprep.subr.bf16.mxu1 %v5704_v50 }
 0x260   :  { %3306 = vmatmul.mubr.bf16.vlgmr.msra.gmra.mrb[64].mxu0 %v6412_v59 }
 0x261   :  { %3758 = vmatmul.mubr.bf16.vlgmr.msra.gmra.mrb[64].mxu1 %v6412_v59  ;;  %3315 = vmatprep.mubr.bf16.mxu0 %v6437_v60  ;;  %v5716_v59 = vld [vmem:[#allocation12 + $0xd8] sm:$0xff]  }
 0x262   :  { %3767 = vmatprep.mubr.bf16.mxu1 %v6437_v60  ;;  %4917 = vmatpush3.bf16.msra.mxu0 %v5703_v38  ;;  %v5715_v60 = vld [vmem:[#allocation12 + $0x18] sm:$0xff]  }
 0x263   :  { %4981 = vmatpush3.bf16.msra.mxu1 %v5705_v15  ;;  %4918 = vmatprep.subr.bf16.mxu0 %v5706_v19 }
 0x264   :  { %4982 = vmatprep.subr.bf16.mxu1 %v5708_v44 }
 0x266   :  { %4919 = vmatpush3.bf16.msra.mxu0 %v5707_v0 }
 0x267   :  { %4983 = vmatpush3.bf16.msra.mxu1 %v5709_v63  ;;  %4920 = vmatprep.subr.bf16.mxu0 %v5710_v7 }
 0x268   :  { %3316 = vmatmul.mubr.bf16.gmra.mrb[68].mxu0 %v6432_v56  ;;  %4984 = vmatprep.subr.bf16.mxu1 %v5712_v8 }
 0x269   :  { %3768 = vmatmul.mubr.bf16.gmra.mrb[68].mxu1 %v6432_v56  ;;  %3325 = vmatprep.mubr.bf16.mxu0 %v6457_v47  ;;  %v5724_v56 = vld [vmem:[#allocation12 + $0xe8] sm:$0xff]  }
 0x26a   :  { %3777 = vmatprep.mubr.bf16.mxu1 %v6457_v47  ;;  %4921 = vmatpush3.bf16.msra.mxu0 %v5711_v12  ;;  %v5723_v47 = vld [vmem:[#allocation12 + $0x28] sm:$0xff]  }
 0x26b   :  { %4985 = vmatpush3.bf16.msra.mxu1 %v5713_v39  ;;  %4922 = vmatprep.subr.bf16.mxu0 %v5714_v32 }
 0x26c   :  { %4986 = vmatprep.subr.bf16.mxu1 %v5716_v59 }
 0x26e   :  { %4923 = vmatpush3.bf16.msra.mxu0 %v5715_v60 }
 0x26f   :  { %4987 = vmatpush3.bf16.msra.mxu1 %v5717_v28  ;;  %4924 = vmatprep.subr.bf16.mxu0 %v5718_v40 }
 0x270   :  { %3326 = vmatmul.mubr.bf16.gmra.mrb[72].mxu0 %v6452_v51  ;;  %4988 = vmatprep.subr.bf16.mxu1 %v5720_v41 }
 0x271   :  { %3778 = vmatmul.mubr.bf16.gmra.mrb[72].mxu1 %v6452_v51  ;;  %3335 = vmatprep.mubr.bf16.mxu0 %v6477_v1  ;;  %v5730_v51 = vld [vmem:[#allocation12 + $0x78] sm:$0xff]  }
 0x272   :  { %3787 = vmatprep.mubr.bf16.mxu1 %v6477_v1  ;;  %4925 = vmatpush3.bf16.msra.mxu0 %v5719_v4  ;;  %v5731_v1 = vld [vmem:[#allocation12 + $0x38] sm:$0xff]  }
 0x273   :  { %4989 = vmatpush3.bf16.msra.mxu1 %v5721_v18  ;;  %4926 = vmatprep.subr.bf16.mxu0 %v5722_v24 }
 0x274   :  { %4990 = vmatprep.subr.bf16.mxu1 %v5724_v56 }
 0x276   :  { %4927 = vmatpush3.bf16.msra.mxu0 %v5723_v47 }
 0x277   :  { %4991 = vmatpush3.bf16.msra.mxu1 %v5725_v31  ;;  %4928 = vmatprep.subr.bf16.mxu0 %v5726_v33 }
 0x278   :  { %3336 = vmatmul.mubr.bf16.gmra.mrb[76].mxu0 %v6472_v53  ;;  %4992 = vmatprep.subr.bf16.mxu1 %v5728_v49 }
 0x279   :  { %3788 = vmatmul.mubr.bf16.gmra.mrb[76].mxu1 %v6472_v53  ;;  %3345 = vmatprep.mubr.bf16.mxu0 %v6497_v30  ;;  %v5732_v53 = vld [vmem:[#allocation12 + $0xf8] sm:$0xff]  }
 0x27a   :  { %3797 = vmatprep.mubr.bf16.mxu1 %v6497_v30  ;;  %4929 = vmatpush3.bf16.msra.mxu0 %v5727_v46  ;;  %v1632_v30 = vld [vmem:[#allocation11] sm:$0xf] }
 0x27b   :  { %4993 = vmatpush3.bf16.msra.mxu1 %v5729_v61  ;;  %4930 = vmatprep.subr.bf16.mxu0 %v5730_v51 }
 0x27c   :  { %4994 = vmatprep.subr.bf16.mxu1 %v5732_v53 }
 0x27e   :  { %4931 = vmatpush3.bf16.msra.mxu0 %v5731_v1 }
 0x280   :  { %3346 = vmatmul.mubr.bf16.gmra.mrb[80].mxu0 %v6492_v62 }
 0x281   :  { %3798 = vmatmul.mubr.bf16.gmra.mrb[80].mxu1 %v6492_v62  ;;  %3355 = vmatprep.mubr.bf16.mxu0 %v6517_v10  ;;  %v5733_v62 = vld [vmem:[#allocation12 + $0xb8] sm:$0xff]  }
 0x282   :  { %3807 = vmatprep.mubr.bf16.mxu1 %v6517_v10  ;;  %4995 = vmatpush3.bf16.msra.mxu1 %v5733_v62  ;;  %v6613_v10 = vrot.slane %v1632_v30, %v277_v48 }
 0x288   :  { %3356 = vmatmul.mubr.bf16.gmra.mrb[84].mxu0 %v6512_v36 }
 0x289   :  { %3808 = vmatmul.mubr.bf16.gmra.mrb[84].mxu1 %v6512_v36  ;;  %3365 = vmatprep.mubr.bf16.mxu0 %v6534_v21  ;;  %v6609_v36 = vrot.slane %v1632_v30, %v6246_v27 }
 0x28a   :  { %3817 = vmatprep.mubr.bf16.mxu1 %v6534_v21  ;;  %v6621_v21 = vrot.slane %v1632_v30, %v281_v25 }
 0x290   :  { %3366 = vmatmul.mubr.bf16.gmra.mrb[88].mxu0 %v6530_v9 }
 0x291   :  { %3818 = vmatmul.mubr.bf16.gmra.mrb[88].mxu1 %v6530_v9  ;;  %3375 = vmatprep.mubr.bf16.mxu0 %v6546_v57  ;;  %v6617_v9 = vrot.slane %v1632_v30, %v273_v37 }
 0x292   :  { %3827 = vmatprep.mubr.bf16.mxu1 %v6546_v57 }
 0x298   :  { %3376 = vmatmul.mubr.bf16.gmra.mrb[92].mxu0 %v6542_v43 }
 0x299   :  { %3828 = vmatmul.mubr.bf16.gmra.mrb[92].mxu1 %v6542_v43 }
 0x333   :  { %v3307_v43 = vpop.f32.mrb[64].mxu0 }
 0x334   :  { %v5044_v57 = vadd.f32 %v3307_v43, %v6609_v36  ;;  %v3759_v11 = vpop.f32.mrb[64].mxu1  ;;  %v3309_v42 = vpop.f32.mrb[65].mxu0 }
 0x335   :  { %v5076_v20 = vadd.f32 %v3759_v11, %v6613_v10  ;;  %v5045_v6 = vadd.f32 %v3309_v42, %v6617_v9  ;;  %v3761_v34 = vpop.f32.mrb[65].mxu1  ;;  %v3311_v48 = vpop.f32.mrb[66].mxu0 }
 0x336   :  { %v5077_v3 = vadd.f32 %v3761_v34, %v6621_v21  ;;  %v5046_v37 = vadd.f32 %v3311_v48, %v6609_v36  ;;  %v3763_v52 = vpop.f32.mrb[66].mxu1  ;;  %v3313_v2 = vpop.f32.mrb[67].mxu0  ;;  %v3838_v22 = vmax.f32 %v5044_v57, 0.0 }
 0x337   :  { %v5078_v35 = vadd.f32 %v3763_v52, %v6613_v10  ;;  %v5047_v25 = vadd.f32 %v3313_v2, %v6617_v9  ;;  %v3765_v26 = vpop.f32.mrb[67].mxu1  ;;  %v3840_v45 = vmax.f32 %v5076_v20, 0.0  ;;  %v3839_v29 = vmax.f32 %v5045_v6, 0.0 }
 0x338   :  { %v3842_v5 = vmax.f32 %v5046_v37, 0.0  ;;  %v5079_v17 = vadd.f32 %v3765_v26, %v6621_v21  ;;  %v3841_v13 = vmax.f32 %v5077_v3, 0.0 }
 0x339   :  { %v3844_v54 = vmax.f32 %v5078_v35, 0.0  ;;  %v3843_v16 = vmax.f32 %v5047_v25, 0.0 }
 0x33a   :  { %v3902_v55 = vpack.c.bf16 %v3842_v5, %v3838_v22  ;;  %v3845_v23 = vmax.f32 %v5079_v17, 0.0 }
 0x33b   :  { %v3904_v58 = vpack.c.bf16 %v3844_v54, %v3840_v45  ;;  %v3903_v14 = vpack.c.bf16 %v3843_v16, %v3839_v29  ;;  %v3317_v50 = vpop.f32.mrb[68].mxu0 }
 0x33c   :  { %v3905_v38 = vpack.c.bf16 %v3845_v23, %v3841_v13  ;;  %v5048_v15 = vadd.f32 %v3317_v50, %v6609_v36  ;;  %v3769_v19 = vpop.f32.mrb[68].mxu1  ;;  %v3319_v44 = vpop.f32.mrb[69].mxu0 }
 0x33d   :  { %v5080_v0 = vadd.f32 %v3769_v19, %v6613_v10  ;;  %v5049_v63 = vadd.f32 %v3319_v44, %v6617_v9  ;;  %v3771_v7 = vpop.f32.mrb[69].mxu1  ;;  %v3321_v8 = vpop.f32.mrb[70].mxu0  ;;  %4229 = vmatprep.mubr.bf16.mxu0 %v3903_v14 }
 0x33e   :  { %v5081_v12 = vadd.f32 %v3771_v7, %v6621_v21  ;;  %v5050_v39 = vadd.f32 %v3321_v8, %v6609_v36  ;;  %v3773_v32 = vpop.f32.mrb[70].mxu1  ;;  %4326 = vmatprep.mubr.bf16.mxu1 %v3905_v38  ;;  %v3323_v59 = vpop.f32.mrb[71].mxu0  ;;  %4230 = vmatmul.mubr.bf16.vlgmr.msra.gmra.mrb[96].mxu0 %v3902_v55  ;;  %v3846_v41 = vmax.f32 %v5048_v15, 0.0 }
 0x33f   :  { %v5082_v60 = vadd.f32 %v3773_v32, %v6613_v10  ;;  %v5051_v28 = vadd.f32 %v3323_v59, %v6617_v9  ;;  %v3775_v40 = vpop.f32.mrb[71].mxu1  ;;  %4327 = vmatmul.mubr.bf16.vlgmr.msra.gmra.mrb[96].mxu1 %v3904_v58  ;;  %v3848_v24 = vmax.f32 %v5080_v0, 0.0  ;;  %v3847_v56 = vmax.f32 %v5049_v63, 0.0 }
 0x340   :  { %v3850_v4 = vmax.f32 %v5050_v39, 0.0  ;;  %v5083_v18 = vadd.f32 %v3775_v40, %v6621_v21  ;;  %v3849_v33 = vmax.f32 %v5081_v12, 0.0 }
 0x341   :  { %v3852_v47 = vmax.f32 %v5082_v60, 0.0  ;;  %v3851_v31 = vmax.f32 %v5051_v28, 0.0 }
 0x342   :  { %v3906_v49 = vpack.c.bf16 %v3850_v4, %v3846_v41  ;;  %v3853_v46 = vmax.f32 %v5083_v18, 0.0 }
 0x343   :  { %v3908_v61 = vpack.c.bf16 %v3852_v47, %v3848_v24  ;;  %v3907_v51 = vpack.c.bf16 %v3851_v31, %v3847_v56  ;;  %v3327_v53 = vpop.f32.mrb[72].mxu0 }
 0x344   :  { %v3909_v1 = vpack.c.bf16 %v3853_v46, %v3849_v33  ;;  %v5052_v62 = vadd.f32 %v3327_v53, %v6609_v36  ;;  %v3779_v30 = vpop.f32.mrb[72].mxu1  ;;  %v3329_v43 = vpop.f32.mrb[73].mxu0 }
 0x345   :  { %v5084_v57 = vadd.f32 %v3779_v30, %v6613_v10  ;;  %v5053_v11 = vadd.f32 %v3329_v43, %v6617_v9  ;;  %v3781_v42 = vpop.f32.mrb[73].mxu1  ;;  %v3331_v20 = vpop.f32.mrb[74].mxu0  ;;  %4237 = vmatprep.mubr.bf16.mxu0 %v3907_v51 }
 0x346   :  { %v5085_v6 = vadd.f32 %v3781_v42, %v6621_v21  ;;  %v5054_v34 = vadd.f32 %v3331_v20, %v6609_v36  ;;  %v3783_v48 = vpop.f32.mrb[74].mxu1  ;;  %4334 = vmatprep.mubr.bf16.mxu1 %v3909_v1  ;;  %v3333_v3 = vpop.f32.mrb[75].mxu0  ;;  %4238 = vmatmul.mubr.bf16.gmra.mrb[100].mxu0 %v3906_v49  ;;  %v3854_v35 = vmax.f32 %v5052_v62, 0.0 }
 0x347   :  { %v5086_v37 = vadd.f32 %v3783_v48, %v6613_v10  ;;  %v5055_v52 = vadd.f32 %v3333_v3, %v6617_v9  ;;  %v3785_v2 = vpop.f32.mrb[75].mxu1  ;;  %4335 = vmatmul.mubr.bf16.gmra.mrb[100].mxu1 %v3908_v61  ;;  %v3856_v22 = vmax.f32 %v5084_v57, 0.0  ;;  %v3855_v5 = vmax.f32 %v5053_v11, 0.0 }
 0x348   :  { %v3858_v25 = vmax.f32 %v5054_v34, 0.0  ;;  %v5087_v26 = vadd.f32 %v3785_v2, %v6621_v21  ;;  %v3857_v29 = vmax.f32 %v5085_v6, 0.0 }
 0x349   :  { %v3860_v17 = vmax.f32 %v5086_v37, 0.0  ;;  %v3859_v45 = vmax.f32 %v5055_v52, 0.0 }
 0x34a   :  { %v3910_v54 = vpack.c.bf16 %v3858_v25, %v3854_v35  ;;  %v3861_v16 = vmax.f32 %v5087_v26, 0.0 }
 0x34b   :  { %v3912_v13 = vpack.c.bf16 %v3860_v17, %v3856_v22  ;;  %v3911_v55 = vpack.c.bf16 %v3859_v45, %v3855_v5  ;;  %v3337_v23 = vpop.f32.mrb[76].mxu0 }
 0x34c   :  { %v3913_v58 = vpack.c.bf16 %v3861_v16, %v3857_v29  ;;  %v5056_v14 = vadd.f32 %v3337_v23, %v6609_v36  ;;  %v3789_v50 = vpop.f32.mrb[76].mxu1  ;;  %v3339_v38 = vpop.f32.mrb[77].mxu0 }
 0x34d   :  { %v5088_v15 = vadd.f32 %v3789_v50, %v6613_v10  ;;  %v5057_v19 = vadd.f32 %v3339_v38, %v6617_v9  ;;  %v3791_v44 = vpop.f32.mrb[77].mxu1  ;;  %v3341_v0 = vpop.f32.mrb[78].mxu0  ;;  %4245 = vmatprep.mubr.bf16.mxu0 %v3911_v55 }
 0x34e   :  { %v5089_v63 = vadd.f32 %v3791_v44, %v6621_v21  ;;  %v5058_v7 = vadd.f32 %v3341_v0, %v6609_v36  ;;  %v3793_v8 = vpop.f32.mrb[78].mxu1  ;;  %4342 = vmatprep.mubr.bf16.mxu1 %v3913_v58  ;;  %v3343_v12 = vpop.f32.mrb[79].mxu0  ;;  %4246 = vmatmul.mubr.bf16.gmra.mrb[104].mxu0 %v3910_v54  ;;  %v3862_v60 = vmax.f32 %v5056_v14, 0.0 }
 0x34f   :  { %v5090_v39 = vadd.f32 %v3793_v8, %v6613_v10  ;;  %v5059_v32 = vadd.f32 %v3343_v12, %v6617_v9  ;;  %v3795_v59 = vpop.f32.mrb[79].mxu1  ;;  %4343 = vmatmul.mubr.bf16.gmra.mrb[104].mxu1 %v3912_v13  ;;  %v3864_v41 = vmax.f32 %v5088_v15, 0.0  ;;  %v3863_v4 = vmax.f32 %v5057_v19, 0.0 }
 0x350   :  { %v3866_v28 = vmax.f32 %v5058_v7, 0.0  ;;  %v5091_v40 = vadd.f32 %v3795_v59, %v6621_v21  ;;  %v3865_v56 = vmax.f32 %v5089_v63, 0.0 }
 0x351   :  { %v3868_v18 = vmax.f32 %v5090_v39, 0.0  ;;  %v3867_v24 = vmax.f32 %v5059_v32, 0.0 }
 0x352   :  { %v3914_v47 = vpack.c.bf16 %v3866_v28, %v3862_v60  ;;  %v3869_v31 = vmax.f32 %v5091_v40, 0.0 }
 0x353   :  { %v3916_v33 = vpack.c.bf16 %v3868_v18, %v3864_v41  ;;  %v3915_v49 = vpack.c.bf16 %v3867_v24, %v3863_v4  ;;  %v3347_v46 = vpop.f32.mrb[80].mxu0 }
 0x354   :  { %v3917_v61 = vpack.c.bf16 %v3869_v31, %v3865_v56  ;;  %v5060_v51 = vadd.f32 %v3347_v46, %v6609_v36  ;;  %v3799_v53 = vpop.f32.mrb[80].mxu1  ;;  %v3349_v1 = vpop.f32.mrb[81].mxu0 }
 0x355   :  { %v5092_v62 = vadd.f32 %v3799_v53, %v6613_v10  ;;  %v5061_v30 = vadd.f32 %v3349_v1, %v6617_v9  ;;  %v3801_v43 = vpop.f32.mrb[81].mxu1  ;;  %v3351_v57 = vpop.f32.mrb[82].mxu0  ;;  %4253 = vmatprep.mubr.bf16.mxu0 %v3915_v49 }
 0x356   :  { %v5093_v11 = vadd.f32 %v3801_v43, %v6621_v21  ;;  %v5062_v42 = vadd.f32 %v3351_v57, %v6609_v36  ;;  %v3803_v20 = vpop.f32.mrb[82].mxu1  ;;  %4350 = vmatprep.mubr.bf16.mxu1 %v3917_v61  ;;  %v3353_v6 = vpop.f32.mrb[83].mxu0  ;;  %4254 = vmatmul.mubr.bf16.gmra.mrb[108].mxu0 %v3914_v47  ;;  %v3870_v37 = vmax.f32 %v5060_v51, 0.0 }
 0x357   :  { %v5094_v34 = vadd.f32 %v3803_v20, %v6613_v10  ;;  %v5063_v48 = vadd.f32 %v3353_v6, %v6617_v9  ;;  %v3805_v3 = vpop.f32.mrb[83].mxu1  ;;  %4351 = vmatmul.mubr.bf16.gmra.mrb[108].mxu1 %v3916_v33  ;;  %v3872_v35 = vmax.f32 %v5092_v62, 0.0  ;;  %v3871_v25 = vmax.f32 %v5061_v30, 0.0 }
 0x358   :  { %v3874_v52 = vmax.f32 %v5062_v42, 0.0  ;;  %v5095_v2 = vadd.f32 %v3805_v3, %v6621_v21  ;;  %v3873_v5 = vmax.f32 %v5093_v11, 0.0 }
 0x359   :  { %v3876_v26 = vmax.f32 %v5094_v34, 0.0  ;;  %v3875_v22 = vmax.f32 %v5063_v48, 0.0 }
 0x35a   :  { %v3918_v17 = vpack.c.bf16 %v3874_v52, %v3870_v37  ;;  %v3877_v45 = vmax.f32 %v5095_v2, 0.0 }
 0x35b   :  { %v3920_v29 = vpack.c.bf16 %v3876_v26, %v3872_v35  ;;  %v3919_v54 = vpack.c.bf16 %v3875_v22, %v3871_v25  ;;  %v3357_v16 = vpop.f32.mrb[84].mxu0 }
 0x35c   :  { %v3921_v13 = vpack.c.bf16 %v3877_v45, %v3873_v5  ;;  %v5064_v55 = vadd.f32 %v3357_v16, %v6609_v36  ;;  %v3809_v23 = vpop.f32.mrb[84].mxu1  ;;  %v3359_v58 = vpop.f32.mrb[85].mxu0 }
 0x35d   :  { %v5096_v14 = vadd.f32 %v3809_v23, %v6613_v10  ;;  %v5065_v50 = vadd.f32 %v3359_v58, %v6617_v9  ;;  %v3811_v38 = vpop.f32.mrb[85].mxu1  ;;  %v3361_v15 = vpop.f32.mrb[86].mxu0  ;;  %4261 = vmatprep.mubr.bf16.mxu0 %v3919_v54 }
 0x35e   :  { %v5097_v19 = vadd.f32 %v3811_v38, %v6621_v21  ;;  %v5066_v44 = vadd.f32 %v3361_v15, %v6609_v36  ;;  %v3813_v0 = vpop.f32.mrb[86].mxu1  ;;  %4358 = vmatprep.mubr.bf16.mxu1 %v3921_v13  ;;  %v3363_v63 = vpop.f32.mrb[87].mxu0  ;;  %4262 = vmatmul.mubr.bf16.gmra.mrb[112].mxu0 %v3918_v17  ;;  %v3878_v39 = vmax.f32 %v5064_v55, 0.0 }
 0x35f   :  { %v5098_v7 = vadd.f32 %v3813_v0, %v6613_v10  ;;  %v5067_v8 = vadd.f32 %v3363_v63, %v6617_v9  ;;  %v3815_v12 = vpop.f32.mrb[87].mxu1  ;;  %4359 = vmatmul.mubr.bf16.gmra.mrb[112].mxu1 %v3920_v29  ;;  %v3880_v60 = vmax.f32 %v5096_v14, 0.0  ;;  %v3879_v28 = vmax.f32 %v5065_v50, 0.0 }
 0x360   :  { %v3882_v32 = vmax.f32 %v5066_v44, 0.0  ;;  %v5099_v59 = vadd.f32 %v3815_v12, %v6621_v21  ;;  %v3881_v4 = vmax.f32 %v5097_v19, 0.0 }
 0x361   :  { %v3884_v40 = vmax.f32 %v5098_v7, 0.0  ;;  %v3883_v41 = vmax.f32 %v5067_v8, 0.0 }
 0x362   :  { %v3922_v18 = vpack.c.bf16 %v3882_v32, %v3878_v39  ;;  %v3885_v24 = vmax.f32 %v5099_v59, 0.0 }
 0x363   :  { %v3924_v56 = vpack.c.bf16 %v3884_v40, %v3880_v60  ;;  %v3923_v47 = vpack.c.bf16 %v3883_v41, %v3879_v28  ;;  %v3367_v31 = vpop.f32.mrb[88].mxu0 }
 0x364   :  { %v3925_v33 = vpack.c.bf16 %v3885_v24, %v3881_v4  ;;  %v5068_v49 = vadd.f32 %v3367_v31, %v6609_v36  ;;  %v3819_v46 = vpop.f32.mrb[88].mxu1  ;;  %v3369_v61 = vpop.f32.mrb[89].mxu0 }
 0x365   :  { %v5100_v51 = vadd.f32 %v3819_v46, %v6613_v10  ;;  %v5069_v53 = vadd.f32 %v3369_v61, %v6617_v9  ;;  %v3821_v1 = vpop.f32.mrb[89].mxu1  ;;  %v3371_v62 = vpop.f32.mrb[90].mxu0  ;;  %4269 = vmatprep.mubr.bf16.mxu0 %v3923_v47 }
 0x366   :  { %v5101_v30 = vadd.f32 %v3821_v1, %v6621_v21  ;;  %v5070_v43 = vadd.f32 %v3371_v62, %v6609_v36  ;;  %v3823_v57 = vpop.f32.mrb[90].mxu1  ;;  %4366 = vmatprep.mubr.bf16.mxu1 %v3925_v33  ;;  %v3373_v11 = vpop.f32.mrb[91].mxu0  ;;  %4270 = vmatmul.mubr.bf16.gmra.mrb[116].mxu0 %v3922_v18  ;;  %v3886_v34 = vmax.f32 %v5068_v49, 0.0 }
 0x367   :  { %v5102_v42 = vadd.f32 %v3823_v57, %v6613_v10  ;;  %v5071_v20 = vadd.f32 %v3373_v11, %v6617_v9  ;;  %v3825_v6 = vpop.f32.mrb[91].mxu1  ;;  %4367 = vmatmul.mubr.bf16.gmra.mrb[116].mxu1 %v3924_v56  ;;  %v3888_v37 = vmax.f32 %v5100_v51, 0.0  ;;  %v3887_v52 = vmax.f32 %v5069_v53, 0.0  ;;  %v6688_v56 = vld [vmem:[#allocation14] ss:$0 sm:$0xff] }
 0x368   :  { %v3890_v48 = vmax.f32 %v5070_v43, 0.0  ;;  %v5103_v3 = vadd.f32 %v3825_v6, %v6621_v21  ;;  %v3889_v25 = vmax.f32 %v5101_v30, 0.0  ;;  %v6692_v11 = vld [vmem:[#allocation15] ss:$0 sm:$0xff] }
 0x369   :  { %v3892_v2 = vmax.f32 %v5102_v42, 0.0  ;;  %v3891_v35 = vmax.f32 %v5071_v20, 0.0 }
 0x36a   :  { %v3926_v26 = vpack.c.bf16 %v3890_v48, %v3886_v34  ;;  %v3893_v22 = vmax.f32 %v5103_v3, 0.0 }
 0x36b   :  { %v3928_v5 = vpack.c.bf16 %v3892_v2, %v3888_v37  ;;  %v3927_v17 = vpack.c.bf16 %v3891_v35, %v3887_v52  ;;  %v3377_v45 = vpop.f32.mrb[92].mxu0 }
 0x36c   :  { %v3929_v29 = vpack.c.bf16 %v3893_v22, %v3889_v25  ;;  %v5072_v54 = vadd.f32 %v3377_v45, %v6609_v36  ;;  %v3829_v16 = vpop.f32.mrb[92].mxu1  ;;  %v3379_v13 = vpop.f32.mrb[93].mxu0 }
 0x36d   :  { %v5104_v55 = vadd.f32 %v3829_v16, %v6613_v10  ;;  %v5073_v23 = vadd.f32 %v3379_v13, %v6617_v9  ;;  %v3831_v58 = vpop.f32.mrb[93].mxu1  ;;  %v3381_v14 = vpop.f32.mrb[94].mxu0  ;;  %4277 = vmatprep.mubr.bf16.mxu0 %v3927_v17 }
 0x36e   :  { %v5105_v50 = vadd.f32 %v3831_v58, %v6621_v21  ;;  %v5074_v38 = vadd.f32 %v3381_v14, %v6609_v36  ;;  %v3833_v15 = vpop.f32.mrb[94].mxu1  ;;  %4374 = vmatprep.mubr.bf16.mxu1 %v3929_v29  ;;  %v3383_v19 = vpop.f32.mrb[95].mxu0  ;;  %4278 = vmatmul.mubr.bf16.gmra.mrb[120].mxu0 %v3926_v26  ;;  %v3894_v7 = vmax.f32 %v5072_v54, 0.0 }
 0x36f   :  { %v5106_v44 = vadd.f32 %v3833_v15, %v6613_v10  ;;  %v5075_v0 = vadd.f32 %v3383_v19, %v6617_v9  ;;  %v3835_v63 = vpop.f32.mrb[95].mxu1  ;;  %4375 = vmatmul.mubr.bf16.gmra.mrb[120].mxu1 %v3928_v5  ;;  %v3896_v39 = vmax.f32 %v5104_v55, 0.0  ;;  %v3895_v32 = vmax.f32 %v5073_v23, 0.0  ;;  %v4483_v10 = vld [vmem:[#allocation2] sm:$0x1] }
 0x370   :  { %v3898_v8 = vmax.f32 %v5074_v38, 0.0  ;;  %v5107_v12 = vadd.f32 %v3835_v63, %v6621_v21  ;;  %v3897_v28 = vmax.f32 %v5105_v50, 0.0  ;;  %v5958_v9 = vmov 0  }
 0x371   :  { %v3900_v59 = vmax.f32 %v5106_v44, 0.0  ;;  %v3899_v60 = vmax.f32 %v5075_v0, 0.0  ;;  %5316 = vset.pattern.permute.xlu1 %v5958_v9 }
 0x372   :  { %v3930_v36 = vpack.c.bf16 %v3898_v8, %v3894_v7  ;;  %v3901_v40 = vmax.f32 %v5107_v12, 0.0  ;;  %4486 = vperm.xlu1 %5316, %v4483_v10  }
 0x373   :  { %v3932_v41 = vpack.c.bf16 %v3900_v59, %v3896_v39  ;;  %v3931_v4 = vpack.c.bf16 %v3899_v60, %v3895_v32 }
 0x374   :  { %v3933_v18 = vpack.c.bf16 %v3901_v40, %v3897_v28 }
 0x375   :  { %4285 = vmatprep.mubr.bf16.mxu0 %v3931_v4 }
 0x376   :  { %4382 = vmatprep.mubr.bf16.mxu1 %v3933_v18  ;;  %4286 = vmatmul.mubr.bf16.gmra.mrb[124].mxu0 %v3930_v36 }
 0x377   :  { %4383 = vmatmul.mubr.bf16.gmra.mrb[124].mxu1 %v3932_v41 }
 0x411   :  { %v4932_v21 = vpop.f32.mrb[96].mxu0 }
 0x412   :  { %v4996_v24 = vpop.f32.mrb[96].mxu1  ;;  %v4933_v47 = vpop.f32.mrb[97].mxu0 }
 0x413   :  { %v4934_v31 = vadd.f32 %v4933_v47, %v4932_v21  ;;  %v4997_v33 = vpop.f32.mrb[97].mxu1  ;;  %v4935_v49 = vpop.f32.mrb[98].mxu0 }
 0x414   :  { %v4998_v46 = vadd.f32 %v4997_v33, %v4996_v24  ;;  %v4999_v61 = vpop.f32.mrb[98].mxu1  ;;  %v4936_v51 = vpop.f32.mrb[99].mxu0 }
 0x415   :  { %v4232_v53 = vadd.f32 %v4934_v31, %v6688_v56  ;;  %v4937_v1 = vadd.f32 %v4936_v51, %v4935_v49  ;;  %v5000_v62 = vpop.f32.mrb[99].mxu1 }
 0x416   :  { %v5001_v30 = vadd.f32 %v5000_v62, %v4999_v61 }
 0x417   :  { %v4235_v43 = vadd.f32 %v4937_v1, %v6688_v56  ;;  %v4329_v57 = vadd.f32 %v4998_v46, %v4232_v53 }
 0x419   :  { %v4332_v42 = vadd.f32 %v5001_v30, %v4235_v43  ;;  %v4938_v20 = vpop.f32.mrb[100].mxu0  ;;  %v4391_v6 = vmax.f32 %v4329_v57, 0.0 }
 0x41a   :  { %v5002_v34 = vpop.f32.mrb[100].mxu1  ;;  %v4939_v48 = vpop.f32.mrb[101].mxu0 }
 0x41b   :  { %v4392_v3 = vmax.f32 %v4332_v42, 0.0  ;;  %v4940_v37 = vadd.f32 %v4939_v48, %v4938_v20  ;;  %v5003_v52 = vpop.f32.mrb[101].mxu1  ;;  %v4941_v2 = vpop.f32.mrb[102].mxu0  ;;  %v4414_v35 = vmul.f32 %v6692_v11, %v4391_v6 }
 0x41c   :  { %v5004_v25 = vadd.f32 %v5003_v52, %v5002_v34  ;;  %v5005_v26 = vpop.f32.mrb[102].mxu1  ;;  %v4942_v22 = vpop.f32.mrb[103].mxu0 }
 0x41d   :  { %v4240_v5 = vadd.f32 %v4940_v37, %v6688_v56  ;;  %v4943_v17 = vadd.f32 %v4942_v22, %v4941_v2  ;;  %v5006_v45 = vpop.f32.mrb[103].mxu1  ;;  %4430 = vxpose.xlu0.b32.start [1/16] %v4414_v35, 128  ;;  %v4415_v13 = vmul.f32 %v6692_v11, %v4392_v3 }
 0x41e   :  { %v5007_v29 = vadd.f32 %v5006_v45, %v5005_v26 }
 0x41f   :  { %v4337_v54 = vadd.f32 %v5004_v25, %v4240_v5  ;;  %v4243_v16 = vadd.f32 %v4943_v17, %v6688_v56 }
 0x421   :  { %v4393_v55 = vmax.f32 %v4337_v54, 0.0  ;;  %v4340_v23 = vadd.f32 %v5007_v29, %v4243_v16  ;;  %v4944_v58 = vpop.f32.mrb[104].mxu0  ;;  %4431 = vxpose.xlu0.b32.cont [2/16] %v4415_v13, 128 }
 0x422   :  { %v5008_v14 = vpop.f32.mrb[104].mxu1  ;;  %v4945_v50 = vpop.f32.mrb[105].mxu0 }
 0x423   :  { %v4394_v38 = vmax.f32 %v4340_v23, 0.0  ;;  %v4946_v15 = vadd.f32 %v4945_v50, %v4944_v58  ;;  %v5009_v19 = vpop.f32.mrb[105].mxu1  ;;  %v4947_v44 = vpop.f32.mrb[106].mxu0  ;;  %v4416_v0 = vmul.f32 %v6692_v11, %v4393_v55 }
 0x424   :  { %v5010_v63 = vadd.f32 %v5009_v19, %v5008_v14  ;;  %v5011_v7 = vpop.f32.mrb[106].mxu1  ;;  %v4948_v8 = vpop.f32.mrb[107].mxu0 }
 0x425   :  { %v4248_v12 = vadd.f32 %v4946_v15, %v6688_v56  ;;  %v4949_v39 = vadd.f32 %v4948_v8, %v4947_v44  ;;  %v5012_v32 = vpop.f32.mrb[107].mxu1  ;;  %4432 = vxpose.xlu0.b32.cont [3/16] %v4416_v0, 128  ;;  %v4417_v36 = vmul.f32 %v6692_v11, %v4394_v38 }
 0x426   :  { %v5013_v59 = vadd.f32 %v5012_v32, %v5011_v7 }
 0x427   :  { %v4345_v60 = vadd.f32 %v5010_v63, %v4248_v12  ;;  %v4251_v28 = vadd.f32 %v4949_v39, %v6688_v56 }
 0x429   :  { %v4395_v40 = vmax.f32 %v4345_v60, 0.0  ;;  %v4348_v41 = vadd.f32 %v5013_v59, %v4251_v28  ;;  %v4950_v4 = vpop.f32.mrb[108].mxu0  ;;  %4433 = vxpose.xlu0.b32.cont [4/16] %v4417_v36, 128 }
 0x42a   :  { %v5014_v18 = vpop.f32.mrb[108].mxu1  ;;  %v4951_v10 = vpop.f32.mrb[109].mxu0 }
 0x42b   :  { %v4396_v21 = vmax.f32 %v4348_v41, 0.0  ;;  %v4952_v24 = vadd.f32 %v4951_v10, %v4950_v4  ;;  %v5015_v47 = vpop.f32.mrb[109].mxu1  ;;  %v4953_v31 = vpop.f32.mrb[110].mxu0  ;;  %v4418_v33 = vmul.f32 %v6692_v11, %v4395_v40 }
 0x42c   :  { %v5016_v49 = vadd.f32 %v5015_v47, %v5014_v18  ;;  %v5017_v46 = vpop.f32.mrb[110].mxu1  ;;  %v4954_v61 = vpop.f32.mrb[111].mxu0 }
 0x42d   :  { %v4256_v51 = vadd.f32 %v4952_v24, %v6688_v56  ;;  %v4955_v53 = vadd.f32 %v4954_v61, %v4953_v31  ;;  %v5018_v1 = vpop.f32.mrb[111].mxu1  ;;  %4434 = vxpose.xlu0.b32.cont [5/16] %v4418_v33, 128  ;;  %v4419_v57 = vmul.f32 %v6692_v11, %v4396_v21 }
 0x42e   :  { %v5019_v62 = vadd.f32 %v5018_v1, %v5017_v46 }
 0x42f   :  { %v4353_v30 = vadd.f32 %v5016_v49, %v4256_v51  ;;  %v4259_v43 = vadd.f32 %v4955_v53, %v6688_v56 }
 0x431   :  { %v4397_v42 = vmax.f32 %v4353_v30, 0.0  ;;  %v4356_v20 = vadd.f32 %v5019_v62, %v4259_v43  ;;  %v4956_v6 = vpop.f32.mrb[112].mxu0  ;;  %4435 = vxpose.xlu0.b32.cont [6/16] %v4419_v57, 128 }
 0x432   :  { %v5020_v34 = vpop.f32.mrb[112].mxu1  ;;  %v4957_v48 = vpop.f32.mrb[113].mxu0 }
 0x433   :  { %v4398_v3 = vmax.f32 %v4356_v20, 0.0  ;;  %v4958_v37 = vadd.f32 %v4957_v48, %v4956_v6  ;;  %v5021_v52 = vpop.f32.mrb[113].mxu1  ;;  %v4959_v2 = vpop.f32.mrb[114].mxu0  ;;  %v4420_v35 = vmul.f32 %v6692_v11, %v4397_v42 }
 0x434   :  { %v5022_v25 = vadd.f32 %v5021_v52, %v5020_v34  ;;  %v5023_v26 = vpop.f32.mrb[114].mxu1  ;;  %v4960_v22 = vpop.f32.mrb[115].mxu0 }
 0x435   :  { %v4264_v5 = vadd.f32 %v4958_v37, %v6688_v56  ;;  %v4961_v17 = vadd.f32 %v4960_v22, %v4959_v2  ;;  %v5024_v45 = vpop.f32.mrb[115].mxu1  ;;  %4436 = vxpose.xlu0.b32.cont [7/16] %v4420_v35, 128  ;;  %v4421_v13 = vmul.f32 %v6692_v11, %v4398_v3 }
 0x436   :  { %v5025_v29 = vadd.f32 %v5024_v45, %v5023_v26 }
 0x437   :  { %v4361_v54 = vadd.f32 %v5022_v25, %v4264_v5  ;;  %v4267_v16 = vadd.f32 %v4961_v17, %v6688_v56 }
 0x439   :  { %v4399_v55 = vmax.f32 %v4361_v54, 0.0  ;;  %v4364_v23 = vadd.f32 %v5025_v29, %v4267_v16  ;;  %v4962_v58 = vpop.f32.mrb[116].mxu0  ;;  %4437 = vxpose.xlu0.b32.cont [8/16] %v4421_v13, 128 }
 0x43a   :  { %v5026_v14 = vpop.f32.mrb[116].mxu1  ;;  %v4963_v50 = vpop.f32.mrb[117].mxu0 }
 0x43b   :  { %v4400_v38 = vmax.f32 %v4364_v23, 0.0  ;;  %v4964_v15 = vadd.f32 %v4963_v50, %v4962_v58  ;;  %v5027_v19 = vpop.f32.mrb[117].mxu1  ;;  %v4965_v44 = vpop.f32.mrb[118].mxu0  ;;  %v4422_v0 = vmul.f32 %v6692_v11, %v4399_v55 }
 0x43c   :  { %v5028_v63 = vadd.f32 %v5027_v19, %v5026_v14  ;;  %v5029_v7 = vpop.f32.mrb[118].mxu1  ;;  %v4966_v8 = vpop.f32.mrb[119].mxu0 }
 0x43d   :  { %v4272_v12 = vadd.f32 %v4964_v15, %v6688_v56  ;;  %v4967_v39 = vadd.f32 %v4966_v8, %v4965_v44  ;;  %v5030_v32 = vpop.f32.mrb[119].mxu1  ;;  %4438 = vxpose.xlu0.b32.cont [9/16] %v4422_v0, 128  ;;  %v4423_v36 = vmul.f32 %v6692_v11, %v4400_v38 }
 0x43e   :  { %v5031_v59 = vadd.f32 %v5030_v32, %v5029_v7 }
 0x43f   :  { %v4369_v60 = vadd.f32 %v5028_v63, %v4272_v12  ;;  %v4275_v28 = vadd.f32 %v4967_v39, %v6688_v56 }
 0x441   :  { %v4401_v40 = vmax.f32 %v4369_v60, 0.0  ;;  %v4372_v41 = vadd.f32 %v5031_v59, %v4275_v28  ;;  %v4968_v4 = vpop.f32.mrb[120].mxu0  ;;  %4439 = vxpose.xlu0.b32.cont [10/16] %v4423_v36, 128 }
 0x442   :  { %v5032_v18 = vpop.f32.mrb[120].mxu1  ;;  %v4969_v10 = vpop.f32.mrb[121].mxu0 }
 0x443   :  { %v4402_v21 = vmax.f32 %v4372_v41, 0.0  ;;  %v4970_v24 = vadd.f32 %v4969_v10, %v4968_v4  ;;  %v5033_v47 = vpop.f32.mrb[121].mxu1  ;;  %v4971_v31 = vpop.f32.mrb[122].mxu0  ;;  %v4424_v33 = vmul.f32 %v6692_v11, %v4401_v40 }
 0x444   :  { %v5034_v49 = vadd.f32 %v5033_v47, %v5032_v18  ;;  %v5035_v46 = vpop.f32.mrb[122].mxu1  ;;  %v4972_v61 = vpop.f32.mrb[123].mxu0 }
 0x445   :  { %v4280_v51 = vadd.f32 %v4970_v24, %v6688_v56  ;;  %v4973_v53 = vadd.f32 %v4972_v61, %v4971_v31  ;;  %v5036_v1 = vpop.f32.mrb[123].mxu1  ;;  %4440 = vxpose.xlu0.b32.cont [11/16] %v4424_v33, 128  ;;  %v4425_v57 = vmul.f32 %v6692_v11, %v4402_v21 }
 0x446   :  { %v5037_v62 = vadd.f32 %v5036_v1, %v5035_v46 }
 0x447   :  { %v4377_v30 = vadd.f32 %v5034_v49, %v4280_v51  ;;  %v4283_v43 = vadd.f32 %v4973_v53, %v6688_v56 }
 0x449   :  { %v4403_v42 = vmax.f32 %v4377_v30, 0.0  ;;  %v4380_v20 = vadd.f32 %v5037_v62, %v4283_v43  ;;  %v4974_v6 = vpop.f32.mrb[124].mxu0  ;;  %4441 = vxpose.xlu0.b32.cont [12/16] %v4425_v57, 128  ;;  %v4487_v62 = vpop.permute.xlu1 %4486 }
 0x44a   :  { %v5038_v34 = vpop.f32.mrb[124].mxu1  ;;  %v4975_v48 = vpop.f32.mrb[125].mxu0  ;;  %v4492_v57 = vrot.slane %v4487_v62, %v6246_v27 }
 0x44b   :  { %v4404_v3 = vmax.f32 %v4380_v20, 0.0  ;;  %v4976_v37 = vadd.f32 %v4975_v48, %v4974_v6  ;;  %v5039_v52 = vpop.f32.mrb[125].mxu1  ;;  %v4977_v2 = vpop.f32.mrb[126].mxu0  ;;  %v4426_v35 = vmul.f32 %v6692_v11, %v4403_v42 }
 0x44c   :  { %v5040_v25 = vadd.f32 %v5039_v52, %v5038_v34  ;;  %v5041_v26 = vpop.f32.mrb[126].mxu1  ;;  %v4978_v22 = vpop.f32.mrb[127].mxu0 }
 0x44d   :  { %v4288_v5 = vadd.f32 %v4976_v37, %v6688_v56  ;;  %v4979_v17 = vadd.f32 %v4978_v22, %v4977_v2  ;;  %v5042_v45 = vpop.f32.mrb[127].mxu1  ;;  %4442 = vxpose.xlu0.b32.cont [13/16] %v4426_v35, 128  ;;  %v4427_v13 = vmul.f32 %v6692_v11, %v4404_v3 }
 0x44e   :  { %v5043_v29 = vadd.f32 %v5042_v45, %v5041_v26 }
 0x44f   :  { %v4385_v54 = vadd.f32 %v5040_v25, %v4288_v5  ;;  %v4291_v16 = vadd.f32 %v4979_v17, %v6688_v56 }
 0x451   :  { %v4405_v55 = vmax.f32 %v4385_v54, 0.0  ;;  %v4388_v23 = vadd.f32 %v5043_v29, %v4291_v16  ;;  %4443 = vxpose.xlu0.b32.cont [14/16] %v4427_v13, 128 }
 0x453   :  { %v4406_v58 = vmax.f32 %v4388_v23, 0.0  ;;  %v4428_v14 = vmul.f32 %v6692_v11, %v4405_v55 }
 0x455   :  { %4444 = vxpose.xlu0.b32.cont [15/16] %v4428_v14, 128  ;;  %v4429_v50 = vmul.f32 %v6692_v11, %v4406_v58 }
 0x459   :  { %4445 = vxpose.xlu0.b32.end [16/16] %v4429_v50, 128 }
 0x482   :  { %5317 = vset.pattern.permute.xlu0 %v5958_v9 }
 0x49d   :  { %v4446_v38 = vpop.trf.xlu0 }
 0x4a1   :  { %v4447_v15 = vpop.trf.xlu0 }
 0x4a2   :  { %v4462_v12 = vadd.f32 %v4447_v15, %v4446_v38 }
 0x4a5   :  { %v4448_v19 = vpop.trf.xlu0 }
 0x4a6   :  { %v4463_v39 = vadd.f32 %v4462_v12, %v4448_v19 }
 0x4a9   :  { %v4449_v44 = vpop.trf.xlu0 }
 0x4aa   :  { %v4464_v59 = vadd.f32 %v4463_v39, %v4449_v44 }
 0x4ad   :  { %v4450_v0 = vpop.trf.xlu0 }
 0x4ae   :  { %v4465_v60 = vadd.f32 %v4464_v59, %v4450_v0 }
 0x4b1   :  { %v4451_v56 = vpop.trf.xlu0 }
 0x4b2   :  { %v4466_v36 = vadd.f32 %v4465_v60, %v4451_v56 }
 0x4b5   :  { %v4452_v63 = vpop.trf.xlu0 }
 0x4b6   :  { %v4467_v11 = vadd.f32 %v4466_v36, %v4452_v63 }
 0x4b9   :  { %v4453_v7 = vpop.trf.xlu0 }
 0x4ba   :  { %v4468_v41 = vadd.f32 %v4467_v11, %v4453_v7 }
 0x4bd   :  { %v4454_v8 = vpop.trf.xlu0 }
 0x4be   :  { %v4469_v9 = vadd.f32 %v4468_v41, %v4454_v8 }
 0x4c1   :  { %v4455_v32 = vpop.trf.xlu0 }
 0x4c2   :  { %v4470_v18 = vadd.f32 %v4469_v9, %v4455_v32 }
 0x4c5   :  { %v4456_v28 = vpop.trf.xlu0 }
 0x4c6   :  { %v4471_v10 = vadd.f32 %v4470_v18, %v4456_v28 }
 0x4c9   :  { %v4457_v40 = vpop.trf.xlu0 }
 0x4ca   :  { %v4472_v24 = vadd.f32 %v4471_v10, %v4457_v40 }
 0x4cd   :  { %v4458_v4 = vpop.trf.xlu0 }
 0x4ce   :  { %v4473_v47 = vadd.f32 %v4472_v24, %v4458_v4 }
 0x4d1   :  { %v4459_v21 = vpop.trf.xlu0 }
 0x4d2   :  { %v4474_v33 = vadd.f32 %v4473_v47, %v4459_v21 }
 0x4d5   :  { %v4460_v31 = vpop.trf.xlu0 }
 0x4d6   :  { %v4475_v49 = vadd.f32 %v4474_v33, %v4460_v31 }
 0x4d9   :  { %v4461_v46 = vpop.trf.xlu0 }
 0x4da   :  { %v4476_v61 = vadd.f32 %v4475_v49, %v4461_v46 }
 0x4dc   :  { %v4477_v51 = vrot.slane %v4476_v61, 4 }
 0x4de   :  { %v4478_v53 = vadd.f32 %v4477_v51, %v4476_v61 }
 0x4e0   :  { %v4479_v1 = vrot.slane %v4478_v53, 2 }
 0x4e2   :  { %v4480_v30 = vadd.f32 %v4479_v1, %v4478_v53 }
 0x4e4   :  { %v4481_v43 = vrot.slane %v4480_v30, 1 }
 0x4e6   :  { %v4482_v42 = vadd.f32 %v4481_v43, %v4480_v30 }
 0x4e8   :  { %v4493_v20 = vadd.f32 %v4492_v57, %v4482_v42 }
 0x4ea   :  { %4494 = vst [vmem:[#allocation17] sm:$0x1] %v4493_v20 }
 0x4eb   :  { %5921 = shalt.err (!%p5918_p12)
}
 0x4ec   :  { %s5922_s5 = scalar_lea.hbm %s6747_s9, 16 }
 0x4ed   :  { %p5923_p13 = scmp.ne.s32.totalorder %s6747_s9, %s5922_s5  ;;  %p5926_p0 = scmp.lt.u32.totalorder %s5922_s5, %s6747_s9 }
 0x4ef   :  { %p5928_p1 = pnand %p5926_p0, %p5923_p13 }
 0x4f1   :  { %5931 = shalt.err (!%p5928_p1)
}
 0x4f2   :  { %4504 = dma.vmem_to_hbm [thread:$0]  %s4502_s17, 16, %s6747_s9, [#allocation5]  }
 0x4f3   :  { %5942 = dma.done.wait [#allocation5], 16  }
 0x4f4   :  { %5943 = vsyncadd [#allocation5], 4294967280 }
 0x4f5   :  { %4508 = vsyncpa [#allocation4], 1 }
 0x4f6   :  { %4509 = vsyncpa [#allocation7], 1 }
 0x4f7   :  { %4510 = vsyncpa [#allocation10], 1 }
 0x4f8   :  { %4511 = vsyncpa [#allocation13], 1 }
 0x4f9   :  { %4512 = vsyncpa [#allocation16], 1 }
 0x4fa   :  { %4513 = vsyncpa [#allocation5], 1 }

// kernel: tpu_custom_call.1
= control target key start
LH: loop header
LB: loop body
LE: loop exit
PB: predicated region body
PF: predicated region fallthrough
CT: control target
= control target key end

     0   :  { %s6738_s0 = inlined_call_operand.hbm [shape: f32[128,160], index: 0, kind: input, shape index: {}]   ;;  %s6739_s1 = inlined_call_operand.hbm [shape: bf16[160,1024], index: 1, kind: input, shape index: {}]   ;;  %s6740_s2 = inlined_call_operand.hbm [shape: f32[1,1024], index: 2, kind: input, shape index: {}]   ;;  %s6741_s3 = inlined_call_operand.hbm [shape: bf16[1024,512], index: 3, kind: input, shape index: {}]   ;;  %s6742_s4 = inlined_call_operand.hbm [shape: f32[1,512], index: 4, kind: input, shape index: {}]   ;;  %s6743_s5 = inlined_call_operand.hbm [shape: bf16[512,128], index: 5, kind: input, shape index: {}]   ;;  %s6744_s6 = inlined_call_operand.hbm [shape: f32[1,128], index: 6, kind: input, shape index: {}]   ;;  %s6745_s7 = inlined_call_operand.hbm [shape: f32[1,128], index: 7, kind: input, shape index: {}]   ;;  %s6746_s8 = inlined_call_operand.<no memory space> [shape: f32[1,1], index: 8, kind: input, shape index: {}]   ;;  %s6747_s9 = inlined_call_operand.hbm [shape: f32[1,128], index: 9, kind: output, shape index: {}]  }
   0x1   :  { %v14_v0 = vstv %s6746_s8 }
   0x2   :  { %15 = vst [vmem:[#allocation2] sm:$0x1] %v14_v0 }
   0x3   :  { %16 = vsyncpa [#allocation4], 0 }
   0x4   :  { %17 = vsyncpa [#allocation7], 0 }
   0x5   :  { %18 = vsyncpa [#allocation10], 0 }
   0x6   :  { %19 = vsyncpa [#allocation13], 0 }
   0x7   :  { %20 = vsyncpa [#allocation16], 0 }
   0x8   :  { %21 = vsyncpa [#allocation5], 0  ;;  %s5944_s11 = smov [#allocation6]   ;;  %s5734_s15 = scalar_lea.hbm %s6739_s1, 10240 }
   0x9   :  { %s39_s12 = sshll.u32 %s5944_s11, 4  ;;  %p5735_p0 = scmp.ne.s32.totalorder %s6739_s1, %s5734_s15  ;;  %s40_s12 = int_to_ptr.vmem [resolvable:$true] %s39_s12 }
   0xa   :  { %p5738_p1 = scmp.lt.u32.totalorder %s5734_s15, %s6739_s1 }
   0xc   :  { %p5740_p2 = pnand %p5738_p1, %p5735_p0 }
   0xe   :  { %5743 = shalt.err (!%p5740_p2)
}
   0xf   :  { %s5744_s19 = scalar_lea.vmem %s40_s12, 10240  ;;  %p5749_p4 = scmp.lt.s32.totalorder %s40_s12, %s40_s12 }
  0x10   :  { %p5745_p3 = scmp.ne.s32.totalorder %s40_s12, %s5744_s19  ;;  %p5750_p5 = scmp.lt.s32.totalorder %s5744_s19, %s5744_s19 }
  0x12   :  { %p5751_p6 = por %p5750_p5, %p5749_p4 }
  0x14   :  { %p5752_p7 = pnand %p5751_p6, %p5745_p3 }
  0x16   :  { %5755 = shalt.err (!%p5752_p7)
}
  0x17   :  { %s5945_s20 = smov 512   ;;  %s5946_s21 = smov 32  }
  0x18   :  { %45 = dma.hbm_to_vmem [thread:$0]  %s6739_s1, 10240, %s40_s12, [#allocation7], %s5945_s20, %s5945_s20, %s5946_s21  }
  0x19   :  { %s5947_s24 = smov [#allocation9]   ;;  %s5948_s26 = smov [#allocation12]  }
  0x1a   :  { %s61_s25 = sshll.u32 %s5947_s24, 4  ;;  %s83_s27 = sshll.u32 %s5948_s26, 4  ;;  %s62_s25 = int_to_ptr.vmem [resolvable:$true] %s61_s25  ;;  %s84_s27 = int_to_ptr.vmem [resolvable:$true] %s83_s27 }
  0x1b   :  { %s5756_s30 = scalar_lea.hbm %s6741_s3, 32768 }
  0x1c   :  { %p5757_p8 = scmp.ne.s32.totalorder %s6741_s3, %s5756_s30  ;;  %p5760_p9 = scmp.lt.u32.totalorder %s5756_s30, %s6741_s3 }
  0x1e   :  { %p5762_p10 = pnand %p5760_p9, %p5757_p8 }
  0x20   :  { %5765 = shalt.err (!%p5762_p10)
}
  0x21   :  { %s5766_s1 = scalar_lea.vmem %s62_s25, 32768  ;;  %p5771_p12 = scmp.lt.s32.totalorder %s62_s25, %s62_s25 }
  0x22   :  { %p5767_p11 = scmp.ne.s32.totalorder %s62_s25, %s5766_s1  ;;  %p5772_p13 = scmp.lt.s32.totalorder %s5766_s1, %s5766_s1 }
  0x24   :  { %p5773_p0 = por %p5772_p13, %p5771_p12 }
  0x26   :  { %p5774_p1 = pnand %p5773_p0, %p5767_p11 }
  0x28   :  { %5777 = shalt.err (!%p5774_p1)
}
  0x29   :  { %s5949_s12 = smov 256   ;;  %s5950_s15 = smov 16  }
  0x2a   :  { %67 = dma.hbm_to_vmem [thread:$0]  %s6741_s3, 32768, %s62_s25, [#allocation10], %s5949_s12, %s5949_s12, %s5950_s15  }
  0x2b   :  { %s5778_s19 = scalar_lea.hbm %s6743_s5, 4096 }
  0x2c   :  { %p5779_p2 = scmp.ne.s32.totalorder %s6743_s5, %s5778_s19  ;;  %p5782_p3 = scmp.lt.u32.totalorder %s5778_s19, %s6743_s5 }
  0x2e   :  { %p5784_p4 = pnand %p5782_p3, %p5779_p2 }
  0x30   :  { %5787 = shalt.err (!%p5784_p4)
}
  0x31   :  { %s5788_s24 = scalar_lea.vmem %s84_s27, 4096  ;;  %p5793_p6 = scmp.lt.s32.totalorder %s84_s27, %s84_s27 }
  0x32   :  { %p5789_p5 = scmp.ne.s32.totalorder %s84_s27, %s5788_s24  ;;  %p5794_p7 = scmp.lt.s32.totalorder %s5788_s24, %s5788_s24 }
  0x34   :  { %p5795_p8 = por %p5794_p7, %p5793_p6 }
  0x36   :  { %p5796_p9 = pnand %p5795_p8, %p5789_p5 }
  0x38   :  { %5799 = shalt.err (!%p5796_p9)
}
  0x39   :  { %s5951_s3 = smov 64   ;;  %s5952_s25 = smov 4  }
  0x3a   :  { %89 = dma.hbm_to_vmem [thread:$0]  %s6743_s5, 4096, %s84_s27, [#allocation13], %s5951_s3, %s5951_s3, %s5952_s25  }
  0x3b   :  { %s5953_s29 = smov [#allocation3]   ;;  %s5954_s10 = smov [#allocation8]  }
  0x3c   :  { %s27_s30 = sshll.u32 %s5953_s29, 4  ;;  %s52_s11 = sshll.u32 %s5954_s10, 4  ;;  %s28_s30 = int_to_ptr.vmem [resolvable:$true] %s27_s30  ;;  %s53_s11 = int_to_ptr.vmem [resolvable:$true] %s52_s11 }
  0x3d   :  { %s5800_s1 = scalar_lea.hbm %s6738_s0, 4096 }
  0x3e   :  { %p5801_p10 = scmp.ne.s32.totalorder %s6738_s0, %s5800_s1  ;;  %p5804_p11 = scmp.lt.u32.totalorder %s5800_s1, %s6738_s0 }
  0x40   :  { %p5806_p12 = pnand %p5804_p11, %p5801_p10 }
  0x42   :  { %5809 = shalt.err (!%p5806_p12)
}
  0x43   :  { %s5810_s5 = scalar_lea.vmem %s28_s30, 4096  ;;  %p5815_p0 = scmp.lt.s32.totalorder %s28_s30, %s28_s30 }
  0x44   :  { %p5811_p13 = scmp.ne.s32.totalorder %s28_s30, %s5810_s5  ;;  %p5816_p1 = scmp.lt.s32.totalorder %s5810_s5, %s5810_s5 }
  0x46   :  { %p5817_p2 = por %p5816_p1, %p5815_p0 }
  0x48   :  { %p5818_p3 = pnand %p5817_p2, %p5811_p13 }
  0x4a   :  { %5821 = shalt.err (!%p5818_p3)
}
  0x4b   :  { %33 = dma.hbm_to_vmem [thread:$0]  %s6738_s0, 4096, %s28_s30, [#allocation4], %s5949_s12, %s5949_s12, %s5950_s15  }
  0x4c   :  { %s5822_s22 = scalar_lea.hbm %s6740_s2, 128 }
  0x4d   :  { %p5823_p4 = scmp.ne.s32.totalorder %s6740_s2, %s5822_s22  ;;  %p5826_p5 = scmp.lt.u32.totalorder %s5822_s22, %s6740_s2 }
  0x4f   :  { %p5828_p6 = pnand %p5826_p5, %p5823_p4 }
  0x51   :  { %5831 = shalt.err (!%p5828_p6)
}
  0x52   :  { %s5832_s26 = scalar_lea.vmem %s53_s11, 128  ;;  %p5837_p8 = scmp.lt.s32.totalorder %s53_s11, %s53_s11 }
  0x53   :  { %p5833_p7 = scmp.ne.s32.totalorder %s53_s11, %s5832_s26  ;;  %p5838_p9 = scmp.lt.s32.totalorder %s5832_s26, %s5832_s26 }
  0x55   :  { %p5839_p10 = por %p5838_p9, %p5837_p8 }
  0x57   :  { %p5840_p11 = pnand %p5839_p10, %p5833_p7 }
  0x59   :  { %5843 = shalt.err (!%p5840_p11)
}
  0x5a   :  { %55 = dma.hbm_to_vmem [thread:$0]  %s6740_s2, 128, %s53_s11, [#allocation7]  }
  0x5b   :  { %s5955_s15 = smov [#allocation11]   ;;  %s5956_s29 = smov [#allocation14]  }
  0x5c   :  { %s74_s28 = sshll.u32 %s5955_s15, 4  ;;  %s96_s30 = sshll.u32 %s5956_s29, 4  ;;  %s75_s28 = int_to_ptr.vmem [resolvable:$true] %s74_s28  ;;  %s97_s30 = int_to_ptr.vmem [resolvable:$true] %s96_s30 }
  0x5d   :  { %s5844_s14 = scalar_lea.hbm %s6742_s4, 64 }
  0x5e   :  { %p5845_p12 = scmp.ne.s32.totalorder %s6742_s4, %s5844_s14  ;;  %p5848_p13 = scmp.lt.u32.totalorder %s5844_s14, %s6742_s4 }
  0x60   :  { %p5850_p0 = pnand %p5848_p13, %p5845_p12 }
  0x62   :  { %5853 = shalt.err (!%p5850_p0)
}
  0x63   :  { %s5854_s2 = scalar_lea.vmem %s75_s28, 64  ;;  %p5859_p2 = scmp.lt.s32.totalorder %s75_s28, %s75_s28 }
  0x64   :  { %p5855_p1 = scmp.ne.s32.totalorder %s75_s28, %s5854_s2  ;;  %p5860_p3 = scmp.lt.s32.totalorder %s5854_s2, %s5854_s2 }
  0x66   :  { %p5861_p4 = por %p5860_p3, %p5859_p2 }
  0x68   :  { %p5862_p5 = pnand %p5861_p4, %p5855_p1 }
  0x6a   :  { %5865 = shalt.err (!%p5862_p5)
}
  0x6b   :  { %77 = dma.hbm_to_vmem [thread:$0]  %s6742_s4, 64, %s75_s28, [#allocation10]  }
  0x6c   :  { %s5866_s19 = scalar_lea.hbm %s6744_s6, 16 }
  0x6d   :  { %p5867_p6 = scmp.ne.s32.totalorder %s6744_s6, %s5866_s19  ;;  %p5870_p7 = scmp.lt.u32.totalorder %s5866_s19, %s6744_s6 }
  0x6f   :  { %p5872_p8 = pnand %p5870_p7, %p5867_p6 }
  0x71   :  { %5875 = shalt.err (!%p5872_p8)
}
  0x72   :  { %s5876_s24 = scalar_lea.vmem %s97_s30, 16  ;;  %s5880_s3 = scalar_lea.vmem %s97_s30, 32 }
  0x73   :  { %p5877_p9 = scmp.ne.s32.totalorder %s97_s30, %s5876_s24  ;;  %p5881_p10 = scmp.lt.s32.totalorder %s97_s30, %s97_s30 }
  0x74   :  { %p5882_p11 = scmp.lt.s32.totalorder %s5880_s3, %s5876_s24 }
  0x76   :  { %p5883_p12 = por %p5882_p11, %p5881_p10 }
  0x78   :  { %p5884_p13 = pnand %p5883_p12, %p5877_p9 }
  0x7a   :  { %5887 = shalt.err (!%p5884_p13)
}
  0x7b   :  { %99 = dma.hbm_to_vmem [thread:$0]  %s6744_s6, 16, %s97_s30, [#allocation13]  }
  0x7c   :  { %s5957_s26 = smov [#allocation15]   ;;  %s5888_s28 = scalar_lea.hbm %s6745_s7, 16 }
  0x7d   :  { %s106_s0 = sshll.u32 %s5957_s26, 4  ;;  %p5889_p0 = scmp.ne.s32.totalorder %s6745_s7, %s5888_s28  ;;  %s107_s0 = int_to_ptr.vmem [resolvable:$true] %s106_s0 }
  0x7e   :  { %p5892_p1 = scmp.lt.u32.totalorder %s5888_s28, %s6745_s7 }
  0x80   :  { %p5894_p2 = pnand %p5892_p1, %p5889_p0 }
  0x82   :  { %5897 = shalt.err (!%p5894_p2)
}
  0x83   :  { %s5898_s1 = scalar_lea.vmem %s107_s0, 16  ;;  %s5902_s6 = scalar_lea.vmem %s107_s0, 32 }
  0x84   :  { %p5899_p3 = scmp.ne.s32.totalorder %s107_s0, %s5898_s1  ;;  %p5903_p4 = scmp.lt.s32.totalorder %s107_s0, %s107_s0 }
  0x85   :  { %p5904_p5 = scmp.lt.s32.totalorder %s5902_s6, %s5898_s1 }
  0x87   :  { %p5905_p6 = por %p5904_p5, %p5903_p4 }
  0x89   :  { %p5906_p7 = pnand %p5905_p6, %p5899_p3 }
  0x8b   :  { %5909 = shalt.err (!%p5906_p7)
}
  0x8c   :  { %109 = dma.hbm_to_vmem [thread:$0]  %s6745_s7, 16, %s107_s0, [#allocation16]  }
  0x8d   :  { %5932 = dma.done.wait [#allocation4], 4096  }
  0x8e   :  { %5933 = vsyncadd [#allocation4], 4294963200 }
  0x8f   :  { %5934 = dma.done.wait [#allocation7], 10368  }
  0x90   :  { %5935 = vsyncadd [#allocation7], 4294956928 }
  0x91   :  { %5936 = dma.done.wait [#allocation10], 32832  }
  0x92   :  { %5937 = vsyncadd [#allocation10], 4294934464 }
  0x93   :  { %5938 = dma.done.wait [#allocation13], 4112  }
  0x94   :  { %5939 = vsyncadd [#allocation13], 4294963184 }
  0x95   :  { %5940 = dma.done.wait [#allocation16], 16  }
  0x96   :  { %5941 = vsyncadd [#allocation16], 4294967280  ;;  %v185_v1 = vld [vmem:[#allocation6] sm:$0xff]  ;;  %v138_v14 = vld [vmem:[#allocation3 + $0x8] sm:$0xff]  ;;  %vm707_vm0 = vcmask 261120   ;;  %s5959_s7 = smov [#allocation17]  }
  0x97   :  { %v189_v2 = vld [vmem:[#allocation6 + $0x20] sm:$0xff]  ;;  %v140_v15 = vld [vmem:[#allocation3 + $0x18] sm:$0xff]  ;;  %v186_v21 = vld [vmem:[#allocation6 + $0x8] sm:$0xff]  ;;  %s4501_s17 = sshll.u32 %s5959_s7, 4  ;;  %s4502_s17 = int_to_ptr.vmem [resolvable:$true] %s4501_s17 }
  0x98   :  { %v193_v3 = vld [vmem:[#allocation6 + $0x40] sm:$0xff]  ;;  %v4515_v4 = vcombine.high %v185_v1, %v189_v2  ;;  %v4514_v5 = vcombine.low %v185_v1, %v189_v2  ;;  %v6115_v17 = vpack.c.bf16 %v140_v15, %v138_v14  ;;  %v190_v22 = vld [vmem:[#allocation6 + $0x28] sm:$0xff]  ;;  %v144_v15 = vld [vmem:[#allocation3 + $0x38] sm:$0xff]  ;;  %s5910_s18 = scalar_lea.vmem %s4502_s17, 16  ;;  %s5914_s2 = scalar_lea.vmem %s4502_s17, 32 }
  0x99   :  { %v197_v6 = vld [vmem:[#allocation6 + $0x60] sm:$0xff]  ;;  %v4517_v24 = vcombine.high %v186_v21, %v190_v22  ;;  %v4516_v25 = vcombine.low %v186_v21, %v190_v22  ;;  %v194_v26 = vld [vmem:[#allocation6 + $0x48] sm:$0xff]  ;;  %p5911_p8 = scmp.ne.s32.totalorder %s4502_s17, %s5910_s18  ;;  %p5915_p9 = scmp.lt.s32.totalorder %s4502_s17, %s4502_s17 }
  0x9a   :  { %v4523_v7 = vcombine.high %v193_v3, %v197_v6  ;;  %v201_v8 = vld [vmem:[#allocation6 + $0x80] sm:$0xff]  ;;  %732 = vmatprep.subr.bf16.mxu0 %v4515_v4  ;;  %v4522_v10 = vcombine.low %v193_v3, %v197_v6  ;;  %4594 = vmatprep.mubr.msk.bf16.mxu0 %vm707_vm0, %v6115_v17  ;;  %v198_v28 = vld [vmem:[#allocation6 + $0x68] sm:$0xff]  ;;  %p5916_p10 = scmp.lt.s32.totalorder %s5914_s2, %s5910_s18 }
  0x9b   :  { %v205_v9 = vld [vmem:[#allocation6 + $0xa0] sm:$0xff]  ;;  %733 = vmatpush1.bf16.msra.mxu0 %v4514_v5  ;;  %4602 = vmatprep.mubr.msk.bf16.mxu1 %vm707_vm0, %v6115_v17  ;;  %v202_v29 = vld [vmem:[#allocation6 + $0x88] sm:$0xff]  ;;  %v4525_v33 = vcombine.high %v194_v26, %v198_v28  ;;  %v4524_v34 = vcombine.low %v194_v26, %v198_v28 }
  0x9c   :  { %734 = vmatprep.subr.bf16.mxu0 %v4523_v7  ;;  %v4531_v11 = vcombine.high %v201_v8, %v205_v9  ;;  %v209_v12 = vld [vmem:[#allocation6 + $0xc0] sm:$0xff]  ;;  %v4530_v16 = vcombine.low %v201_v8, %v205_v9  ;;  %v206_v30 = vld [vmem:[#allocation6 + $0xa8] sm:$0xff]  ;;  %845 = vmatprep.subr.bf16.mxu1 %v4517_v24  ;;  %v187_v8 = vld [vmem:[#allocation6 + $0x10] sm:$0xff]  ;;  %p5917_p11 = por %p5916_p10, %p5915_p9 }
  0x9d   :  { %v213_v13 = vld [vmem:[#allocation6 + $0xe0] sm:$0xff]  ;;  %846 = vmatpush1.bf16.msra.mxu1 %v4516_v25  ;;  %v4533_v36 = vcombine.high %v202_v29, %v206_v30  ;;  %v210_v38 = vld [vmem:[#allocation6 + $0xc8] sm:$0xff]  ;;  %v4532_v42 = vcombine.low %v202_v29, %v206_v30  ;;  %v191_v9 = vld [vmem:[#allocation6 + $0x30] sm:$0xff] }
  0x9e   :  { %v4539_v18 = vcombine.high %v209_v12, %v213_v13  ;;  %v217_v19 = vld [vmem:[#allocation6 + $0x100] sm:$0xff]  ;;  %v4538_v23 = vcombine.low %v209_v12, %v213_v13  ;;  %847 = vmatprep.subr.bf16.mxu1 %v4525_v33  ;;  %v214_v39 = vld [vmem:[#allocation6 + $0xe8] sm:$0xff]  ;;  %v199_v24 = vld [vmem:[#allocation6 + $0x70] sm:$0xff]  ;;  %v4518_v29 = vcombine.low %v187_v8, %v191_v9  ;;  %p5918_p12 = pnand %p5917_p11, %p5911_p8 }
  0x9f   :  { %735 = vmatpush1.bf16.msra.mxu0 %v4522_v10  ;;  %v221_v20 = vld [vmem:[#allocation6 + $0x120] sm:$0xff]  ;;  %v4541_v44 = vcombine.high %v210_v38, %v214_v39  ;;  %v218_v46 = vld [vmem:[#allocation6 + $0x108] sm:$0xff]  ;;  %v4540_v50 = vcombine.low %v210_v38, %v214_v39  ;;  %v188_v39 = vld [vmem:[#allocation6 + $0x18] sm:$0xff] }
  0xa0   :  { %736 = vmatprep.subr.bf16.mxu0 %v4531_v11  ;;  %v4547_v27 = vcombine.high %v217_v19, %v221_v20  ;;  %v225_v31 = vld [vmem:[#allocation6 + $0x140] sm:$0xff]  ;;  %v4546_v35 = vcombine.low %v217_v19, %v221_v20  ;;  %v222_v47 = vld [vmem:[#allocation6 + $0x128] sm:$0xff]  ;;  %v139_v11 = vld [vmem:[#allocation3 + $0x10] sm:$0xff]  ;;  %v4519_v20 = vcombine.high %v187_v8, %v191_v9 }
  0xa1   :  { %v229_v32 = vld [vmem:[#allocation6 + $0x160] sm:$0xff]  ;;  %848 = vmatpush1.bf16.msra.mxu1 %v4524_v34  ;;  %v4549_v52 = vcombine.high %v218_v46, %v222_v47  ;;  %v226_v54 = vld [vmem:[#allocation6 + $0x148] sm:$0xff]  ;;  %v4548_v58 = vcombine.low %v218_v46, %v222_v47  ;;  %v148_v34 = vld [vmem:[#allocation3 + $0x58] sm:$0xff] }
  0xa2   :  { %v4555_v37 = vcombine.high %v225_v31, %v229_v32  ;;  %v233_v40 = vld [vmem:[#allocation6 + $0x180] sm:$0xff]  ;;  %v4554_v43 = vcombine.low %v225_v31, %v229_v32  ;;  %849 = vmatprep.subr.bf16.mxu1 %v4533_v36  ;;  %v230_v55 = vld [vmem:[#allocation6 + $0x168] sm:$0xff]  ;;  %v143_v31 = vld [vmem:[#allocation3 + $0x30] sm:$0xff] }
  0xa3   :  { %737 = vmatpush1.bf16.msra.mxu0 %v4530_v16  ;;  %v237_v41 = vld [vmem:[#allocation6 + $0x1a0] sm:$0xff]  ;;  %v4557_v60 = vcombine.high %v226_v54, %v230_v55  ;;  %v234_v62 = vld [vmem:[#allocation6 + $0x188] sm:$0xff]  ;;  %v4556_v2 = vcombine.low %v226_v54, %v230_v55  ;;  %v203_v36 = vld [vmem:[#allocation6 + $0x90] sm:$0xff] }
  0xa4   :  { %738 = vmatprep.subr.bf16.mxu0 %v4539_v18  ;;  %v4563_v45 = vcombine.high %v233_v40, %v237_v41  ;;  %v241_v48 = vld [vmem:[#allocation6 + $0x1c0] sm:$0xff]  ;;  %v4562_v51 = vcombine.low %v233_v40, %v237_v41  ;;  %v238_v63 = vld [vmem:[#allocation6 + $0x1a8] sm:$0xff]  ;;  %v192_v41 = vld [vmem:[#allocation6 + $0x38] sm:$0xff] }
  0xa5   :  { %v245_v49 = vld [vmem:[#allocation6 + $0x1e0] sm:$0xff]  ;;  %850 = vmatpush1.bf16.msra.mxu1 %v4532_v42  ;;  %v4565_v4 = vcombine.high %v234_v62, %v238_v63  ;;  %v242_v6 = vld [vmem:[#allocation6 + $0x1c8] sm:$0xff]  ;;  %v4564_v12 = vcombine.low %v234_v62, %v238_v63  ;;  %v215_v46 = vld [vmem:[#allocation6 + $0xf0] sm:$0xff] }
  0xa6   :  { %851 = vmatprep.subr.bf16.mxu1 %v4541_v44  ;;  %v4571_v53 = vcombine.high %v241_v48, %v245_v49  ;;  %v249_v56 = vld [vmem:[#allocation6 + $0x200] sm:$0xff]  ;;  %v4570_v59 = vcombine.low %v241_v48, %v245_v49  ;;  %v246_v7 = vld [vmem:[#allocation6 + $0x1e8] sm:$0xff]  ;;  %v4521_v48 = vcombine.high %v188_v39, %v192_v41  ;;  %v196_v49 = vld [vmem:[#allocation6 + $0x58] sm:$0xff] }
  0xa7   :  { %739 = vmatpush1.bf16.msra.mxu0 %v4538_v23  ;;  %v253_v57 = vld [vmem:[#allocation6 + $0x220] sm:$0xff]  ;;  %v142_v14 = vld [vmem:[#allocation3 + $0x28] sm:$0xff]  ;;  %v4573_v16 = vcombine.high %v242_v6, %v246_v7  ;;  %v4572_v22 = vcombine.low %v242_v6, %v246_v7  ;;  %v195_v23 = vld [vmem:[#allocation6 + $0x50] sm:$0xff] }
  0xa8   :  { %740 = vmatprep.subr.bf16.mxu0 %v4547_v27  ;;  %v4579_v61 = vcombine.high %v249_v56, %v253_v57  ;;  %v257_v0 = vld [vmem:[#allocation6 + $0x240] sm:$0xff]  ;;  %v4578_v3 = vcombine.low %v249_v56, %v253_v57  ;;  %v250_v18 = vld [vmem:[#allocation6 + $0x208] sm:$0xff]  ;;  %v6123_v25 = vpack.c.bf16 %v144_v15, %v142_v14  ;;  %v4527_v32 = vcombine.high %v195_v23, %v199_v24  ;;  %v152_v56 = vld [vmem:[#allocation3 + $0x78] sm:$0xff] }
  0xa9   :  { %852 = vmatpush1.bf16.msra.mxu1 %v4540_v50  ;;  %v261_v1 = vld [vmem:[#allocation6 + $0x260] sm:$0xff]  ;;  %v254_v19 = vld [vmem:[#allocation6 + $0x228] sm:$0xff]  ;;  %v4526_v40 = vcombine.low %v195_v23, %v199_v24  ;;  %v219_v57 = vld [vmem:[#allocation6 + $0x110] sm:$0xff] }
  0xaa   :  { %853 = vmatprep.subr.bf16.mxu1 %v4549_v52  ;;  %v4587_v5 = vcombine.high %v257_v0, %v261_v1  ;;  %v137_v10 = vld [vmem:[#allocation3] sm:$0xff]  ;;  %v4586_v13 = vcombine.low %v257_v0, %v261_v1  ;;  %v4581_v26 = vcombine.high %v250_v18, %v254_v19  ;;  %v258_v27 = vld [vmem:[#allocation6 + $0x248] sm:$0xff]  ;;  %v208_v63 = vld [vmem:[#allocation6 + $0xb8] sm:$0xff] }
  0xab   :  { %741 = vmatpush1.bf16.msra.mxu0 %v4546_v35  ;;  %v6121_v21 = vpack.c.bf16 %v139_v11, %v137_v10  ;;  %v262_v28 = vld [vmem:[#allocation6 + $0x268] sm:$0xff]  ;;  %v141_v30 = vld [vmem:[#allocation3 + $0x20] sm:$0xff]  ;;  %v4580_v35 = vcombine.low %v250_v18, %v254_v19  ;;  %v212_v7 = vld [vmem:[#allocation6 + $0xd8] sm:$0xff] }
  0xac   :  { %742 = vmatprep.subr.bf16.mxu0 %v4555_v37  ;;  %v146_v33 = vld [vmem:[#allocation3 + $0x48] sm:$0xff]  ;;  %v207_v37 = vld [vmem:[#allocation6 + $0xb0] sm:$0xff]  ;;  %v4589_v38 = vcombine.high %v258_v27, %v262_v28  ;;  %v4588_v44 = vcombine.low %v258_v27, %v262_v28  ;;  %v145_v52 = vld [vmem:[#allocation3 + $0x40] sm:$0xff] }
  0xad   :  { %854 = vmatpush1.bf16.msra.mxu1 %v4548_v58  ;;  %v4535_v42 = vcombine.high %v203_v36, %v207_v37  ;;  %v6130_v47 = vpack.c.bf16 %v148_v34, %v146_v33  ;;  %v4534_v50 = vcombine.low %v203_v36, %v207_v37  ;;  %v150_v55 = vld [vmem:[#allocation3 + $0x68] sm:$0xff]  ;;  %v223_v58 = vld [vmem:[#allocation6 + $0x130] sm:$0xff]  ;;  %v216_v9 = vld [vmem:[#allocation6 + $0xf8] sm:$0xff] }
  0xae   :  { %855 = vmatprep.subr.bf16.mxu1 %v4557_v60  ;;  %v4551_v0 = vcombine.high %v219_v57, %v223_v58  ;;  %v4550_v8 = vcombine.low %v219_v57, %v223_v58  ;;  %v149_v10 = vld [vmem:[#allocation3 + $0x60] sm:$0xff]  ;;  %v151_v11 = vld [vmem:[#allocation3 + $0x70] sm:$0xff]  ;;  %v156_v14 = vld [vmem:[#allocation3 + $0x98] sm:$0xff]  ;;  %v4545_v19 = vcombine.high %v212_v7, %v216_v9 }
  0xaf   :  { %743 = vmatpush1.bf16.msra.mxu0 %v4554_v43  ;;  %v6128_v43 = vpack.c.bf16 %v143_v31, %v141_v30  ;;  %v235_v15 = vld [vmem:[#allocation6 + $0x190] sm:$0xff]  ;;  %v224_v23 = vld [vmem:[#allocation6 + $0x138] sm:$0xff] }
  0xb0   :  { %744 = vmatprep.subr.bf16.mxu0 %v4563_v45  ;;  %v211_v45 = vld [vmem:[#allocation6 + $0xd0] sm:$0xff]  ;;  %v232_v34 = vld [vmem:[#allocation6 + $0x178] sm:$0xff] }
  0xb1   :  { %856 = vmatpush1.bf16.msra.mxu1 %v4556_v2  ;;  %v4543_v54 = vcombine.high %v211_v45, %v215_v46  ;;  %v4542_v62 = vcombine.low %v211_v45, %v215_v46  ;;  %v227_v2 = vld [vmem:[#allocation6 + $0x150] sm:$0xff]  ;;  %v236_v45 = vld [vmem:[#allocation6 + $0x198] sm:$0xff] }
  0xb2   :  { %857 = vmatprep.subr.bf16.mxu1 %v4565_v4  ;;  %v243_v27 = vld [vmem:[#allocation6 + $0x1d0] sm:$0xff]  ;;  %v248_v58 = vld [vmem:[#allocation6 + $0x1f8] sm:$0xff] }
  0xb3   :  { %745 = vmatpush1.bf16.msra.mxu0 %v4562_v51  ;;  %v200_v51 = vld [vmem:[#allocation6 + $0x78] sm:$0xff]  ;;  %v247_v28 = vld [vmem:[#allocation6 + $0x1f0] sm:$0xff] }
  0xb4   :  { %746 = vmatprep.subr.bf16.mxu0 %v4571_v53  ;;  %v147_v53 = vld [vmem:[#allocation3 + $0x50] sm:$0xff]  ;;  %v4529_v60 = vcombine.high %v196_v49, %v200_v51  ;;  %v4528_v4 = vcombine.low %v196_v49, %v200_v51  ;;  %v4575_v37 = vcombine.high %v243_v27, %v247_v28  ;;  %v4574_v46 = vcombine.low %v243_v27, %v247_v28  ;;  %v165_v28 = vld [vmem:[#allocation3 + $0xe0] sm:$0xff] }
  0xb5   :  { %858 = vmatpush1.bf16.msra.mxu1 %v4564_v12  ;;  %v6136_v1 = vpack.c.bf16 %v147_v53, %v145_v52  ;;  %v155_v36 = vld [vmem:[#allocation3 + $0x90] sm:$0xff] }
  0xb6   :  { %859 = vmatprep.subr.bf16.mxu1 %v4573_v16  ;;  %v239_v16 = vld [vmem:[#allocation6 + $0x1b0] sm:$0xff] }
  0xb7   :  { %747 = vmatpush1.bf16.msra.mxu0 %v4570_v59  ;;  %v4520_v59 = vcombine.low %v188_v39, %v192_v41  ;;  %v4567_v24 = vcombine.high %v235_v15, %v239_v16  ;;  %v4566_v33 = vcombine.low %v235_v15, %v239_v16  ;;  %v160_v39 = vld [vmem:[#allocation3 + $0xb8] sm:$0xff]  ;;  %v255_v41 = vld [vmem:[#allocation6 + $0x230] sm:$0xff]  ;;  %v166_v16 = vld [vmem:[#allocation3 + $0xe8] sm:$0xff] }
  0xb8   :  { %748 = vmatprep.subr.bf16.mxu0 %v4579_v61  ;;  %v204_v61 = vld [vmem:[#allocation6 + $0x98] sm:$0xff]  ;;  %v259_v51 = vld [vmem:[#allocation6 + $0x250] sm:$0xff] }
  0xb9   :  { %860 = vmatpush1.bf16.msra.mxu1 %v4572_v22  ;;  %v4537_v6 = vcombine.high %v204_v61, %v208_v63  ;;  %v4536_v18 = vcombine.low %v204_v61, %v208_v63  ;;  %v263_v52 = vld [vmem:[#allocation6 + $0x270] sm:$0xff]  ;;  %v164_v63 = vld [vmem:[#allocation3 + $0xd8] sm:$0xff] }
  0xba   :  { %861 = vmatprep.subr.bf16.mxu1 %v4581_v26  ;;  %v6146_v26 = vpack.c.bf16 %v151_v11, %v149_v10  ;;  %v4591_v61 = vcombine.high %v259_v51, %v263_v52  ;;  %v260_v10 = vld [vmem:[#allocation6 + $0x258] sm:$0xff]  ;;  %v163_v15 = vld [vmem:[#allocation3 + $0xd0] sm:$0xff] }
  0xbb   :  { %749 = vmatpush1.bf16.msra.mxu0 %v4578_v3  ;;  %v231_v3 = vld [vmem:[#allocation6 + $0x170] sm:$0xff]  ;;  %v264_v11 = vld [vmem:[#allocation6 + $0x278] sm:$0xff] }
  0xbc   :  { %750 = vmatprep.subr.bf16.mxu0 %v4587_v5  ;;  %v6140_v5 = vpack.c.bf16 %v152_v56, %v150_v55  ;;  %v4559_v12 = vcombine.high %v227_v2, %v231_v3  ;;  %v4558_v22 = vcombine.low %v227_v2, %v231_v3  ;;  %v244_v56 = vld [vmem:[#allocation6 + $0x1d8] sm:$0xff] }
  0xbd   :  { %862 = vmatpush1.bf16.msra.mxu1 %v4580_v35  ;;  %v153_v35 = vld [vmem:[#allocation3 + $0x80] sm:$0xff]  ;;  %v252_v2 = vld [vmem:[#allocation6 + $0x218] sm:$0xff] }
  0xbe   :  { %863 = vmatprep.subr.bf16.mxu1 %v4589_v38  ;;  %v158_v38 = vld [vmem:[#allocation3 + $0xa8] sm:$0xff]  ;;  %v256_v3 = vld [vmem:[#allocation6 + $0x238] sm:$0xff] }
  0xbf   :  { %751 = vmatpush1.bf16.msra.mxu0 %v4586_v13  ;;  %v154_v13 = vld [vmem:[#allocation3 + $0x88] sm:$0xff] }
  0xc0   :  { %958 = vmatprep.subr.bf16.mxu0 %v4519_v20  ;;  %v220_v20 = vld [vmem:[#allocation6 + $0x118] sm:$0xff]  ;;  %v6150_v30 = vpack.c.bf16 %v156_v14, %v154_v13  ;;  %v4585_v13 = vcombine.high %v252_v2, %v256_v3  ;;  %v161_v14 = vld [vmem:[#allocation3 + $0xc0] sm:$0xff] }
  0xc1   :  { %864 = vmatpush1.bf16.msra.mxu1 %v4588_v44  ;;  %v4553_v31 = vcombine.high %v220_v20, %v224_v23 }
  0xc2   :  { %765 = vmatmul.mubr.bf16.vlgmr.msra.gmra.mrb[0].mxu0 %v6121_v21  ;;  %1071 = vmatprep.subr.bf16.mxu1 %v4521_v48  ;;  %v240_v48 = vld [vmem:[#allocation6 + $0x1b8] sm:$0xff] }
  0xc3   :  { %4595 = vmatprep.mubr.msk.bf16.mxu0 %vm707_vm0, %v6123_v25  ;;  %959 = vmatpush1.bf16.msra.mxu0 %v4518_v29  ;;  %v4544_v29 = vcombine.low %v212_v7, %v216_v9  ;;  %v4569_v55 = vcombine.high %v236_v45, %v240_v48  ;;  %v4590_v7 = vcombine.low %v259_v51, %v263_v52  ;;  %v5347_v51 = vld [vmem:[#allocation9 + $0x8c] ss:$16 sps:$4 sm:$0xff]   ;;  %v5354_v52 = vld [vmem:[#allocation9 + $0xc0] ss:$16 sps:$4 sm:$0xff]  }
  0xc4   :  { %960 = vmatprep.subr.bf16.mxu0 %v4527_v32  ;;  %878 = vmatmul.mubr.bf16.vlgmr.msra.gmra.mrb[0].mxu1 %v6121_v21  ;;  %v228_v32 = vld [vmem:[#allocation6 + $0x158] sm:$0xff]  ;;  %v4576_v9 = vcombine.low %v244_v56, %v248_v58 }
  0xc5   :  { %4603 = vmatprep.mubr.msk.bf16.mxu1 %vm707_vm0, %v6123_v25  ;;  %1072 = vmatpush1.bf16.msra.mxu1 %v4520_v59  ;;  %v4561_v44 = vcombine.high %v228_v32, %v232_v34  ;;  %v4560_v53 = vcombine.low %v228_v32, %v232_v34  ;;  %v157_v59 = vld [vmem:[#allocation3 + $0xa0] sm:$0xff]  ;;  %v5318_v32 = vld [vmem:[#allocation9] ss:$16 sps:$4 sm:$0xff]  }
  0xc6   :  { %1073 = vmatprep.subr.bf16.mxu1 %v4529_v60  ;;  %v159_v60 = vld [vmem:[#allocation3 + $0xb0] sm:$0xff]  ;;  %v5324_v34 = vld [vmem:[#allocation9 + $0x20] ss:$16 sps:$4 sm:$0xff]  }
  0xc7   :  { %961 = vmatpush1.bf16.msra.mxu0 %v4526_v40  ;;  %v251_v40 = vld [vmem:[#allocation6 + $0x210] sm:$0xff] }
  0xc8   :  { %962 = vmatprep.subr.bf16.mxu0 %v4535_v42  ;;  %v4552_v42 = vcombine.low %v220_v20, %v224_v23  ;;  %v4583_v49 = vcombine.high %v251_v40, %v255_v41  ;;  %v4582_v57 = vcombine.low %v251_v40, %v255_v41  ;;  %v4593_v20 = vcombine.high %v260_v10, %v264_v11  ;;  %v5336_v40 = vld [vmem:[#allocation9 + $0x60] ss:$16 sps:$4 sm:$0xff]   ;;  %v5344_v41 = vld [vmem:[#allocation9 + $0x84] ss:$16 sps:$4 sm:$0xff]  }
  0xc9   :  { %1074 = vmatpush1.bf16.msra.mxu1 %v4528_v4  ;;  %v4577_v4 = vcombine.high %v244_v56, %v248_v58  ;;  %v6176_v23 = vpack.c.bf16 %v163_v15, %v161_v14  ;;  %v5353_v56 = vld [vmem:[#allocation9 + $0xac] ss:$16 sps:$4 sm:$0xff]   ;;  %v5404_v15 = vld [vmem:[#allocation9 + $0x1c4] ss:$16 sps:$4 sm:$0xff]  }
  0xca   :  { %775 = vmatmul.mubr.bf16.gmra.mrb[4].mxu0 %v6128_v43  ;;  %1075 = vmatprep.subr.bf16.mxu1 %v4537_v6  ;;  %v5320_v6 = vld [vmem:[#allocation9 + $0x4] ss:$16 sps:$4 sm:$0xff]   ;;  %v5359_v58 = vld [vmem:[#allocation9 + $0xcc] ss:$16 sps:$4 sm:$0xff]  }
  0xcb   :  { %4596 = vmatprep.mubr.msk.bf16.mxu0 %vm707_vm0, %v6130_v47  ;;  %963 = vmatpush1.bf16.msra.mxu0 %v4534_v50  ;;  %v6156_v50 = vpack.c.bf16 %v155_v36, %v153_v35  ;;  %v5332_v35 = vld [vmem:[#allocation9 + $0x44] ss:$16 sps:$4 sm:$0xff]   ;;  %v5330_v36 = vld [vmem:[#allocation9 + $0x40] ss:$16 sps:$4 sm:$0xff]   ;;  %v5389_v14 = vld [vmem:[#allocation9 + $0x16c] ss:$16 sps:$4 sm:$0xff]  }
  0xcc   :  { %964 = vmatprep.subr.bf16.mxu0 %v4543_v54  ;;  %888 = vmatmul.mubr.bf16.gmra.mrb[4].mxu1 %v6128_v43  ;;  %v6160_v54 = vpack.c.bf16 %v160_v39, %v158_v38  ;;  %v5321_v38 = vld [vmem:[#allocation9 + $0x8] ss:$16 sps:$4 sm:$0xff]   ;;  %v5329_v39 = vld [vmem:[#allocation9 + $0x2c] ss:$16 sps:$4 sm:$0xff]  }
  0xcd   :  { %4604 = vmatprep.mubr.msk.bf16.mxu1 %vm707_vm0, %v6130_v47  ;;  %1076 = vmatpush1.bf16.msra.mxu1 %v4536_v18  ;;  %v168_v18 = vld [vmem:[#allocation3 + $0xf8] sm:$0xff] }
  0xce   :  { %1077 = vmatprep.subr.bf16.mxu1 %v4545_v19  ;;  %v4584_v19 = vcombine.low %v252_v2, %v256_v3  ;;  %v6180_v27 = vpack.c.bf16 %v168_v18, %v166_v16  ;;  %v5378_v2 = vld [vmem:[#allocation9 + $0x140] ss:$16 sps:$4 sm:$0xff]   ;;  %v5386_v3 = vld [vmem:[#allocation9 + $0x164] ss:$16 sps:$4 sm:$0xff]   ;;  %v5395_v16 = vld [vmem:[#allocation9 + $0x18c] ss:$16 sps:$4 sm:$0xff]  }
  0xcf   :  { %965 = vmatpush1.bf16.msra.mxu0 %v4542_v62  ;;  %v162_v62 = vld [vmem:[#allocation3 + $0xc8] sm:$0xff] }
  0xd0   :  { %966 = vmatprep.subr.bf16.mxu0 %v4551_v0  ;;  %v4568_v0 = vcombine.low %v236_v45, %v240_v48  ;;  %v5350_v45 = vld [vmem:[#allocation9 + $0xa4] ss:$16 sps:$4 sm:$0xff]   ;;  %v5341_v48 = vld [vmem:[#allocation9 + $0x6c] ss:$16 sps:$4 sm:$0xff]   ;;  %v5402_v18 = vld [vmem:[#allocation9 + $0x1c0] ss:$16 sps:$4 sm:$0xff]  }
  0xd1   :  { %1078 = vmatpush1.bf16.msra.mxu1 %v4544_v29  ;;  %v167_v29 = vld [vmem:[#allocation3 + $0xf0] sm:$0xff] }
  0xd2   :  { %785 = vmatmul.mubr.bf16.gmra.mrb[8].mxu0 %v6136_v1  ;;  %1079 = vmatprep.subr.bf16.mxu1 %v4553_v31  ;;  %v6186_v31 = vpack.c.bf16 %v167_v29, %v165_v28  ;;  %v5407_v28 = vld [vmem:[#allocation9 + $0x1cc] ss:$16 sps:$4 sm:$0xff]   ;;  %v5405_v29 = vld [vmem:[#allocation9 + $0x1c8] ss:$16 sps:$4 sm:$0xff]  }
  0xd3   :  { %4597 = vmatprep.mubr.msk.bf16.mxu0 %vm707_vm0, %v6140_v5  ;;  %967 = vmatpush1.bf16.msra.mxu0 %v4550_v8  ;;  %v6166_v8 = vpack.c.bf16 %v159_v60, %v157_v59  ;;  %v5366_v59 = vld [vmem:[#allocation9 + $0x100] ss:$16 sps:$4 sm:$0xff]   ;;  %v5374_v60 = vld [vmem:[#allocation9 + $0x124] ss:$16 sps:$4 sm:$0xff]  }
  0xd4   :  { %968 = vmatprep.subr.bf16.mxu0 %v4559_v12  ;;  %898 = vmatmul.mubr.bf16.gmra.mrb[8].mxu1 %v6136_v1  ;;  %v6170_v12 = vpack.c.bf16 %v164_v63, %v162_v62  ;;  %v5365_v62 = vld [vmem:[#allocation9 + $0xec] ss:$16 sps:$4 sm:$0xff]   ;;  %v5380_v63 = vld [vmem:[#allocation9 + $0x144] ss:$16 sps:$4 sm:$0xff]  }
  0xd5   :  { %4605 = vmatprep.mubr.msk.bf16.mxu1 %vm707_vm0, %v6140_v5  ;;  %1080 = vmatpush1.bf16.msra.mxu1 %v4552_v42  ;;  %v5327_v42 = vld [vmem:[#allocation9 + $0x28] ss:$16 sps:$4 sm:$0xff]  }
  0xd6   :  { %1081 = vmatprep.subr.bf16.mxu1 %v4561_v44  ;;  %v5335_v44 = vld [vmem:[#allocation9 + $0x4c] ss:$16 sps:$4 sm:$0xff]  }
  0xd7   :  { %969 = vmatpush1.bf16.msra.mxu0 %v4558_v22  ;;  %v5323_v22 = vld [vmem:[#allocation9 + $0xc] ss:$16 sps:$4 sm:$0xff]  }
  0xd8   :  { %970 = vmatprep.subr.bf16.mxu0 %v4567_v24  ;;  %v4592_v24 = vcombine.low %v260_v10, %v264_v11  ;;  %v5390_v10 = vld [vmem:[#allocation9 + $0x180] ss:$16 sps:$4 sm:$0xff]   ;;  %v5398_v11 = vld [vmem:[#allocation9 + $0x1a4] ss:$16 sps:$4 sm:$0xff]  }
  0xd9   :  { %1082 = vmatpush1.bf16.msra.mxu1 %v4560_v53  ;;  %v5362_v53 = vld [vmem:[#allocation9 + $0xe4] ss:$16 sps:$4 sm:$0xff]  }
  0xda   :  { %795 = vmatmul.mubr.bf16.gmra.mrb[12].mxu0 %v6146_v26  ;;  %1083 = vmatprep.subr.bf16.mxu1 %v4569_v55  ;;  %v5345_v55 = vld [vmem:[#allocation9 + $0x88] ss:$16 sps:$4 sm:$0xff]  }
  0xdb   :  { %4598 = vmatprep.mubr.msk.bf16.mxu0 %vm707_vm0, %v6150_v30  ;;  %971 = vmatpush1.bf16.msra.mxu0 %v4566_v33  ;;  %v5326_v33 = vld [vmem:[#allocation9 + $0x24] ss:$16 sps:$4 sm:$0xff]  }
  0xdc   :  { %972 = vmatprep.subr.bf16.mxu0 %v4575_v37  ;;  %908 = vmatmul.mubr.bf16.gmra.mrb[12].mxu1 %v6146_v26  ;;  %v5338_v37 = vld [vmem:[#allocation9 + $0x64] ss:$16 sps:$4 sm:$0xff]  }
  0xdd   :  { %4606 = vmatprep.mubr.msk.bf16.mxu1 %vm707_vm0, %v6150_v30  ;;  %1084 = vmatpush1.bf16.msra.mxu1 %v4568_v0  ;;  %v5371_v0 = vld [vmem:[#allocation9 + $0x10c] ss:$16 sps:$4 sm:$0xff]  }
  0xde   :  { %1085 = vmatprep.subr.bf16.mxu1 %v4577_v4  ;;  %v5369_v4 = vld [vmem:[#allocation9 + $0x108] ss:$16 sps:$4 sm:$0xff]  }
  0xdf   :  { %973 = vmatpush1.bf16.msra.mxu0 %v4574_v46  ;;  %v5333_v46 = vld [vmem:[#allocation9 + $0x48] ss:$16 sps:$4 sm:$0xff]  }
  0xe0   :  { %974 = vmatprep.subr.bf16.mxu0 %v4583_v49  ;;  %v5348_v49 = vld [vmem:[#allocation9 + $0xa0] ss:$16 sps:$4 sm:$0xff]  }
  0xe1   :  { %1086 = vmatpush1.bf16.msra.mxu1 %v4576_v9  ;;  %v5383_v9 = vld [vmem:[#allocation9 + $0x14c] ss:$16 sps:$4 sm:$0xff]  }
  0xe2   :  { %805 = vmatmul.mubr.bf16.gmra.mrb[16].mxu0 %v6156_v50  ;;  %1087 = vmatprep.subr.bf16.mxu1 %v4585_v13  ;;  %v5381_v13 = vld [vmem:[#allocation9 + $0x148] ss:$16 sps:$4 sm:$0xff]  }
  0xe3   :  { %4599 = vmatprep.mubr.msk.bf16.mxu0 %vm707_vm0, %v6160_v54  ;;  %975 = vmatpush1.bf16.msra.mxu0 %v4582_v57  ;;  %v5368_v57 = vld [vmem:[#allocation9 + $0x104] ss:$16 sps:$4 sm:$0xff]  }
  0xe4   :  { %976 = vmatprep.subr.bf16.mxu0 %v4591_v61  ;;  %918 = vmatmul.mubr.bf16.gmra.mrb[16].mxu1 %v6156_v50  ;;  %v5357_v61 = vld [vmem:[#allocation9 + $0xc8] ss:$16 sps:$4 sm:$0xff]  }
  0xe5   :  { %4607 = vmatprep.mubr.msk.bf16.mxu1 %vm707_vm0, %v6160_v54  ;;  %1088 = vmatpush1.bf16.msra.mxu1 %v4584_v19  ;;  %v5410_v19 = vld [vmem:[#allocation9 + $0x1e4] ss:$16 sps:$4 sm:$0xff]  }
  0xe6   :  { %1089 = vmatprep.subr.bf16.mxu1 %v4593_v20  ;;  %v5393_v20 = vld [vmem:[#allocation9 + $0x188] ss:$16 sps:$4 sm:$0xff]  }
  0xe7   :  { %977 = vmatpush1.bf16.msra.mxu0 %v4590_v7  ;;  %v5392_v7 = vld [vmem:[#allocation9 + $0x184] ss:$16 sps:$4 sm:$0xff]  }
  0xe8   :  { %2934 = vmatprep.subr.bf16.mxu0 %v5320_v6  ;;  %v5377_v6 = vld [vmem:[#allocation9 + $0x12c] ss:$16 sps:$4 sm:$0xff]  }
  0xe9   :  { %1090 = vmatpush1.bf16.msra.mxu1 %v4592_v24  ;;  %v5408_v24 = vld [vmem:[#allocation9 + $0x1e0] ss:$16 sps:$4 sm:$0xff]  }
  0xea   :  { %815 = vmatmul.mubr.bf16.gmra.mrb[20].mxu0 %v6166_v8  ;;  %3386 = vmatprep.subr.bf16.mxu1 %v5323_v22  ;;  %v5401_v22 = vld [vmem:[#allocation9 + $0x1ac] ss:$16 sps:$4 sm:$0xff]  }
  0xeb   :  { %4600 = vmatprep.mubr.msk.bf16.mxu0 %vm707_vm0, %v6170_v12 }
  0xec   :  { %928 = vmatmul.mubr.bf16.gmra.mrb[20].mxu1 %v6166_v8 }
  0xed   :  { %4608 = vmatprep.mubr.msk.bf16.mxu1 %vm707_vm0, %v6170_v12 }
  0xf2   :  { %825 = vmatmul.mubr.bf16.gmra.mrb[24].mxu0 %v6176_v23 }
  0xf3   :  { %4601 = vmatprep.mubr.msk.bf16.mxu0 %vm707_vm0, %v6180_v27 }
  0xf4   :  { %938 = vmatmul.mubr.bf16.gmra.mrb[24].mxu1 %v6176_v23 }
  0xf5   :  { %4609 = vmatprep.mubr.msk.bf16.mxu1 %vm707_vm0, %v6180_v27 }
  0xfa   :  { %835 = vmatmul.mubr.bf16.gmra.mrb[28].mxu0 %v6186_v31 }
  0xfb   :  { %4610 = vmatprep.mubr.msk.bf16.mxu0 %vm707_vm0, %v6115_v17 }
  0xfc   :  { %948 = vmatmul.mubr.bf16.gmra.mrb[28].mxu1 %v6186_v31 }
  0xfd   :  { %4618 = vmatprep.mubr.msk.bf16.mxu1 %vm707_vm0, %v6115_v17  ;;  %v5342_v17 = vld [vmem:[#allocation9 + $0x80] ss:$16 sps:$4 sm:$0xff]  }
 0x102   :  { %991 = vmatmul.mubr.bf16.vlgmr.msra.gmra.mrb[32].mxu0 %v6121_v21 }
 0x103   :  { %4611 = vmatprep.mubr.msk.bf16.mxu0 %vm707_vm0, %v6123_v25  ;;  %2935 = vmatpush1.bf16.msra.mxu0 %v5318_v32  ;;  %v5413_v32 = vld [vmem:[#allocation9 + $0x1ec] ss:$16 sps:$4 sm:$0xff]  }
 0x104   :  { %2936 = vmatprep.subr.bf16.mxu0 %v5326_v33  ;;  %1104 = vmatmul.mubr.bf16.vlgmr.msra.gmra.mrb[32].mxu1 %v6121_v21  ;;  %v5356_v21 = vld [vmem:[#allocation9 + $0xc4] ss:$16 sps:$4 sm:$0xff]   ;;  %v5411_v33 = vld [vmem:[#allocation9 + $0x1e8] ss:$16 sps:$4 sm:$0xff]  }
 0x105   :  { %3387 = vmatpush1.bf16.msra.mxu1 %v5321_v38  ;;  %4619 = vmatprep.mubr.msk.bf16.mxu1 %vm707_vm0, %v6123_v25  ;;  %v5339_v25 = vld [vmem:[#allocation9 + $0x68] ss:$16 sps:$4 sm:$0xff]  }
 0x106   :  { %3388 = vmatprep.subr.bf16.mxu1 %v5329_v39 }
 0x107   :  { %2937 = vmatpush1.bf16.msra.mxu0 %v5324_v34  ;;  %v267_v34 = vlaneseq }
 0x108   :  { %2938 = vmatprep.subr.bf16.mxu0 %v5332_v35 }
 0x109   :  { %3389 = vmatpush1.bf16.msra.mxu1 %v5327_v42  ;;  %v6243_v35 = vshrl.u32 %v267_v34, 7  ;;  %v5437_v34 = vld [vmem:[#allocation9 + $0x26c] ss:$16 sps:$4 sm:$0xff]  }
 0x10a   :  { %1001 = vmatmul.mubr.bf16.gmra.mrb[36].mxu0 %v6128_v43  ;;  %3390 = vmatprep.subr.bf16.mxu1 %v5335_v44 }
 0x10b   :  { %4612 = vmatprep.mubr.msk.bf16.mxu0 %vm707_vm0, %v6130_v47  ;;  %2939 = vmatpush1.bf16.msra.mxu0 %v5330_v36  ;;  %v6248_v36 = vld [vmem:[#allocation8] sm:$0xff] }
 0x10c   :  { %2940 = vmatprep.subr.bf16.mxu0 %v5338_v37  ;;  %1114 = vmatmul.mubr.bf16.gmra.mrb[36].mxu1 %v6128_v43  ;;  %v5360_v43 = vld [vmem:[#allocation9 + $0xe0] ss:$16 sps:$4 sm:$0xff]   ;;  %v273_v37 = vsub.s32 1, %v6243_v35 }
 0x10d   :  { %3391 = vmatpush1.bf16.msra.mxu1 %v5333_v46  ;;  %4620 = vmatprep.mubr.msk.bf16.mxu1 %vm707_vm0, %v6130_v47  ;;  %v5351_v47 = vld [vmem:[#allocation9 + $0xa8] ss:$16 sps:$4 sm:$0xff]  }
 0x10e   :  { %3392 = vmatprep.subr.bf16.mxu1 %v5341_v48  ;;  %v277_v48 = vsub.s32 2, %v6243_v35 }
 0x10f   :  { %2941 = vmatpush1.bf16.msra.mxu0 %v5336_v40 }
 0x110   :  { %2942 = vmatprep.subr.bf16.mxu0 %v5344_v41 }
 0x111   :  { %3393 = vmatpush1.bf16.msra.mxu1 %v5339_v25  ;;  %v281_v25 = vsub.s32 3, %v6243_v35 }
 0x112   :  { %1011 = vmatmul.mubr.bf16.gmra.mrb[40].mxu0 %v6136_v1  ;;  %3394 = vmatprep.subr.bf16.mxu1 %v5347_v51 }
 0x113   :  { %4613 = vmatprep.mubr.msk.bf16.mxu0 %vm707_vm0, %v6140_v5  ;;  %2943 = vmatpush1.bf16.msra.mxu0 %v5342_v17 }
 0x114   :  { %2944 = vmatprep.subr.bf16.mxu0 %v5350_v45  ;;  %1124 = vmatmul.mubr.bf16.gmra.mrb[40].mxu1 %v6136_v1  ;;  %v5372_v1 = vld [vmem:[#allocation9 + $0x120] ss:$16 sps:$4 sm:$0xff]  }
 0x115   :  { %3395 = vmatpush1.bf16.msra.mxu1 %v5345_v55  ;;  %4621 = vmatprep.mubr.msk.bf16.mxu1 %vm707_vm0, %v6140_v5  ;;  %v5363_v5 = vld [vmem:[#allocation9 + $0xe8] ss:$16 sps:$4 sm:$0xff]  }
 0x116   :  { %3396 = vmatprep.subr.bf16.mxu1 %v5353_v56 }
 0x117   :  { %2945 = vmatpush1.bf16.msra.mxu0 %v5348_v49 }
 0x118   :  { %2946 = vmatprep.subr.bf16.mxu0 %v5356_v21 }
 0x119   :  { %3397 = vmatpush1.bf16.msra.mxu1 %v5351_v47  ;;  %v6269_v47 = vrot.slane %v6248_v36, %v277_v48 }
 0x11a   :  { %1021 = vmatmul.mubr.bf16.gmra.mrb[44].mxu0 %v6146_v26  ;;  %3398 = vmatprep.subr.bf16.mxu1 %v5359_v58 }
 0x11b   :  { %4614 = vmatprep.mubr.msk.bf16.mxu0 %vm707_vm0, %v6150_v30  ;;  %2947 = vmatpush1.bf16.msra.mxu0 %v5354_v52 }
 0x11c   :  { %2948 = vmatprep.subr.bf16.mxu0 %v5362_v53  ;;  %1134 = vmatmul.mubr.bf16.gmra.mrb[44].mxu1 %v6146_v26  ;;  %v5384_v26 = vld [vmem:[#allocation9 + $0x160] ss:$16 sps:$4 sm:$0xff]  }
 0x11d   :  { %3399 = vmatpush1.bf16.msra.mxu1 %v5357_v61  ;;  %4622 = vmatprep.mubr.msk.bf16.mxu1 %vm707_vm0, %v6150_v30  ;;  %v5375_v30 = vld [vmem:[#allocation9 + $0x128] ss:$16 sps:$4 sm:$0xff]   ;;  %v5425_v61 = vld [vmem:[#allocation9 + $0x22c] ss:$16 sps:$4 sm:$0xff]  }
 0x11e   :  { %3400 = vmatprep.subr.bf16.mxu1 %v5365_v62  ;;  %v6275_v62 = vrot.slane %v6248_v36, %v281_v25 }
 0x11f   :  { %2949 = vmatpush1.bf16.msra.mxu0 %v5360_v43  ;;  %v5414_v43 = vld [vmem:[#allocation9 + $0x200] ss:$16 sps:$4 sm:$0xff]  }
 0x120   :  { %2950 = vmatprep.subr.bf16.mxu0 %v5368_v57  ;;  %v5417_v57 = vld [vmem:[#allocation9 + $0x208] ss:$16 sps:$4 sm:$0xff]  }
 0x121   :  { %3401 = vmatpush1.bf16.msra.mxu1 %v5363_v5 }
 0x122   :  { %1031 = vmatmul.mubr.bf16.gmra.mrb[48].mxu0 %v6156_v50  ;;  %3402 = vmatprep.subr.bf16.mxu1 %v5371_v0 }
 0x123   :  { %4615 = vmatprep.mubr.msk.bf16.mxu0 %vm707_vm0, %v6160_v54  ;;  %2951 = vmatpush1.bf16.msra.mxu0 %v5366_v59 }
 0x124   :  { %2952 = vmatprep.subr.bf16.mxu0 %v5374_v60  ;;  %1144 = vmatmul.mubr.bf16.gmra.mrb[48].mxu1 %v6156_v50  ;;  %v5396_v50 = vld [vmem:[#allocation9 + $0x1a0] ss:$16 sps:$4 sm:$0xff]   ;;  %v5422_v60 = vld [vmem:[#allocation9 + $0x224] ss:$16 sps:$4 sm:$0xff]  }
 0x125   :  { %3403 = vmatpush1.bf16.msra.mxu1 %v5369_v4  ;;  %4623 = vmatprep.mubr.msk.bf16.mxu1 %vm707_vm0, %v6160_v54  ;;  %v5387_v54 = vld [vmem:[#allocation9 + $0x168] ss:$16 sps:$4 sm:$0xff]  }
 0x126   :  { %3404 = vmatprep.subr.bf16.mxu1 %v5377_v6  ;;  %v5423_v6 = vld [vmem:[#allocation9 + $0x228] ss:$16 sps:$4 sm:$0xff]  }
 0x127   :  { %2953 = vmatpush1.bf16.msra.mxu0 %v5372_v1 }
 0x128   :  { %2954 = vmatprep.subr.bf16.mxu0 %v5380_v63 }
 0x129   :  { %3405 = vmatpush1.bf16.msra.mxu1 %v5375_v30 }
 0x12a   :  { %1041 = vmatmul.mubr.bf16.gmra.mrb[52].mxu0 %v6166_v8  ;;  %3406 = vmatprep.subr.bf16.mxu1 %v5383_v9 }
 0x12b   :  { %4616 = vmatprep.mubr.msk.bf16.mxu0 %vm707_vm0, %v6170_v12  ;;  %2955 = vmatpush1.bf16.msra.mxu0 %v5378_v2  ;;  %v5420_v2 = vld [vmem:[#allocation9 + $0x220] ss:$16 sps:$4 sm:$0xff]  }
 0x12c   :  { %2956 = vmatprep.subr.bf16.mxu0 %v5386_v3  ;;  %1154 = vmatmul.mubr.bf16.gmra.mrb[52].mxu1 %v6166_v8  ;;  %v5416_v8 = vld [vmem:[#allocation9 + $0x204] ss:$16 sps:$4 sm:$0xff]  }
 0x12d   :  { %3407 = vmatpush1.bf16.msra.mxu1 %v5381_v13  ;;  %4624 = vmatprep.mubr.msk.bf16.mxu1 %vm707_vm0, %v6170_v12  ;;  %v5399_v12 = vld [vmem:[#allocation9 + $0x1a8] ss:$16 sps:$4 sm:$0xff]  }
 0x12e   :  { %3408 = vmatprep.subr.bf16.mxu1 %v5389_v14 }
 0x12f   :  { %2957 = vmatpush1.bf16.msra.mxu0 %v5384_v26  ;;  %v5428_v26 = vld [vmem:[#allocation9 + $0x244] ss:$16 sps:$4 sm:$0xff]  }
 0x130   :  { %2958 = vmatprep.subr.bf16.mxu0 %v5392_v7 }
 0x131   :  { %3409 = vmatpush1.bf16.msra.mxu1 %v5387_v54 }
 0x132   :  { %1051 = vmatmul.mubr.bf16.gmra.mrb[56].mxu0 %v6176_v23  ;;  %3410 = vmatprep.subr.bf16.mxu1 %v5395_v16 }
 0x133   :  { %4617 = vmatprep.mubr.msk.bf16.mxu0 %vm707_vm0, %v6180_v27  ;;  %2959 = vmatpush1.bf16.msra.mxu0 %v5390_v10 }
 0x134   :  { %2960 = vmatprep.subr.bf16.mxu0 %v5398_v11  ;;  %1164 = vmatmul.mubr.bf16.gmra.mrb[56].mxu1 %v6176_v23  ;;  %v5419_v23 = vld [vmem:[#allocation9 + $0x20c] ss:$16 sps:$4 sm:$0xff]  }
 0x135   :  { %3411 = vmatpush1.bf16.msra.mxu1 %v5393_v20  ;;  %4625 = vmatprep.mubr.msk.bf16.mxu1 %vm707_vm0, %v6180_v27  ;;  %v6246_v27 = vsub.s32 0, %v6243_v35  ;;  %v5431_v11 = vld [vmem:[#allocation9 + $0x24c] ss:$16 sps:$4 sm:$0xff]  }
 0x136   :  { %3412 = vmatprep.subr.bf16.mxu1 %v5401_v22 }
 0x137   :  { %2961 = vmatpush1.bf16.msra.mxu0 %v5396_v50  ;;  %v6253_v38 = vrot.slane %v6248_v36, %v6246_v27 }
 0x138   :  { %2962 = vmatprep.subr.bf16.mxu0 %v5404_v15 }
 0x139   :  { %3413 = vmatpush1.bf16.msra.mxu1 %v5399_v12  ;;  %v5426_v12 = vld [vmem:[#allocation9 + $0x240] ss:$16 sps:$4 sm:$0xff]  }
 0x13a   :  { %1061 = vmatmul.mubr.bf16.gmra.mrb[60].mxu0 %v6186_v31  ;;  %3414 = vmatprep.subr.bf16.mxu1 %v5407_v28  ;;  %v5429_v28 = vld [vmem:[#allocation9 + $0x248] ss:$16 sps:$4 sm:$0xff]  }
 0x13b   :  { %2963 = vmatpush1.bf16.msra.mxu0 %v5402_v18 }
 0x13c   :  { %2964 = vmatprep.subr.bf16.mxu0 %v5410_v19  ;;  %1174 = vmatmul.mubr.bf16.gmra.mrb[60].mxu1 %v6186_v31  ;;  %v6258_v31 = vrot.slane %v6248_v36, %v273_v37 }
 0x13d   :  { %3415 = vmatpush1.bf16.msra.mxu1 %v5405_v29 }
 0x13e   :  { %3416 = vmatprep.subr.bf16.mxu1 %v5413_v32 }
 0x13f   :  { %2965 = vmatpush1.bf16.msra.mxu0 %v5408_v24 }
 0x140   :  { %3047 = vmatprep.subr.bf16.mxu0 %v5416_v8 }
 0x141   :  { %3417 = vmatpush1.bf16.msra.mxu1 %v5411_v33 }
 0x142   :  { %3499 = vmatprep.subr.bf16.mxu1 %v5419_v23  ;;  %v5434_v23 = vld [vmem:[#allocation9 + $0x264] ss:$16 sps:$4 sm:$0xff]  }
 0x195   :  { %v766_v39 = vpop.f32.mrb[0].mxu0 }
 0x196   :  { %v767_v40 = vadd.f32 %v766_v39, %v6253_v38  ;;  %v768_v41 = vpop.f32.mrb[1].mxu0 }
 0x197   :  { %v769_v42 = vadd.f32 %v768_v41, %v6258_v31  ;;  %v770_v44 = vpop.f32.mrb[2].mxu0  ;;  %v879_v3 = vpop.f32.mrb[0].mxu1 }
 0x198   :  { %v771_v17 = vadd.f32 %v770_v44, %v6253_v38  ;;  %v772_v45 = vpop.f32.mrb[3].mxu0  ;;  %v1184_v49 = vmax.f32 %v767_v40, 0.0  ;;  %v880_v7 = vadd.f32 %v879_v3, %v6269_v47  ;;  %v881_v30 = vpop.f32.mrb[1].mxu1 }
 0x199   :  { %v773_v46 = vadd.f32 %v772_v45, %v6258_v31  ;;  %v1185_v51 = vmax.f32 %v769_v42, 0.0  ;;  %v882_v13 = vadd.f32 %v881_v30, %v6275_v62  ;;  %v883_v14 = vpop.f32.mrb[2].mxu1  ;;  %v5432_v45 = vld [vmem:[#allocation9 + $0x260] ss:$16 sps:$4 sm:$0xff]  }
 0x19a   :  { %v1192_v21 = vmax.f32 %v771_v17, 0.0  ;;  %v1186_v54 = vmax.f32 %v880_v7, 0.0  ;;  %v884_v16 = vadd.f32 %v883_v14, %v6269_v47  ;;  %v885_v18 = vpop.f32.mrb[3].mxu1  ;;  %v5441_v7 = vld [vmem:[#allocation9 + $0x288] ss:$16 sps:$4 sm:$0xff]  }
 0x19b   :  { %v1193_v52 = vmax.f32 %v773_v46, 0.0  ;;  %v1187_v20 = vmax.f32 %v882_v13, 0.0  ;;  %v886_v22 = vadd.f32 %v885_v18, %v6275_v62  ;;  %v5449_v13 = vld [vmem:[#allocation9 + $0x2ac] ss:$16 sps:$4 sm:$0xff]  }
 0x19c   :  { %v1312_v53 = vpack.c.bf16 %v1192_v21, %v1184_v49  ;;  %v1194_v29 = vmax.f32 %v884_v16, 0.0 }
 0x19d   :  { %v1313_v55 = vpack.c.bf16 %v1193_v52, %v1185_v51  ;;  %v776_v56 = vpop.f32.mrb[4].mxu0  ;;  %v1195_v39 = vmax.f32 %v886_v22, 0.0  ;;  %v5435_v51 = vld [vmem:[#allocation9 + $0x268] ss:$16 sps:$4 sm:$0xff]   ;;  %v5440_v52 = vld [vmem:[#allocation9 + $0x284] ss:$16 sps:$4 sm:$0xff]  }
 0x19e   :  { %v777_v58 = vadd.f32 %v776_v56, %v6253_v38  ;;  %v778_v59 = vpop.f32.mrb[5].mxu0  ;;  %v6286_v42 = vpack.c.bf16 %v1194_v29, %v1186_v54 }
 0x19f   :  { %v779_v1 = vadd.f32 %v778_v59, %v6258_v31  ;;  %v780_v63 = vpop.f32.mrb[6].mxu0  ;;  %2966 = vmatprep.mubr.bf16.mxu0 %v1313_v55  ;;  %3418 = vmatprep.mubr.bf16.mxu1 %v1313_v55  ;;  %v6289_v46 = vpack.c.bf16 %v1195_v39, %v1187_v20  ;;  %v889_v49 = vpop.f32.mrb[4].mxu1 }
 0x1a0   :  { %v781_v5 = vadd.f32 %v780_v63, %v6253_v38  ;;  %v782_v0 = vpop.f32.mrb[7].mxu0  ;;  %2967 = vmatmul.mubr.bf16.vlgmr.msra.gmra.mrb[64].mxu0 %v1312_v53  ;;  %3419 = vmatmul.mubr.bf16.vlgmr.msra.gmra.mrb[64].mxu1 %v1312_v53  ;;  %v1200_v9 = vmax.f32 %v777_v58, 0.0  ;;  %v890_v53 = vadd.f32 %v889_v49, %v6269_v47  ;;  %v891_v55 = vpop.f32.mrb[5].mxu1 }
 0x1a1   :  { %v783_v4 = vadd.f32 %v782_v0, %v6258_v31  ;;  %3048 = vmatpush1.bf16.msra.mxu0 %v5414_v43  ;;  %3500 = vmatpush1.bf16.msra.mxu1 %v5417_v57  ;;  %v1201_v50 = vmax.f32 %v779_v1, 0.0  ;;  %v5443_v57 = vld [vmem:[#allocation9 + $0x28c] ss:$16 sps:$4 sm:$0xff]   ;;  %v892_v58 = vadd.f32 %v891_v55, %v6275_v62  ;;  %v893_v59 = vpop.f32.mrb[6].mxu1  ;;  %v5450_v55 = vld [vmem:[#allocation9 + $0x2c0] ss:$16 sps:$4 sm:$0xff]  }
 0x1a2   :  { %v1208_v10 = vmax.f32 %v781_v5, 0.0  ;;  %3049 = vmatprep.subr.bf16.mxu0 %v5422_v60  ;;  %3501 = vmatprep.subr.bf16.mxu1 %v5425_v61  ;;  %v1202_v1 = vmax.f32 %v890_v53, 0.0  ;;  %v894_v63 = vadd.f32 %v893_v59, %v6269_v47  ;;  %v895_v5 = vpop.f32.mrb[7].mxu1  ;;  %v5458_v59 = vld [vmem:[#allocation9 + $0x2e4] ss:$16 sps:$4 sm:$0xff]  }
 0x1a3   :  { %v1209_v15 = vmax.f32 %v783_v4, 0.0  ;;  %v896_v3 = vadd.f32 %v895_v5, %v6275_v62 }
 0x1a4   :  { %v1320_v19 = vpack.c.bf16 %v1208_v10, %v1200_v9  ;;  %v1210_v30 = vmax.f32 %v894_v63, 0.0 }
 0x1a5   :  { %v1321_v24 = vpack.c.bf16 %v1209_v15, %v1201_v50  ;;  %3050 = vmatpush1.bf16.msra.mxu0 %v5420_v2  ;;  %v786_v8 = vpop.f32.mrb[8].mxu0  ;;  %3502 = vmatpush1.bf16.msra.mxu1 %v5423_v6  ;;  %v1203_v2 = vmax.f32 %v892_v58, 0.0  ;;  %v1211_v14 = vmax.f32 %v896_v3, 0.0  ;;  %v5456_v3 = vld [vmem:[#allocation9 + $0x2e0] ss:$16 sps:$4 sm:$0xff]  }
 0x1a6   :  { %v787_v32 = vadd.f32 %v786_v8, %v6253_v38  ;;  %v788_v33 = vpop.f32.mrb[9].mxu0  ;;  %3051 = vmatprep.subr.bf16.mxu0 %v5428_v26  ;;  %3503 = vmatprep.subr.bf16.mxu1 %v5431_v11  ;;  %v5438_v26 = vld [vmem:[#allocation9 + $0x280] ss:$16 sps:$4 sm:$0xff]   ;;  %v5446_v11 = vld [vmem:[#allocation9 + $0x2a4] ss:$16 sps:$4 sm:$0xff]   ;;  %v6298_v54 = vpack.c.bf16 %v1210_v30, %v1202_v1 }
 0x1a7   :  { %v789_v40 = vadd.f32 %v788_v33, %v6258_v31  ;;  %v790_v41 = vpop.f32.mrb[10].mxu0  ;;  %2976 = vmatprep.mubr.bf16.mxu0 %v1321_v24  ;;  %3428 = vmatprep.mubr.bf16.mxu1 %v1321_v24  ;;  %v6301_v20 = vpack.c.bf16 %v1211_v14, %v1203_v2  ;;  %v899_v22 = vpop.f32.mrb[8].mxu1  ;;  %v5447_v8 = vld [vmem:[#allocation9 + $0x2a8] ss:$16 sps:$4 sm:$0xff]   ;;  %v5464_v30 = vld [vmem:[#allocation9 + $0x304] ss:$16 sps:$4 sm:$0xff]  }
 0x1a8   :  { %v791_v44 = vadd.f32 %v790_v41, %v6253_v38  ;;  %v792_v17 = vpop.f32.mrb[11].mxu0  ;;  %2977 = vmatmul.mubr.bf16.gmra.mrb[68].mxu0 %v1320_v19  ;;  %3429 = vmatmul.mubr.bf16.gmra.mrb[68].mxu1 %v1320_v19  ;;  %v1216_v56 = vmax.f32 %v787_v32, 0.0  ;;  %v5444_v19 = vld [vmem:[#allocation9 + $0x2a0] ss:$16 sps:$4 sm:$0xff]   ;;  %v901_v29 = vpop.f32.mrb[9].mxu1 }
 0x1a9   :  { %v793_v21 = vadd.f32 %v792_v17, %v6258_v31  ;;  %3052 = vmatpush1.bf16.msra.mxu0 %v5426_v12  ;;  %3504 = vmatpush1.bf16.msra.mxu1 %v5429_v28  ;;  %v1217_v60 = vmax.f32 %v789_v40, 0.0  ;;  %v5452_v12 = vld [vmem:[#allocation9 + $0x2c4] ss:$16 sps:$4 sm:$0xff]   ;;  %v900_v28 = vadd.f32 %v899_v22, %v6269_v47  ;;  %v903_v39 = vpop.f32.mrb[10].mxu1  ;;  %v5467_v14 = vld [vmem:[#allocation9 + $0x30c] ss:$16 sps:$4 sm:$0xff]  }
 0x1aa   :  { %v1224_v43 = vmax.f32 %v791_v44, 0.0  ;;  %3053 = vmatprep.subr.bf16.mxu0 %v5434_v23  ;;  %3505 = vmatprep.subr.bf16.mxu1 %v5437_v34  ;;  %v5455_v23 = vld [vmem:[#allocation9 + $0x2cc] ss:$16 sps:$4 sm:$0xff]   ;;  %v902_v34 = vadd.f32 %v901_v29, %v6275_v62  ;;  %v904_v17 = vadd.f32 %v903_v39, %v6269_v47 }
 0x1ab   :  { %v1225_v61 = vmax.f32 %v793_v21, 0.0  ;;  %v1218_v44 = vmax.f32 %v900_v28, 0.0 }
 0x1ac   :  { %v1328_v0 = vpack.c.bf16 %v1224_v43, %v1216_v56  ;;  %v1219_v21 = vmax.f32 %v902_v34, 0.0  ;;  %v5453_v56 = vld [vmem:[#allocation9 + $0x2c8] ss:$16 sps:$4 sm:$0xff]   ;;  %v1226_v43 = vmax.f32 %v904_v17, 0.0 }
 0x1ad   :  { %v1329_v4 = vpack.c.bf16 %v1225_v61, %v1217_v60  ;;  %3054 = vmatpush1.bf16.msra.mxu0 %v5432_v45  ;;  %v796_v6 = vpop.f32.mrb[12].mxu0  ;;  %3506 = vmatpush1.bf16.msra.mxu1 %v5435_v51  ;;  %v905_v45 = vpop.f32.mrb[11].mxu1  ;;  %v5461_v60 = vld [vmem:[#allocation9 + $0x2ec] ss:$16 sps:$4 sm:$0xff]  }
 0x1ae   :  { %v797_v9 = vadd.f32 %v796_v6, %v6253_v38  ;;  %v798_v10 = vpop.f32.mrb[13].mxu0  ;;  %3055 = vmatprep.subr.bf16.mxu0 %v5440_v52  ;;  %3507 = vmatprep.subr.bf16.mxu1 %v5443_v57  ;;  %v906_v51 = vadd.f32 %v905_v45, %v6275_v62  ;;  %v6310_v5 = vpack.c.bf16 %v1226_v43, %v1218_v44  ;;  %v5473_v44 = vld [vmem:[#allocation9 + $0x32c] ss:$16 sps:$4 sm:$0xff]  }
 0x1af   :  { %v799_v50 = vadd.f32 %v798_v10, %v6258_v31  ;;  %v800_v15 = vpop.f32.mrb[14].mxu0  ;;  %2986 = vmatprep.mubr.bf16.mxu0 %v1329_v4  ;;  %3438 = vmatprep.mubr.bf16.mxu1 %v1329_v4  ;;  %v909_v6 = vpop.f32.mrb[12].mxu1 }
 0x1b0   :  { %v801_v16 = vadd.f32 %v800_v15, %v6253_v38  ;;  %v802_v18 = vpop.f32.mrb[15].mxu0  ;;  %2987 = vmatmul.mubr.bf16.gmra.mrb[72].mxu0 %v1328_v0  ;;  %3439 = vmatmul.mubr.bf16.gmra.mrb[72].mxu1 %v1328_v0  ;;  %v1232_v32 = vmax.f32 %v797_v9, 0.0  ;;  %v1227_v61 = vmax.f32 %v906_v51, 0.0  ;;  %v910_v9 = vadd.f32 %v909_v6, %v6269_v47  ;;  %v911_v10 = vpop.f32.mrb[13].mxu1 }
 0x1b1   :  { %v803_v24 = vadd.f32 %v802_v18, %v6258_v31  ;;  %3056 = vmatpush1.bf16.msra.mxu0 %v5438_v26  ;;  %3508 = vmatpush1.bf16.msra.mxu1 %v5441_v7  ;;  %v1233_v40 = vmax.f32 %v799_v50, 0.0  ;;  %v5459_v7 = vld [vmem:[#allocation9 + $0x2e8] ss:$16 sps:$4 sm:$0xff]   ;;  %v912_v50 = vadd.f32 %v911_v10, %v6275_v62  ;;  %v913_v15 = vpop.f32.mrb[14].mxu1 }
 0x1b2   :  { %v1240_v33 = vmax.f32 %v801_v16, 0.0  ;;  %3057 = vmatprep.subr.bf16.mxu0 %v5446_v11  ;;  %3509 = vmatprep.subr.bf16.mxu1 %v5449_v13  ;;  %v6313_v4 = vpack.c.bf16 %v1227_v61, %v1219_v21  ;;  %v914_v22 = vadd.f32 %v913_v15, %v6269_v47  ;;  %v5477_v15 = vld [vmem:[#allocation9 + $0x348] ss:$16 sps:$4 sm:$0xff]  }
 0x1b3   :  { %v1241_v41 = vmax.f32 %v803_v24, 0.0  ;;  %v915_v24 = vpop.f32.mrb[15].mxu1 }
 0x1b4   :  { %v1336_v49 = vpack.c.bf16 %v1240_v33, %v1232_v32  ;;  %v916_v28 = vadd.f32 %v915_v24, %v6275_v62  ;;  %v5462_v33 = vld [vmem:[#allocation9 + $0x300] ss:$16 sps:$4 sm:$0xff]   ;;  %v1242_v34 = vmax.f32 %v914_v22, 0.0  ;;  %v5482_v22 = vld [vmem:[#allocation9 + $0x364] ss:$16 sps:$4 sm:$0xff]  }
 0x1b5   :  { %v1337_v52 = vpack.c.bf16 %v1241_v41, %v1233_v40  ;;  %3058 = vmatpush1.bf16.msra.mxu0 %v5444_v19  ;;  %v806_v53 = vpop.f32.mrb[16].mxu0  ;;  %3510 = vmatpush1.bf16.msra.mxu1 %v5447_v8  ;;  %v1234_v19 = vmax.f32 %v910_v9, 0.0  ;;  %v5470_v41 = vld [vmem:[#allocation9 + $0x324] ss:$16 sps:$4 sm:$0xff]   ;;  %v5485_v24 = vld [vmem:[#allocation9 + $0x36c] ss:$16 sps:$4 sm:$0xff]  }
 0x1b6   :  { %v807_v57 = vadd.f32 %v806_v53, %v6253_v38  ;;  %v808_v58 = vpop.f32.mrb[17].mxu0  ;;  %3059 = vmatprep.subr.bf16.mxu0 %v5452_v12  ;;  %3511 = vmatprep.subr.bf16.mxu1 %v5455_v23  ;;  %v1235_v12 = vmax.f32 %v912_v50, 0.0  ;;  %v5465_v23 = vld [vmem:[#allocation9 + $0x308] ss:$16 sps:$4 sm:$0xff]   ;;  %v1243_v17 = vmax.f32 %v916_v28, 0.0 }
 0x1b7   :  { %v809_v1 = vadd.f32 %v808_v58, %v6258_v31  ;;  %v810_v63 = vpop.f32.mrb[18].mxu0  ;;  %2996 = vmatprep.mubr.bf16.mxu0 %v1337_v52  ;;  %3448 = vmatprep.mubr.bf16.mxu1 %v1337_v52  ;;  %v6322_v21 = vpack.c.bf16 %v1242_v34, %v1234_v19  ;;  %v5468_v53 = vld [vmem:[#allocation9 + $0x320] ss:$16 sps:$4 sm:$0xff]   ;;  %v5476_v58 = vld [vmem:[#allocation9 + $0x344] ss:$16 sps:$4 sm:$0xff]  }
 0x1b8   :  { %v811_v0 = vadd.f32 %v810_v63, %v6253_v38  ;;  %v812_v2 = vpop.f32.mrb[19].mxu0  ;;  %2997 = vmatmul.mubr.bf16.gmra.mrb[76].mxu0 %v1336_v49  ;;  %3449 = vmatmul.mubr.bf16.gmra.mrb[76].mxu1 %v1336_v49  ;;  %v1248_v11 = vmax.f32 %v807_v57, 0.0  ;;  %v5471_v57 = vld [vmem:[#allocation9 + $0x328] ss:$16 sps:$4 sm:$0xff]   ;;  %v5479_v63 = vld [vmem:[#allocation9 + $0x34c] ss:$16 sps:$4 sm:$0xff]  }
 0x1b9   :  { %v813_v26 = vadd.f32 %v812_v2, %v6258_v31  ;;  %3060 = vmatpush1.bf16.msra.mxu0 %v5450_v55  ;;  %3512 = vmatpush1.bf16.msra.mxu1 %v5453_v56  ;;  %v1249_v16 = vmax.f32 %v809_v1, 0.0  ;;  %v6325_v55 = vpack.c.bf16 %v1243_v17, %v1235_v12  ;;  %v919_v56 = vpop.f32.mrb[16].mxu1  ;;  %v5474_v50 = vld [vmem:[#allocation9 + $0x340] ss:$16 sps:$4 sm:$0xff]  }
 0x1ba   :  { %v1256_v13 = vmax.f32 %v811_v0, 0.0  ;;  %3061 = vmatprep.subr.bf16.mxu0 %v5458_v59  ;;  %3513 = vmatprep.subr.bf16.mxu1 %v5461_v60  ;;  %v920_v59 = vadd.f32 %v919_v56, %v6269_v47  ;;  %v921_v60 = vpop.f32.mrb[17].mxu1 }
 0x1bb   :  { %v1257_v18 = vmax.f32 %v813_v26, 0.0  ;;  %v922_v0 = vadd.f32 %v921_v60, %v6275_v62  ;;  %v923_v2 = vpop.f32.mrb[18].mxu1 }
 0x1bc   :  { %v1344_v8 = vpack.c.bf16 %v1256_v13, %v1248_v11  ;;  %v1250_v26 = vmax.f32 %v920_v59, 0.0 }
 0x1bd   :  { %v1345_v29 = vpack.c.bf16 %v1257_v18, %v1249_v16  ;;  %3062 = vmatpush1.bf16.msra.mxu0 %v5456_v3  ;;  %v816_v32 = vpop.f32.mrb[20].mxu0  ;;  %3514 = vmatpush1.bf16.msra.mxu1 %v5459_v7  ;;  %v924_v7 = vadd.f32 %v923_v2, %v6269_v47  ;;  %v1251_v10 = vmax.f32 %v922_v0, 0.0 }
 0x1be   :  { %v817_v39 = vadd.f32 %v816_v32, %v6253_v38  ;;  %v818_v40 = vpop.f32.mrb[21].mxu0  ;;  %3063 = vmatprep.subr.bf16.mxu0 %v5464_v30  ;;  %3515 = vmatprep.subr.bf16.mxu1 %v5467_v14  ;;  %v925_v30 = vpop.f32.mrb[19].mxu1 }
 0x1bf   :  { %v819_v45 = vadd.f32 %v818_v40, %v6258_v31  ;;  %v820_v49 = vpop.f32.mrb[22].mxu0  ;;  %3006 = vmatprep.mubr.bf16.mxu0 %v1345_v29  ;;  %3458 = vmatprep.mubr.bf16.mxu1 %v1345_v29  ;;  %v926_v11 = vadd.f32 %v925_v30, %v6275_v62  ;;  %v1258_v16 = vmax.f32 %v924_v7, 0.0  ;;  %v285_v30 = vsub.s32 4, %v6243_v35 }
 0x1c0   :  { %v821_v51 = vadd.f32 %v820_v49, %v6253_v38  ;;  %v822_v52 = vpop.f32.mrb[23].mxu0  ;;  %3007 = vmatmul.mubr.bf16.gmra.mrb[80].mxu0 %v1344_v8  ;;  %3459 = vmatmul.mubr.bf16.gmra.mrb[80].mxu1 %v1344_v8  ;;  %v1264_v61 = vmax.f32 %v817_v39, 0.0  ;;  %v929_v39 = vpop.f32.mrb[20].mxu1 }
 0x1c1   :  { %v823_v43 = vadd.f32 %v822_v52, %v6258_v31  ;;  %3064 = vmatpush1.bf16.msra.mxu0 %v5462_v33  ;;  %3516 = vmatpush1.bf16.msra.mxu1 %v5465_v23  ;;  %v1265_v3 = vmax.f32 %v819_v45, 0.0  ;;  %v1259_v8 = vmax.f32 %v926_v11, 0.0  ;;  %v6334_v29 = vpack.c.bf16 %v1258_v16, %v1250_v26  ;;  %v5480_v23 = vld [vmem:[#allocation9 + $0x360] ss:$16 sps:$4 sm:$0xff]   ;;  %v931_v45 = vpop.f32.mrb[21].mxu1 }
 0x1c2   :  { %v1272_v1 = vmax.f32 %v821_v51, 0.0  ;;  %3065 = vmatprep.subr.bf16.mxu0 %v5470_v41  ;;  %3517 = vmatprep.subr.bf16.mxu1 %v5473_v44  ;;  %v5483_v41 = vld [vmem:[#allocation9 + $0x368] ss:$16 sps:$4 sm:$0xff]   ;;  %v5488_v44 = vld [vmem:[#allocation9 + $0x384] ss:$16 sps:$4 sm:$0xff]   ;;  %v930_v17 = vadd.f32 %v929_v39, %v6269_v47  ;;  %v933_v56 = vpop.f32.mrb[22].mxu1  ;;  %v6356_v39 = vrot.slane %v6248_v36, %v285_v30 }
 0x1c3   :  { %v1273_v6 = vmax.f32 %v823_v43, 0.0  ;;  %v6337_v34 = vpack.c.bf16 %v1259_v8, %v1251_v10  ;;  %v5491_v52 = vld [vmem:[#allocation9 + $0x38c] ss:$16 sps:$4 sm:$0xff]   ;;  %v934_v59 = vadd.f32 %v933_v56, %v6269_v47  ;;  %v935_v60 = vpop.f32.mrb[23].mxu1  ;;  %v5494_v26 = vld [vmem:[#allocation9 + $0x3a4] ss:$16 sps:$4 sm:$0xff]  }
 0x1c4   :  { %v1352_v9 = vpack.c.bf16 %v1272_v1, %v1264_v61  ;;  %v5486_v1 = vld [vmem:[#allocation9 + $0x380] ss:$16 sps:$4 sm:$0xff]   ;;  %v936_v2 = vadd.f32 %v935_v60, %v6275_v62  ;;  %v5497_v11 = vld [vmem:[#allocation9 + $0x3ac] ss:$16 sps:$4 sm:$0xff]   ;;  %v5501_v60 = vld [vmem:[#allocation9 + $0x3c8] ss:$16 sps:$4 sm:$0xff]  }
 0x1c5   :  { %v1353_v13 = vpack.c.bf16 %v1273_v6, %v1265_v3  ;;  %3066 = vmatpush1.bf16.msra.mxu0 %v5468_v53  ;;  %v826_v14 = vpop.f32.mrb[24].mxu0  ;;  %3518 = vmatpush1.bf16.msra.mxu1 %v5471_v57  ;;  %v932_v53 = vadd.f32 %v931_v45, %v6275_v62  ;;  %v1274_v7 = vmax.f32 %v934_v59, 0.0  ;;  %v5498_v59 = vld [vmem:[#allocation9 + $0x3c0] ss:$16 sps:$4 sm:$0xff]  }
 0x1c6   :  { %v827_v18 = vadd.f32 %v826_v14, %v6253_v38  ;;  %v828_v19 = vpop.f32.mrb[25].mxu0  ;;  %3067 = vmatprep.subr.bf16.mxu0 %v5476_v58  ;;  %3519 = vmatprep.subr.bf16.mxu1 %v5479_v63  ;;  %v1266_v58 = vmax.f32 %v930_v17, 0.0  ;;  %v5489_v63 = vld [vmem:[#allocation9 + $0x388] ss:$16 sps:$4 sm:$0xff]   ;;  %v289_v14 = vsub.s32 5, %v6243_v35 }
 0x1c7   :  { %v829_v12 = vadd.f32 %v828_v19, %v6258_v31  ;;  %v830_v28 = vpop.f32.mrb[26].mxu0  ;;  %3016 = vmatprep.mubr.bf16.mxu0 %v1353_v13  ;;  %3468 = vmatprep.mubr.bf16.mxu1 %v1353_v13  ;;  %v1267_v0 = vmax.f32 %v932_v53, 0.0  ;;  %v1275_v13 = vmax.f32 %v936_v2, 0.0  ;;  %v939_v8 = vpop.f32.mrb[24].mxu1 }
 0x1c8   :  { %v831_v32 = vadd.f32 %v830_v28, %v6253_v38  ;;  %v832_v33 = vpop.f32.mrb[27].mxu0  ;;  %3017 = vmatmul.mubr.bf16.gmra.mrb[84].mxu0 %v1352_v9  ;;  %3469 = vmatmul.mubr.bf16.gmra.mrb[84].mxu1 %v1352_v9  ;;  %v1280_v49 = vmax.f32 %v827_v18, 0.0  ;;  %v6348_v16 = vpack.c.bf16 %v1274_v7, %v1266_v58  ;;  %v5495_v28 = vld [vmem:[#allocation9 + $0x3a8] ss:$16 sps:$4 sm:$0xff]  }
 0x1c9   :  { %v833_v40 = vadd.f32 %v832_v33, %v6258_v31  ;;  %3068 = vmatpush1.bf16.msra.mxu0 %v5474_v50  ;;  %3520 = vmatpush1.bf16.msra.mxu1 %v5477_v15  ;;  %v1281_v43 = vmax.f32 %v829_v12, 0.0  ;;  %v940_v33 = vadd.f32 %v939_v8, %v6269_v47 }
 0x1ca   :  { %v1288_v51 = vmax.f32 %v831_v32, 0.0  ;;  %3069 = vmatprep.subr.bf16.mxu0 %v5482_v22  ;;  %3521 = vmatprep.subr.bf16.mxu1 %v5485_v24  ;;  %v5492_v22 = vld [vmem:[#allocation9 + $0x3a0] ss:$16 sps:$4 sm:$0xff]   ;;  %v6351_v24 = vpack.c.bf16 %v1275_v13, %v1267_v0  ;;  %v5500_v32 = vld [vmem:[#allocation9 + $0x3c4] ss:$16 sps:$4 sm:$0xff]  }
 0x1cb   :  { %v1289_v57 = vmax.f32 %v833_v40, 0.0 }
 0x1cc   :  { %v1360_v61 = vpack.c.bf16 %v1288_v51, %v1280_v49  ;;  %v1282_v51 = vmax.f32 %v940_v33, 0.0 }
 0x1cd   :  { %v1361_v3 = vpack.c.bf16 %v1289_v57, %v1281_v43  ;;  %3070 = vmatpush1.bf16.msra.mxu0 %v5480_v23  ;;  %v836_v6 = vpop.f32.mrb[28].mxu0  ;;  %3522 = vmatpush1.bf16.msra.mxu1 %v5483_v41  ;;  %v941_v23 = vpop.f32.mrb[25].mxu1  ;;  %v5503_v41 = vld [vmem:[#allocation9 + $0x3cc] ss:$16 sps:$4 sm:$0xff]  }
 0x1ce   :  { %v837_v9 = vadd.f32 %v836_v6, %v6253_v38  ;;  %v838_v10 = vpop.f32.mrb[29].mxu0  ;;  %3071 = vmatprep.subr.bf16.mxu0 %v5488_v44  ;;  %3523 = vmatprep.subr.bf16.mxu1 %v5491_v52  ;;  %v942_v44 = vadd.f32 %v941_v23, %v6275_v62  ;;  %v943_v17 = vpop.f32.mrb[26].mxu1  ;;  %v5504_v6 = vld [vmem:[#allocation9 + $0x3e0] ss:$16 sps:$4 sm:$0xff]  }
 0x1cf   :  { %v839_v50 = vadd.f32 %v838_v10, %v6258_v31  ;;  %v840_v15 = vpop.f32.mrb[30].mxu0  ;;  %3026 = vmatprep.mubr.bf16.mxu0 %v1361_v3  ;;  %3478 = vmatprep.mubr.bf16.mxu1 %v1361_v3  ;;  %v944_v52 = vadd.f32 %v943_v17, %v6269_v47  ;;  %v945_v53 = vpop.f32.mrb[27].mxu1  ;;  %v5507_v10 = vld [vmem:[#allocation9 + $0x3e8] ss:$16 sps:$4 sm:$0xff]  }
 0x1d0   :  { %v841_v18 = vadd.f32 %v840_v15, %v6253_v38  ;;  %v842_v19 = vpop.f32.mrb[31].mxu0  ;;  %3027 = vmatmul.mubr.bf16.gmra.mrb[88].mxu0 %v1360_v61  ;;  %3479 = vmatmul.mubr.bf16.gmra.mrb[88].mxu1 %v1360_v61  ;;  %v1296_v38 = vmax.f32 %v837_v9, 0.0  ;;  %v1283_v43 = vmax.f32 %v942_v44, 0.0  ;;  %v946_v57 = vadd.f32 %v945_v53, %v6275_v62  ;;  %v949_v13 = vpop.f32.mrb[28].mxu1  ;;  %v5510_v53 = vld [vmem:[#allocation9 + $0x400] ss:$16 sps:$4 sm:$0xff]  }
 0x1d1   :  { %v843_v12 = vadd.f32 %v842_v19, %v6258_v31  ;;  %3072 = vmatpush1.bf16.msra.mxu0 %v5486_v1  ;;  %3524 = vmatpush1.bf16.msra.mxu1 %v5489_v63  ;;  %v6360_v31 = vrot.slane %v6248_v36, %v289_v14  ;;  %v1297_v45 = vmax.f32 %v839_v50, 0.0  ;;  %v1290_v61 = vmax.f32 %v944_v52, 0.0  ;;  %v5506_v63 = vld [vmem:[#allocation9 + $0x3e4] ss:$16 sps:$4 sm:$0xff]  }
 0x1d2   :  { %v1304_v40 = vmax.f32 %v841_v18, 0.0  ;;  %3073 = vmatprep.subr.bf16.mxu0 %v5494_v26  ;;  %3525 = vmatprep.subr.bf16.mxu1 %v5497_v11  ;;  %v1291_v0 = vmax.f32 %v946_v57, 0.0  ;;  %v5509_v26 = vld [vmem:[#allocation9 + $0x3ec] ss:$16 sps:$4 sm:$0xff]   ;;  %v5512_v18 = vld [vmem:[#allocation9 + $0x404] ss:$16 sps:$4 sm:$0xff]   ;;  %v950_v19 = vadd.f32 %v949_v13, %v6269_v47 }
 0x1d3   :  { %v1305_v49 = vmax.f32 %v843_v12, 0.0  ;;  %v6365_v7 = vpack.c.bf16 %v1290_v61, %v1282_v51 }
 0x1d4   :  { %v1368_v56 = vpack.c.bf16 %v1304_v40, %v1296_v38  ;;  %v6368_v11 = vpack.c.bf16 %v1291_v0, %v1283_v43  ;;  %v297_v40 = vsub.s32 7, %v6243_v35 }
 0x1d5   :  { %v1369_v58 = vpack.c.bf16 %v1305_v49, %v1297_v45  ;;  %3074 = vmatpush1.bf16.msra.mxu0 %v5492_v22  ;;  %3526 = vmatpush1.bf16.msra.mxu1 %v5495_v28  ;;  %v992_v1 = vpop.f32.mrb[32].mxu0  ;;  %v951_v22 = vpop.f32.mrb[29].mxu1  ;;  %v293_v28 = vsub.s32 6, %v6243_v35 }
 0x1d6   :  { %3075 = vmatprep.subr.bf16.mxu0 %v5500_v32  ;;  %3527 = vmatprep.subr.bf16.mxu1 %v5503_v41  ;;  %v993_v2 = vadd.f32 %v992_v1, %v6356_v39  ;;  %v994_v3 = vpop.f32.mrb[33].mxu0  ;;  %v5515_v32 = vld [vmem:[#allocation9 + $0x40c] ss:$16 sps:$4 sm:$0xff]   ;;  %v952_v33 = vadd.f32 %v951_v22, %v6275_v62  ;;  %v953_v23 = vpop.f32.mrb[30].mxu1  ;;  %v1298_v41 = vmax.f32 %v950_v19, 0.0  ;;  %v6389_v61 = vrot.slane %v6248_v36, %v297_v40 }
 0x1d7   :  { %3036 = vmatprep.mubr.bf16.mxu0 %v1369_v58  ;;  %3488 = vmatprep.mubr.bf16.mxu1 %v1369_v58  ;;  %v995_v30 = vadd.f32 %v994_v3, %v6360_v31  ;;  %v996_v9 = vpop.f32.mrb[34].mxu0  ;;  %v954_v44 = vadd.f32 %v953_v23, %v6269_v47  ;;  %v955_v17 = vpop.f32.mrb[31].mxu1  ;;  %v5518_v47 = vld [vmem:[#allocation9 + $0x424] ss:$16 sps:$4 sm:$0xff]   ;;  %v5521_v1 = vld [vmem:[#allocation9 + $0x42c] ss:$16 sps:$4 sm:$0xff]  }
 0x1d8   :  { %3037 = vmatmul.mubr.bf16.gmra.mrb[92].mxu0 %v1368_v56  ;;  %3489 = vmatmul.mubr.bf16.gmra.mrb[92].mxu1 %v1368_v56  ;;  %v1188_v14 = vmax.f32 %v993_v2, 0.0  ;;  %v997_v50 = vadd.f32 %v996_v9, %v6356_v39  ;;  %v998_v15 = vpop.f32.mrb[35].mxu0  ;;  %v1299_v49 = vmax.f32 %v952_v33, 0.0  ;;  %v956_v51 = vadd.f32 %v955_v17, %v6275_v62  ;;  %v5513_v56 = vld [vmem:[#allocation9 + $0x408] ss:$16 sps:$4 sm:$0xff]   ;;  %v1105_v9 = vpop.f32.mrb[32].mxu1 }
 0x1d9   :  { %3076 = vmatpush1.bf16.msra.mxu0 %v5498_v59  ;;  %3528 = vmatpush1.bf16.msra.mxu1 %v5501_v60  ;;  %v1189_v8 = vmax.f32 %v995_v30, 0.0  ;;  %v999_v12 = vadd.f32 %v998_v15, %v6360_v31  ;;  %v1306_v43 = vmax.f32 %v954_v44, 0.0  ;;  %v1107_v15 = vpop.f32.mrb[33].mxu1  ;;  %v5525_v44 = vld [vmem:[#allocation9 + $0x448] ss:$16 sps:$4 sm:$0xff]  }
 0x1da   :  { %3077 = vmatprep.subr.bf16.mxu0 %v5506_v63  ;;  %3079 = vmatprep.mubr.bf16.mxu0 %v6289_v46  ;;  %v1196_v38 = vmax.f32 %v997_v50, 0.0  ;;  %v1307_v59 = vmax.f32 %v956_v51, 0.0  ;;  %v1108_v22 = vadd.f32 %v1107_v15, %v6389_v61 }
 0x1db   :  { %3529 = vmatprep.subr.bf16.mxu1 %v5509_v26  ;;  %3531 = vmatprep.mubr.bf16.mxu1 %v6289_v46  ;;  %v1197_v45 = vmax.f32 %v999_v12, 0.0  ;;  %v6385_v46 = vrot.slane %v6248_v36, %v293_v28  ;;  %v6391_v63 = vpack.c.bf16 %v1306_v43, %v1298_v41  ;;  %v5516_v36 = vld [vmem:[#allocation9 + $0x420] ss:$16 sps:$4 sm:$0xff]   ;;  %v5533_v43 = vld [vmem:[#allocation9 + $0x46c] ss:$16 sps:$4 sm:$0xff]  }
 0x1dc   :  { %v6380_v52 = vpack.c.bf16 %v1196_v38, %v1188_v14  ;;  %v6396_v3 = vpack.c.bf16 %v1307_v59, %v1299_v49  ;;  %v1191_v38 = vmax.f32 %v1108_v22, 0.0  ;;  %v5522_v41 = vld [vmem:[#allocation9 + $0x440] ss:$16 sps:$4 sm:$0xff]  }
 0x1dd   :  { %3078 = vmatpush1.bf16.msra.mxu0 %v5504_v6  ;;  %3530 = vmatpush1.bf16.msra.mxu1 %v5507_v10  ;;  %v6382_v57 = vpack.c.bf16 %v1197_v45, %v1189_v8  ;;  %v1002_v58 = vpop.f32.mrb[36].mxu0  ;;  %v5519_v10 = vld [vmem:[#allocation9 + $0x428] ss:$16 sps:$4 sm:$0xff]   ;;  %v1106_v50 = vadd.f32 %v1105_v9, %v6385_v46  ;;  %v1109_v8 = vpop.f32.mrb[34].mxu1 }
 0x1de   :  { %3160 = vmatprep.subr.bf16.mxu0 %v5512_v18  ;;  %3612 = vmatprep.subr.bf16.mxu1 %v5515_v32  ;;  %v1003_v60 = vadd.f32 %v1002_v58, %v6356_v39  ;;  %v1004_v62 = vpop.f32.mrb[37].mxu0  ;;  %v5527_v18 = vld [vmem:[#allocation9 + $0x44c] ss:$16 sps:$4 sm:$0xff]   ;;  %v1110_v32 = vadd.f32 %v1109_v8, %v6385_v46  ;;  %v1111_v33 = vpop.f32.mrb[35].mxu1 }
 0x1df   :  { %v1005_v0 = vadd.f32 %v1004_v62, %v6360_v31  ;;  %v1006_v2 = vpop.f32.mrb[38].mxu0  ;;  %v1190_v28 = vmax.f32 %v1106_v50, 0.0  ;;  %v1112_v40 = vadd.f32 %v1111_v33, %v6389_v61  ;;  %v5537_v33 = vld [vmem:[#allocation9 + $0x488] ss:$16 sps:$4 sm:$0xff]  }
 0x1e0   :  { %3080 = vmatmul.mubr.bf16.vlgmr.msra.gmra.mrb[64].mxu0 %v6286_v42  ;;  %3532 = vmatmul.mubr.bf16.vlgmr.msra.gmra.mrb[64].mxu1 %v6286_v42  ;;  %v1204_v6 = vmax.f32 %v1003_v60, 0.0  ;;  %v1007_v26 = vadd.f32 %v1006_v2, %v6356_v39  ;;  %v1008_v30 = vpop.f32.mrb[39].mxu0  ;;  %v5524_v42 = vld [vmem:[#allocation9 + $0x444] ss:$16 sps:$4 sm:$0xff]   ;;  %v1198_v49 = vmax.f32 %v1110_v32, 0.0  ;;  %v1115_v2 = vpop.f32.mrb[36].mxu1 }
 0x1e1   :  { %3161 = vmatpush1.bf16.msra.mxu0 %v5510_v53  ;;  %3613 = vmatpush1.bf16.msra.mxu1 %v5513_v56  ;;  %v1205_v13 = vmax.f32 %v1005_v0, 0.0  ;;  %v1009_v14 = vadd.f32 %v1008_v30, %v6360_v31  ;;  %v1199_v56 = vmax.f32 %v1112_v40, 0.0  ;;  %v5534_v32 = vld [vmem:[#allocation9 + $0x480] ss:$16 sps:$4 sm:$0xff]  }
 0x1e2   :  { %3162 = vmatprep.subr.bf16.mxu0 %v5518_v47  ;;  %3089 = vmatprep.mubr.bf16.mxu0 %v6301_v20  ;;  %v1212_v19 = vmax.f32 %v1007_v26, 0.0  ;;  %v6412_v59 = vpack.c.bf16 %v1198_v49, %v1190_v28  ;;  %v5531_v26 = vld [vmem:[#allocation9 + $0x468] ss:$16 sps:$4 sm:$0xff]  }
 0x1e3   :  { %3541 = vmatprep.mubr.bf16.mxu1 %v6301_v20  ;;  %3614 = vmatprep.subr.bf16.mxu1 %v5521_v1  ;;  %v1213_v12 = vmax.f32 %v1009_v14, 0.0  ;;  %v5530_v20 = vld [vmem:[#allocation9 + $0x464] ss:$16 sps:$4 sm:$0xff]   ;;  %v6417_v0 = vpack.c.bf16 %v1199_v56, %v1191_v38 }
 0x1e4   :  { %v6405_v23 = vpack.c.bf16 %v1212_v19, %v1204_v6  ;;  %v5528_v6 = vld [vmem:[#allocation9 + $0x460] ss:$16 sps:$4 sm:$0xff]  }
 0x1e5   :  { %3163 = vmatpush1.bf16.msra.mxu0 %v5516_v36  ;;  %3615 = vmatpush1.bf16.msra.mxu1 %v5519_v10  ;;  %v6408_v17 = vpack.c.bf16 %v1213_v12, %v1205_v13  ;;  %v1012_v45 = vpop.f32.mrb[40].mxu0  ;;  %v1116_v36 = vadd.f32 %v1115_v2, %v6385_v46  ;;  %v1117_v10 = vpop.f32.mrb[37].mxu1  ;;  %v5539_v13 = vld [vmem:[#allocation9 + $0x48c] ss:$16 sps:$4 sm:$0xff]   ;;  %v5543_v2 = vld [vmem:[#allocation9 + $0x4a8] ss:$16 sps:$4 sm:$0xff]  }
 0x1e6   :  { %3164 = vmatprep.subr.bf16.mxu0 %v5524_v42  ;;  %3616 = vmatprep.subr.bf16.mxu1 %v5527_v18  ;;  %v1013_v51 = vadd.f32 %v1012_v45, %v6356_v39  ;;  %v1014_v53 = vpop.f32.mrb[41].mxu0  ;;  %v1118_v50 = vadd.f32 %v1117_v10, %v6389_v61  ;;  %v1119_v15 = vpop.f32.mrb[38].mxu1 }
 0x1e7   :  { %v1015_v58 = vadd.f32 %v1014_v53, %v6360_v31  ;;  %v1016_v47 = vpop.f32.mrb[42].mxu0  ;;  %v1206_v18 = vmax.f32 %v1116_v36, 0.0  ;;  %v1120_v19 = vadd.f32 %v1119_v15, %v6385_v46  ;;  %v1121_v22 = vpop.f32.mrb[39].mxu1  ;;  %v5551_v36 = vld [vmem:[#allocation9 + $0x4cc] ss:$16 sps:$4 sm:$0xff]  }
 0x1e8   :  { %3090 = vmatmul.mubr.bf16.gmra.mrb[68].mxu0 %v6298_v54  ;;  %3542 = vmatmul.mubr.bf16.gmra.mrb[68].mxu1 %v6298_v54  ;;  %v1220_v60 = vmax.f32 %v1013_v51, 0.0  ;;  %v1017_v62 = vadd.f32 %v1016_v47, %v6356_v39  ;;  %v1018_v1 = vpop.f32.mrb[43].mxu0  ;;  %v5536_v54 = vld [vmem:[#allocation9 + $0x484] ss:$16 sps:$4 sm:$0xff]   ;;  %v1207_v12 = vmax.f32 %v1118_v50, 0.0  ;;  %v1122_v28 = vadd.f32 %v1121_v22, %v6389_v61 }
 0x1e9   :  { %3165 = vmatpush1.bf16.msra.mxu0 %v5522_v41  ;;  %3617 = vmatpush1.bf16.msra.mxu1 %v5525_v44  ;;  %v1221_v30 = vmax.f32 %v1015_v58, 0.0  ;;  %v1019_v9 = vadd.f32 %v1018_v1, %v6360_v31  ;;  %v1214_v41 = vmax.f32 %v1120_v19, 0.0  ;;  %v5540_v1 = vld [vmem:[#allocation9 + $0x4a0] ss:$16 sps:$4 sm:$0xff]  }
 0x1ea   :  { %3166 = vmatprep.subr.bf16.mxu0 %v5530_v20  ;;  %3099 = vmatprep.mubr.bf16.mxu0 %v6313_v4  ;;  %v1228_v14 = vmax.f32 %v1017_v62, 0.0  ;;  %v1215_v49 = vmax.f32 %v1122_v28, 0.0  ;;  %v5545_v20 = vld [vmem:[#allocation9 + $0x4ac] ss:$16 sps:$4 sm:$0xff]   ;;  %v1125_v62 = vpop.f32.mrb[40].mxu1 }
 0x1eb   :  { %3551 = vmatprep.mubr.bf16.mxu1 %v6313_v4  ;;  %3618 = vmatprep.subr.bf16.mxu1 %v5533_v43  ;;  %v1229_v42 = vmax.f32 %v1019_v9, 0.0  ;;  %v5542_v4 = vld [vmem:[#allocation9 + $0x4a4] ss:$16 sps:$4 sm:$0xff]   ;;  %v6432_v56 = vpack.c.bf16 %v1214_v41, %v1206_v18  ;;  %v1127_v9 = vpop.f32.mrb[41].mxu1  ;;  %v5549_v28 = vld [vmem:[#allocation9 + $0x4c8] ss:$16 sps:$4 sm:$0xff]  }
 0x1ec   :  { %v6425_v8 = vpack.c.bf16 %v1228_v14, %v1220_v60  ;;  %v6437_v60 = vpack.c.bf16 %v1215_v49, %v1207_v12  ;;  %v5546_v12 = vld [vmem:[#allocation9 + $0x4c0] ss:$16 sps:$4 sm:$0xff]  }
 0x1ed   :  { %3167 = vmatpush1.bf16.msra.mxu0 %v5528_v6  ;;  %3619 = vmatpush1.bf16.msra.mxu1 %v5531_v26  ;;  %v6428_v38 = vpack.c.bf16 %v1229_v42, %v1221_v30  ;;  %v1022_v40 = vpop.f32.mrb[44].mxu0  ;;  %v1126_v30 = vadd.f32 %v1125_v62, %v6385_v46 }
 0x1ee   :  { %3168 = vmatprep.subr.bf16.mxu0 %v5536_v54  ;;  %3620 = vmatprep.subr.bf16.mxu1 %v5539_v13  ;;  %v1023_v44 = vadd.f32 %v1022_v40, %v6356_v39  ;;  %v1024_v45 = vpop.f32.mrb[45].mxu0  ;;  %v1128_v54 = vadd.f32 %v1127_v9, %v6389_v61  ;;  %v1129_v13 = vpop.f32.mrb[42].mxu1 }
 0x1ef   :  { %v1025_v51 = vadd.f32 %v1024_v45, %v6360_v31  ;;  %v1026_v53 = vpop.f32.mrb[46].mxu0  ;;  %v1222_v50 = vmax.f32 %v1126_v30, 0.0  ;;  %v1130_v15 = vadd.f32 %v1129_v13, %v6385_v46  ;;  %v1131_v42 = vpop.f32.mrb[43].mxu1  ;;  %v5557_v45 = vld [vmem:[#allocation9 + $0x4ec] ss:$16 sps:$4 sm:$0xff]  }
 0x1f0   :  { %3100 = vmatmul.mubr.bf16.gmra.mrb[72].mxu0 %v6310_v5  ;;  %3552 = vmatmul.mubr.bf16.gmra.mrb[72].mxu1 %v6310_v5  ;;  %v1236_v43 = vmax.f32 %v1023_v44, 0.0  ;;  %v1027_v58 = vadd.f32 %v1026_v53, %v6356_v39  ;;  %v1028_v47 = vpop.f32.mrb[47].mxu0  ;;  %v5548_v5 = vld [vmem:[#allocation9 + $0x4c4] ss:$16 sps:$4 sm:$0xff]   ;;  %v1223_v19 = vmax.f32 %v1128_v54, 0.0  ;;  %v1132_v22 = vadd.f32 %v1131_v42, %v6389_v61  ;;  %v1135_v62 = vpop.f32.mrb[44].mxu1 }
 0x1f1   :  { %3169 = vmatpush1.bf16.msra.mxu0 %v5534_v32  ;;  %3621 = vmatpush1.bf16.msra.mxu1 %v5537_v33  ;;  %v1237_v6 = vmax.f32 %v1025_v51, 0.0  ;;  %v1029_v26 = vadd.f32 %v1028_v47, %v6360_v31  ;;  %v1230_v40 = vmax.f32 %v1130_v15, 0.0  ;;  %v1136_v30 = vadd.f32 %v1135_v62, %v6385_v46  ;;  %v1137_v9 = vpop.f32.mrb[45].mxu1 }
 0x1f2   :  { %3170 = vmatprep.subr.bf16.mxu0 %v5542_v4  ;;  %3109 = vmatprep.mubr.bf16.mxu0 %v6325_v55  ;;  %v1244_v10 = vmax.f32 %v1027_v58, 0.0  ;;  %v1231_v44 = vmax.f32 %v1132_v22, 0.0  ;;  %v1139_v54 = vpop.f32.mrb[46].mxu1 }
 0x1f3   :  { %3561 = vmatprep.mubr.bf16.mxu1 %v6325_v55  ;;  %3622 = vmatprep.subr.bf16.mxu1 %v5545_v20  ;;  %v1245_v14 = vmax.f32 %v1029_v26, 0.0  ;;  %v5554_v55 = vld [vmem:[#allocation9 + $0x4e4] ss:$16 sps:$4 sm:$0xff]   ;;  %v6452_v51 = vpack.c.bf16 %v1230_v40, %v1222_v50  ;;  %v1140_v50 = vadd.f32 %v1139_v54, %v6385_v46  ;;  %v1141_v15 = vpop.f32.mrb[47].mxu1 }
 0x1f4   :  { %v6445_v18 = vpack.c.bf16 %v1244_v10, %v1236_v43  ;;  %v6457_v47 = vpack.c.bf16 %v1231_v44, %v1223_v19  ;;  %v1138_v10 = vadd.f32 %v1137_v9, %v6389_v61  ;;  %v1142_v22 = vadd.f32 %v1141_v15, %v6389_v61 }
 0x1f5   :  { %3171 = vmatpush1.bf16.msra.mxu0 %v5540_v1  ;;  %3623 = vmatpush1.bf16.msra.mxu1 %v5543_v2  ;;  %v6448_v32 = vpack.c.bf16 %v1245_v14, %v1237_v6  ;;  %v1032_v33 = vpop.f32.mrb[48].mxu0  ;;  %v5552_v1 = vld [vmem:[#allocation9 + $0x4e0] ss:$16 sps:$4 sm:$0xff]   ;;  %v5555_v2 = vld [vmem:[#allocation9 + $0x4e8] ss:$16 sps:$4 sm:$0xff]   ;;  %v1238_v14 = vmax.f32 %v1136_v30, 0.0 }
 0x1f6   :  { %3172 = vmatprep.subr.bf16.mxu0 %v5548_v5  ;;  %3624 = vmatprep.subr.bf16.mxu1 %v5551_v36  ;;  %v1033_v41 = vadd.f32 %v1032_v33, %v6356_v39  ;;  %v1034_v4 = vpop.f32.mrb[49].mxu0  ;;  %v5563_v5 = vld [vmem:[#allocation9 + $0x50c] ss:$16 sps:$4 sm:$0xff]   ;;  %v1239_v19 = vmax.f32 %v1138_v10, 0.0  ;;  %v1247_v44 = vmax.f32 %v1142_v22, 0.0 }
 0x1f7   :  { %v1035_v49 = vadd.f32 %v1034_v4, %v6360_v31  ;;  %v1036_v20 = vpop.f32.mrb[50].mxu0 }
 0x1f8   :  { %3110 = vmatmul.mubr.bf16.gmra.mrb[76].mxu0 %v6322_v21  ;;  %3562 = vmatmul.mubr.bf16.gmra.mrb[76].mxu1 %v6322_v21  ;;  %v1252_v53 = vmax.f32 %v1033_v41, 0.0  ;;  %v1037_v43 = vadd.f32 %v1036_v20, %v6356_v39  ;;  %v1038_v58 = vpop.f32.mrb[51].mxu0  ;;  %v5560_v21 = vld [vmem:[#allocation9 + $0x504] ss:$16 sps:$4 sm:$0xff]  }
 0x1f9   :  { %3173 = vmatpush1.bf16.msra.mxu0 %v5546_v12  ;;  %3625 = vmatpush1.bf16.msra.mxu1 %v5549_v28  ;;  %v1253_v6 = vmax.f32 %v1035_v49, 0.0  ;;  %v1039_v26 = vadd.f32 %v1038_v58, %v6360_v31  ;;  %v5558_v12 = vld [vmem:[#allocation9 + $0x500] ss:$16 sps:$4 sm:$0xff]   ;;  %v5561_v28 = vld [vmem:[#allocation9 + $0x508] ss:$16 sps:$4 sm:$0xff]  }
 0x1fa   :  { %3174 = vmatprep.subr.bf16.mxu0 %v5554_v55  ;;  %3119 = vmatprep.mubr.bf16.mxu0 %v6337_v34  ;;  %v1260_v36 = vmax.f32 %v1037_v43, 0.0  ;;  %v1246_v55 = vmax.f32 %v1140_v50, 0.0 }
 0x1fb   :  { %3571 = vmatprep.mubr.bf16.mxu1 %v6337_v34  ;;  %3626 = vmatprep.subr.bf16.mxu1 %v5557_v45  ;;  %v1261_v13 = vmax.f32 %v1039_v26, 0.0  ;;  %v5566_v34 = vld [vmem:[#allocation9 + $0x524] ss:$16 sps:$4 sm:$0xff]   ;;  %v5569_v45 = vld [vmem:[#allocation9 + $0x52c] ss:$16 sps:$4 sm:$0xff]  }
 0x1fc   :  { %v6465_v42 = vpack.c.bf16 %v1260_v36, %v1252_v53  ;;  %v6472_v53 = vpack.c.bf16 %v1246_v55, %v1238_v14  ;;  %v5567_v26 = vld [vmem:[#allocation9 + $0x528] ss:$16 sps:$4 sm:$0xff]   ;;  %v5575_v36 = vld [vmem:[#allocation9 + $0x54c] ss:$16 sps:$4 sm:$0xff]  }
 0x1fd   :  { %3175 = vmatpush1.bf16.msra.mxu0 %v5552_v1  ;;  %3627 = vmatpush1.bf16.msra.mxu1 %v5555_v2  ;;  %v6468_v33 = vpack.c.bf16 %v1261_v13, %v1253_v6  ;;  %v1042_v40 = vpop.f32.mrb[52].mxu0  ;;  %v6477_v1 = vpack.c.bf16 %v1247_v44, %v1239_v19  ;;  %v1145_v2 = vpop.f32.mrb[48].mxu1  ;;  %v5564_v6 = vld [vmem:[#allocation9 + $0x520] ss:$16 sps:$4 sm:$0xff]   ;;  %v5573_v55 = vld [vmem:[#allocation9 + $0x548] ss:$16 sps:$4 sm:$0xff]  }
 0x1fe   :  { %3176 = vmatprep.subr.bf16.mxu0 %v5560_v21  ;;  %3628 = vmatprep.subr.bf16.mxu1 %v5563_v5  ;;  %v1043_v41 = vadd.f32 %v1042_v40, %v6356_v39  ;;  %v1044_v4 = vpop.f32.mrb[53].mxu0  ;;  %v1146_v21 = vadd.f32 %v1145_v2, %v6385_v46  ;;  %v1147_v5 = vpop.f32.mrb[49].mxu1  ;;  %v5570_v40 = vld [vmem:[#allocation9 + $0x540] ss:$16 sps:$4 sm:$0xff]  }
 0x1ff   :  { %v1045_v49 = vadd.f32 %v1044_v4, %v6360_v31  ;;  %v1046_v20 = vpop.f32.mrb[54].mxu0  ;;  %v1148_v54 = vadd.f32 %v1147_v5, %v6389_v61  ;;  %v1149_v13 = vpop.f32.mrb[50].mxu1  ;;  %v5579_v5 = vld [vmem:[#allocation9 + $0x568] ss:$16 sps:$4 sm:$0xff]  }
 0x200   :  { %3120 = vmatmul.mubr.bf16.gmra.mrb[80].mxu0 %v6334_v29  ;;  %3572 = vmatmul.mubr.bf16.gmra.mrb[80].mxu1 %v6334_v29  ;;  %v1268_v43 = vmax.f32 %v1043_v41, 0.0  ;;  %v1047_v58 = vadd.f32 %v1046_v20, %v6356_v39  ;;  %v1048_v62 = vpop.f32.mrb[55].mxu0  ;;  %v5572_v29 = vld [vmem:[#allocation9 + $0x544] ss:$16 sps:$4 sm:$0xff]   ;;  %v1254_v50 = vmax.f32 %v1146_v21, 0.0  ;;  %v1150_v15 = vadd.f32 %v1149_v13, %v6385_v46  ;;  %v1151_v19 = vpop.f32.mrb[51].mxu1 }
 0x201   :  { %3177 = vmatpush1.bf16.msra.mxu0 %v5558_v12  ;;  %3629 = vmatpush1.bf16.msra.mxu1 %v5561_v28  ;;  %v1269_v30 = vmax.f32 %v1045_v49, 0.0  ;;  %v1049_v9 = vadd.f32 %v1048_v62, %v6360_v31  ;;  %v1255_v12 = vmax.f32 %v1148_v54, 0.0  ;;  %v1152_v28 = vadd.f32 %v1151_v19, %v6389_v61  ;;  %v5581_v20 = vld [vmem:[#allocation9 + $0x56c] ss:$16 sps:$4 sm:$0xff]   ;;  %v5576_v21 = vld [vmem:[#allocation9 + $0x560] ss:$16 sps:$4 sm:$0xff]  }
 0x202   :  { %3178 = vmatprep.subr.bf16.mxu0 %v5566_v34  ;;  %3129 = vmatprep.mubr.bf16.mxu0 %v6351_v24  ;;  %v1276_v10 = vmax.f32 %v1047_v58, 0.0  ;;  %v1262_v4 = vmax.f32 %v1150_v15, 0.0  ;;  %v5587_v13 = vld [vmem:[#allocation9 + $0x58c] ss:$16 sps:$4 sm:$0xff]  }
 0x203   :  { %3581 = vmatprep.mubr.bf16.mxu1 %v6351_v24  ;;  %3630 = vmatprep.subr.bf16.mxu1 %v5569_v45  ;;  %v1277_v14 = vmax.f32 %v1049_v9, 0.0  ;;  %v5578_v24 = vld [vmem:[#allocation9 + $0x564] ss:$16 sps:$4 sm:$0xff]   ;;  %v1263_v49 = vmax.f32 %v1152_v28, 0.0  ;;  %v1155_v9 = vpop.f32.mrb[52].mxu1 }
 0x204   :  { %v6485_v22 = vpack.c.bf16 %v1276_v10, %v1268_v43  ;;  %v6492_v62 = vpack.c.bf16 %v1262_v4, %v1254_v50  ;;  %v1156_v10 = vadd.f32 %v1155_v9, %v6385_v46  ;;  %v1157_v54 = vpop.f32.mrb[53].mxu1 }
 0x205   :  { %3179 = vmatpush1.bf16.msra.mxu0 %v5564_v6  ;;  %3631 = vmatpush1.bf16.msra.mxu1 %v5567_v26  ;;  %v6488_v34 = vpack.c.bf16 %v1277_v14, %v1269_v30  ;;  %v1052_v41 = vpop.f32.mrb[56].mxu0  ;;  %v6497_v30 = vpack.c.bf16 %v1263_v49, %v1255_v12  ;;  %v1158_v50 = vadd.f32 %v1157_v54, %v6389_v61  ;;  %v1159_v15 = vpop.f32.mrb[54].mxu1 }
 0x206   :  { %3180 = vmatprep.subr.bf16.mxu0 %v5572_v29  ;;  %3632 = vmatprep.subr.bf16.mxu1 %v5575_v36  ;;  %v1053_v44 = vadd.f32 %v1052_v41, %v6356_v39  ;;  %v1054_v45 = vpop.f32.mrb[57].mxu0  ;;  %v1270_v12 = vmax.f32 %v1156_v10, 0.0  ;;  %v1160_v28 = vadd.f32 %v1159_v15, %v6385_v46 }
 0x207   :  { %v1055_v43 = vadd.f32 %v1054_v45, %v6360_v31  ;;  %v1056_v58 = vpop.f32.mrb[58].mxu0  ;;  %v1271_v41 = vmax.f32 %v1158_v50, 0.0 }
 0x208   :  { %3130 = vmatmul.mubr.bf16.gmra.mrb[84].mxu0 %v6348_v16  ;;  %3582 = vmatmul.mubr.bf16.gmra.mrb[84].mxu1 %v6348_v16  ;;  %v1284_v2 = vmax.f32 %v1053_v44, 0.0  ;;  %v1057_v6 = vadd.f32 %v1056_v58, %v6356_v39  ;;  %v1058_v26 = vpop.f32.mrb[59].mxu0  ;;  %v5584_v16 = vld [vmem:[#allocation9 + $0x584] ss:$16 sps:$4 sm:$0xff]   ;;  %v5585_v44 = vld [vmem:[#allocation9 + $0x588] ss:$16 sps:$4 sm:$0xff]  }
 0x209   :  { %3181 = vmatpush1.bf16.msra.mxu0 %v5570_v40  ;;  %3633 = vmatpush1.bf16.msra.mxu1 %v5573_v55  ;;  %v1285_v29 = vmax.f32 %v1055_v43, 0.0  ;;  %v1059_v36 = vadd.f32 %v1058_v26, %v6360_v31  ;;  %v1161_v40 = vpop.f32.mrb[55].mxu1  ;;  %v1278_v43 = vmax.f32 %v1160_v28, 0.0 }
 0x20a   :  { %3182 = vmatprep.subr.bf16.mxu0 %v5578_v24  ;;  %3139 = vmatprep.mubr.bf16.mxu0 %v6368_v11  ;;  %v1292_v14 = vmax.f32 %v1057_v6, 0.0  ;;  %v1162_v4 = vadd.f32 %v1161_v40, %v6389_v61  ;;  %v5582_v24 = vld [vmem:[#allocation9 + $0x580] ss:$16 sps:$4 sm:$0xff]   ;;  %v1165_v54 = vpop.f32.mrb[56].mxu1 }
 0x20b   :  { %3591 = vmatprep.mubr.bf16.mxu1 %v6368_v11  ;;  %3634 = vmatprep.subr.bf16.mxu1 %v5581_v20  ;;  %v1293_v19 = vmax.f32 %v1059_v36, 0.0  ;;  %v5590_v11 = vld [vmem:[#allocation9 + $0x5a4] ss:$16 sps:$4 sm:$0xff]   ;;  %v6512_v36 = vpack.c.bf16 %v1278_v43, %v1270_v12  ;;  %v1166_v15 = vadd.f32 %v1165_v54, %v6385_v46  ;;  %v5599_v12 = vld [vmem:[#allocation9 + $0x5cc] ss:$16 sps:$4 sm:$0xff]  }
 0x20c   :  { %v6505_v55 = vpack.c.bf16 %v1292_v14, %v1284_v2  ;;  %v1279_v6 = vmax.f32 %v1162_v4, 0.0  ;;  %v5593_v2 = vld [vmem:[#allocation9 + $0x5ac] ss:$16 sps:$4 sm:$0xff]   ;;  %v5603_v54 = vld [vmem:[#allocation9 + $0x5e8] ss:$16 sps:$4 sm:$0xff]  }
 0x20d   :  { %3183 = vmatpush1.bf16.msra.mxu0 %v5576_v21  ;;  %3635 = vmatpush1.bf16.msra.mxu1 %v5579_v5  ;;  %v6508_v45 = vpack.c.bf16 %v1293_v19, %v1285_v29  ;;  %v1062_v49 = vpop.f32.mrb[60].mxu0  ;;  %v1167_v19 = vpop.f32.mrb[57].mxu1  ;;  %v1286_v4 = vmax.f32 %v1166_v15, 0.0 }
 0x20e   :  { %3184 = vmatprep.subr.bf16.mxu0 %v5584_v16  ;;  %3636 = vmatprep.subr.bf16.mxu1 %v5587_v13  ;;  %v1063_v20 = vadd.f32 %v1062_v49, %v6356_v39  ;;  %v1064_v58 = vpop.f32.mrb[61].mxu0  ;;  %v6517_v10 = vpack.c.bf16 %v1279_v6, %v1271_v41  ;;  %v5588_v16 = vld [vmem:[#allocation9 + $0x5a0] ss:$16 sps:$4 sm:$0xff]   ;;  %v5591_v13 = vld [vmem:[#allocation9 + $0x5a8] ss:$16 sps:$4 sm:$0xff]   ;;  %v1168_v28 = vadd.f32 %v1167_v19, %v6389_v61  ;;  %v1169_v40 = vpop.f32.mrb[58].mxu1 }
 0x20f   :  { %v1065_v26 = vadd.f32 %v1064_v58, %v6360_v31  ;;  %v1066_v9 = vpop.f32.mrb[62].mxu0 }
 0x210   :  { %3140 = vmatmul.mubr.bf16.gmra.mrb[88].mxu0 %v6365_v7  ;;  %3592 = vmatmul.mubr.bf16.gmra.mrb[88].mxu1 %v6365_v7  ;;  %v1300_v21 = vmax.f32 %v1063_v20, 0.0  ;;  %v1067_v5 = vadd.f32 %v1066_v9, %v6356_v39  ;;  %v1068_v29 = vpop.f32.mrb[63].mxu0  ;;  %v5596_v7 = vld [vmem:[#allocation9 + $0x5c4] ss:$16 sps:$4 sm:$0xff]   ;;  %v1287_v49 = vmax.f32 %v1168_v28, 0.0 }
 0x211   :  { %3185 = vmatpush1.bf16.msra.mxu0 %v5582_v24  ;;  %3637 = vmatpush1.bf16.msra.mxu1 %v5585_v44  ;;  %v1301_v14 = vmax.f32 %v1065_v26, 0.0  ;;  %v1069_v50 = vadd.f32 %v1068_v29, %v6360_v31  ;;  %v1170_v24 = vadd.f32 %v1169_v40, %v6385_v46  ;;  %v1171_v31 = vpop.f32.mrb[59].mxu1  ;;  %v5597_v20 = vld [vmem:[#allocation9 + $0x5c8] ss:$16 sps:$4 sm:$0xff]   ;;  %v5605_v26 = vld [vmem:[#allocation9 + $0x5ec] ss:$16 sps:$4 sm:$0xff]  }
 0x212   :  { %3186 = vmatprep.subr.bf16.mxu0 %v5590_v11  ;;  %3149 = vmatprep.mubr.bf16.mxu0 %v6396_v3  ;;  %v1308_v39 = vmax.f32 %v1067_v5, 0.0  ;;  %v1172_v43 = vadd.f32 %v1171_v31, %v6389_v61  ;;  %v5594_v11 = vld [vmem:[#allocation9 + $0x5c0] ss:$16 sps:$4 sm:$0xff]   ;;  %v1175_v5 = vpop.f32.mrb[60].mxu1 }
 0x213   :  { %3601 = vmatprep.mubr.bf16.mxu1 %v6396_v3  ;;  %3638 = vmatprep.subr.bf16.mxu1 %v5593_v2  ;;  %v1309_v41 = vmax.f32 %v1069_v50, 0.0  ;;  %v1294_v6 = vmax.f32 %v1170_v24, 0.0  ;;  %v5602_v3 = vld [vmem:[#allocation9 + $0x5e4] ss:$16 sps:$4 sm:$0xff]   ;;  %v5600_v29 = vld [vmem:[#allocation9 + $0x5e0] ss:$16 sps:$4 sm:$0xff]  }
 0x214   :  { %v6525_v44 = vpack.c.bf16 %v1308_v39, %v1300_v21  ;;  %v1295_v2 = vmax.f32 %v1172_v43, 0.0  ;;  %v5611_v50 = vld [vmem:[#allocation9 + $0x60c] ss:$16 sps:$4 sm:$0xff]   ;;  %v5606_v40 = vld [vmem:[#allocation9 + $0x600] ss:$16 sps:$4 sm:$0xff]  }
 0x215   :  { %3187 = vmatpush1.bf16.msra.mxu0 %v5588_v16  ;;  %3639 = vmatpush1.bf16.msra.mxu1 %v5591_v13  ;;  %v6528_v58 = vpack.c.bf16 %v1309_v41, %v1301_v14  ;;  %v6530_v9 = vpack.c.bf16 %v1294_v6, %v1286_v4  ;;  %v1176_v16 = vadd.f32 %v1175_v5, %v6385_v46  ;;  %v1177_v13 = vpop.f32.mrb[61].mxu1  ;;  %v5608_v14 = vld [vmem:[#allocation9 + $0x604] ss:$16 sps:$4 sm:$0xff]   ;;  %v5609_v41 = vld [vmem:[#allocation9 + $0x608] ss:$16 sps:$4 sm:$0xff]  }
 0x216   :  { %3188 = vmatprep.subr.bf16.mxu0 %v5596_v7  ;;  %3640 = vmatprep.subr.bf16.mxu1 %v5599_v12  ;;  %v6534_v21 = vpack.c.bf16 %v1295_v2, %v1287_v49  ;;  %v1178_v15 = vadd.f32 %v1177_v13, %v6389_v61  ;;  %v1179_v19 = vpop.f32.mrb[62].mxu1  ;;  %v5614_v24 = vld [vmem:[#allocation9 + $0x624] ss:$16 sps:$4 sm:$0xff]   ;;  %v5617_v49 = vld [vmem:[#allocation9 + $0x62c] ss:$16 sps:$4 sm:$0xff]  }
 0x217   :  { %v1180_v7 = vadd.f32 %v1179_v19, %v6385_v46  ;;  %v1181_v12 = vpop.f32.mrb[63].mxu1  ;;  %v5612_v46 = vld [vmem:[#allocation9 + $0x620] ss:$16 sps:$4 sm:$0xff]   ;;  %v5629_v2 = vld [vmem:[#allocation9 + $0x66c] ss:$16 sps:$4 sm:$0xff]  }
 0x218   :  { %3150 = vmatmul.mubr.bf16.gmra.mrb[92].mxu0 %v6391_v63  ;;  %3602 = vmatmul.mubr.bf16.gmra.mrb[92].mxu1 %v6391_v63  ;;  %v1302_v63 = vmax.f32 %v1176_v16, 0.0  ;;  %v1303_v39 = vmax.f32 %v1178_v15, 0.0  ;;  %v1182_v28 = vadd.f32 %v1181_v12, %v6389_v61  ;;  %v5615_v61 = vld [vmem:[#allocation9 + $0x628] ss:$16 sps:$4 sm:$0xff]   ;;  %v5618_v6 = vld [vmem:[#allocation9 + $0x640] ss:$16 sps:$4 sm:$0xff]  }
 0x219   :  { %3189 = vmatpush1.bf16.msra.mxu0 %v5594_v11  ;;  %3641 = vmatpush1.bf16.msra.mxu1 %v5597_v20  ;;  %v1310_v4 = vmax.f32 %v1180_v7, 0.0  ;;  %v5620_v11 = vld [vmem:[#allocation9 + $0x644] ss:$16 sps:$4 sm:$0xff]   ;;  %v5623_v20 = vld [vmem:[#allocation9 + $0x64c] ss:$16 sps:$4 sm:$0xff]  }
 0x21a   :  { %3190 = vmatprep.subr.bf16.mxu0 %v5602_v3  ;;  %3192 = vmatprep.mubr.bf16.mxu0 %v6382_v57  ;;  %v1311_v31 = vmax.f32 %v1182_v28, 0.0  ;;  %v5621_v3 = vld [vmem:[#allocation9 + $0x648] ss:$16 sps:$4 sm:$0xff]   ;;  %v5638_v13 = vld [vmem:[#allocation9 + $0x6a4] ss:$16 sps:$4 sm:$0xff]  }
 0x21b   :  { %3642 = vmatprep.subr.bf16.mxu1 %v5605_v26  ;;  %3644 = vmatprep.mubr.bf16.mxu1 %v6382_v57  ;;  %v6542_v43 = vpack.c.bf16 %v1310_v4, %v1302_v63  ;;  %v5624_v26 = vld [vmem:[#allocation9 + $0x660] ss:$16 sps:$4 sm:$0xff]   ;;  %v5627_v5 = vld [vmem:[#allocation9 + $0x668] ss:$16 sps:$4 sm:$0xff]   ;;  %v5647_v15 = vld [vmem:[#allocation9 + $0x6cc] ss:$16 sps:$4 sm:$0xff]  }
 0x21c   :  { %v6546_v57 = vpack.c.bf16 %v1311_v31, %v1303_v39  ;;  %v5633_v16 = vld [vmem:[#allocation9 + $0x688] ss:$16 sps:$4 sm:$0xff]   ;;  %v5642_v19 = vld [vmem:[#allocation9 + $0x6c0] ss:$16 sps:$4 sm:$0xff]   ;;  %v5650_v7 = vld [vmem:[#allocation9 + $0x6e4] ss:$16 sps:$4 sm:$0xff]  }
 0x21d   :  { %3191 = vmatpush1.bf16.msra.mxu0 %v5600_v29  ;;  %3643 = vmatpush1.bf16.msra.mxu1 %v5603_v54  ;;  %v5635_v29 = vld [vmem:[#allocation9 + $0x68c] ss:$16 sps:$4 sm:$0xff]   ;;  %v5630_v54 = vld [vmem:[#allocation9 + $0x680] ss:$16 sps:$4 sm:$0xff]   ;;  %v5645_v63 = vld [vmem:[#allocation9 + $0x6c8] ss:$16 sps:$4 sm:$0xff]  }
 0x21e   :  { %3273 = vmatprep.subr.bf16.mxu0 %v5608_v14  ;;  %3725 = vmatprep.subr.bf16.mxu1 %v5611_v50  ;;  %v5636_v14 = vld [vmem:[#allocation9 + $0x6a0] ss:$16 sps:$4 sm:$0xff]   ;;  %v5639_v50 = vld [vmem:[#allocation9 + $0x6a8] ss:$16 sps:$4 sm:$0xff]   ;;  %v5659_v28 = vld [vmem:[#allocation9 + $0x70c] ss:$16 sps:$4 sm:$0xff]  }
 0x21f   :  { %v5648_v12 = vld [vmem:[#allocation9 + $0x6e0] ss:$16 sps:$4 sm:$0xff]   ;;  %v5651_v39 = vld [vmem:[#allocation9 + $0x6e8] ss:$16 sps:$4 sm:$0xff]   ;;  %v5662_v4 = vld [vmem:[#allocation9 + $0x724] ss:$16 sps:$4 sm:$0xff]  }
 0x220   :  { %3193 = vmatmul.mubr.bf16.vlgmr.msra.gmra.mrb[64].mxu0 %v6380_v52  ;;  %3645 = vmatmul.mubr.bf16.vlgmr.msra.gmra.mrb[64].mxu1 %v6380_v52  ;;  %v5626_v52 = vld [vmem:[#allocation9 + $0x664] ss:$16 sps:$4 sm:$0xff]   ;;  %v5663_v31 = vld [vmem:[#allocation9 + $0x728] ss:$16 sps:$4 sm:$0xff]  }
 0x221   :  { %3274 = vmatpush1.bf16.msra.mxu0 %v5606_v40  ;;  %3726 = vmatpush1.bf16.msra.mxu1 %v5609_v41  ;;  %v5654_v40 = vld [vmem:[#allocation9 + $0x700] ss:$16 sps:$4 sm:$0xff]   ;;  %v5657_v41 = vld [vmem:[#allocation9 + $0x708] ss:$16 sps:$4 sm:$0xff]  }
 0x222   :  { %3275 = vmatprep.subr.bf16.mxu0 %v5614_v24  ;;  %3202 = vmatprep.mubr.bf16.mxu0 %v6408_v17  ;;  %v5660_v24 = vld [vmem:[#allocation9 + $0x720] ss:$16 sps:$4 sm:$0xff]  }
 0x223   :  { %3654 = vmatprep.mubr.bf16.mxu1 %v6408_v17  ;;  %3727 = vmatprep.subr.bf16.mxu1 %v5617_v49  ;;  %v5632_v17 = vld [vmem:[#allocation9 + $0x684] ss:$16 sps:$4 sm:$0xff]   ;;  %v5671_v49 = vld [vmem:[#allocation9 + $0x74c] ss:$16 sps:$4 sm:$0xff]  }
 0x225   :  { %3276 = vmatpush1.bf16.msra.mxu0 %v5612_v46  ;;  %3728 = vmatpush1.bf16.msra.mxu1 %v5615_v61  ;;  %v5666_v46 = vld [vmem:[#allocation9 + $0x740] ss:$16 sps:$4 sm:$0xff]   ;;  %v5669_v61 = vld [vmem:[#allocation9 + $0x748] ss:$16 sps:$4 sm:$0xff]  }
 0x226   :  { %3277 = vmatprep.subr.bf16.mxu0 %v5620_v11  ;;  %3729 = vmatprep.subr.bf16.mxu1 %v5623_v20  ;;  %v5674_v11 = vld [vmem:[#allocation9 + $0x764] ss:$16 sps:$4 sm:$0xff]   ;;  %v5672_v20 = vld [vmem:[#allocation9 + $0x760] ss:$16 sps:$4 sm:$0xff]  }
 0x228   :  { %3203 = vmatmul.mubr.bf16.gmra.mrb[68].mxu0 %v6405_v23  ;;  %3655 = vmatmul.mubr.bf16.gmra.mrb[68].mxu1 %v6405_v23  ;;  %v5641_v23 = vld [vmem:[#allocation9 + $0x6ac] ss:$16 sps:$4 sm:$0xff]  }
 0x229   :  { %3278 = vmatpush1.bf16.msra.mxu0 %v5618_v6  ;;  %3730 = vmatpush1.bf16.msra.mxu1 %v5621_v3  ;;  %v5675_v6 = vld [vmem:[#allocation9 + $0x768] ss:$16 sps:$4 sm:$0xff]   ;;  %v5683_v3 = vld [vmem:[#allocation9 + $0x78c] ss:$16 sps:$4 sm:$0xff]  }
 0x22a   :  { %3279 = vmatprep.subr.bf16.mxu0 %v5626_v52  ;;  %3212 = vmatprep.mubr.bf16.mxu0 %v6428_v38  ;;  %v5678_v52 = vld [vmem:[#allocation9 + $0x780] ss:$16 sps:$4 sm:$0xff]  }
 0x22b   :  { %3664 = vmatprep.mubr.bf16.mxu1 %v6428_v38  ;;  %3731 = vmatprep.subr.bf16.mxu1 %v5629_v2  ;;  %v5644_v38 = vld [vmem:[#allocation9 + $0x6c4] ss:$16 sps:$4 sm:$0xff]   ;;  %v5681_v2 = vld [vmem:[#allocation9 + $0x788] ss:$16 sps:$4 sm:$0xff]  }
 0x22d   :  { %3280 = vmatpush1.bf16.msra.mxu0 %v5624_v26  ;;  %3732 = vmatpush1.bf16.msra.mxu1 %v5627_v5  ;;  %v5686_v26 = vld [vmem:[#allocation9 + $0x7a4] ss:$16 sps:$4 sm:$0xff]   ;;  %v5684_v5 = vld [vmem:[#allocation9 + $0x7a0] ss:$16 sps:$4 sm:$0xff]  }
 0x22e   :  { %3281 = vmatprep.subr.bf16.mxu0 %v5632_v17  ;;  %3733 = vmatprep.subr.bf16.mxu1 %v5635_v29  ;;  %v5687_v17 = vld [vmem:[#allocation9 + $0x7a8] ss:$16 sps:$4 sm:$0xff]   ;;  %v5695_v29 = vld [vmem:[#allocation9 + $0x7cc] ss:$16 sps:$4 sm:$0xff]  }
 0x230   :  { %3213 = vmatmul.mubr.bf16.gmra.mrb[72].mxu0 %v6425_v8  ;;  %3665 = vmatmul.mubr.bf16.gmra.mrb[72].mxu1 %v6425_v8  ;;  %v5653_v8 = vld [vmem:[#allocation9 + $0x6ec] ss:$16 sps:$4 sm:$0xff]  }
 0x231   :  { %3282 = vmatpush1.bf16.msra.mxu0 %v5630_v54  ;;  %3734 = vmatpush1.bf16.msra.mxu1 %v5633_v16  ;;  %v5690_v54 = vld [vmem:[#allocation9 + $0x7c0] ss:$16 sps:$4 sm:$0xff]   ;;  %v5693_v16 = vld [vmem:[#allocation9 + $0x7c8] ss:$16 sps:$4 sm:$0xff]  }
 0x232   :  { %3283 = vmatprep.subr.bf16.mxu0 %v5638_v13  ;;  %3222 = vmatprep.mubr.bf16.mxu0 %v6448_v32  ;;  %v5698_v13 = vld [vmem:[#allocation9 + $0x7e4] ss:$16 sps:$4 sm:$0xff]  }
 0x233   :  { %3674 = vmatprep.mubr.bf16.mxu1 %v6448_v32  ;;  %3735 = vmatprep.subr.bf16.mxu1 %v5641_v23  ;;  %v5656_v32 = vld [vmem:[#allocation9 + $0x704] ss:$16 sps:$4 sm:$0xff]   ;;  %v5696_v23 = vld [vmem:[#allocation9 + $0x7e0] ss:$16 sps:$4 sm:$0xff]  }
 0x235   :  { %3284 = vmatpush1.bf16.msra.mxu0 %v5636_v14  ;;  %3736 = vmatpush1.bf16.msra.mxu1 %v5639_v50  ;;  %v5702_v14 = vld [vmem:[#allocation12 + $0x40] sm:$0xff]  }
 0x236   :  { %3285 = vmatprep.subr.bf16.mxu0 %v5644_v38  ;;  %3737 = vmatprep.subr.bf16.mxu1 %v5647_v15  ;;  %v5704_v50 = vld [vmem:[#allocation12 + $0xc0] sm:$0xff]  }
 0x237   :  { %v5703_v38 = vld [vmem:[#allocation12] sm:$0xff]  }
 0x238   :  { %3223 = vmatmul.mubr.bf16.gmra.mrb[76].mxu0 %v6445_v18  ;;  %3675 = vmatmul.mubr.bf16.gmra.mrb[76].mxu1 %v6445_v18  ;;  %v5665_v18 = vld [vmem:[#allocation9 + $0x72c] ss:$16 sps:$4 sm:$0xff]   ;;  %v5705_v15 = vld [vmem:[#allocation12 + $0x80] sm:$0xff]  }
 0x239   :  { %3286 = vmatpush1.bf16.msra.mxu0 %v5642_v19  ;;  %3738 = vmatpush1.bf16.msra.mxu1 %v5645_v63  ;;  %v5706_v19 = vld [vmem:[#allocation12 + $0x48] sm:$0xff]  }
 0x23a   :  { %3287 = vmatprep.subr.bf16.mxu0 %v5650_v7  ;;  %3232 = vmatprep.mubr.bf16.mxu0 %v6468_v33  ;;  %v5709_v63 = vld [vmem:[#allocation12 + $0x88] sm:$0xff]   ;;  %v5710_v7 = vld [vmem:[#allocation12 + $0x50] sm:$0xff]  }
 0x23b   :  { %3684 = vmatprep.mubr.bf16.mxu1 %v6468_v33  ;;  %3739 = vmatprep.subr.bf16.mxu1 %v5653_v8  ;;  %v5668_v33 = vld [vmem:[#allocation9 + $0x744] ss:$16 sps:$4 sm:$0xff]  }
 0x23c   :  { %v5712_v8 = vld [vmem:[#allocation12 + $0xd0] sm:$0xff]  }
 0x23d   :  { %3288 = vmatpush1.bf16.msra.mxu0 %v5648_v12  ;;  %3740 = vmatpush1.bf16.msra.mxu1 %v5651_v39  ;;  %v5711_v12 = vld [vmem:[#allocation12 + $0x10] sm:$0xff]  }
 0x23e   :  { %3289 = vmatprep.subr.bf16.mxu0 %v5656_v32  ;;  %3741 = vmatprep.subr.bf16.mxu1 %v5659_v28  ;;  %v5713_v39 = vld [vmem:[#allocation12 + $0x90] sm:$0xff]   ;;  %v5714_v32 = vld [vmem:[#allocation12 + $0x58] sm:$0xff]  }
 0x23f   :  { %v5717_v28 = vld [vmem:[#allocation12 + $0x98] sm:$0xff]  }
 0x240   :  { %3233 = vmatmul.mubr.bf16.gmra.mrb[80].mxu0 %v6465_v42  ;;  %3685 = vmatmul.mubr.bf16.gmra.mrb[80].mxu1 %v6465_v42  ;;  %v5677_v42 = vld [vmem:[#allocation9 + $0x76c] ss:$16 sps:$4 sm:$0xff]  }
 0x241   :  { %3290 = vmatpush1.bf16.msra.mxu0 %v5654_v40  ;;  %3742 = vmatpush1.bf16.msra.mxu1 %v5657_v41  ;;  %v5718_v40 = vld [vmem:[#allocation12 + $0x60] sm:$0xff]  }
 0x242   :  { %3291 = vmatprep.subr.bf16.mxu0 %v5662_v4  ;;  %3242 = vmatprep.mubr.bf16.mxu0 %v6488_v34  ;;  %v5720_v41 = vld [vmem:[#allocation12 + $0xe0] sm:$0xff]  }
 0x243   :  { %3694 = vmatprep.mubr.bf16.mxu1 %v6488_v34  ;;  %3743 = vmatprep.subr.bf16.mxu1 %v5665_v18  ;;  %v5680_v34 = vld [vmem:[#allocation9 + $0x784] ss:$16 sps:$4 sm:$0xff]  }
 0x244   :  { %v5719_v4 = vld [vmem:[#allocation12 + $0x20] sm:$0xff]  }
 0x245   :  { %3292 = vmatpush1.bf16.msra.mxu0 %v5660_v24  ;;  %3744 = vmatpush1.bf16.msra.mxu1 %v5663_v31  ;;  %v5721_v18 = vld [vmem:[#allocation12 + $0xa0] sm:$0xff]   ;;  %v5722_v24 = vld [vmem:[#allocation12 + $0x68] sm:$0xff]  }
 0x246   :  { %3293 = vmatprep.subr.bf16.mxu0 %v5668_v33  ;;  %3745 = vmatprep.subr.bf16.mxu1 %v5671_v49  ;;  %v5725_v31 = vld [vmem:[#allocation12 + $0xa8] sm:$0xff]   ;;  %v5726_v33 = vld [vmem:[#allocation12 + $0x70] sm:$0xff]  }
 0x247   :  { %v5728_v49 = vld [vmem:[#allocation12 + $0xf0] sm:$0xff]  }
 0x248   :  { %3243 = vmatmul.mubr.bf16.gmra.mrb[84].mxu0 %v6485_v22  ;;  %3695 = vmatmul.mubr.bf16.gmra.mrb[84].mxu1 %v6485_v22  ;;  %v5689_v22 = vld [vmem:[#allocation9 + $0x7ac] ss:$16 sps:$4 sm:$0xff]  }
 0x249   :  { %3294 = vmatpush1.bf16.msra.mxu0 %v5666_v46  ;;  %3746 = vmatpush1.bf16.msra.mxu1 %v5669_v61  ;;  %v5727_v46 = vld [vmem:[#allocation12 + $0x30] sm:$0xff]  }
 0x24a   :  { %3295 = vmatprep.subr.bf16.mxu0 %v5674_v11  ;;  %3252 = vmatprep.mubr.bf16.mxu0 %v6508_v45  ;;  %v5729_v61 = vld [vmem:[#allocation12 + $0xb0] sm:$0xff]  }
 0x24b   :  { %3704 = vmatprep.mubr.bf16.mxu1 %v6508_v45  ;;  %3747 = vmatprep.subr.bf16.mxu1 %v5677_v42  ;;  %v5692_v45 = vld [vmem:[#allocation9 + $0x7c4] ss:$16 sps:$4 sm:$0xff]  }
 0x24d   :  { %3296 = vmatpush1.bf16.msra.mxu0 %v5672_v20  ;;  %3748 = vmatpush1.bf16.msra.mxu1 %v5675_v6 }
 0x24e   :  { %3297 = vmatprep.subr.bf16.mxu0 %v5680_v34  ;;  %3749 = vmatprep.subr.bf16.mxu1 %v5683_v3 }
 0x250   :  { %3253 = vmatmul.mubr.bf16.gmra.mrb[88].mxu0 %v6505_v55  ;;  %3705 = vmatmul.mubr.bf16.gmra.mrb[88].mxu1 %v6505_v55  ;;  %v5701_v55 = vld [vmem:[#allocation9 + $0x7ec] ss:$16 sps:$4 sm:$0xff]  }
 0x251   :  { %3298 = vmatpush1.bf16.msra.mxu0 %v5678_v52  ;;  %3750 = vmatpush1.bf16.msra.mxu1 %v5681_v2 }
 0x252   :  { %3299 = vmatprep.subr.bf16.mxu0 %v5686_v26  ;;  %3262 = vmatprep.mubr.bf16.mxu0 %v6528_v58 }
 0x253   :  { %3714 = vmatprep.mubr.bf16.mxu1 %v6528_v58  ;;  %3751 = vmatprep.subr.bf16.mxu1 %v5689_v22  ;;  %v5699_v58 = vld [vmem:[#allocation9 + $0x7e8] ss:$16 sps:$4 sm:$0xff]  }
 0x255   :  { %3300 = vmatpush1.bf16.msra.mxu0 %v5684_v5  ;;  %3752 = vmatpush1.bf16.msra.mxu1 %v5687_v17 }
 0x256   :  { %3301 = vmatprep.subr.bf16.mxu0 %v5692_v45  ;;  %3753 = vmatprep.subr.bf16.mxu1 %v5695_v29 }
 0x258   :  { %3263 = vmatmul.mubr.bf16.gmra.mrb[92].mxu0 %v6525_v44  ;;  %3715 = vmatmul.mubr.bf16.gmra.mrb[92].mxu1 %v6525_v44  ;;  %v5708_v44 = vld [vmem:[#allocation12 + $0xc8] sm:$0xff]  }
 0x259   :  { %3302 = vmatpush1.bf16.msra.mxu0 %v5690_v54  ;;  %3305 = vmatprep.mubr.bf16.mxu0 %v6417_v0 }
 0x25a   :  { %3754 = vmatpush1.bf16.msra.mxu1 %v5693_v16  ;;  %3757 = vmatprep.mubr.bf16.mxu1 %v6417_v0  ;;  %v5707_v0 = vld [vmem:[#allocation12 + $0x8] sm:$0xff]  }
 0x25b   :  { %3303 = vmatprep.subr.bf16.mxu0 %v5698_v13  ;;  %3755 = vmatprep.subr.bf16.mxu1 %v5701_v55 }
 0x25d   :  { %3304 = vmatpush1.bf16.msra.mxu0 %v5696_v23 }
 0x25e   :  { %3756 = vmatpush1.bf16.msra.mxu1 %v5699_v58  ;;  %4916 = vmatprep.subr.bf16.mxu0 %v5702_v14 }
 0x25f   :  { %4980 = vmatprep.subr.bf16.mxu1 %v5704_v50 }
 0x260   :  { %3306 = vmatmul.mubr.bf16.vlgmr.msra.gmra.mrb[64].mxu0 %v6412_v59 }
 0x261   :  { %3758 = vmatmul.mubr.bf16.vlgmr.msra.gmra.mrb[64].mxu1 %v6412_v59  ;;  %3315 = vmatprep.mubr.bf16.mxu0 %v6437_v60  ;;  %v5716_v59 = vld [vmem:[#allocation12 + $0xd8] sm:$0xff]  }
 0x262   :  { %3767 = vmatprep.mubr.bf16.mxu1 %v6437_v60  ;;  %4917 = vmatpush3.bf16.msra.mxu0 %v5703_v38  ;;  %v5715_v60 = vld [vmem:[#allocation12 + $0x18] sm:$0xff]  }
 0x263   :  { %4981 = vmatpush3.bf16.msra.mxu1 %v5705_v15  ;;  %4918 = vmatprep.subr.bf16.mxu0 %v5706_v19 }
 0x264   :  { %4982 = vmatprep.subr.bf16.mxu1 %v5708_v44 }
 0x266   :  { %4919 = vmatpush3.bf16.msra.mxu0 %v5707_v0 }
 0x267   :  { %4983 = vmatpush3.bf16.msra.mxu1 %v5709_v63  ;;  %4920 = vmatprep.subr.bf16.mxu0 %v5710_v7 }
 0x268   :  { %3316 = vmatmul.mubr.bf16.gmra.mrb[68].mxu0 %v6432_v56  ;;  %4984 = vmatprep.subr.bf16.mxu1 %v5712_v8 }
 0x269   :  { %3768 = vmatmul.mubr.bf16.gmra.mrb[68].mxu1 %v6432_v56  ;;  %3325 = vmatprep.mubr.bf16.mxu0 %v6457_v47  ;;  %v5724_v56 = vld [vmem:[#allocation12 + $0xe8] sm:$0xff]  }
 0x26a   :  { %3777 = vmatprep.mubr.bf16.mxu1 %v6457_v47  ;;  %4921 = vmatpush3.bf16.msra.mxu0 %v5711_v12  ;;  %v5723_v47 = vld [vmem:[#allocation12 + $0x28] sm:$0xff]  }
 0x26b   :  { %4985 = vmatpush3.bf16.msra.mxu1 %v5713_v39  ;;  %4922 = vmatprep.subr.bf16.mxu0 %v5714_v32 }
 0x26c   :  { %4986 = vmatprep.subr.bf16.mxu1 %v5716_v59 }
 0x26e   :  { %4923 = vmatpush3.bf16.msra.mxu0 %v5715_v60 }
 0x26f   :  { %4987 = vmatpush3.bf16.msra.mxu1 %v5717_v28  ;;  %4924 = vmatprep.subr.bf16.mxu0 %v5718_v40 }
 0x270   :  { %3326 = vmatmul.mubr.bf16.gmra.mrb[72].mxu0 %v6452_v51  ;;  %4988 = vmatprep.subr.bf16.mxu1 %v5720_v41 }
 0x271   :  { %3778 = vmatmul.mubr.bf16.gmra.mrb[72].mxu1 %v6452_v51  ;;  %3335 = vmatprep.mubr.bf16.mxu0 %v6477_v1  ;;  %v5730_v51 = vld [vmem:[#allocation12 + $0x78] sm:$0xff]  }
 0x272   :  { %3787 = vmatprep.mubr.bf16.mxu1 %v6477_v1  ;;  %4925 = vmatpush3.bf16.msra.mxu0 %v5719_v4  ;;  %v5731_v1 = vld [vmem:[#allocation12 + $0x38] sm:$0xff]  }
 0x273   :  { %4989 = vmatpush3.bf16.msra.mxu1 %v5721_v18  ;;  %4926 = vmatprep.subr.bf16.mxu0 %v5722_v24 }
 0x274   :  { %4990 = vmatprep.subr.bf16.mxu1 %v5724_v56 }
 0x276   :  { %4927 = vmatpush3.bf16.msra.mxu0 %v5723_v47 }
 0x277   :  { %4991 = vmatpush3.bf16.msra.mxu1 %v5725_v31  ;;  %4928 = vmatprep.subr.bf16.mxu0 %v5726_v33 }
 0x278   :  { %3336 = vmatmul.mubr.bf16.gmra.mrb[76].mxu0 %v6472_v53  ;;  %4992 = vmatprep.subr.bf16.mxu1 %v5728_v49 }
 0x279   :  { %3788 = vmatmul.mubr.bf16.gmra.mrb[76].mxu1 %v6472_v53  ;;  %3345 = vmatprep.mubr.bf16.mxu0 %v6497_v30  ;;  %v5732_v53 = vld [vmem:[#allocation12 + $0xf8] sm:$0xff]  }
 0x27a   :  { %3797 = vmatprep.mubr.bf16.mxu1 %v6497_v30  ;;  %4929 = vmatpush3.bf16.msra.mxu0 %v5727_v46  ;;  %v1632_v30 = vld [vmem:[#allocation11] sm:$0xf] }
 0x27b   :  { %4993 = vmatpush3.bf16.msra.mxu1 %v5729_v61  ;;  %4930 = vmatprep.subr.bf16.mxu0 %v5730_v51 }
 0x27c   :  { %4994 = vmatprep.subr.bf16.mxu1 %v5732_v53 }
 0x27e   :  { %4931 = vmatpush3.bf16.msra.mxu0 %v5731_v1 }
 0x280   :  { %3346 = vmatmul.mubr.bf16.gmra.mrb[80].mxu0 %v6492_v62 }
 0x281   :  { %3798 = vmatmul.mubr.bf16.gmra.mrb[80].mxu1 %v6492_v62  ;;  %3355 = vmatprep.mubr.bf16.mxu0 %v6517_v10  ;;  %v5733_v62 = vld [vmem:[#allocation12 + $0xb8] sm:$0xff]  }
 0x282   :  { %3807 = vmatprep.mubr.bf16.mxu1 %v6517_v10  ;;  %4995 = vmatpush3.bf16.msra.mxu1 %v5733_v62  ;;  %v6613_v10 = vrot.slane %v1632_v30, %v277_v48 }
 0x288   :  { %3356 = vmatmul.mubr.bf16.gmra.mrb[84].mxu0 %v6512_v36 }
 0x289   :  { %3808 = vmatmul.mubr.bf16.gmra.mrb[84].mxu1 %v6512_v36  ;;  %3365 = vmatprep.mubr.bf16.mxu0 %v6534_v21  ;;  %v6609_v36 = vrot.slane %v1632_v30, %v6246_v27 }
 0x28a   :  { %3817 = vmatprep.mubr.bf16.mxu1 %v6534_v21  ;;  %v6621_v21 = vrot.slane %v1632_v30, %v281_v25 }
 0x290   :  { %3366 = vmatmul.mubr.bf16.gmra.mrb[88].mxu0 %v6530_v9 }
 0x291   :  { %3818 = vmatmul.mubr.bf16.gmra.mrb[88].mxu1 %v6530_v9  ;;  %3375 = vmatprep.mubr.bf16.mxu0 %v6546_v57  ;;  %v6617_v9 = vrot.slane %v1632_v30, %v273_v37 }
 0x292   :  { %3827 = vmatprep.mubr.bf16.mxu1 %v6546_v57 }
 0x298   :  { %3376 = vmatmul.mubr.bf16.gmra.mrb[92].mxu0 %v6542_v43 }
 0x299   :  { %3828 = vmatmul.mubr.bf16.gmra.mrb[92].mxu1 %v6542_v43 }
 0x333   :  { %v3307_v43 = vpop.f32.mrb[64].mxu0 }
 0x334   :  { %v5044_v57 = vadd.f32 %v3307_v43, %v6609_v36  ;;  %v3759_v11 = vpop.f32.mrb[64].mxu1  ;;  %v3309_v42 = vpop.f32.mrb[65].mxu0 }
 0x335   :  { %v5076_v20 = vadd.f32 %v3759_v11, %v6613_v10  ;;  %v5045_v6 = vadd.f32 %v3309_v42, %v6617_v9  ;;  %v3761_v34 = vpop.f32.mrb[65].mxu1  ;;  %v3311_v48 = vpop.f32.mrb[66].mxu0 }
 0x336   :  { %v5077_v3 = vadd.f32 %v3761_v34, %v6621_v21  ;;  %v5046_v37 = vadd.f32 %v3311_v48, %v6609_v36  ;;  %v3763_v52 = vpop.f32.mrb[66].mxu1  ;;  %v3313_v2 = vpop.f32.mrb[67].mxu0  ;;  %v3838_v22 = vmax.f32 %v5044_v57, 0.0 }
 0x337   :  { %v5078_v35 = vadd.f32 %v3763_v52, %v6613_v10  ;;  %v5047_v25 = vadd.f32 %v3313_v2, %v6617_v9  ;;  %v3765_v26 = vpop.f32.mrb[67].mxu1  ;;  %v3840_v45 = vmax.f32 %v5076_v20, 0.0  ;;  %v3839_v29 = vmax.f32 %v5045_v6, 0.0 }
 0x338   :  { %v3842_v5 = vmax.f32 %v5046_v37, 0.0  ;;  %v5079_v17 = vadd.f32 %v3765_v26, %v6621_v21  ;;  %v3841_v13 = vmax.f32 %v5077_v3, 0.0 }
 0x339   :  { %v3844_v54 = vmax.f32 %v5078_v35, 0.0  ;;  %v3843_v16 = vmax.f32 %v5047_v25, 0.0 }
 0x33a   :  { %v3902_v55 = vpack.c.bf16 %v3842_v5, %v3838_v22  ;;  %v3845_v23 = vmax.f32 %v5079_v17, 0.0 }
 0x33b   :  { %v3904_v58 = vpack.c.bf16 %v3844_v54, %v3840_v45  ;;  %v3903_v14 = vpack.c.bf16 %v3843_v16, %v3839_v29  ;;  %v3317_v50 = vpop.f32.mrb[68].mxu0 }
 0x33c   :  { %v3905_v38 = vpack.c.bf16 %v3845_v23, %v3841_v13  ;;  %v5048_v15 = vadd.f32 %v3317_v50, %v6609_v36  ;;  %v3769_v19 = vpop.f32.mrb[68].mxu1  ;;  %v3319_v44 = vpop.f32.mrb[69].mxu0 }
 0x33d   :  { %v5080_v0 = vadd.f32 %v3769_v19, %v6613_v10  ;;  %v5049_v63 = vadd.f32 %v3319_v44, %v6617_v9  ;;  %v3771_v7 = vpop.f32.mrb[69].mxu1  ;;  %v3321_v8 = vpop.f32.mrb[70].mxu0  ;;  %4229 = vmatprep.mubr.bf16.mxu0 %v3903_v14 }
 0x33e   :  { %v5081_v12 = vadd.f32 %v3771_v7, %v6621_v21  ;;  %v5050_v39 = vadd.f32 %v3321_v8, %v6609_v36  ;;  %v3773_v32 = vpop.f32.mrb[70].mxu1  ;;  %4326 = vmatprep.mubr.bf16.mxu1 %v3905_v38  ;;  %v3323_v59 = vpop.f32.mrb[71].mxu0  ;;  %4230 = vmatmul.mubr.bf16.vlgmr.msra.gmra.mrb[96].mxu0 %v3902_v55  ;;  %v3846_v41 = vmax.f32 %v5048_v15, 0.0 }
 0x33f   :  { %v5082_v60 = vadd.f32 %v3773_v32, %v6613_v10  ;;  %v5051_v28 = vadd.f32 %v3323_v59, %v6617_v9  ;;  %v3775_v40 = vpop.f32.mrb[71].mxu1  ;;  %4327 = vmatmul.mubr.bf16.vlgmr.msra.gmra.mrb[96].mxu1 %v3904_v58  ;;  %v3848_v24 = vmax.f32 %v5080_v0, 0.0  ;;  %v3847_v56 = vmax.f32 %v5049_v63, 0.0 }
 0x340   :  { %v3850_v4 = vmax.f32 %v5050_v39, 0.0  ;;  %v5083_v18 = vadd.f32 %v3775_v40, %v6621_v21  ;;  %v3849_v33 = vmax.f32 %v5081_v12, 0.0 }
 0x341   :  { %v3852_v47 = vmax.f32 %v5082_v60, 0.0  ;;  %v3851_v31 = vmax.f32 %v5051_v28, 0.0 }
 0x342   :  { %v3906_v49 = vpack.c.bf16 %v3850_v4, %v3846_v41  ;;  %v3853_v46 = vmax.f32 %v5083_v18, 0.0 }
 0x343   :  { %v3908_v61 = vpack.c.bf16 %v3852_v47, %v3848_v24  ;;  %v3907_v51 = vpack.c.bf16 %v3851_v31, %v3847_v56  ;;  %v3327_v53 = vpop.f32.mrb[72].mxu0 }
 0x344   :  { %v3909_v1 = vpack.c.bf16 %v3853_v46, %v3849_v33  ;;  %v5052_v62 = vadd.f32 %v3327_v53, %v6609_v36  ;;  %v3779_v30 = vpop.f32.mrb[72].mxu1  ;;  %v3329_v43 = vpop.f32.mrb[73].mxu0 }
 0x345   :  { %v5084_v57 = vadd.f32 %v3779_v30, %v6613_v10  ;;  %v5053_v11 = vadd.f32 %v3329_v43, %v6617_v9  ;;  %v3781_v42 = vpop.f32.mrb[73].mxu1  ;;  %v3331_v20 = vpop.f32.mrb[74].mxu0  ;;  %4237 = vmatprep.mubr.bf16.mxu0 %v3907_v51 }
 0x346   :  { %v5085_v6 = vadd.f32 %v3781_v42, %v6621_v21  ;;  %v5054_v34 = vadd.f32 %v3331_v20, %v6609_v36  ;;  %v3783_v48 = vpop.f32.mrb[74].mxu1  ;;  %4334 = vmatprep.mubr.bf16.mxu1 %v3909_v1  ;;  %v3333_v3 = vpop.f32.mrb[75].mxu0  ;;  %4238 = vmatmul.mubr.bf16.gmra.mrb[100].mxu0 %v3906_v49  ;;  %v3854_v35 = vmax.f32 %v5052_v62, 0.0 }
 0x347   :  { %v5086_v37 = vadd.f32 %v3783_v48, %v6613_v10  ;;  %v5055_v52 = vadd.f32 %v3333_v3, %v6617_v9  ;;  %v3785_v2 = vpop.f32.mrb[75].mxu1  ;;  %4335 = vmatmul.mubr.bf16.gmra.mrb[100].mxu1 %v3908_v61  ;;  %v3856_v22 = vmax.f32 %v5084_v57, 0.0  ;;  %v3855_v5 = vmax.f32 %v5053_v11, 0.0 }
 0x348   :  { %v3858_v25 = vmax.f32 %v5054_v34, 0.0  ;;  %v5087_v26 = vadd.f32 %v3785_v2, %v6621_v21  ;;  %v3857_v29 = vmax.f32 %v5085_v6, 0.0 }
 0x349   :  { %v3860_v17 = vmax.f32 %v5086_v37, 0.0  ;;  %v3859_v45 = vmax.f32 %v5055_v52, 0.0 }
 0x34a   :  { %v3910_v54 = vpack.c.bf16 %v3858_v25, %v3854_v35  ;;  %v3861_v16 = vmax.f32 %v5087_v26, 0.0 }
 0x34b   :  { %v3912_v13 = vpack.c.bf16 %v3860_v17, %v3856_v22  ;;  %v3911_v55 = vpack.c.bf16 %v3859_v45, %v3855_v5  ;;  %v3337_v23 = vpop.f32.mrb[76].mxu0 }
 0x34c   :  { %v3913_v58 = vpack.c.bf16 %v3861_v16, %v3857_v29  ;;  %v5056_v14 = vadd.f32 %v3337_v23, %v6609_v36  ;;  %v3789_v50 = vpop.f32.mrb[76].mxu1  ;;  %v3339_v38 = vpop.f32.mrb[77].mxu0 }
 0x34d   :  { %v5088_v15 = vadd.f32 %v3789_v50, %v6613_v10  ;;  %v5057_v19 = vadd.f32 %v3339_v38, %v6617_v9  ;;  %v3791_v44 = vpop.f32.mrb[77].mxu1  ;;  %v3341_v0 = vpop.f32.mrb[78].mxu0  ;;  %4245 = vmatprep.mubr.bf16.mxu0 %v3911_v55 }
 0x34e   :  { %v5089_v63 = vadd.f32 %v3791_v44, %v6621_v21  ;;  %v5058_v7 = vadd.f32 %v3341_v0, %v6609_v36  ;;  %v3793_v8 = vpop.f32.mrb[78].mxu1  ;;  %4342 = vmatprep.mubr.bf16.mxu1 %v3913_v58  ;;  %v3343_v12 = vpop.f32.mrb[79].mxu0  ;;  %4246 = vmatmul.mubr.bf16.gmra.mrb[104].mxu0 %v3910_v54  ;;  %v3862_v60 = vmax.f32 %v5056_v14, 0.0 }
 0x34f   :  { %v5090_v39 = vadd.f32 %v3793_v8, %v6613_v10  ;;  %v5059_v32 = vadd.f32 %v3343_v12, %v6617_v9  ;;  %v3795_v59 = vpop.f32.mrb[79].mxu1  ;;  %4343 = vmatmul.mubr.bf16.gmra.mrb[104].mxu1 %v3912_v13  ;;  %v3864_v41 = vmax.f32 %v5088_v15, 0.0  ;;  %v3863_v4 = vmax.f32 %v5057_v19, 0.0 }
 0x350   :  { %v3866_v28 = vmax.f32 %v5058_v7, 0.0  ;;  %v5091_v40 = vadd.f32 %v3795_v59, %v6621_v21  ;;  %v3865_v56 = vmax.f32 %v5089_v63, 0.0 }
 0x351   :  { %v3868_v18 = vmax.f32 %v5090_v39, 0.0  ;;  %v3867_v24 = vmax.f32 %v5059_v32, 0.0 }
 0x352   :  { %v3914_v47 = vpack.c.bf16 %v3866_v28, %v3862_v60  ;;  %v3869_v31 = vmax.f32 %v5091_v40, 0.0 }
 0x353   :  { %v3916_v33 = vpack.c.bf16 %v3868_v18, %v3864_v41  ;;  %v3915_v49 = vpack.c.bf16 %v3867_v24, %v3863_v4  ;;  %v3347_v46 = vpop.f32.mrb[80].mxu0 }
 0x354   :  { %v3917_v61 = vpack.c.bf16 %v3869_v31, %v3865_v56  ;;  %v5060_v51 = vadd.f32 %v3347_v46, %v6609_v36  ;;  %v3799_v53 = vpop.f32.mrb[80].mxu1  ;;  %v3349_v1 = vpop.f32.mrb[81].mxu0 }
 0x355   :  { %v5092_v62 = vadd.f32 %v3799_v53, %v6613_v10  ;;  %v5061_v30 = vadd.f32 %v3349_v1, %v6617_v9  ;;  %v3801_v43 = vpop.f32.mrb[81].mxu1  ;;  %v3351_v57 = vpop.f32.mrb[82].mxu0  ;;  %4253 = vmatprep.mubr.bf16.mxu0 %v3915_v49 }
 0x356   :  { %v5093_v11 = vadd.f32 %v3801_v43, %v6621_v21  ;;  %v5062_v42 = vadd.f32 %v3351_v57, %v6609_v36  ;;  %v3803_v20 = vpop.f32.mrb[82].mxu1  ;;  %4350 = vmatprep.mubr.bf16.mxu1 %v3917_v61  ;;  %v3353_v6 = vpop.f32.mrb[83].mxu0  ;;  %4254 = vmatmul.mubr.bf16.gmra.mrb[108].mxu0 %v3914_v47  ;;  %v3870_v37 = vmax.f32 %v5060_v51, 0.0 }
 0x357   :  { %v5094_v34 = vadd.f32 %v3803_v20, %v6613_v10  ;;  %v5063_v48 = vadd.f32 %v3353_v6, %v6617_v9  ;;  %v3805_v3 = vpop.f32.mrb[83].mxu1  ;;  %4351 = vmatmul.mubr.bf16.gmra.mrb[108].mxu1 %v3916_v33  ;;  %v3872_v35 = vmax.f32 %v5092_v62, 0.0  ;;  %v3871_v25 = vmax.f32 %v5061_v30, 0.0 }
 0x358   :  { %v3874_v52 = vmax.f32 %v5062_v42, 0.0  ;;  %v5095_v2 = vadd.f32 %v3805_v3, %v6621_v21  ;;  %v3873_v5 = vmax.f32 %v5093_v11, 0.0 }
 0x359   :  { %v3876_v26 = vmax.f32 %v5094_v34, 0.0  ;;  %v3875_v22 = vmax.f32 %v5063_v48, 0.0 }
 0x35a   :  { %v3918_v17 = vpack.c.bf16 %v3874_v52, %v3870_v37  ;;  %v3877_v45 = vmax.f32 %v5095_v2, 0.0 }
 0x35b   :  { %v3920_v29 = vpack.c.bf16 %v3876_v26, %v3872_v35  ;;  %v3919_v54 = vpack.c.bf16 %v3875_v22, %v3871_v25  ;;  %v3357_v16 = vpop.f32.mrb[84].mxu0 }
 0x35c   :  { %v3921_v13 = vpack.c.bf16 %v3877_v45, %v3873_v5  ;;  %v5064_v55 = vadd.f32 %v3357_v16, %v6609_v36  ;;  %v3809_v23 = vpop.f32.mrb[84].mxu1  ;;  %v3359_v58 = vpop.f32.mrb[85].mxu0 }
 0x35d   :  { %v5096_v14 = vadd.f32 %v3809_v23, %v6613_v10  ;;  %v5065_v50 = vadd.f32 %v3359_v58, %v6617_v9  ;;  %v3811_v38 = vpop.f32.mrb[85].mxu1  ;;  %v3361_v15 = vpop.f32.mrb[86].mxu0  ;;  %4261 = vmatprep.mubr.bf16.mxu0 %v3919_v54 }
 0x35e   :  { %v5097_v19 = vadd.f32 %v3811_v38, %v6621_v21  ;;  %v5066_v44 = vadd.f32 %v3361_v15, %v6609_v36  ;;  %v3813_v0 = vpop.f32.mrb[86].mxu1  ;;  %4358 = vmatprep.mubr.bf16.mxu1 %v3921_v13  ;;  %v3363_v63 = vpop.f32.mrb[87].mxu0  ;;  %4262 = vmatmul.mubr.bf16.gmra.mrb[112].mxu0 %v3918_v17  ;;  %v3878_v39 = vmax.f32 %v5064_v55, 0.0 }
 0x35f   :  { %v5098_v7 = vadd.f32 %v3813_v0, %v6613_v10  ;;  %v5067_v8 = vadd.f32 %v3363_v63, %v6617_v9  ;;  %v3815_v12 = vpop.f32.mrb[87].mxu1  ;;  %4359 = vmatmul.mubr.bf16.gmra.mrb[112].mxu1 %v3920_v29  ;;  %v3880_v60 = vmax.f32 %v5096_v14, 0.0  ;;  %v3879_v28 = vmax.f32 %v5065_v50, 0.0 }
 0x360   :  { %v3882_v32 = vmax.f32 %v5066_v44, 0.0  ;;  %v5099_v59 = vadd.f32 %v3815_v12, %v6621_v21  ;;  %v3881_v4 = vmax.f32 %v5097_v19, 0.0 }
 0x361   :  { %v3884_v40 = vmax.f32 %v5098_v7, 0.0  ;;  %v3883_v41 = vmax.f32 %v5067_v8, 0.0 }
 0x362   :  { %v3922_v18 = vpack.c.bf16 %v3882_v32, %v3878_v39  ;;  %v3885_v24 = vmax.f32 %v5099_v59, 0.0 }
 0x363   :  { %v3924_v56 = vpack.c.bf16 %v3884_v40, %v3880_v60  ;;  %v3923_v47 = vpack.c.bf16 %v3883_v41, %v3879_v28  ;;  %v3367_v31 = vpop.f32.mrb[88].mxu0 }
 0x364   :  { %v3925_v33 = vpack.c.bf16 %v3885_v24, %v3881_v4  ;;  %v5068_v49 = vadd.f32 %v3367_v31, %v6609_v36  ;;  %v3819_v46 = vpop.f32.mrb[88].mxu1  ;;  %v3369_v61 = vpop.f32.mrb[89].mxu0 }
 0x365   :  { %v5100_v51 = vadd.f32 %v3819_v46, %v6613_v10  ;;  %v5069_v53 = vadd.f32 %v3369_v61, %v6617_v9  ;;  %v3821_v1 = vpop.f32.mrb[89].mxu1  ;;  %v3371_v62 = vpop.f32.mrb[90].mxu0  ;;  %4269 = vmatprep.mubr.bf16.mxu0 %v3923_v47 }
 0x366   :  { %v5101_v30 = vadd.f32 %v3821_v1, %v6621_v21  ;;  %v5070_v43 = vadd.f32 %v3371_v62, %v6609_v36  ;;  %v3823_v57 = vpop.f32.mrb[90].mxu1  ;;  %4366 = vmatprep.mubr.bf16.mxu1 %v3925_v33  ;;  %v3373_v11 = vpop.f32.mrb[91].mxu0  ;;  %4270 = vmatmul.mubr.bf16.gmra.mrb[116].mxu0 %v3922_v18  ;;  %v3886_v34 = vmax.f32 %v5068_v49, 0.0 }
 0x367   :  { %v5102_v42 = vadd.f32 %v3823_v57, %v6613_v10  ;;  %v5071_v20 = vadd.f32 %v3373_v11, %v6617_v9  ;;  %v3825_v6 = vpop.f32.mrb[91].mxu1  ;;  %4367 = vmatmul.mubr.bf16.gmra.mrb[116].mxu1 %v3924_v56  ;;  %v3888_v37 = vmax.f32 %v5100_v51, 0.0  ;;  %v3887_v52 = vmax.f32 %v5069_v53, 0.0  ;;  %v6688_v56 = vld [vmem:[#allocation14] ss:$0 sm:$0xff] }
 0x368   :  { %v3890_v48 = vmax.f32 %v5070_v43, 0.0  ;;  %v5103_v3 = vadd.f32 %v3825_v6, %v6621_v21  ;;  %v3889_v25 = vmax.f32 %v5101_v30, 0.0  ;;  %v6692_v11 = vld [vmem:[#allocation15] ss:$0 sm:$0xff] }
 0x369   :  { %v3892_v2 = vmax.f32 %v5102_v42, 0.0  ;;  %v3891_v35 = vmax.f32 %v5071_v20, 0.0 }
 0x36a   :  { %v3926_v26 = vpack.c.bf16 %v3890_v48, %v3886_v34  ;;  %v3893_v22 = vmax.f32 %v5103_v3, 0.0 }
 0x36b   :  { %v3928_v5 = vpack.c.bf16 %v3892_v2, %v3888_v37  ;;  %v3927_v17 = vpack.c.bf16 %v3891_v35, %v3887_v52  ;;  %v3377_v45 = vpop.f32.mrb[92].mxu0 }
 0x36c   :  { %v3929_v29 = vpack.c.bf16 %v3893_v22, %v3889_v25  ;;  %v5072_v54 = vadd.f32 %v3377_v45, %v6609_v36  ;;  %v3829_v16 = vpop.f32.mrb[92].mxu1  ;;  %v3379_v13 = vpop.f32.mrb[93].mxu0 }
 0x36d   :  { %v5104_v55 = vadd.f32 %v3829_v16, %v6613_v10  ;;  %v5073_v23 = vadd.f32 %v3379_v13, %v6617_v9  ;;  %v3831_v58 = vpop.f32.mrb[93].mxu1  ;;  %v3381_v14 = vpop.f32.mrb[94].mxu0  ;;  %4277 = vmatprep.mubr.bf16.mxu0 %v3927_v17 }
 0x36e   :  { %v5105_v50 = vadd.f32 %v3831_v58, %v6621_v21  ;;  %v5074_v38 = vadd.f32 %v3381_v14, %v6609_v36  ;;  %v3833_v15 = vpop.f32.mrb[94].mxu1  ;;  %4374 = vmatprep.mubr.bf16.mxu1 %v3929_v29  ;;  %v3383_v19 = vpop.f32.mrb[95].mxu0  ;;  %4278 = vmatmul.mubr.bf16.gmra.mrb[120].mxu0 %v3926_v26  ;;  %v3894_v7 = vmax.f32 %v5072_v54, 0.0 }
 0x36f   :  { %v5106_v44 = vadd.f32 %v3833_v15, %v6613_v10  ;;  %v5075_v0 = vadd.f32 %v3383_v19, %v6617_v9  ;;  %v3835_v63 = vpop.f32.mrb[95].mxu1  ;;  %4375 = vmatmul.mubr.bf16.gmra.mrb[120].mxu1 %v3928_v5  ;;  %v3896_v39 = vmax.f32 %v5104_v55, 0.0  ;;  %v3895_v32 = vmax.f32 %v5073_v23, 0.0  ;;  %v4483_v10 = vld [vmem:[#allocation2] sm:$0x1] }
 0x370   :  { %v3898_v8 = vmax.f32 %v5074_v38, 0.0  ;;  %v5107_v12 = vadd.f32 %v3835_v63, %v6621_v21  ;;  %v3897_v28 = vmax.f32 %v5105_v50, 0.0  ;;  %v5958_v9 = vmov 0  }
 0x371   :  { %v3900_v59 = vmax.f32 %v5106_v44, 0.0  ;;  %v3899_v60 = vmax.f32 %v5075_v0, 0.0  ;;  %5316 = vset.pattern.permute.xlu1 %v5958_v9 }
 0x372   :  { %v3930_v36 = vpack.c.bf16 %v3898_v8, %v3894_v7  ;;  %v3901_v40 = vmax.f32 %v5107_v12, 0.0  ;;  %4486 = vperm.xlu1 %5316, %v4483_v10  }
 0x373   :  { %v3932_v41 = vpack.c.bf16 %v3900_v59, %v3896_v39  ;;  %v3931_v4 = vpack.c.bf16 %v3899_v60, %v3895_v32 }
 0x374   :  { %v3933_v18 = vpack.c.bf16 %v3901_v40, %v3897_v28 }
 0x375   :  { %4285 = vmatprep.mubr.bf16.mxu0 %v3931_v4 }
 0x376   :  { %4382 = vmatprep.mubr.bf16.mxu1 %v3933_v18  ;;  %4286 = vmatmul.mubr.bf16.gmra.mrb[124].mxu0 %v3930_v36 }
 0x377   :  { %4383 = vmatmul.mubr.bf16.gmra.mrb[124].mxu1 %v3932_v41 }
 0x411   :  { %v4932_v21 = vpop.f32.mrb[96].mxu0 }
 0x412   :  { %v4996_v24 = vpop.f32.mrb[96].mxu1  ;;  %v4933_v47 = vpop.f32.mrb[97].mxu0 }
 0x413   :  { %v4934_v31 = vadd.f32 %v4933_v47, %v4932_v21  ;;  %v4997_v33 = vpop.f32.mrb[97].mxu1  ;;  %v4935_v49 = vpop.f32.mrb[98].mxu0 }
 0x414   :  { %v4998_v46 = vadd.f32 %v4997_v33, %v4996_v24  ;;  %v4999_v61 = vpop.f32.mrb[98].mxu1  ;;  %v4936_v51 = vpop.f32.mrb[99].mxu0 }
 0x415   :  { %v4232_v53 = vadd.f32 %v4934_v31, %v6688_v56  ;;  %v4937_v1 = vadd.f32 %v4936_v51, %v4935_v49  ;;  %v5000_v62 = vpop.f32.mrb[99].mxu1 }
 0x416   :  { %v5001_v30 = vadd.f32 %v5000_v62, %v4999_v61 }
 0x417   :  { %v4235_v43 = vadd.f32 %v4937_v1, %v6688_v56  ;;  %v4329_v57 = vadd.f32 %v4998_v46, %v4232_v53 }
 0x419   :  { %v4332_v42 = vadd.f32 %v5001_v30, %v4235_v43  ;;  %v4938_v20 = vpop.f32.mrb[100].mxu0  ;;  %v4391_v6 = vmax.f32 %v4329_v57, 0.0 }
 0x41a   :  { %v5002_v34 = vpop.f32.mrb[100].mxu1  ;;  %v4939_v48 = vpop.f32.mrb[101].mxu0 }
 0x41b   :  { %v4392_v3 = vmax.f32 %v4332_v42, 0.0  ;;  %v4940_v37 = vadd.f32 %v4939_v48, %v4938_v20  ;;  %v5003_v52 = vpop.f32.mrb[101].mxu1  ;;  %v4941_v2 = vpop.f32.mrb[102].mxu0  ;;  %v4414_v35 = vmul.f32 %v6692_v11, %v4391_v6 }
 0x41c   :  { %v5004_v25 = vadd.f32 %v5003_v52, %v5002_v34  ;;  %v5005_v26 = vpop.f32.mrb[102].mxu1  ;;  %v4942_v22 = vpop.f32.mrb[103].mxu0 }
 0x41d   :  { %v4240_v5 = vadd.f32 %v4940_v37, %v6688_v56  ;;  %v4943_v17 = vadd.f32 %v4942_v22, %v4941_v2  ;;  %v5006_v45 = vpop.f32.mrb[103].mxu1  ;;  %4430 = vxpose.xlu0.b32.start [1/16] %v4414_v35, 128  ;;  %v4415_v13 = vmul.f32 %v6692_v11, %v4392_v3 }
 0x41e   :  { %v5007_v29 = vadd.f32 %v5006_v45, %v5005_v26 }
 0x41f   :  { %v4337_v54 = vadd.f32 %v5004_v25, %v4240_v5  ;;  %v4243_v16 = vadd.f32 %v4943_v17, %v6688_v56 }
 0x421   :  { %v4393_v55 = vmax.f32 %v4337_v54, 0.0  ;;  %v4340_v23 = vadd.f32 %v5007_v29, %v4243_v16  ;;  %v4944_v58 = vpop.f32.mrb[104].mxu0  ;;  %4431 = vxpose.xlu0.b32.cont [2/16] %v4415_v13, 128 }
 0x422   :  { %v5008_v14 = vpop.f32.mrb[104].mxu1  ;;  %v4945_v50 = vpop.f32.mrb[105].mxu0 }
 0x423   :  { %v4394_v38 = vmax.f32 %v4340_v23, 0.0  ;;  %v4946_v15 = vadd.f32 %v4945_v50, %v4944_v58  ;;  %v5009_v19 = vpop.f32.mrb[105].mxu1  ;;  %v4947_v44 = vpop.f32.mrb[106].mxu0  ;;  %v4416_v0 = vmul.f32 %v6692_v11, %v4393_v55 }
 0x424   :  { %v5010_v63 = vadd.f32 %v5009_v19, %v5008_v14  ;;  %v5011_v7 = vpop.f32.mrb[106].mxu1  ;;  %v4948_v8 = vpop.f32.mrb[107].mxu0 }
 0x425   :  { %v4248_v12 = vadd.f32 %v4946_v15, %v6688_v56  ;;  %v4949_v39 = vadd.f32 %v4948_v8, %v4947_v44  ;;  %v5012_v32 = vpop.f32.mrb[107].mxu1  ;;  %4432 = vxpose.xlu0.b32.cont [3/16] %v4416_v0, 128  ;;  %v4417_v36 = vmul.f32 %v6692_v11, %v4394_v38 }
 0x426   :  { %v5013_v59 = vadd.f32 %v5012_v32, %v5011_v7 }
 0x427   :  { %v4345_v60 = vadd.f32 %v5010_v63, %v4248_v12  ;;  %v4251_v28 = vadd.f32 %v4949_v39, %v6688_v56 }
 0x429   :  { %v4395_v40 = vmax.f32 %v4345_v60, 0.0  ;;  %v4348_v41 = vadd.f32 %v5013_v59, %v4251_v28  ;;  %v4950_v4 = vpop.f32.mrb[108].mxu0  ;;  %4433 = vxpose.xlu0.b32.cont [4/16] %v4417_v36, 128 }
 0x42a   :  { %v5014_v18 = vpop.f32.mrb[108].mxu1  ;;  %v4951_v10 = vpop.f32.mrb[109].mxu0 }
 0x42b   :  { %v4396_v21 = vmax.f32 %v4348_v41, 0.0  ;;  %v4952_v24 = vadd.f32 %v4951_v10, %v4950_v4  ;;  %v5015_v47 = vpop.f32.mrb[109].mxu1  ;;  %v4953_v31 = vpop.f32.mrb[110].mxu0  ;;  %v4418_v33 = vmul.f32 %v6692_v11, %v4395_v40 }
 0x42c   :  { %v5016_v49 = vadd.f32 %v5015_v47, %v5014_v18  ;;  %v5017_v46 = vpop.f32.mrb[110].mxu1  ;;  %v4954_v61 = vpop.f32.mrb[111].mxu0 }
 0x42d   :  { %v4256_v51 = vadd.f32 %v4952_v24, %v6688_v56  ;;  %v4955_v53 = vadd.f32 %v4954_v61, %v4953_v31  ;;  %v5018_v1 = vpop.f32.mrb[111].mxu1  ;;  %4434 = vxpose.xlu0.b32.cont [5/16] %v4418_v33, 128  ;;  %v4419_v57 = vmul.f32 %v6692_v11, %v4396_v21 }
 0x42e   :  { %v5019_v62 = vadd.f32 %v5018_v1, %v5017_v46 }
 0x42f   :  { %v4353_v30 = vadd.f32 %v5016_v49, %v4256_v51  ;;  %v4259_v43 = vadd.f32 %v4955_v53, %v6688_v56 }
 0x431   :  { %v4397_v42 = vmax.f32 %v4353_v30, 0.0  ;;  %v4356_v20 = vadd.f32 %v5019_v62, %v4259_v43  ;;  %v4956_v6 = vpop.f32.mrb[112].mxu0  ;;  %4435 = vxpose.xlu0.b32.cont [6/16] %v4419_v57, 128 }
 0x432   :  { %v5020_v34 = vpop.f32.mrb[112].mxu1  ;;  %v4957_v48 = vpop.f32.mrb[113].mxu0 }
 0x433   :  { %v4398_v3 = vmax.f32 %v4356_v20, 0.0  ;;  %v4958_v37 = vadd.f32 %v4957_v48, %v4956_v6  ;;  %v5021_v52 = vpop.f32.mrb[113].mxu1  ;;  %v4959_v2 = vpop.f32.mrb[114].mxu0  ;;  %v4420_v35 = vmul.f32 %v6692_v11, %v4397_v42 }
 0x434   :  { %v5022_v25 = vadd.f32 %v5021_v52, %v5020_v34  ;;  %v5023_v26 = vpop.f32.mrb[114].mxu1  ;;  %v4960_v22 = vpop.f32.mrb[115].mxu0 }
 0x435   :  { %v4264_v5 = vadd.f32 %v4958_v37, %v6688_v56  ;;  %v4961_v17 = vadd.f32 %v4960_v22, %v4959_v2  ;;  %v5024_v45 = vpop.f32.mrb[115].mxu1  ;;  %4436 = vxpose.xlu0.b32.cont [7/16] %v4420_v35, 128  ;;  %v4421_v13 = vmul.f32 %v6692_v11, %v4398_v3 }
 0x436   :  { %v5025_v29 = vadd.f32 %v5024_v45, %v5023_v26 }
 0x437   :  { %v4361_v54 = vadd.f32 %v5022_v25, %v4264_v5  ;;  %v4267_v16 = vadd.f32 %v4961_v17, %v6688_v56 }
 0x439   :  { %v4399_v55 = vmax.f32 %v4361_v54, 0.0  ;;  %v4364_v23 = vadd.f32 %v5025_v29, %v4267_v16  ;;  %v4962_v58 = vpop.f32.mrb[116].mxu0  ;;  %4437 = vxpose.xlu0.b32.cont [8/16] %v4421_v13, 128 }
 0x43a   :  { %v5026_v14 = vpop.f32.mrb[116].mxu1  ;;  %v4963_v50 = vpop.f32.mrb[117].mxu0 }
 0x43b   :  { %v4400_v38 = vmax.f32 %v4364_v23, 0.0  ;;  %v4964_v15 = vadd.f32 %v4963_v50, %v4962_v58  ;;  %v5027_v19 = vpop.f32.mrb[117].mxu1  ;;  %v4965_v44 = vpop.f32.mrb[118].mxu0  ;;  %v4422_v0 = vmul.f32 %v6692_v11, %v4399_v55 }
 0x43c   :  { %v5028_v63 = vadd.f32 %v5027_v19, %v5026_v14  ;;  %v5029_v7 = vpop.f32.mrb[118].mxu1  ;;  %v4966_v8 = vpop.f32.mrb[119].mxu0 }
 0x43d   :  { %v4272_v12 = vadd.f32 %v4964_v15, %v6688_v56  ;;  %v4967_v39 = vadd.f32 %v4966_v8, %v4965_v44  ;;  %v5030_v32 = vpop.f32.mrb[119].mxu1  ;;  %4438 = vxpose.xlu0.b32.cont [9/16] %v4422_v0, 128  ;;  %v4423_v36 = vmul.f32 %v6692_v11, %v4400_v38 }
 0x43e   :  { %v5031_v59 = vadd.f32 %v5030_v32, %v5029_v7 }
 0x43f   :  { %v4369_v60 = vadd.f32 %v5028_v63, %v4272_v12  ;;  %v4275_v28 = vadd.f32 %v4967_v39, %v6688_v56 }
 0x441   :  { %v4401_v40 = vmax.f32 %v4369_v60, 0.0  ;;  %v4372_v41 = vadd.f32 %v5031_v59, %v4275_v28  ;;  %v4968_v4 = vpop.f32.mrb[120].mxu0  ;;  %4439 = vxpose.xlu0.b32.cont [10/16] %v4423_v36, 128 }
 0x442   :  { %v5032_v18 = vpop.f32.mrb[120].mxu1  ;;  %v4969_v10 = vpop.f32.mrb[121].mxu0 }
 0x443   :  { %v4402_v21 = vmax.f32 %v4372_v41, 0.0  ;;  %v4970_v24 = vadd.f32 %v4969_v10, %v4968_v4  ;;  %v5033_v47 = vpop.f32.mrb[121].mxu1  ;;  %v4971_v31 = vpop.f32.mrb[122].mxu0  ;;  %v4424_v33 = vmul.f32 %v6692_v11, %v4401_v40 }
 0x444   :  { %v5034_v49 = vadd.f32 %v5033_v47, %v5032_v18  ;;  %v5035_v46 = vpop.f32.mrb[122].mxu1  ;;  %v4972_v61 = vpop.f32.mrb[123].mxu0 }
 0x445   :  { %v4280_v51 = vadd.f32 %v4970_v24, %v6688_v56  ;;  %v4973_v53 = vadd.f32 %v4972_v61, %v4971_v31  ;;  %v5036_v1 = vpop.f32.mrb[123].mxu1  ;;  %4440 = vxpose.xlu0.b32.cont [11/16] %v4424_v33, 128  ;;  %v4425_v57 = vmul.f32 %v6692_v11, %v4402_v21 }
 0x446   :  { %v5037_v62 = vadd.f32 %v5036_v1, %v5035_v46 }
 0x447   :  { %v4377_v30 = vadd.f32 %v5034_v49, %v4280_v51  ;;  %v4283_v43 = vadd.f32 %v4973_v53, %v6688_v56 }
 0x449   :  { %v4403_v42 = vmax.f32 %v4377_v30, 0.0  ;;  %v4380_v20 = vadd.f32 %v5037_v62, %v4283_v43  ;;  %v4974_v6 = vpop.f32.mrb[124].mxu0  ;;  %4441 = vxpose.xlu0.b32.cont [12/16] %v4425_v57, 128  ;;  %v4487_v62 = vpop.permute.xlu1 %4486 }
 0x44a   :  { %v5038_v34 = vpop.f32.mrb[124].mxu1  ;;  %v4975_v48 = vpop.f32.mrb[125].mxu0  ;;  %v4492_v57 = vrot.slane %v4487_v62, %v6246_v27 }
 0x44b   :  { %v4404_v3 = vmax.f32 %v4380_v20, 0.0  ;;  %v4976_v37 = vadd.f32 %v4975_v48, %v4974_v6  ;;  %v5039_v52 = vpop.f32.mrb[125].mxu1  ;;  %v4977_v2 = vpop.f32.mrb[126].mxu0  ;;  %v4426_v35 = vmul.f32 %v6692_v11, %v4403_v42 }
 0x44c   :  { %v5040_v25 = vadd.f32 %v5039_v52, %v5038_v34  ;;  %v5041_v26 = vpop.f32.mrb[126].mxu1  ;;  %v4978_v22 = vpop.f32.mrb[127].mxu0 }
 0x44d   :  { %v4288_v5 = vadd.f32 %v4976_v37, %v6688_v56  ;;  %v4979_v17 = vadd.f32 %v4978_v22, %v4977_v2  ;;  %v5042_v45 = vpop.f32.mrb[127].mxu1  ;;  %4442 = vxpose.xlu0.b32.cont [13/16] %v4426_v35, 128  ;;  %v4427_v13 = vmul.f32 %v6692_v11, %v4404_v3 }
 0x44e   :  { %v5043_v29 = vadd.f32 %v5042_v45, %v5041_v26 }
 0x44f   :  { %v4385_v54 = vadd.f32 %v5040_v25, %v4288_v5  ;;  %v4291_v16 = vadd.f32 %v4979_v17, %v6688_v56 }
 0x451   :  { %v4405_v55 = vmax.f32 %v4385_v54, 0.0  ;;  %v4388_v23 = vadd.f32 %v5043_v29, %v4291_v16  ;;  %4443 = vxpose.xlu0.b32.cont [14/16] %v4427_v13, 128 }
 0x453   :  { %v4406_v58 = vmax.f32 %v4388_v23, 0.0  ;;  %v4428_v14 = vmul.f32 %v6692_v11, %v4405_v55 }
 0x455   :  { %4444 = vxpose.xlu0.b32.cont [15/16] %v4428_v14, 128  ;;  %v4429_v50 = vmul.f32 %v6692_v11, %v4406_v58 }
 0x459   :  { %4445 = vxpose.xlu0.b32.end [16/16] %v4429_v50, 128 }
 0x482   :  { %5317 = vset.pattern.permute.xlu0 %v5958_v9 }
 0x49d   :  { %v4446_v38 = vpop.trf.xlu0 }
 0x4a1   :  { %v4447_v15 = vpop.trf.xlu0 }
 0x4a2   :  { %v4462_v12 = vadd.f32 %v4447_v15, %v4446_v38 }
 0x4a5   :  { %v4448_v19 = vpop.trf.xlu0 }
 0x4a6   :  { %v4463_v39 = vadd.f32 %v4462_v12, %v4448_v19 }
 0x4a9   :  { %v4449_v44 = vpop.trf.xlu0 }
 0x4aa   :  { %v4464_v59 = vadd.f32 %v4463_v39, %v4449_v44 }
 0x4ad   :  { %v4450_v0 = vpop.trf.xlu0 }
 0x4ae   :  { %v4465_v60 = vadd.f32 %v4464_v59, %v4450_v0 }
 0x4b1   :  { %v4451_v56 = vpop.trf.xlu0 }
 0x4b2   :  { %v4466_v36 = vadd.f32 %v4465_v60, %v4451_v56 }
 0x4b5   :  { %v4452_v63 = vpop.trf.xlu0 }
 0x4b6   :  { %v4467_v11 = vadd.f32 %v4466_v36, %v4452_v63 }
 0x4b9   :  { %v4453_v7 = vpop.trf.xlu0 }
 0x4ba   :  { %v4468_v41 = vadd.f32 %v4467_v11, %v4453_v7 }
 0x4bd   :  { %v4454_v8 = vpop.trf.xlu0 }
 0x4be   :  { %v4469_v9 = vadd.f32 %v4468_v41, %v4454_v8 }
 0x4c1   :  { %v4455_v32 = vpop.trf.xlu0 }
 0x4c2   :  { %v4470_v18 = vadd.f32 %v4469_v9, %v4455_v32 }
 0x4c5   :  { %v4456_v28 = vpop.trf.xlu0 }
 0x4c6   :  { %v4471_v10 = vadd.f32 %v4470_v18, %v4456_v28 }
 0x4c9   :  { %v4457_v40 = vpop.trf.xlu0 }
 0x4ca   :  { %v4472_v24 = vadd.f32 %v4471_v10, %v4457_v40 }
 0x4cd   :  { %v4458_v4 = vpop.trf.xlu0 }
 0x4ce   :  { %v4473_v47 = vadd.f32 %v4472_v24, %v4458_v4 }
 0x4d1   :  { %v4459_v21 = vpop.trf.xlu0 }
 0x4d2   :  { %v4474_v33 = vadd.f32 %v4473_v47, %v4459_v21 }
 0x4d5   :  { %v4460_v31 = vpop.trf.xlu0 }
 0x4d6   :  { %v4475_v49 = vadd.f32 %v4474_v33, %v4460_v31 }
 0x4d9   :  { %v4461_v46 = vpop.trf.xlu0 }
 0x4da   :  { %v4476_v61 = vadd.f32 %v4475_v49, %v4461_v46 }
 0x4dc   :  { %v4477_v51 = vrot.slane %v4476_v61, 4 }
 0x4de   :  { %v4478_v53 = vadd.f32 %v4477_v51, %v4476_v61 }
 0x4e0   :  { %v4479_v1 = vrot.slane %v4478_v53, 2 }
 0x4e2   :  { %v4480_v30 = vadd.f32 %v4479_v1, %v4478_v53 }
 0x4e4   :  { %v4481_v43 = vrot.slane %v4480_v30, 1 }
 0x4e6   :  { %v4482_v42 = vadd.f32 %v4481_v43, %v4480_v30 }
 0x4e8   :  { %v4493_v20 = vadd.f32 %v4492_v57, %v4482_v42 }
 0x4ea   :  { %4494 = vst [vmem:[#allocation17] sm:$0x1] %v4493_v20 }
 0x4eb   :  { %5921 = shalt.err (!%p5918_p12)
}
 0x4ec   :  { %s5922_s5 = scalar_lea.hbm %s6747_s9, 16 }
 0x4ed   :  { %p5923_p13 = scmp.ne.s32.totalorder %s6747_s9, %s5922_s5  ;;  %p5926_p0 = scmp.lt.u32.totalorder %s5922_s5, %s6747_s9 }
 0x4ef   :  { %p5928_p1 = pnand %p5926_p0, %p5923_p13 }
 0x4f1   :  { %5931 = shalt.err (!%p5928_p1)
}
 0x4f2   :  { %4504 = dma.vmem_to_hbm [thread:$0]  %s4502_s17, 16, %s6747_s9, [#allocation5]  }
 0x4f3   :  { %5942 = dma.done.wait [#allocation5], 16  }
 0x4f4   :  { %5943 = vsyncadd [#allocation5], 4294967280 }
 0x4f5   :  { %4508 = vsyncpa [#allocation4], 1 }
 0x4f6   :  { %4509 = vsyncpa [#allocation7], 1 }
 0x4f7   :  { %4510 = vsyncpa [#allocation10], 1 }
 0x4f8   :  { %4511 = vsyncpa [#allocation13], 1 }
 0x4f9   :  { %4512 = vsyncpa [#allocation16], 1 }
 0x4fa   :  { %4513 = vsyncpa [#allocation5], 1 }

</bundles_post_ra>
